<compile_context>
chip_gen: v7x
topology: tpu7x:2x2x1
jax: 0.10.0
libtpu: 0.0.40
codegen_flags: <defaults>
</compile_context>

<pallas_src>
import functools

import jax
import jax.numpy as jnp
from jax.experimental import pallas as pl
from jax.experimental.pallas import tpu as pltpu


# --------------------------------------------------------------------------
# Generation-aware VMEM limit / row tile (v5e/v6e: 128 MiB, v7x: 64 MiB)
# --------------------------------------------------------------------------
def _tpu_vmem_capacity_bytes():
    try:
        info = pltpu.get_tpu_info()
        for attr in ("vmem_capacity_bytes", "vmem_bytes", "vmem_size_bytes"):
            v = getattr(info, attr, None)
            if v:
                return int(v)
    except Exception:
        pass
    return 64 * 1024 * 1024        # conservative fallback (v7x floor)


_VMEM_CAP = _tpu_vmem_capacity_bytes()
_VMEM_LIMIT = int(min(_VMEM_CAP * 3 // 4, 96 * 1024 * 1024))
_ROW_TILE = 512 if _VMEM_CAP >= 96 * 1024 * 1024 else 256   # FFN row tile
_Q_TILE = 256                                               # query tile


def _pick_tile(total, desired):
    """Largest tile <= desired that divides `total` (falls back to total)."""
    t = max(1, min(desired, total))
    while t > 8 and total % t:
        t //= 2
    if total % t:
        t = total
    return t


def _gelu_new(x):
    # HF NewGELUActivation (tanh approximation), f32, no jnp.power.
    return 0.5 * x * (1.0 + jnp.tanh(
        0.7978845608028654 * (x + 0.044715 * x * x * x)))


# --------------------------------------------------------------------------
# Kernel (A): fused RMSNorm + QKV + attention + output proj + residual add
# grid = (B, S // tq); QKV for the full sequence is computed once per batch
# element (qi == 0) into a VMEM scratch that persists across query tiles.
# --------------------------------------------------------------------------
def _attn_kernel(x_ref, ln_ref, wqkv_ref, bias_ref, mask_ref, wo_ref, o_ref,
                 qkv_ref, *, nH, dh, tq):
    H = nH * dh
    qi = pl.program_id(1)

    @pl.when(qi == 0)
    def _():
        # fused RMSNorm + QKV projection for the whole sequence of this batch
        x = x_ref[0].astype(jnp.float32)                   # (S, H) f32
        var = jnp.mean(x * x, axis=-1, keepdims=True)
        xn = (x * jax.lax.rsqrt(var + 1e-6) * ln_ref[...]).astype(jnp.bfloat16)
        qkv_ref[...] = jnp.dot(xn, wqkv_ref[...],
                               preferred_element_type=jnp.float32
                               ).astype(jnp.bfloat16)      # (S, 3H) bf16

    q_start = pl.multiple_of(qi * tq, tq)
    x_rows = x_ref[0, pl.ds(q_start, tq), :].astype(jnp.float32)  # residual
    mask = mask_ref[0]                                     # (1, S) f32 additive
    wo = wo_ref[...]                                       # (H, H) bf16

    acc = jnp.zeros((tq, H), jnp.float32)
    # TODO(synk): dh=64 fills only part of the 256-wide MXU contraction for
    # QK^T / PV; head-pair packing could raise MXU utilization further.
    for h in range(nH):                                    # static unrolled
        q = qkv_ref[pl.ds(q_start, tq), pl.ds(h * dh, dh)]         # (tq, dh)
        k = qkv_ref[:, pl.ds(H + h * dh, dh)]                      # (S,  dh)
        v = qkv_ref[:, pl.ds(2 * H + h * dh, dh)]                  # (S,  dh)
        # T5/mT5: no 1/sqrt(dh) scaling; contract dh directly (no transpose).
        scores = jax.lax.dot_general(
            q, k, (((1,), (1,)), ((), ())),
            preferred_element_type=jnp.float32)            # (tq, S) f32
        scores = scores + bias_ref[h].astype(jnp.float32) + mask
        m = jnp.max(scores, axis=-1, keepdims=True)
        e = jnp.exp(scores - m)
        denom = jnp.sum(e, axis=-1, keepdims=True)
        probs = (e * pl.reciprocal(denom, approx=True)).astype(jnp.bfloat16)
        ctx = jnp.dot(probs, v, preferred_element_type=jnp.float32)  # (tq, dh)
        # fold this head's context straight into the output projection
        acc = acc + jnp.dot(ctx.astype(jnp.bfloat16),
                            wo[h * dh:(h + 1) * dh, :],
                            preferred_element_type=jnp.float32)
    o_ref[0] = (x_rows + acc).astype(o_ref.dtype)


def attn_block(x, bias, mask_add, ln_w, wqkv, wo, *, nH, dh, tq):
    B, S, H = x.shape
    nQ = S // tq
    kernel = functools.partial(_attn_kernel, nH=nH, dh=dh, tq=tq)
    cost = pl.CostEstimate(
        flops=B * (2 * S * H * 3 * H + 4 * S * S * H + 2 * S * H * H),
        transcendentals=B * nH * S * S,
        bytes_accessed=(2 * B * S * H * 2 + H * 3 * H * 2 + H * H * 2
                        + nH * S * S * 2 + B * S * 4))
    return pl.pallas_call(
        kernel,
        grid=(B, nQ),
        in_specs=[pl.BlockSpec((1, S, H), lambda b, q: (b, 0, 0)),    # x (full seq)
                  pl.BlockSpec((1, H), lambda b, q: (0, 0)),          # ln1
                  pl.BlockSpec((H, 3 * H), lambda b, q: (0, 0)),      # wqkv (resident)
                  pl.BlockSpec((nH, tq, S), lambda b, q: (0, q, 0)),  # bias (bf16)
                  pl.BlockSpec((1, 1, S), lambda b, q: (b, 0, 0)),    # additive mask
                  pl.BlockSpec((H, H), lambda b, q: (0, 0))],         # wo (resident)
        out_specs=pl.BlockSpec((1, tq, H), lambda b, q: (b, q, 0)),
        out_shape=jax.ShapeDtypeStruct((B, S, H), jnp.bfloat16),
        scratch_shapes=[pltpu.VMEM((S, 3 * H), jnp.bfloat16)],        # per-batch QKV
        compiler_params=pltpu.CompilerParams(
            dimension_semantics=("parallel", "arbitrary"),
            vmem_limit_bytes=_VMEM_LIMIT),
        cost_estimate=cost,
    )(x, ln_w, wqkv, bias, mask_add, wo)


# --------------------------------------------------------------------------
# Kernel (B): RMSNorm + gated-GELU FFN + residual add, row-tiled over M = B*S
# --------------------------------------------------------------------------
def _ln_ffn_kernel(h_ref, ln_ref, wi_ref, wo_ref, o_ref, *, F):
    x = h_ref[...].astype(jnp.float32)                     # (tm, H) residual
    var = jnp.mean(x * x, axis=-1, keepdims=True)
    xn = (x * jax.lax.rsqrt(var + 1e-6) * ln_ref[...]).astype(jnp.bfloat16)
    hh = jnp.dot(xn, wi_ref[...],
                 preferred_element_type=jnp.float32)       # (tm, 2F) f32
    g = _gelu_new(hh[:, :F]) * hh[:, F:]                   # gated GELU, f32
    y = x + jnp.dot(g.astype(jnp.bfloat16), wo_ref[...],
                    preferred_element_type=jnp.float32)
    o_ref[...] = y.astype(o_ref.dtype)


def ln_ffn_block(h, ln_w, wi, wo, *, tm):
    M, H = h.shape
    F2 = wi.shape[1]
    F = F2 // 2
    kernel = functools.partial(_ln_ffn_kernel, F=F)
    cost = pl.CostEstimate(
        flops=2 * M * H * F2 + 2 * M * F * H,
        transcendentals=M * F + M,
        bytes_accessed=2 * M * H * 2 + H * F2 * 2 + F * H * 2)
    return pl.pallas_call(
        kernel,
        grid=(pl.cdiv(M, tm),),
        in_specs=[pl.BlockSpec((tm, H), lambda i: (i, 0)),
                  pl.BlockSpec((1, H), lambda i: (0, 0)),
                  pl.BlockSpec((H, F2), lambda i: (0, 0)),
                  pl.BlockSpec((F, H), lambda i: (0, 0))],
        out_specs=pl.BlockSpec((tm, H), lambda i: (i, 0)),
        out_shape=jax.ShapeDtypeStruct((M, H), jnp.bfloat16),
        input_output_aliases={0: 0},                       # residual buffer reuse
        compiler_params=pltpu.CompilerParams(
            dimension_semantics=("parallel",),
            vmem_limit_bytes=_VMEM_LIMIT),
        cost_estimate=cost,
    )(h, ln_w, wi, wo)


# --------------------------------------------------------------------------
# Kernel (C): final RMSNorm + masked-mean pool (VPU reduce) + projection,
# tiled over the batch axis.
# --------------------------------------------------------------------------
def _pool_proj_kernel(h_ref, ln_ref, mask_ref, w_ref, b_ref, o_ref):
    x = h_ref[0].astype(jnp.float32)                       # (S, H)
    var = jnp.mean(x * x, axis=-1, keepdims=True)
    xn = x * jax.lax.rsqrt(var + 1e-6) * ln_ref[...]       # final T5 RMSNorm
    m = mask_ref[0]                                        # (S, 1) f32
    summed = jnp.sum(xn * m, axis=0, keepdims=True)        # (1, H) masked sum
    denom = jnp.maximum(jnp.sum(m), 1.0)                   # NaN guard
    pooled = summed / denom
    o_ref[0] = (jnp.dot(pooled.astype(jnp.bfloat16), w_ref[...],
                        preferred_element_type=jnp.float32) + b_ref[...])


def pool_and_project(hidden, final_ln, mask, proj_w, proj_b):
    B, S, H = hidden.shape
    P = proj_w.shape[1]
    mask3 = mask.reshape(B, S, 1)
    out = pl.pallas_call(
        _pool_proj_kernel,
        grid=(B,),
        in_specs=[pl.BlockSpec((1, S, H), lambda b: (b, 0, 0)),
                  pl.BlockSpec((1, H), lambda b: (0, 0)),
                  pl.BlockSpec((1, S, 1), lambda b: (b, 0, 0)),
                  pl.BlockSpec((H, P), lambda b: (0, 0)),
                  pl.BlockSpec((1, P), lambda b: (0, 0))],
        out_specs=pl.BlockSpec((1, 1, P), lambda b: (b, 0, 0)),
        out_shape=jax.ShapeDtypeStruct((B, 1, P), jnp.float32),
        compiler_params=pltpu.CompilerParams(
            dimension_semantics=("parallel",),
            vmem_limit_bytes=_VMEM_LIMIT),
    )(hidden, final_ln, mask3, proj_w, proj_b)
    return out.reshape(B, P)


# --------------------------------------------------------------------------
# Plain-JAX glue: relative position bias (integer bucket math) + model driver
# --------------------------------------------------------------------------
def _relative_position_bucket(rel_pos, num_buckets=32, max_distance=128):
    # bidirectional (encoder) variant, matching HF T5Attention.
    num_buckets = num_buckets // 2
    buckets = (rel_pos > 0).astype(jnp.int32) * num_buckets
    rel_pos = jnp.abs(rel_pos)
    max_exact = num_buckets // 2
    is_small = rel_pos < max_exact
    rel_large = max_exact + (
        jnp.log(jnp.maximum(rel_pos, 1).astype(jnp.float32) / max_exact)
        / jnp.log(max_distance / max_exact)
        * (num_buckets - max_exact)).astype(jnp.int32)
    rel_large = jnp.minimum(rel_large, num_buckets - 1)
    return buckets + jnp.where(is_small, rel_pos, rel_large)


def compute_position_bias(rel_bias_table, seq_len, num_buckets, max_distance):
    ctx = jnp.arange(seq_len)[:, None]
    mem = jnp.arange(seq_len)[None, :]
    buckets = _relative_position_bucket(mem - ctx, num_buckets, max_distance)
    bias = jnp.take(rel_bias_table, buckets, axis=0)       # (S, S, nH)
    return jnp.transpose(bias, (2, 0, 1))                  # (nH, S, S)


def mt5_retriever_encoder(params, input_ids, attention_mask, *,
                          nH, dh, num_buckets, max_distance, tq, tm):
    B, S = input_ids.shape
    H = nH * dh
    mask_f = attention_mask.astype(jnp.float32)
    # HF-style additive mask (finite large negative instead of finfo.min).
    mask_add = ((1.0 - mask_f) * -1e9)[:, None, :]         # (B, 1, S)

    # residual stream is bf16 between kernels (f32 math inside kernels)
    h = jnp.take(params["embed"], input_ids, axis=0).astype(jnp.bfloat16)
    bias = compute_position_bias(params["rel_bias"], S, num_buckets,
                                 max_distance).astype(jnp.bfloat16)

    for lp in params["layers"]:
        h = attn_block(h, bias, mask_add, lp["ln1"], lp["wqkv"], lp["wo"],
                       nH=nH, dh=dh, tq=tq)                # (B,S,H) bf16
        h = ln_ffn_block(h.reshape(B * S, H), lp["ln2"], lp["wi"],
                         lp["wo_ffn"], tm=tm).reshape(B, S, H)

    # final RMSNorm + masked-mean pool + projection (vmsst branch), one kernel
    return pool_and_project(h, params["final_ln"], mask_f,
                            params["proj_w"], params["proj_b"])


# --------------------------------------------------------------------------
# Deterministic parameter init (synthetic weights, no checkpoint load)
# --------------------------------------------------------------------------
def init_params(key, vocab, H, nH, dh, d_ff, n_layers, num_buckets, P):
    def bf16(k, shape):
        return (jax.random.normal(k, shape, jnp.float32) * 0.02).astype(jnp.bfloat16)

    k = jax.random.split(key, 4 + n_layers)
    params = {
        "embed":    jax.random.normal(k[0], (vocab, H), jnp.float32) * 0.02,
        "rel_bias": jax.random.normal(k[1], (num_buckets, nH), jnp.float32) * 0.02,
        "final_ln": jnp.ones((1, H), jnp.float32),
        "proj_w":   bf16(k[2], (H, P)),
        "proj_b":   jax.random.normal(k[3], (1, P), jnp.float32) * 0.02,
        "layers":   [],
    }
    for i in range(n_layers):
        lk = jax.random.split(k[4 + i], 4)
        params["layers"].append({
            "ln1":    jnp.ones((1, H), jnp.float32),
            "wqkv":   bf16(lk[0], (H, 3 * H)),      # fused Q|K|V
            "wo":     bf16(lk[1], (H, H)),
            "ln2":    jnp.ones((1, H), jnp.float32),
            "wi":     bf16(lk[2], (H, 2 * d_ff)),   # fused wi_0|wi_1
            "wo_ffn": bf16(lk[3], (d_ff, H)),
        })
    return params


if __name__ == "__main__":
    # Small MT5-encoder-consistent config with MXU/lane-aligned dims.
    B, S = 2, 128
    H, nH, dh = 256, 4, 64
    d_ff, n_layers = 512, 2
    vocab, num_buckets, max_distance = 512, 32, 128
    P = 128                                    # projection dim (vmsst branch)

    tq = _pick_tile(S, _Q_TILE)                # query tile
    tm = _pick_tile(B * S, _ROW_TILE)          # FFN row tile over M = B*S

    key = jax.random.PRNGKey(0)
    pkey, ikey = jax.random.split(key)
    params = init_params(pkey, vocab, H, nH, dh, d_ff, n_layers, num_buckets, P)

    input_ids = jax.random.randint(ikey, (B, S), 0, vocab, dtype=jnp.int32)
    attention_mask = jnp.concatenate(
        [jnp.ones((1, S), jnp.int32),
         (jnp.arange(S) < S // 2).astype(jnp.int32)[None, :]], axis=0)

    fwd = jax.jit(functools.partial(
        mt5_retriever_encoder, nH=nH, dh=dh,
        num_buckets=num_buckets, max_distance=max_distance, tq=tq, tm=tm))
    out = fwd(params, input_ids, attention_mask)
    out = jax.block_until_ready(out)

    assert out.shape == (B, P), out.shape
    assert bool(jnp.all(jnp.isfinite(out)))
    # TODO(synk): real HF mT5 checkpoint weights are not loaded (synthetic init).
    print("KERNEL_OK")
</pallas_src>

<mosaic_0001>
module attributes {stable_mosaic.version = 11 : i64} {
  func.func @_attn_kernel(%arg0: i32, %arg1: i32, %arg2: memref<1x128x256xbf16, #tpu.memory_space<vmem>>, %arg3: memref<1x256xf32, #tpu.memory_space<vmem>>, %arg4: memref<256x768xbf16, #tpu.memory_space<vmem>>, %arg5: memref<4x128x128xbf16, #tpu.memory_space<vmem>>, %arg6: memref<1x1x128xf32, #tpu.memory_space<vmem>>, %arg7: memref<256x256xbf16, #tpu.memory_space<vmem>>, %arg8: memref<1x128x256xbf16, #tpu.memory_space<vmem>>, %arg9: memref<128x768xbf16, #tpu.memory_space<vmem>>) attributes {dimension_semantics = [#tpu.dimension_semantics<parallel>, #tpu.dimension_semantics<arbitrary>], iteration_bounds = array<i64: 2, 1>, scalar_prefetch = 0 : i64, scratch_operands = 1 : i64, tpu.core_type = #tpu.core_type<tc>, window_params = [{transform_indices = @transform_0, window_bounds = array<i64: 1, 128, 256>}, {pipeline_mode = #tpu.pipeline_mode<synchronous>, transform_indices = @transform_1, window_bounds = array<i64: 1, 256>}, {pipeline_mode = #tpu.pipeline_mode<synchronous>, transform_indices = @transform_2, window_bounds = array<i64: 256, 768>}, {transform_indices = @transform_3, window_bounds = array<i64: 4, 128, 128>}, {transform_indices = @transform_4, window_bounds = array<i64: 1, 1, 128>}, {pipeline_mode = #tpu.pipeline_mode<synchronous>, transform_indices = @transform_5, window_bounds = array<i64: 256, 256>}, {transform_indices = @transform_6, window_bounds = array<i64: 1, 128, 256>}]} {
    %c0_i32 = arith.constant 0 : i32
    %0 = arith.cmpi eq, %arg1, %c0_i32 : i32
    %1 = arith.extui %0 : i1 to i32
    %c0_i32_0 = arith.constant 0 : i32
    %2 = arith.cmpi ne, %1, %c0_i32_0 : i32
    scf.if %2 {
      %c0_48 = arith.constant 0 : index
      %c0_49 = arith.constant 0 : index
      %c0_50 = arith.constant 0 : index
      %126 = vector.load %arg2[%c0_48, %c0_49, %c0_50] : memref<1x128x256xbf16, #tpu.memory_space<vmem>>, vector<1x128x256xbf16>
      %127 = vector.shape_cast %126 : vector<1x128x256xbf16> to vector<128x256xbf16>
      %128 = arith.extf %127 : vector<128x256xbf16> to vector<128x256xf32>
      %129 = arith.mulf %128, %128 : vector<128x256xf32>
      %cst_51 = arith.constant dense<0.000000e+00> : vector<128xf32>
      %130 = vector.multi_reduction <add>, %129, %cst_51 [1] : vector<128x256xf32> to vector<128xf32>
      %131 = vector.shape_cast %130 : vector<128xf32> to vector<128x1xf32>
      %cst_52 = arith.constant 2.560000e+02 : f32
      %132 = vector.broadcast %cst_52 : f32 to vector<128x1xf32>
      %133 = arith.divf %131, %132 : vector<128x1xf32>
      %cst_53 = arith.constant 9.99999997E-7 : f32
      %134 = vector.broadcast %cst_53 : f32 to vector<128x1xf32>
      %135 = arith.addf %133, %134 : vector<128x1xf32>
      %136 = math.rsqrt %135 : vector<128x1xf32>
      %137 = vector.broadcast %136 : vector<128x1xf32> to vector<128x256xf32>
      %138 = arith.mulf %128, %137 : vector<128x256xf32>
      %c0_54 = arith.constant 0 : index
      %c0_55 = arith.constant 0 : index
      %139 = vector.load %arg3[%c0_54, %c0_55] : memref<1x256xf32, #tpu.memory_space<vmem>>, vector<1x256xf32>
      %140 = vector.broadcast %139 : vector<1x256xf32> to vector<128x256xf32>
      %141 = arith.mulf %138, %140 : vector<128x256xf32>
      %142 = arith.truncf %141 : vector<128x256xf32> to vector<128x256xbf16>
      %c0_56 = arith.constant 0 : index
      %c0_57 = arith.constant 0 : index
      %143 = vector.load %arg4[%c0_56, %c0_57] : memref<256x768xbf16, #tpu.memory_space<vmem>>, vector<256x768xbf16>
      %cst_58 = arith.constant dense<0.000000e+00> : vector<128x768xf32>
      %144 = tpu.matmul %142, %143, %cst_58 {dimension_numbers = #tpu.dot_dimension_numbers<[1], [0], [0], [1], [0, 0, 1, 1], [], []>} : vector<128x256xbf16>, vector<256x768xbf16>, vector<128x768xf32> -> vector<128x768xf32>
      %145 = arith.truncf %144 : vector<128x768xf32> to vector<128x768xbf16>
      %c0_59 = arith.constant 0 : index
      %c0_60 = arith.constant 0 : index
      %146 = vector.load %arg9[%c0_59, %c0_60] : memref<128x768xbf16, #tpu.memory_space<vmem>>, vector<128x768xbf16>
      tpu.vector_store %arg9[%c0_59, %c0_60], %145 {strides = array<i32>} : memref<128x768xbf16, #tpu.memory_space<vmem>>, vector<128x768xbf16>,
    } else {
    }
    %c128_i32 = arith.constant 128 : i32
    %3 = arith.muli %arg1, %c128_i32 : i32
    %4 = tpu.assume_multiple %3, 128 : i32
    %c0 = arith.constant 0 : index
    %5 = arith.index_cast %4 : i32 to index
    %c0_1 = arith.constant 0 : index
    %6 = vector.load %arg2[%c0, %5, %c0_1] : memref<1x128x256xbf16, #tpu.memory_space<vmem>>, vector<1x128x256xbf16>
    %7 = vector.shape_cast %6 : vector<1x128x256xbf16> to vector<128x256xbf16>
    %8 = arith.extf %7 : vector<128x256xbf16> to vector<128x256xf32>
    %c0_2 = arith.constant 0 : index
    %c0_3 = arith.constant 0 : index
    %c0_4 = arith.constant 0 : index
    %9 = vector.load %arg6[%c0_2, %c0_3, %c0_4] : memref<1x1x128xf32, #tpu.memory_space<vmem>>, vector<1x1x128xf32>
    %10 = vector.shape_cast %9 : vector<1x1x128xf32> to vector<1x128xf32>
    %c0_5 = arith.constant 0 : index
    %c0_6 = arith.constant 0 : index
    %11 = vector.load %arg7[%c0_5, %c0_6] : memref<256x256xbf16, #tpu.memory_space<vmem>>, vector<256x256xbf16>
    %cst = arith.constant 0.000000e+00 : f32
    %12 = vector.broadcast %cst : f32 to vector<128x256xf32>
    %13 = arith.index_cast %4 : i32 to index
    %c0_7 = arith.constant 0 : index
    %14 = vector.load %arg9[%13, %c0_7] : memref<128x768xbf16, #tpu.memory_space<vmem>>, vector<128x64xbf16>
    %c0_8 = arith.constant 0 : index
    %c256 = arith.constant 256 : index
    %15 = vector.load %arg9[%c0_8, %c256] : memref<128x768xbf16, #tpu.memory_space<vmem>>, vector<128x64xbf16>
    %c0_9 = arith.constant 0 : index
    %c512 = arith.constant 512 : index
    %16 = vector.load %arg9[%c0_9, %c512] : memref<128x768xbf16, #tpu.memory_space<vmem>>, vector<128x64xbf16>
    %cst_10 = arith.constant dense<0.000000e+00> : vector<128x128xf32>
    %17 = tpu.matmul %14, %15, %cst_10 {dimension_numbers = #tpu.dot_dimension_numbers<[1], [1], [0], [0], [0, 0, 1, 0], [], []>} : vector<128x64xbf16>, vector<128x64xbf16>, vector<128x128xf32> -> vector<128x128xf32>
    %c0_11 = arith.constant 0 : index
    %c0_12 = arith.constant 0 : index
    %c0_13 = arith.constant 0 : index
    %18 = vector.load %arg5[%c0_11, %c0_12, %c0_13] : memref<4x128x128xbf16, #tpu.memory_space<vmem>>, vector<1x128x128xbf16>
    %19 = vector.shape_cast %18 : vector<1x128x128xbf16> to vector<128x128xbf16>
    %20 = arith.extf %19 : vector<128x128xbf16> to vector<128x128xf32>
    %21 = arith.addf %17, %20 : vector<128x128xf32>
    %22 = vector.broadcast %10 : vector<1x128xf32> to vector<128x128xf32>
    %23 = arith.addf %21, %22 : vector<128x128xf32>
    %cst_14 = arith.constant dense<0xFF800000> : vector<128xf32>
    %24 = vector.multi_reduction <maximumf>, %23, %cst_14 [1] : vector<128x128xf32> to vector<128xf32>
    %25 = vector.shape_cast %24 : vector<128xf32> to vector<128x1xf32>
    %26 = vector.broadcast %25 : vector<128x1xf32> to vector<128x128xf32>
    %27 = arith.subf %23, %26 : vector<128x128xf32>
    %28 = math.exp %27 : vector<128x128xf32>
    %cst_15 = arith.constant dense<0.000000e+00> : vector<128xf32>
    %29 = vector.multi_reduction <add>, %28, %cst_15 [1] : vector<128x128xf32> to vector<128xf32>
    %30 = vector.shape_cast %29 : vector<128xf32> to vector<128x1xf32>
    %31 = tpu.reciprocal %30 {approx = true} : vector<128x1xf32> -> vector<128x1xf32>
    %32 = vector.broadcast %31 : vector<128x1xf32> to vector<128x128xf32>
    %33 = arith.mulf %28, %32 : vector<128x128xf32>
    %34 = arith.truncf %33 : vector<128x128xf32> to vector<128x128xbf16>
    %cst_16 = arith.constant dense<0.000000e+00> : vector<128x64xf32>
    %35 = tpu.matmul %34, %16, %cst_16 {dimension_numbers = #tpu.dot_dimension_numbers<[1], [0], [0], [1], [0, 0, 1, 1], [], []>} : vector<128x128xbf16>, vector<128x64xbf16>, vector<128x64xf32> -> vector<128x64xf32>
    %36 = arith.truncf %35 : vector<128x64xf32> to vector<128x64xbf16>
    %37 = vector.extract_strided_slice %11 {offsets = [0, 0], sizes = [64, 256], strides = [1, 1]} : vector<256x256xbf16> to vector<64x256xbf16>
    %cst_17 = arith.constant dense<0.000000e+00> : vector<128x256xf32>
    %38 = tpu.matmul %36, %37, %cst_17 {dimension_numbers = #tpu.dot_dimension_numbers<[1], [0], [0], [1], [0, 0, 1, 1], [], []>} : vector<128x64xbf16>, vector<64x256xbf16>, vector<128x256xf32> -> vector<128x256xf32>
    %39 = arith.addf %12, %38 : vector<128x256xf32>
    %40 = arith.index_cast %4 : i32 to index
    %c64 = arith.constant 64 : index
    %41 = vector.load %arg9[%40, %c64] : memref<128x768xbf16, #tpu.memory_space<vmem>>, vector<128x64xbf16>
    %c0_18 = arith.constant 0 : index
    %c320 = arith.constant 320 : index
    %42 = vector.load %arg9[%c0_18, %c320] : memref<128x768xbf16, #tpu.memory_space<vmem>>, vector<128x64xbf16>
    %c0_19 = arith.constant 0 : index
    %c576 = arith.constant 576 : index
    %43 = vector.load %arg9[%c0_19, %c576] : memref<128x768xbf16, #tpu.memory_space<vmem>>, vector<128x64xbf16>
    %cst_20 = arith.constant dense<0.000000e+00> : vector<128x128xf32>
    %44 = tpu.matmul %41, %42, %cst_20 {dimension_numbers = #tpu.dot_dimension_numbers<[1], [1], [0], [0], [0, 0, 1, 0], [], []>} : vector<128x64xbf16>, vector<128x64xbf16>, vector<128x128xf32> -> vector<128x128xf32>
    %c1 = arith.constant 1 : index
    %c0_21 = arith.constant 0 : index
    %c0_22 = arith.constant 0 : index
    %45 = vector.load %arg5[%c1, %c0_21, %c0_22] : memref<4x128x128xbf16, #tpu.memory_space<vmem>>, vector<1x128x128xbf16>
    %46 = vector.shape_cast %45 : vector<1x128x128xbf16> to vector<128x128xbf16>
    %47 = arith.extf %46 : vector<128x128xbf16> to vector<128x128xf32>
    %48 = arith.addf %44, %47 : vector<128x128xf32>
    %49 = vector.broadcast %10 : vector<1x128xf32> to vector<128x128xf32>
    %50 = arith.addf %48, %49 : vector<128x128xf32>
    %cst_23 = arith.constant dense<0xFF800000> : vector<128xf32>
    %51 = vector.multi_reduction <maximumf>, %50, %cst_23 [1] : vector<128x128xf32> to vector<128xf32>
    %52 = vector.shape_cast %51 : vector<128xf32> to vector<128x1xf32>
    %53 = vector.broadcast %52 : vector<128x1xf32> to vector<128x128xf32>
    %54 = arith.subf %50, %53 : vector<128x128xf32>
    %55 = math.exp %54 : vector<128x128xf32>
    %cst_24 = arith.constant dense<0.000000e+00> : vector<128xf32>
    %56 = vector.multi_reduction <add>, %55, %cst_24 [1] : vector<128x128xf32> to vector<128xf32>
    %57 = vector.shape_cast %56 : vector<128xf32> to vector<128x1xf32>
    %58 = tpu.reciprocal %57 {approx = true} : vector<128x1xf32> -> vector<128x1xf32>
    %59 = vector.broadcast %58 : vector<128x1xf32> to vector<128x128xf32>
    %60 = arith.mulf %55, %59 : vector<128x128xf32>
    %61 = arith.truncf %60 : vector<128x128xf32> to vector<128x128xbf16>
    %cst_25 = arith.constant dense<0.000000e+00> : vector<128x64xf32>
    %62 = tpu.matmul %61, %43, %cst_25 {dimension_numbers = #tpu.dot_dimension_numbers<[1], [0], [0], [1], [0, 0, 1, 1], [], []>} : vector<128x128xbf16>, vector<128x64xbf16>, vector<128x64xf32> -> vector<128x64xf32>
    %63 = arith.truncf %62 : vector<128x64xf32> to vector<128x64xbf16>
    %64 = vector.extract_strided_slice %11 {offsets = [64, 0], sizes = [64, 256], strides = [1, 1]} : vector<256x256xbf16> to vector<64x256xbf16>
    %cst_26 = arith.constant dense<0.000000e+00> : vector<128x256xf32>
    %65 = tpu.matmul %63, %64, %cst_26 {dimension_numbers = #tpu.dot_dimension_numbers<[1], [0], [0], [1], [0, 0, 1, 1], [], []>} : vector<128x64xbf16>, vector<64x256xbf16>, vector<128x256xf32> -> vector<128x256xf32>
    %66 = arith.addf %39, %65 : vector<128x256xf32>
    %67 = arith.index_cast %4 : i32 to index
    %c128 = arith.constant 128 : index
    %68 = vector.load %arg9[%67, %c128] : memref<128x768xbf16, #tpu.memory_space<vmem>>, vector<128x64xbf16>
    %c0_27 = arith.constant 0 : index
    %c384 = arith.constant 384 : index
    %69 = vector.load %arg9[%c0_27, %c384] : memref<128x768xbf16, #tpu.memory_space<vmem>>, vector<128x64xbf16>
    %c0_28 = arith.constant 0 : index
    %c640 = arith.constant 640 : index
    %70 = vector.load %arg9[%c0_28, %c640] : memref<128x768xbf16, #tpu.memory_space<vmem>>, vector<128x64xbf16>
    %cst_29 = arith.constant dense<0.000000e+00> : vector<128x128xf32>
    %71 = tpu.matmul %68, %69, %cst_29 {dimension_numbers = #tpu.dot_dimension_numbers<[1], [1], [0], [0], [0, 0, 1, 0], [], []>} : vector<128x64xbf16>, vector<128x64xbf16>, vector<128x128xf32> -> vector<128x128xf32>
    %c2 = arith.constant 2 : index
    %c0_30 = arith.constant 0 : index
    %c0_31 = arith.constant 0 : index
    %72 = vector.load %arg5[%c2, %c0_30, %c0_31] : memref<4x128x128xbf16, #tpu.memory_space<vmem>>, vector<1x128x128xbf16>
    %73 = vector.shape_cast %72 : vector<1x128x128xbf16> to vector<128x128xbf16>
    %74 = arith.extf %73 : vector<128x128xbf16> to vector<128x128xf32>
    %75 = arith.addf %71, %74 : vector<128x128xf32>
    %76 = vector.broadcast %10 : vector<1x128xf32> to vector<128x128xf32>
    %77 = arith.addf %75, %76 : vector<128x128xf32>
    %cst_32 = arith.constant dense<0xFF800000> : vector<128xf32>
    %78 = vector.multi_reduction <maximumf>, %77, %cst_32 [1] : vector<128x128xf32> to vector<128xf32>
    %79 = vector.shape_cast %78 : vector<128xf32> to vector<128x1xf32>
    %80 = vector.broadcast %79 : vector<128x1xf32> to vector<128x128xf32>
    %81 = arith.subf %77, %80 : vector<128x128xf32>
    %82 = math.exp %81 : vector<128x128xf32>
    %cst_33 = arith.constant dense<0.000000e+00> : vector<128xf32>
    %83 = vector.multi_reduction <add>, %82, %cst_33 [1] : vector<128x128xf32> to vector<128xf32>
    %84 = vector.shape_cast %83 : vector<128xf32> to vector<128x1xf32>
    %85 = tpu.reciprocal %84 {approx = true} : vector<128x1xf32> -> vector<128x1xf32>
    %86 = vector.broadcast %85 : vector<128x1xf32> to vector<128x128xf32>
    %87 = arith.mulf %82, %86 : vector<128x128xf32>
    %88 = arith.truncf %87 : vector<128x128xf32> to vector<128x128xbf16>
    %cst_34 = arith.constant dense<0.000000e+00> : vector<128x64xf32>
    %89 = tpu.matmul %88, %70, %cst_34 {dimension_numbers = #tpu.dot_dimension_numbers<[1], [0], [0], [1], [0, 0, 1, 1], [], []>} : vector<128x128xbf16>, vector<128x64xbf16>, vector<128x64xf32> -> vector<128x64xf32>
    %90 = arith.truncf %89 : vector<128x64xf32> to vector<128x64xbf16>
    %91 = vector.extract_strided_slice %11 {offsets = [128, 0], sizes = [64, 256], strides = [1, 1]} : vector<256x256xbf16> to vector<64x256xbf16>
    %cst_35 = arith.constant dense<0.000000e+00> : vector<128x256xf32>
    %92 = tpu.matmul %90, %91, %cst_35 {dimension_numbers = #tpu.dot_dimension_numbers<[1], [0], [0], [1], [0, 0, 1, 1], [], []>} : vector<128x64xbf16>, vector<64x256xbf16>, vector<128x256xf32> -> vector<128x256xf32>
    %93 = arith.addf %66, %92 : vector<128x256xf32>
    %94 = arith.index_cast %4 : i32 to index
    %c192 = arith.constant 192 : index
    %95 = vector.load %arg9[%94, %c192] : memref<128x768xbf16, #tpu.memory_space<vmem>>, vector<128x64xbf16>
    %c0_36 = arith.constant 0 : index
    %c448 = arith.constant 448 : index
    %96 = vector.load %arg9[%c0_36, %c448] : memref<128x768xbf16, #tpu.memory_space<vmem>>, vector<128x64xbf16>
    %c0_37 = arith.constant 0 : index
    %c704 = arith.constant 704 : index
    %97 = vector.load %arg9[%c0_37, %c704] : memref<128x768xbf16, #tpu.memory_space<vmem>>, vector<128x64xbf16>
    %cst_38 = arith.constant dense<0.000000e+00> : vector<128x128xf32>
    %98 = tpu.matmul %95, %96, %cst_38 {dimension_numbers = #tpu.dot_dimension_numbers<[1], [1], [0], [0], [0, 0, 1, 0], [], []>} : vector<128x64xbf16>, vector<128x64xbf16>, vector<128x128xf32> -> vector<128x128xf32>
    %c3 = arith.constant 3 : index
    %c0_39 = arith.constant 0 : index
    %c0_40 = arith.constant 0 : index
    %99 = vector.load %arg5[%c3, %c0_39, %c0_40] : memref<4x128x128xbf16, #tpu.memory_space<vmem>>, vector<1x128x128xbf16>
    %100 = vector.shape_cast %99 : vector<1x128x128xbf16> to vector<128x128xbf16>
    %101 = arith.extf %100 : vector<128x128xbf16> to vector<128x128xf32>
    %102 = arith.addf %98, %101 : vector<128x128xf32>
    %103 = vector.broadcast %10 : vector<1x128xf32> to vector<128x128xf32>
    %104 = arith.addf %102, %103 : vector<128x128xf32>
    %cst_41 = arith.constant dense<0xFF800000> : vector<128xf32>
    %105 = vector.multi_reduction <maximumf>, %104, %cst_41 [1] : vector<128x128xf32> to vector<128xf32>
    %106 = vector.shape_cast %105 : vector<128xf32> to vector<128x1xf32>
    %107 = vector.broadcast %106 : vector<128x1xf32> to vector<128x128xf32>
    %108 = arith.subf %104, %107 : vector<128x128xf32>
    %109 = math.exp %108 : vector<128x128xf32>
    %cst_42 = arith.constant dense<0.000000e+00> : vector<128xf32>
    %110 = vector.multi_reduction <add>, %109, %cst_42 [1] : vector<128x128xf32> to vector<128xf32>
    %111 = vector.shape_cast %110 : vector<128xf32> to vector<128x1xf32>
    %112 = tpu.reciprocal %111 {approx = true} : vector<128x1xf32> -> vector<128x1xf32>
    %113 = vector.broadcast %112 : vector<128x1xf32> to vector<128x128xf32>
    %114 = arith.mulf %109, %113 : vector<128x128xf32>
    %115 = arith.truncf %114 : vector<128x128xf32> to vector<128x128xbf16>
    %cst_43 = arith.constant dense<0.000000e+00> : vector<128x64xf32>
    %116 = tpu.matmul %115, %97, %cst_43 {dimension_numbers = #tpu.dot_dimension_numbers<[1], [0], [0], [1], [0, 0, 1, 1], [], []>} : vector<128x128xbf16>, vector<128x64xbf16>, vector<128x64xf32> -> vector<128x64xf32>
    %117 = arith.truncf %116 : vector<128x64xf32> to vector<128x64xbf16>
    %118 = vector.extract_strided_slice %11 {offsets = [192, 0], sizes = [64, 256], strides = [1, 1]} : vector<256x256xbf16> to vector<64x256xbf16>
    %cst_44 = arith.constant dense<0.000000e+00> : vector<128x256xf32>
    %119 = tpu.matmul %117, %118, %cst_44 {dimension_numbers = #tpu.dot_dimension_numbers<[1], [0], [0], [1], [0, 0, 1, 1], [], []>} : vector<128x64xbf16>, vector<64x256xbf16>, vector<128x256xf32> -> vector<128x256xf32>
    %120 = arith.addf %93, %119 : vector<128x256xf32>
    %121 = arith.addf %8, %120 : vector<128x256xf32>
    %122 = arith.truncf %121 : vector<128x256xf32> to vector<128x256xbf16>
    %c0_45 = arith.constant 0 : index
    %c0_46 = arith.constant 0 : index
    %c0_47 = arith.constant 0 : index
    %123 = vector.load %arg8[%c0_45, %c0_46, %c0_47] : memref<1x128x256xbf16, #tpu.memory_space<vmem>>, vector<1x128x256xbf16>
    %124 = vector.shape_cast %123 : vector<1x128x256xbf16> to vector<128x256xbf16>
    %125 = vector.shape_cast %122 : vector<128x256xbf16> to vector<1x128x256xbf16>
    tpu.vector_store %arg8[%c0_45, %c0_46, %c0_47], %125 {strides = array<i32>} : memref<1x128x256xbf16, #tpu.memory_space<vmem>>, vector<1x128x256xbf16>,
    return
  }
  func.func @transform_0(%arg0: i32, %arg1: i32) -> (i32, i32, i32) {
    %c0_i32 = arith.constant 0 : i32
    %c0_i32_0 = arith.constant 0 : i32
    %c0_i32_1 = arith.constant 0 : i32
    return %arg0, %c0_i32, %c0_i32_0 : i32, i32, i32
  }
  func.func @transform_1(%arg0: i32, %arg1: i32) -> (i32, i32) {
    %c0_i32 = arith.constant 0 : i32
    %c0_i32_0 = arith.constant 0 : i32
    %c0_i32_1 = arith.constant 0 : i32
    return %c0_i32, %c0_i32_0 : i32, i32
  }
  func.func @transform_2(%arg0: i32, %arg1: i32) -> (i32, i32) {
    %c0_i32 = arith.constant 0 : i32
    %c0_i32_0 = arith.constant 0 : i32
    %c0_i32_1 = arith.constant 0 : i32
    return %c0_i32, %c0_i32_0 : i32, i32
  }
  func.func @transform_3(%arg0: i32, %arg1: i32) -> (i32, i32, i32) {
    %c0_i32 = arith.constant 0 : i32
    %c0_i32_0 = arith.constant 0 : i32
    %c0_i32_1 = arith.constant 0 : i32
    return %c0_i32, %arg1, %c0_i32_0 : i32, i32, i32
  }
  func.func @transform_4(%arg0: i32, %arg1: i32) -> (i32, i32, i32) {
    %c0_i32 = arith.constant 0 : i32
    %c0_i32_0 = arith.constant 0 : i32
    %c0_i32_1 = arith.constant 0 : i32
    return %arg0, %c0_i32, %c0_i32_0 : i32, i32, i32
  }
  func.func @transform_5(%arg0: i32, %arg1: i32) -> (i32, i32) {
    %c0_i32 = arith.constant 0 : i32
    %c0_i32_0 = arith.constant 0 : i32
    %c0_i32_1 = arith.constant 0 : i32
    return %c0_i32, %c0_i32_0 : i32, i32
  }
  func.func @transform_6(%arg0: i32, %arg1: i32) -> (i32, i32, i32) {
    %c0_i32 = arith.constant 0 : i32
    %c0_i32_0 = arith.constant 0 : i32
    return %arg0, %arg1, %c0_i32 : i32, i32, i32
  }
}

module attributes {stable_mosaic.version = 11 : i64} {
  func.func @_ln_ffn_kernel(%arg0: i32, %arg1: memref<256x256xbf16, #tpu.memory_space<vmem>>, %arg2: memref<1x256xf32, #tpu.memory_space<vmem>>, %arg3: memref<256x1024xbf16, #tpu.memory_space<vmem>>, %arg4: memref<512x256xbf16, #tpu.memory_space<vmem>>, %arg5: memref<256x256xbf16, #tpu.memory_space<vmem>>) attributes {dimension_semantics = [#tpu.dimension_semantics<parallel>], iteration_bounds = array<i64: 1>, scalar_prefetch = 0 : i64, scratch_operands = 0 : i64, tpu.core_type = #tpu.core_type<tc>, window_params = [{transform_indices = @transform_0, window_bounds = array<i64: 256, 256>}, {pipeline_mode = #tpu.pipeline_mode<synchronous>, transform_indices = @transform_1, window_bounds = array<i64: 1, 256>}, {pipeline_mode = #tpu.pipeline_mode<synchronous>, transform_indices = @transform_2, window_bounds = array<i64: 256, 1024>}, {pipeline_mode = #tpu.pipeline_mode<synchronous>, transform_indices = @transform_3, window_bounds = array<i64: 512, 256>}, {transform_indices = @transform_4, window_bounds = array<i64: 256, 256>}]} {
    %c0 = arith.constant 0 : index
    %c0_0 = arith.constant 0 : index
    %0 = vector.load %arg1[%c0, %c0_0] : memref<256x256xbf16, #tpu.memory_space<vmem>>, vector<256x256xbf16>
    %1 = arith.extf %0 : vector<256x256xbf16> to vector<256x256xf32>
    %2 = arith.mulf %1, %1 : vector<256x256xf32>
    %cst = arith.constant dense<0.000000e+00> : vector<256xf32>
    %3 = vector.multi_reduction <add>, %2, %cst [1] : vector<256x256xf32> to vector<256xf32>
    %4 = vector.shape_cast %3 : vector<256xf32> to vector<256x1xf32>
    %cst_1 = arith.constant 2.560000e+02 : f32
    %5 = vector.broadcast %cst_1 : f32 to vector<256x1xf32>
    %6 = arith.divf %4, %5 : vector<256x1xf32>
    %cst_2 = arith.constant 9.99999997E-7 : f32
    %7 = vector.broadcast %cst_2 : f32 to vector<256x1xf32>
    %8 = arith.addf %6, %7 : vector<256x1xf32>
    %9 = math.rsqrt %8 : vector<256x1xf32>
    %10 = vector.broadcast %9 : vector<256x1xf32> to vector<256x256xf32>
    %11 = arith.mulf %1, %10 : vector<256x256xf32>
    %c0_3 = arith.constant 0 : index
    %c0_4 = arith.constant 0 : index
    %12 = vector.load %arg2[%c0_3, %c0_4] : memref<1x256xf32, #tpu.memory_space<vmem>>, vector<1x256xf32>
    %13 = vector.broadcast %12 : vector<1x256xf32> to vector<256x256xf32>
    %14 = arith.mulf %11, %13 : vector<256x256xf32>
    %15 = arith.truncf %14 : vector<256x256xf32> to vector<256x256xbf16>
    %c0_5 = arith.constant 0 : index
    %c0_6 = arith.constant 0 : index
    %16 = vector.load %arg3[%c0_5, %c0_6] : memref<256x1024xbf16, #tpu.memory_space<vmem>>, vector<256x1024xbf16>
    %cst_7 = arith.constant dense<0.000000e+00> : vector<256x1024xf32>
    %17 = tpu.matmul %15, %16, %cst_7 {dimension_numbers = #tpu.dot_dimension_numbers<[1], [0], [0], [1], [0, 0, 1, 1], [], []>} : vector<256x256xbf16>, vector<256x1024xbf16>, vector<256x1024xf32> -> vector<256x1024xf32>
    %18 = vector.extract_strided_slice %17 {offsets = [0, 0], sizes = [256, 512], strides = [1, 1]} : vector<256x1024xf32> to vector<256x512xf32>
    %cst_8 = arith.constant 5.000000e-01 : f32
    %19 = vector.broadcast %cst_8 : f32 to vector<256x512xf32>
    %20 = arith.mulf %19, %18 : vector<256x512xf32>
    %cst_9 = arith.constant 4.471500e-02 : f32
    %21 = vector.broadcast %cst_9 : f32 to vector<256x512xf32>
    %22 = arith.mulf %21, %18 : vector<256x512xf32>
    %23 = arith.mulf %22, %18 : vector<256x512xf32>
    %24 = arith.mulf %23, %18 : vector<256x512xf32>
    %25 = arith.addf %18, %24 : vector<256x512xf32>
    %cst_10 = arith.constant 0.797884583 : f32
    %26 = vector.broadcast %cst_10 : f32 to vector<256x512xf32>
    %27 = arith.mulf %26, %25 : vector<256x512xf32>
    %28 = math.tanh %27 : vector<256x512xf32>
    %cst_11 = arith.constant 1.000000e+00 : f32
    %29 = vector.broadcast %cst_11 : f32 to vector<256x512xf32>
    %30 = arith.addf %29, %28 : vector<256x512xf32>
    %31 = arith.mulf %20, %30 : vector<256x512xf32>
    %32 = vector.extract_strided_slice %17 {offsets = [0, 512], sizes = [256, 512], strides = [1, 1]} : vector<256x1024xf32> to vector<256x512xf32>
    %33 = arith.mulf %31, %32 : vector<256x512xf32>
    %34 = arith.truncf %33 : vector<256x512xf32> to vector<256x512xbf16>
    %c0_12 = arith.constant 0 : index
    %c0_13 = arith.constant 0 : index
    %35 = vector.load %arg4[%c0_12, %c0_13] : memref<512x256xbf16, #tpu.memory_space<vmem>>, vector<512x256xbf16>
    %cst_14 = arith.constant dense<0.000000e+00> : vector<256x256xf32>
    %36 = tpu.matmul %34, %35, %cst_14 {dimension_numbers = #tpu.dot_dimension_numbers<[1], [0], [0], [1], [0, 0, 1, 1], [], []>} : vector<256x512xbf16>, vector<512x256xbf16>, vector<256x256xf32> -> vector<256x256xf32>
    %37 = arith.addf %1, %36 : vector<256x256xf32>
    %38 = arith.truncf %37 : vector<256x256xf32> to vector<256x256xbf16>
    %c0_15 = arith.constant 0 : index
    %c0_16 = arith.constant 0 : index
    %39 = vector.load %arg5[%c0_15, %c0_16] : memref<256x256xbf16, #tpu.memory_space<vmem>>, vector<256x256xbf16>
    tpu.vector_store %arg5[%c0_15, %c0_16], %38 {strides = array<i32>} : memref<256x256xbf16, #tpu.memory_space<vmem>>, vector<256x256xbf16>,
    return
  }
  func.func @transform_0(%arg0: i32) -> (i32, i32) {
    %c0_i32 = arith.constant 0 : i32
    %c0_i32_0 = arith.constant 0 : i32
    return %arg0, %c0_i32 : i32, i32
  }
  func.func @transform_1(%arg0: i32) -> (i32, i32) {
    %c0_i32 = arith.constant 0 : i32
    %c0_i32_0 = arith.constant 0 : i32
    %c0_i32_1 = arith.constant 0 : i32
    return %c0_i32, %c0_i32_0 : i32, i32
  }
  func.func @transform_2(%arg0: i32) -> (i32, i32) {
    %c0_i32 = arith.constant 0 : i32
    %c0_i32_0 = arith.constant 0 : i32
    %c0_i32_1 = arith.constant 0 : i32
    return %c0_i32, %c0_i32_0 : i32, i32
  }
  func.func @transform_3(%arg0: i32) -> (i32, i32) {
    %c0_i32 = arith.constant 0 : i32
    %c0_i32_0 = arith.constant 0 : i32
    %c0_i32_1 = arith.constant 0 : i32
    return %c0_i32, %c0_i32_0 : i32, i32
  }
  func.func @transform_4(%arg0: i32) -> (i32, i32) {
    %c0_i32 = arith.constant 0 : i32
    %c0_i32_0 = arith.constant 0 : i32
    return %arg0, %c0_i32 : i32, i32
  }
}

module attributes {stable_mosaic.version = 11 : i64} {
  func.func @_pool_proj_kernel(%arg0: i32, %arg1: memref<1x128x256xbf16, #tpu.memory_space<vmem>>, %arg2: memref<1x256xf32, #tpu.memory_space<vmem>>, %arg3: memref<1x128x1xf32, #tpu.memory_space<vmem>>, %arg4: memref<256x128xbf16, #tpu.memory_space<vmem>>, %arg5: memref<1x128xf32, #tpu.memory_space<vmem>>, %arg6: memref<1x1x128xf32, #tpu.memory_space<vmem>>) attributes {dimension_semantics = [#tpu.dimension_semantics<parallel>], iteration_bounds = array<i64: 2>, scalar_prefetch = 0 : i64, scratch_operands = 0 : i64, tpu.core_type = #tpu.core_type<tc>, window_params = [{transform_indices = @transform_0, window_bounds = array<i64: 1, 128, 256>}, {pipeline_mode = #tpu.pipeline_mode<synchronous>, transform_indices = @transform_1, window_bounds = array<i64: 1, 256>}, {transform_indices = @transform_2, window_bounds = array<i64: 1, 128, 1>}, {pipeline_mode = #tpu.pipeline_mode<synchronous>, transform_indices = @transform_3, window_bounds = array<i64: 256, 128>}, {pipeline_mode = #tpu.pipeline_mode<synchronous>, transform_indices = @transform_4, window_bounds = array<i64: 1, 128>}, {transform_indices = @transform_5, window_bounds = array<i64: 1, 1, 128>}]} {
    %c0 = arith.constant 0 : index
    %c0_0 = arith.constant 0 : index
    %c0_1 = arith.constant 0 : index
    %0 = vector.load %arg1[%c0, %c0_0, %c0_1] : memref<1x128x256xbf16, #tpu.memory_space<vmem>>, vector<1x128x256xbf16>
    %1 = vector.shape_cast %0 : vector<1x128x256xbf16> to vector<128x256xbf16>
    %2 = arith.extf %1 : vector<128x256xbf16> to vector<128x256xf32>
    %3 = arith.mulf %2, %2 : vector<128x256xf32>
    %cst = arith.constant dense<0.000000e+00> : vector<128xf32>
    %4 = vector.multi_reduction <add>, %3, %cst [1] : vector<128x256xf32> to vector<128xf32>
    %5 = vector.shape_cast %4 : vector<128xf32> to vector<128x1xf32>
    %cst_2 = arith.constant 2.560000e+02 : f32
    %6 = vector.broadcast %cst_2 : f32 to vector<128x1xf32>
    %7 = arith.divf %5, %6 : vector<128x1xf32>
    %cst_3 = arith.constant 9.99999997E-7 : f32
    %8 = vector.broadcast %cst_3 : f32 to vector<128x1xf32>
    %9 = arith.addf %7, %8 : vector<128x1xf32>
    %10 = math.rsqrt %9 : vector<128x1xf32>
    %11 = vector.broadcast %10 : vector<128x1xf32> to vector<128x256xf32>
    %12 = arith.mulf %2, %11 : vector<128x256xf32>
    %c0_4 = arith.constant 0 : index
    %c0_5 = arith.constant 0 : index
    %13 = vector.load %arg2[%c0_4, %c0_5] : memref<1x256xf32, #tpu.memory_space<vmem>>, vector<1x256xf32>
    %14 = vector.broadcast %13 : vector<1x256xf32> to vector<128x256xf32>
    %15 = arith.mulf %12, %14 : vector<128x256xf32>
    %c0_6 = arith.constant 0 : index
    %c0_7 = arith.constant 0 : index
    %c0_8 = arith.constant 0 : index
    %16 = vector.load %arg3[%c0_6, %c0_7, %c0_8] : memref<1x128x1xf32, #tpu.memory_space<vmem>>, vector<1x128x1xf32>
    %17 = vector.shape_cast %16 : vector<1x128x1xf32> to vector<128x1xf32>
    %18 = vector.broadcast %17 : vector<128x1xf32> to vector<128x256xf32>
    %19 = arith.mulf %15, %18 : vector<128x256xf32>
    %cst_9 = arith.constant dense<0.000000e+00> : vector<256xf32>
    %20 = vector.multi_reduction <add>, %19, %cst_9 [0] : vector<128x256xf32> to vector<256xf32>
    %21 = vector.shape_cast %20 : vector<256xf32> to vector<1x256xf32>
    %22 = vector.shape_cast %17 : vector<128x1xf32> to vector<1x128x1xf32>
    %cst_10 = arith.constant dense<0.000000e+00> : vector<1xf32>
    %23 = vector.multi_reduction <add>, %22, %cst_10 [1, 2] : vector<1x128x1xf32> to vector<1xf32>
    %24 = vector.shape_cast %23 : vector<1xf32> to vector<1x1x1xf32>
    %25 = vector.extract %24[0, 0, 0] : f32 from vector<1x1x1xf32>
    %cst_11 = arith.constant 1.000000e+00 : f32
    %26 = arith.maximumf %25, %cst_11 : f32
    %27 = vector.broadcast %26 : f32 to vector<1x256xf32>
    %28 = arith.divf %21, %27 : vector<1x256xf32>
    %29 = arith.truncf %28 : vector<1x256xf32> to vector<1x256xbf16>
    %c0_12 = arith.constant 0 : index
    %c0_13 = arith.constant 0 : index
    %30 = vector.load %arg4[%c0_12, %c0_13] : memref<256x128xbf16, #tpu.memory_space<vmem>>, vector<256x128xbf16>
    %cst_14 = arith.constant dense<0.000000e+00> : vector<1x128xf32>
    %31 = tpu.matmul %29, %30, %cst_14 {dimension_numbers = #tpu.dot_dimension_numbers<[1], [0], [0], [1], [0, 0, 1, 1], [], []>} : vector<1x256xbf16>, vector<256x128xbf16>, vector<1x128xf32> -> vector<1x128xf32>
    %c0_15 = arith.constant 0 : index
    %c0_16 = arith.constant 0 : index
    %32 = vector.load %arg5[%c0_15, %c0_16] : memref<1x128xf32, #tpu.memory_space<vmem>>, vector<1x128xf32>
    %33 = arith.addf %31, %32 : vector<1x128xf32>
    %c0_17 = arith.constant 0 : index
    %c0_18 = arith.constant 0 : index
    %c0_19 = arith.constant 0 : index
    %34 = vector.load %arg6[%c0_17, %c0_18, %c0_19] : memref<1x1x128xf32, #tpu.memory_space<vmem>>, vector<1x1x128xf32>
    %35 = vector.shape_cast %34 : vector<1x1x128xf32> to vector<1x128xf32>
    %36 = vector.shape_cast %33 : vector<1x128xf32> to vector<1x1x128xf32>
    tpu.vector_store %arg6[%c0_17, %c0_18, %c0_19], %36 {strides = array<i32>} : memref<1x1x128xf32, #tpu.memory_space<vmem>>, vector<1x1x128xf32>,
    return
  }
  func.func @transform_0(%arg0: i32) -> (i32, i32, i32) {
    %c0_i32 = arith.constant 0 : i32
    %c0_i32_0 = arith.constant 0 : i32
    %c0_i32_1 = arith.constant 0 : i32
    return %arg0, %c0_i32, %c0_i32_0 : i32, i32, i32
  }
  func.func @transform_1(%arg0: i32) -> (i32, i32) {
    %c0_i32 = arith.constant 0 : i32
    %c0_i32_0 = arith.constant 0 : i32
    %c0_i32_1 = arith.constant 0 : i32
    return %c0_i32, %c0_i32_0 : i32, i32
  }
  func.func @transform_2(%arg0: i32) -> (i32, i32, i32) {
    %c0_i32 = arith.constant 0 : i32
    %c0_i32_0 = arith.constant 0 : i32
    %c0_i32_1 = arith.constant 0 : i32
    return %arg0, %c0_i32, %c0_i32_0 : i32, i32, i32
  }
  func.func @transform_3(%arg0: i32) -> (i32, i32) {
    %c0_i32 = arith.constant 0 : i32
    %c0_i32_0 = arith.constant 0 : i32
    %c0_i32_1 = arith.constant 0 : i32
    return %c0_i32, %c0_i32_0 : i32, i32
  }
  func.func @transform_4(%arg0: i32) -> (i32, i32) {
    %c0_i32 = arith.constant 0 : i32
    %c0_i32_0 = arith.constant 0 : i32
    %c0_i32_1 = arith.constant 0 : i32
    return %c0_i32, %c0_i32_0 : i32, i32
  }
  func.func @transform_5(%arg0: i32) -> (i32, i32, i32) {
    %c0_i32 = arith.constant 0 : i32
    %c0_i32_0 = arith.constant 0 : i32
    %c0_i32_1 = arith.constant 0 : i32
    return %arg0, %c0_i32, %c0_i32_0 : i32, i32, i32
  }
}

</mosaic_0001>

<bundles_post_ra>
// kernel: mt5_retriever_encoder.9
= control target key start
LH: loop header
LB: loop body
LE: loop exit
PB: predicated region body
PF: predicated region fallthrough
CT: control target
= control target key end

     0   :  { %10 = vsyncpa [#allocation3], 0  ;;  %s1670_s0 = inlined_call_operand.vmem [shape: bf16[2,128,256], index: 0, kind: input, shape index: {}]   ;;  %s1671_s1 = inlined_call_operand.vmem [shape: f32[1,256], index: 1, kind: input, shape index: {}]   ;;  %s1672_s2 = inlined_call_operand.vmem [shape: f32[2,128,1], index: 2, kind: input, shape index: {}]   ;;  %s1673_s3 = inlined_call_operand.vmem [shape: bf16[256,128], index: 3, kind: input, shape index: {}]   ;;  %s1674_s4 = inlined_call_operand.vmem [shape: f32[1,128], index: 4, kind: input, shape index: {}]   ;;  %s1675_s5 = inlined_call_operand.hbm [shape: f32[2,1,128], index: 5, kind: output, shape index: {}]  }
   0x1   :  { %12 = vsyncpa [#allocation3 + $0x1], 0  ;;  %s1207_s18 = smov 0   ;;  %s1209_s19 = smov 0  }
   0x2   :  { %s1211_s20 = smov 0   ;;  %s1213_s21 = smov 0  }
   0x3 LB: > { %s1228_s22 = sadd.s32 4294967295, %s1172_s21   ;;  %s964_s23 = sadd.s32 4294967294, %s1172_s21   ;;  %s1172_s21 = sphi %s1213_s21, %s1681_s21   ;;  %s1168_s20 = sphi %s1211_s20, %s1680_s20   ;;  %s1164_s19 = sphi %s1209_s19, %s1679_s19   ;;  %s1160_s18 = sphi %s1207_s18, %s1678_s18  }
   0x4   : > { %s1232_s24 = sadd.s32 1, %s1172_s21   ;;  %s140_s25 = sadd.s32 1, %s1168_s20 }
   0x5   : > { %s137_s26 = ssub.s32 %s1172_s21, %s1232_s24  ;;  %p150_p0 = scmp.ne.s32.totalorder %s1168_s20, %s1164_s19 }
   0x6   : > { %p138_p1 = scmp.eq.s32.totalorder %s137_s26, 0  ;;  %p151_p2 = scmp.eq.s32.totalorder %s1228_s22, 1 }
   0x7   : > { %p156_p3 = scmp.ne.s32.totalorder %s1164_s19, %s1160_s18  ;;  %p157_p4 = scmp.eq.s32.totalorder %s964_s23, 1 }
   0x8   : > { %s1243_s27 = scalar_select %p138_p1, %s1168_s20, %s140_s25  }
   0x9   : > { %p1245_p5 = por %p151_p2, %p150_p0  ;;  %p1249_p6 = por %p157_p4, %p156_p3 }
   0xa   : > { %p967_p7 = scmp.ge.s32.totalorder %s1172_s21, 1  ;;  %p200_p8 = scmp.lt.s32.totalorder %s1172_s21, 3 }
   0xc   : > { %p201_p9 = pnand %p967_p7, %p200_p8 }
   0xd   : > { %p232_p10 = scmp.lt.s32.totalorder (!%p201_p9), %s1228_s22, 1  ;;  %v1174_v0 = vmov (!%p201_p9), 0   ;;  %vm666_vm0 = vcmask (!%p201_p9), 7168   ;;  %s1175_s16 = smov (!%p201_p9), 1.0  }
   0xe   : > { %204 = sbr.rel (%p201_p9) target bundleno = 531 (0x213), region = 40  ;;  %1059 = vset.pattern.permute.xlu1 (!%p201_p9), %v1174_v0  ;;  %1058 = vset.pattern.permute.xlu0 (!%p201_p9), %v1174_v0  ;;  %s230_s23 = sand.u32 (!%p201_p9), 1, %s1164_s19  }
   0xf   : > { %s885_s11 = scalar_lea.sflag (!%p201_p9), [#allocation3], %s230_s23 }
  0x15   : > { %s1257_s30 = scalar_select %p232_p10, %s1228_s22, 1 }
  0x17   : > { %s991_s6 = sshll.u32 %s1257_s30, 7  ;;  %s988_s30 = sshll.u32 %s1228_s22, 4 }
  0x18   : > { %s1265_s9 = scalar_lea.vmem %s1670_s0, %s991_s6  ;;  %s1348_s12 = scalar_lea.vmem %s1672_s2, %s991_s6 }
  0x19   : > { %v244_v1 = vld [vmem:[%s1265_s9 + $0x8] sm:$0xff]  ;;  %v243_v2 = vld [vmem:[%s1265_s9] sm:$0xff]  ;;  %v245_v3 = vld [vmem:[%s1265_s9 + $0x10] sm:$0xff]  ;;  %s231_s6 = scalar_lea.vmem [#allocation2], %s230_s23  ;;  %s1628_s10 = scalar_lea.hbm %s1675_s5, %s988_s30 }
  0x1a   : > { %v1270_v4 = vunpack.c.l.bf16 %v244_v1  ;;  %v1272_v5 = vunpack.c.h.bf16 %v244_v1  ;;  %v1274_v6 = vunpack.c.l.bf16 %v243_v2  ;;  %v1276_v7 = vunpack.c.h.bf16 %v243_v2  ;;  %v246_v8 = vld [vmem:[%s1265_s9 + $0x18] sm:$0xff]  ;;  %v247_v13 = vld [vmem:[%s1265_s9 + $0x20] sm:$0xff]  ;;  %v248_v18 = vld [vmem:[%s1265_s9 + $0x28] sm:$0xff]  ;;  %s897_s7 = sshll.u32 %s231_s6, 4  ;;  %s1176_s22 = smov [#allocation2]   ;;  %s1630_s7 = int_to_ptr.vmem [resolvable:$true] %s897_s7 }
  0x1b   : > { %v1279_v9 = vunpack.c.l.bf16 %v245_v3  ;;  %v1281_v10 = vunpack.c.h.bf16 %v245_v3  ;;  %v1283_v11 = vunpack.c.l.bf16 %v246_v8  ;;  %v1285_v12 = vunpack.c.h.bf16 %v246_v8  ;;  %v249_v23 = vld [vmem:[%s1265_s9 + $0x30] sm:$0xff]  ;;  %v250_v28 = vld [vmem:[%s1265_s9 + $0x38] sm:$0xff]  ;;  %v251_v33 = vld [vmem:[%s1265_s9 + $0x40] sm:$0xff]  ;;  %s1114_s13 = sshll.u32 %s1176_s22, 4  ;;  %s1115_s13 = int_to_ptr.vmem [resolvable:$false] %s1114_s13 }
  0x1c   : > { %v293_v14 = vmul.f32 %v1270_v4, %v1270_v4  ;;  %v294_v15 = vmul.f32 %v1272_v5, %v1272_v5  ;;  %v291_v16 = vmul.f32 %v1274_v6, %v1274_v6  ;;  %v292_v17 = vmul.f32 %v1276_v7, %v1276_v7  ;;  %v252_v42 = vld [vmem:[%s1265_s9 + $0x48] sm:$0xff]  ;;  %v253_v49 = vld [vmem:[%s1265_s9 + $0x50] sm:$0xff]  ;;  %v254_v50 = vld [vmem:[%s1265_s9 + $0x58] sm:$0xff]  ;;  %s1116_s14 = scalar_lea.vmem %s1115_s13, 32  ;;  %p1117_p0 = scmp.lt.s32.totalorder %s1630_s7, %s1115_s13 }
  0x1d   : > { %v295_v19 = vmul.f32 %v1279_v9, %v1279_v9  ;;  %v296_v20 = vmul.f32 %v1281_v10, %v1281_v10  ;;  %v297_v21 = vmul.f32 %v1283_v11, %v1283_v11  ;;  %v298_v22 = vmul.f32 %v1285_v12, %v1285_v12  ;;  %v255_v57 = vld [vmem:[%s1265_s9 + $0x60] sm:$0xff]  ;;  %v1373_v62 = vld [vmem:[%s1348_s12 + $0x8] sm:$0xff] }
  0x1e   : > { %v326_v24 = vadd.f32 %v294_v15, %v293_v14  ;;  %v323_v25 = vadd.f32 %v292_v17, %v291_v16  ;;  %v1306_v26 = vunpack.c.l.bf16 %v247_v13  ;;  %v1308_v27 = vunpack.c.h.bf16 %v247_v13  ;;  %v1370_v61 = vld [vmem:[%s1348_s12] sm:$0xff]  ;;  %v256_v1 = vld [vmem:[%s1265_s9 + $0x68] sm:$0xff]  ;;  %v1383_v14 = vld [vmem:[%s1348_s12 + $0x10] sm:$0xff] }
  0x1f   : > { %v329_v29 = vadd.f32 %v296_v20, %v295_v19  ;;  %v332_v30 = vadd.f32 %v298_v22, %v297_v21  ;;  %v1311_v31 = vunpack.c.l.bf16 %v248_v18  ;;  %v1313_v32 = vunpack.c.h.bf16 %v248_v18  ;;  %v1398_v21 = vld [vmem:[%s1348_s12 + $0x18] sm:$0xff] }
  0x20   : > { %327 = vadd.xlane.f32.xlu1 %v326_v24  ;;  %324 = vadd.xlane.f32.xlu0 %v323_v25  ;;  %v299_v34 = vmul.f32 %v1306_v26, %v1306_v26  ;;  %v300_v35 = vmul.f32 %v1308_v27, %v1308_v27  ;;  %v1320_v36 = vunpack.c.l.bf16 %v249_v23  ;;  %v1322_v37 = vunpack.c.h.bf16 %v249_v23 }
  0x21   : > { %v301_v38 = vmul.f32 %v1311_v31, %v1311_v31  ;;  %v302_v39 = vmul.f32 %v1313_v32, %v1313_v32  ;;  %v1328_v40 = vunpack.c.l.bf16 %v250_v28  ;;  %v1330_v41 = vunpack.c.h.bf16 %v250_v28 }
  0x22   : > { %v335_v43 = vadd.f32 %v300_v35, %v299_v34  ;;  %v1333_v44 = vunpack.c.l.bf16 %v251_v33  ;;  %v303_v46 = vmul.f32 %v1320_v36, %v1320_v36  ;;  %v304_v47 = vmul.f32 %v1322_v37, %v1322_v37 }
  0x23   : > { %v338_v45 = vadd.f32 %v302_v39, %v301_v38  ;;  %v1339_v48 = vunpack.c.h.bf16 %v251_v33  ;;  %v305_v51 = vmul.f32 %v1328_v40, %v1328_v40  ;;  %v306_v52 = vmul.f32 %v1330_v41, %v1330_v41  ;;  %v1412_v33 = vld [vmem:[%s1348_s12 + $0x20] sm:$0xff] }
  0x24   : > { %330 = vadd.xlane.f32.xlu1 %v329_v29  ;;  %333 = vadd.xlane.f32.xlu0 %v332_v30  ;;  %v1354_v53 = vunpack.c.l.bf16 %v252_v42  ;;  %v1356_v54 = vunpack.c.h.bf16 %v252_v42  ;;  %v307_v55 = vmul.f32 %v1333_v44, %v1333_v44  ;;  %v1363_v58 = vunpack.c.l.bf16 %v253_v49  ;;  %v257_v29 = vld [vmem:[%s1265_s9 + $0x70] sm:$0xff] }
  0x25   : > { %v308_v56 = vmul.f32 %v1339_v48, %v1339_v48  ;;  %v1365_v59 = vunpack.c.h.bf16 %v253_v49  ;;  %v1367_v60 = vunpack.c.l.bf16 %v254_v50  ;;  %v341_v63 = vadd.f32 %v304_v47, %v303_v46  ;;  %v1423_v46 = vld [vmem:[%s1348_s12 + $0x28] sm:$0xff] }
  0x26   : > { %v1375_v0 = vunpack.c.h.bf16 %v254_v50  ;;  %v344_v2 = vadd.f32 %v306_v52, %v305_v51  ;;  %v309_v3 = vmul.f32 %v1354_v53, %v1354_v53  ;;  %v310_v8 = vmul.f32 %v1356_v54, %v1356_v54 }
  0x27   : > { %v347_v13 = vadd.f32 %v308_v56, %v307_v55  ;;  %v311_v15 = vmul.f32 %v1363_v58, %v1363_v58  ;;  %v312_v16 = vmul.f32 %v1365_v59, %v1365_v59  ;;  %v313_v17 = vmul.f32 %v1367_v60, %v1367_v60  ;;  %v502_v55 = vld [vmem:[%s1348_s12 + $0x30] sm:$0xff] }
  0x28   : > { %336 = vadd.xlane.f32.xlu1 %v335_v43  ;;  %339 = vadd.xlane.f32.xlu0 %v338_v45  ;;  %v1391_v18 = vunpack.c.l.bf16 %v255_v57  ;;  %v314_v19 = vmul.f32 %v1375_v0, %v1375_v0  ;;  %v1395_v20 = vunpack.c.h.bf16 %v255_v57  ;;  %v667_v22 = vsel %vm666_vm0, %v1370_v61, 0.0 }
  0x29   : > { %v668_v23 = vsel %vm666_vm0, %v1373_v62, 0.0  ;;  %v350_v24 = vadd.f32 %v310_v8, %v309_v3  ;;  %v1404_v25 = vunpack.c.l.bf16 %v256_v1  ;;  %v1406_v28 = vunpack.c.h.bf16 %v256_v1  ;;  %v503_v1 = vld [vmem:[%s1348_s12 + $0x38] sm:$0xff] }
  0x2a   : > { %v670_v30 = vsel %vm666_vm0, %v1383_v14, 0.0  ;;  %v669_v34 = vadd.f32 %v668_v23, %v667_v22  ;;  %v353_v35 = vadd.f32 %v312_v16, %v311_v15  ;;  %v315_v38 = vmul.f32 %v1391_v18, %v1391_v18  ;;  %v504_v16 = vld [vmem:[%s1348_s12 + $0x40] sm:$0xff]  ;;  %v505_v22 = vld [vmem:[%s1348_s12 + $0x48] sm:$0xff] }
  0x2b   : > { %v672_v39 = vsel %vm666_vm0, %v1398_v21, 0.0  ;;  %v356_v42 = vadd.f32 %v314_v19, %v313_v17  ;;  %v316_v43 = vmul.f32 %v1395_v20, %v1395_v20  ;;  %v1420_v45 = vunpack.c.l.bf16 %v257_v29 }
  0x2c   : > { %342 = vadd.xlane.f32.xlu1 %v341_v63  ;;  %345 = vadd.xlane.f32.xlu0 %v344_v2  ;;  %v671_v47 = vadd.f32 %v670_v30, %v669_v34  ;;  %v317_v49 = vmul.f32 %v1404_v25, %v1404_v25  ;;  %v318_v50 = vmul.f32 %v1406_v28, %v1406_v28  ;;  %v1429_v51 = vunpack.c.h.bf16 %v257_v29  ;;  %v506_v30 = vld [vmem:[%s1348_s12 + $0x50] sm:$0xff] }
  0x2d   : > { %v674_v52 = vsel %vm666_vm0, %v1412_v33, 0.0  ;;  %v676_v57 = vsel %vm666_vm0, %v1423_v46, 0.0  ;;  %v359_v63 = vadd.f32 %v316_v43, %v315_v38  ;;  %v319_v8 = vmul.f32 %v1420_v45, %v1420_v45  ;;  %v507_v38 = vld [vmem:[%s1348_s12 + $0x58] sm:$0xff]  ;;  %v508_v43 = vld [vmem:[%s1348_s12 + $0x60] sm:$0xff] }
  0x2e   : > { %v673_v56 = vadd.f32 %v672_v39, %v671_v47  ;;  %v362_v3 = vadd.f32 %v318_v50, %v317_v49  ;;  %v678_v15 = vsel %vm666_vm0, %v502_v55, 0.0  ;;  %v680_v19 = vsel %vm666_vm0, %v503_v1, 0.0  ;;  %v509_v50 = vld [vmem:[%s1348_s12 + $0x68] sm:$0xff] }
  0x2f   : > { %v682_v29 = vsel %vm666_vm0, %v504_v16, 0.0  ;;  %v688_v49 = vsel %vm666_vm0, %v507_v38, 0.0 }
  0x30   : > { %348 = vadd.xlane.f32.xlu1 %v347_v13  ;;  %351 = vadd.xlane.f32.xlu0 %v350_v24  ;;  %v675_v2 = vadd.f32 %v674_v52, %v673_v56  ;;  %v320_v13 = vmul.f32 %v1429_v51, %v1429_v51  ;;  %v690_v56 = vsel %vm666_vm0, %v508_v43, 0.0 }
  0x32   : > { %v677_v17 = vadd.f32 %v676_v57, %v675_v2  ;;  %v365_v24 = vadd.f32 %v320_v13, %v319_v8  ;;  %v510_v57 = vld [vmem:[%s1348_s12 + $0x70] sm:$0xff]  ;;  %v692_v2 = vsel %vm666_vm0, %v509_v50, 0.0 }
  0x33   : > { %v694_v13 = vsel %vm666_vm0, %v510_v57, 0.0 }
  0x34   : > { %354 = vadd.xlane.f32.xlu1 %v353_v35  ;;  %357 = vadd.xlane.f32.xlu0 %v356_v42  ;;  %v679_v23 = vadd.f32 %v678_v15, %v677_v17  ;;  %v684_v35 = vsel %vm666_vm0, %v505_v22, 0.0  ;;  %v686_v42 = vsel %vm666_vm0, %v506_v30, 0.0 }
  0x36   : > { %v681_v34 = vadd.f32 %v680_v19, %v679_v23 }
  0x38   : > { %360 = vadd.xlane.f32.xlu1 %v359_v63  ;;  %363 = vadd.xlane.f32.xlu0 %v362_v3  ;;  %v683_v39 = vadd.f32 %v682_v29, %v681_v34  ;;  %v511_v3 = vld [vmem:[%s1348_s12 + $0x78] sm:$0xff]  ;;  %s1110_s12 = scalar_lea.vmem %s1630_s7, 16 }
  0x39   : > { %v696_v17 = vsel %vm666_vm0, %v511_v3, 0.0  ;;  %p1111_p11 = scmp.ne.s32.totalorder %s1630_s7, %s1110_s12  ;;  %p1118_p1 = scmp.lt.s32.totalorder %s1116_s14, %s1110_s12 }
  0x3a   : > { %v685_v47 = vadd.f32 %v684_v35, %v683_v39 }
  0x3b   : > { %p1112_p12 = pnand %p1111_p11, %p1245_p5  ;;  %p1119_p2 = por %p1118_p1, %p1117_p0 }
  0x3c   : > { %366 = vadd.xlane.f32.xlu1 %v365_v24  ;;  %v687_v52 = vadd.f32 %v686_v42, %v685_v47  ;;  %v258_v24 = vld [vmem:[%s1265_s9 + $0x78] sm:$0xff]  ;;  %v1071_v42 = vld [vmem:[%s1673_s3 + $0x28] sm:$0xff]  }
  0x3d   : > { %v1463_v29 = vunpack.c.l.bf16 %v258_v24  ;;  %v1465_v34 = vunpack.c.h.bf16 %v258_v24  ;;  %p1113_p13 = pneg %p1112_p12 }
  0x3e   : > { %v689_v63 = vadd.f32 %v688_v49, %v687_v52  ;;  %v1073_v49 = vld [vmem:[%s1673_s3 + $0x30] sm:$0xff]  }
  0x3f   : > { %v321_v35 = vmul.f32 %v1463_v29, %v1463_v29  ;;  %v322_v39 = vmul.f32 %v1465_v34, %v1465_v34  ;;  %p1120_p3 = pnand %p1119_p2, %p1113_p13 }
  0x40   : > { %v691_v8 = vadd.f32 %v690_v56, %v689_v63  ;;  %v1075_v56 = vld [vmem:[%s1673_s3 + $0x38] sm:$0xff]  }
  0x42   : > { %v693_v15 = vadd.f32 %v692_v2, %v691_v8 }
  0x44   : > { %v695_v19 = vadd.f32 %v694_v13, %v693_v15 }
  0x46   : > { %v697_v23 = vadd.f32 %v696_v17, %v695_v19 }
  0x48   : > { %698 = vadd.xlane.f32.xlu0 %v697_v23 }
  0x4d   : > { %519 = vperm.xlu1 %1059, %v1373_v62   ;;  %v368_v62 = vadd.f32 %v322_v39, %v321_v35 }
  0x5e   : > { %514 = vperm.xlu0 %1058, %v1370_v61   ;;  %v1060_v61 = vld [vmem:[%s1673_s3 + $0x40] sm:$0xff]  }
  0x5f   : > { %993 = vmatprep.subr.bf16.mxu0 %v1060_v61 }
  0x62   : > { %524 = vperm.xlu0 %1058, %v1383_v14   ;;  %v1061_v14 = vld [vmem:[%s1673_s3] sm:$0xff]  }
  0x63   : > { %994 = vmatpush3.bf16.msra.mxu0 %v1061_v14 }
  0x66   : > { %529 = vperm.xlu0 %1058, %v1398_v21   ;;  %v1062_v21 = vld [vmem:[%s1673_s3 + $0x48] sm:$0xff]  }
  0x67   : > { %995 = vmatprep.subr.bf16.mxu0 %v1062_v21 }
  0x6a   : > { %534 = vperm.xlu0 %1058, %v1412_v33   ;;  %v1063_v33 = vld [vmem:[%s1673_s3 + $0x8] sm:$0xff]  }
  0x6b   : > { %996 = vmatpush3.bf16.msra.mxu0 %v1063_v33 }
  0x6e   : > { %544 = vperm.xlu0 %1058, %v502_v55   ;;  %v1065_v55 = vld [vmem:[%s1673_s3 + $0x10] sm:$0xff]  }
  0x71   : > { %369 = vadd.xlane.f32.xlu1 %v368_v62 }
  0x72   : > { %549 = vperm.xlu0 %1058, %v503_v1   ;;  %v1066_v1 = vld [vmem:[%s1673_s3 + $0x58] sm:$0xff]  }
  0x76   : > { %554 = vperm.xlu0 %1058, %v504_v16   ;;  %v1067_v16 = vld [vmem:[%s1673_s3 + $0x18] sm:$0xff]  }
  0x7a   : > { %559 = vperm.xlu0 %1058, %v505_v22   ;;  %v1068_v22 = vld [vmem:[%s1673_s3 + $0x60] sm:$0xff]  }
  0x7e   : > { %569 = vperm.xlu0 %1058, %v507_v38   ;;  %v1070_v38 = vld [vmem:[%s1673_s3 + $0x68] sm:$0xff]  }
  0x82   : > { %539 = vperm.xlu1 %1059, %v1423_v46   ;;  %579 = vperm.xlu0 %1058, %v509_v50   ;;  %v1064_v46 = vld [vmem:[%s1673_s3 + $0x50] sm:$0xff]   ;;  %v1074_v50 = vld [vmem:[%s1673_s3 + $0x78] sm:$0xff]  }
  0x83   : > { %997 = vmatprep.subr.bf16.mxu0 %v1064_v46 }
  0x84   : > { %998 = vmatpush3.bf16.msra.mxu0 %v1065_v55 }
  0x85   : > { %999 = vmatprep.subr.bf16.mxu0 %v1066_v1 }
  0x86   : > { %564 = vperm.xlu1 %1059, %v506_v30   ;;  %589 = vperm.xlu0 %1058, %v511_v3   ;;  %v1069_v30 = vld [vmem:[%s1673_s3 + $0x20] sm:$0xff]  }
  0x88   : > { %1000 = vmatpush3.bf16.msra.mxu0 %v1067_v16 }
  0x89   : > { %1001 = vmatprep.subr.bf16.mxu0 %v1068_v22 }
  0x8a   : > { %574 = vperm.xlu1 %1059, %v508_v43   ;;  %v1072_v43 = vld [vmem:[%s1673_s3 + $0x70] sm:$0xff]  }
  0x8c   : > { %1002 = vmatpush3.bf16.msra.mxu0 %v1069_v30 }
  0x8d   : > { %1003 = vmatprep.subr.bf16.mxu0 %v1070_v38 }
  0x8e   : > { %584 = vperm.xlu1 %1059, %v510_v57  }
  0x90   : > { %1004 = vmatpush3.bf16.msra.mxu0 %v1071_v42 }
  0x91   : > { %1005 = vmatprep.subr.bf16.mxu0 %v1072_v43 }
  0x94   : > { %1006 = vmatpush3.bf16.msra.mxu0 %v1073_v49 }
  0x95   : > { %1007 = vmatprep.subr.bf16.mxu0 %v1074_v50  ;;  %v454_v50 = vlaneseq }
  0x98   : > { %1008 = vmatpush3.bf16.msra.mxu0 %v1075_v56 }
  0xad   : > { %v325_v47 = vpop.xlane.xlu0 %324  ;;  %v328_v3 = vpop.xlane.xlu1 %327 }
  0xae   : > { %v372_v35 = vmul.f32 0.00390625, %v325_v47  ;;  %v373_v62 = vmul.f32 0.00390625, %v328_v3 }
  0xb0   : > { %v388_v33 = vadd.f32 1e-06, %v372_v35  ;;  %v389_v1 = vadd.f32 1e-06, %v373_v62 }
  0xb1   : > { %v334_v52 = vpop.xlane.xlu0 %333  ;;  %v331_v13 = vpop.xlane.xlu1 %330 }
  0xb2   : > { %v374_v61 = vmul.f32 0.00390625, %v331_v13  ;;  %v375_v21 = vmul.f32 0.00390625, %v334_v52  ;;  %1076 = vrsqrt.f32 %v388_v33  ;;  %v452_v33 = vld [vmem:[%s1671_s1] sm:$0x3] }
  0xb3   : > { %1078 = vrsqrt.f32 %v389_v1 }
  0xb4   : > { %v390_v30 = vadd.f32 1e-06, %v374_v61  ;;  %v391_v42 = vadd.f32 1e-06, %v375_v21 }
  0xb5   : > { %v340_v57 = vpop.xlane.xlu0 %339  ;;  %v337_v17 = vpop.xlane.xlu1 %336 }
  0xb6   : > { %v376_v16 = vmul.f32 0.00390625, %v337_v17  ;;  %v377_v43 = vmul.f32 0.00390625, %v340_v57  ;;  %1080 = vrsqrt.f32 %v390_v30  ;;  %v455_v17 = vshrl.u32 %v454_v50, 7 }
  0xb7   : > { %1082 = vrsqrt.f32 %v391_v42 }
  0xb8   : > { %v392_v47 = vadd.f32 1e-06, %v376_v16  ;;  %v393_v13 = vadd.f32 1e-06, %v377_v43  ;;  %v456_v62 = vsub.s32 0, %v455_v17  ;;  %v460_v1 = vsub.s32 1, %v455_v17 }
  0xb9   : > { %v346_v63 = vpop.xlane.xlu0 %345  ;;  %v343_v23 = vpop.xlane.xlu1 %342 }
  0xba   : > { %v378_v3 = vmul.f32 0.00390625, %v343_v23  ;;  %1084 = vrsqrt.f32 %v392_v47  ;;  %v1535_v42 = vrot.slane %v452_v33, %v456_v62 }
  0xbb   : > { %1086 = vrsqrt.f32 %v393_v13 }
  0xbc   : > { %v394_v35 = vadd.f32 1e-06, %v378_v3 }
  0xbd   : > { %v352_v2 = vpop.xlane.xlu0 %351  ;;  %v349_v46 = vpop.xlane.xlu1 %348 }
  0xbe   : > { %v380_v57 = vmul.f32 0.00390625, %v349_v46  ;;  %1088 = vrsqrt.f32 %v394_v35 }
  0xc0   : > { %v396_v30 = vadd.f32 1e-06, %v380_v57 }
  0xc1   : > { %v358_v8 = vpop.xlane.xlu0 %357  ;;  %v355_v52 = vpop.xlane.xlu1 %354 }
  0xc2   : > { %v383_v43 = vmul.f32 0.00390625, %v358_v8 }
  0xc5   : > { %v1522_v15 = vpop.xlane.xlu0 %363 }
  0xd5   : > { %v699_v19 = vpop.xlane.xlu0 %698 }
  0xd6   : > { %v700_v24 = vrot.slane %v699_v19, 4 }
  0xd8   : > { %v701_v39 = vadd.f32 %v700_v24, %v699_v19  ;;  %v379_v24 = vmul.f32 0.00390625, %v346_v63 }
  0xda   : > { %v702_v14 = vrot.slane %v701_v39, 2  ;;  %v395_v21 = vadd.f32 1e-06, %v379_v24  ;;  %v1543_v24 = vrot.slane %v452_v33, %v460_v1 }
  0xdc   : > { %v703_v55 = vadd.f32 %v702_v14, %v701_v39  ;;  %v361_v39 = vpop.xlane.xlu1 %360  ;;  %v1077_v14 = vpop.eup %1076  ;;  %1090 = vrsqrt.f32 %v395_v21 }
  0xdd   : > { %v1524_v22 = vpop.permute.xlu0 %514  ;;  %v1079_v23 = vpop.eup %1078  ;;  %v420_v46 = vmul.f32 %v1077_v14, %v1274_v6  ;;  %v421_v50 = vmul.f32 %v1077_v14, %v1276_v7  ;;  %1092 = vrsqrt.f32 %v396_v30  ;;  %v384_v35 = vmul.f32 0.00390625, %v361_v39 }
  0xde   : > { %v704_v38 = vrot.slane %v703_v55, 1  ;;  %v1081_v16 = vpop.eup %1080  ;;  %v422_v47 = vmul.f32 %v1079_v23, %v1270_v4  ;;  %v423_v17 = vmul.f32 %v1079_v23, %v1272_v5  ;;  %v399_v14 = vadd.f32 1e-06, %v383_v43 }
  0xdf   : > { %v1083_v63 = vpop.eup %1082  ;;  %v425_v6 = vmul.f32 %v1081_v16, %v1281_v10  ;;  %v464_v4 = vmul.f32 %v1535_v42, %v420_v46  ;;  %v465_v5 = vmul.f32 %v1543_v24, %v421_v50  ;;  %v400_v39 = vadd.f32 1e-06, %v384_v35 }
  0xe0   : > { %v705_v49 = vadd.f32 %v704_v38, %v703_v55  ;;  %v381_v55 = vmul.f32 0.00390625, %v352_v2  ;;  %v382_v38 = vmul.f32 0.00390625, %v355_v52  ;;  %v1085_v2 = vpop.eup %1084  ;;  %v424_v52 = vmul.f32 %v1081_v16, %v1279_v9 }
  0xe1   : > { %v1526_v56 = vpop.permute.xlu0 %524  ;;  %v426_v8 = vmul.f32 %v1083_v63, %v1283_v11  ;;  %v427_v7 = vmul.f32 %v1083_v63, %v1285_v12  ;;  %v1087_v62 = vpop.eup %1086  ;;  %v466_v21 = vmul.f32 %v1535_v42, %v422_v47  ;;  %v428_v33 = vmul.f32 %v1085_v2, %v1306_v26 }
  0xe2   : > { %1015 = vpush %v705_v49  ;;  %v367_v49 = vpop.xlane.xlu1 %366  ;;  %v397_v13 = vadd.f32 1e-06, %v381_v55  ;;  %v398_v57 = vadd.f32 1e-06, %v382_v38  ;;  %v467_v9 = vmul.f32 %v1543_v24, %v423_v17  ;;  %v468_v10 = vmul.f32 %v1535_v42, %v424_v52  ;;  %v1089_v38 = vpop.eup %1088 }
  0xe3   : > { %v429_v11 = vmul.f32 %v1085_v2, %v1308_v27  ;;  %v385_v23 = vmul.f32 0.00390625, %v1522_v15  ;;  %v469_v12 = vmul.f32 %v1543_v24, %v425_v6  ;;  %v470_v1 = vmul.f32 %v1535_v42, %v426_v8 }
  0xe4   : > { %1094 = vrsqrt.f32 %v397_v13  ;;  %v592_v26 = vmul.f32 %v1524_v22, %v464_v4  ;;  %v471_v30 = vmul.f32 %v1543_v24, %v427_v7  ;;  %v430_v63 = vmul.f32 %v1087_v62, %v1311_v31 }
  0xe5   : > { %v1528_v19 = vpop.permute.xlu0 %529  ;;  %1096 = vrsqrt.f32 %v398_v57  ;;  %v386_v27 = vmul.f32 0.00390625, %v367_v49  ;;  %v593_v46 = vmul.f32 %v1524_v22, %v465_v5  ;;  %v472_v15 = vmul.f32 %v1535_v42, %v428_v33 }
  0xe6   : > { %v520_v55 = vpop.permute.xlu1 %519  ;;  %1098 = vrsqrt.f32 %v399_v14  ;;  %v596_v47 = vmul.f32 %v1526_v56, %v468_v10  ;;  %v473_v50 = vmul.f32 %v1543_v24, %v429_v11  ;;  %v431_v2 = vmul.f32 %v1087_v62, %v1313_v32  ;;  %v1091_v13 = vpop.eup %1090 }
  0xe7   : > { %v594_v43 = vmul.f32 %v520_v55, %v466_v21  ;;  %1100 = vrsqrt.f32 %v400_v39  ;;  %v401_v17 = vadd.f32 1e-06, %v385_v23  ;;  %v595_v52 = vmul.f32 %v520_v55, %v467_v9  ;;  %v1093_v8 = vpop.eup %1092 }
  0xe8   : > { %v597_v31 = vmul.f32 %v1526_v56, %v469_v12  ;;  %v598_v49 = vmul.f32 %v1528_v19, %v470_v1  ;;  %v432_v22 = vmul.f32 %v1089_v38, %v1320_v36  ;;  %v474_v6 = vmul.f32 %v1535_v42, %v430_v63 }
  0xe9   : > { %v1530_v61 = vpop.permute.xlu0 %534  ;;  %v624_v35 = vadd.f32 %v594_v43, %v592_v26  ;;  %v402_v57 = vadd.f32 1e-06, %v386_v27  ;;  %v645_v4 = vadd.f32 %v595_v52, %v593_v46  ;;  %v599_v7 = vmul.f32 %v1528_v19, %v471_v30 }
  0xea   : > { %v433_v32 = vmul.f32 %v1089_v38, %v1322_v37  ;;  %v600_v21 = vmul.f32 %v1530_v61, %v472_v15  ;;  %v434_v56 = vmul.f32 %v1091_v13, %v1328_v40  ;;  %v435_v5 = vmul.f32 %v1091_v13, %v1330_v41 }
  0xeb   : > { %v625_v14 = vadd.f32 %v624_v35, %v596_v47  ;;  %1102 = vrsqrt.f32 %v401_v17  ;;  %v646_v36 = vadd.f32 %v645_v4, %v597_v31  ;;  %v601_v9 = vmul.f32 %v1530_v61, %v473_v50 }
  0xec   : > { %v436_v19 = vmul.f32 %v1093_v8, %v1333_v44  ;;  %v437_v37 = vmul.f32 %v1093_v8, %v1339_v48  ;;  %v475_v23 = vmul.f32 %v1543_v24, %v431_v2  ;;  %1104 = vrsqrt.f32 %v402_v57 }
  0xed   : > { %v1540_v3 = vpop.permute.xlu0 %544  ;;  %v626_v39 = vadd.f32 %v625_v14, %v598_v49  ;;  %v647_v55 = vadd.f32 %v646_v36, %v599_v7  ;;  %v476_v40 = vmul.f32 %v1535_v42, %v432_v22  ;;  %v477_v26 = vmul.f32 %v1543_v24, %v433_v32 }
  0xee   : > { %v1095_v11 = vpop.eup %1094  ;;  %v478_v61 = vmul.f32 %v1535_v42, %v434_v56  ;;  %v479_v30 = vmul.f32 %v1543_v24, %v435_v5  ;;  %v480_v15 = vmul.f32 %v1535_v42, %v436_v19  ;;  %v481_v43 = vmul.f32 %v1543_v24, %v437_v37 }
  0xef   : > { %v1097_v41 = vpop.eup %1096  ;;  %v627_v1 = vadd.f32 %v626_v39, %v600_v21  ;;  %v648_v44 = vadd.f32 %v647_v55, %v601_v9  ;;  %v438_v47 = vmul.f32 %v1095_v11, %v1354_v53  ;;  %v439_v50 = vmul.f32 %v1095_v11, %v1356_v54 }
  0xf0   : > { %v1099_v38 = vpop.eup %1098  ;;  %v604_v13 = vmul.f32 %v1540_v3, %v476_v40  ;;  %v605_v17 = vmul.f32 %v1540_v3, %v477_v26  ;;  %v440_v22 = vmul.f32 %v1097_v41, %v1363_v58 }
  0xf1   : > { %v1559_v16 = vpop.permute.xlu0 %549  ;;  %v1101_v2 = vpop.eup %1100  ;;  %v442_v35 = vmul.f32 %v1099_v38, %v1367_v60  ;;  %v443_v49 = vmul.f32 %v1099_v38, %v1375_v0  ;;  %v482_v7 = vmul.f32 %v1535_v42, %v438_v47  ;;  %v483_v3 = vmul.f32 %v1543_v24, %v439_v50 }
  0xf2   : > { %v606_v53 = vmul.f32 %v1559_v16, %v478_v61  ;;  %v607_v54 = vmul.f32 %v1559_v16, %v479_v30  ;;  %v444_v32 = vmul.f32 %v1101_v2, %v1391_v18  ;;  %v445_v60 = vmul.f32 %v1101_v2, %v1395_v20 }
  0xf3   : > { %v486_v5 = vmul.f32 %v1535_v42, %v442_v35  ;;  %v487_v16 = vmul.f32 %v1543_v24, %v443_v49 }
  0xf4   : > { %v488_v19 = vmul.f32 %v1535_v42, %v444_v32  ;;  %v489_v37 = vmul.f32 %v1543_v24, %v445_v60 }
  0xf5   : > { %v555_v62 = vpop.permute.xlu0 %554  ;;  %v1103_v0 = vpop.eup %1102 }
  0xf6   : > { %v608_v14 = vmul.f32 %v555_v62, %v480_v15  ;;  %v609_v58 = vmul.f32 %v555_v62, %v481_v43  ;;  %v1105_v9 = vpop.eup %1104  ;;  %v446_v20 = vmul.f32 %v1103_v0, %v1404_v25  ;;  %v447_v62 = vmul.f32 %v1103_v0, %v1406_v28 }
  0xf7   : > { %v448_v30 = vmul.f32 %v1105_v9, %v1420_v45 }
  0xf9   : > { %v560_v27 = vpop.permute.xlu0 %559  ;;  %v492_v45 = vmul.f32 %v1535_v42, %v448_v30 }
  0xfa   : > { %v611_v11 = vmul.f32 %v560_v27, %v483_v3 }
  0xfd   : > { %v570_v21 = vpop.permute.xlu0 %569 }
  0xfe   : > { %v370_v33 = vpop.xlane.xlu1 %369  ;;  %v614_v26 = vmul.f32 %v570_v21, %v486_v5  ;;  %v615_v61 = vmul.f32 %v570_v21, %v487_v16 }
  0xff   : > { %v387_v10 = vmul.f32 0.00390625, %v370_v33  ;;  %v484_v33 = vmul.f32 %v1535_v42, %v440_v22 }
 0x101   : > { %v403_v12 = vadd.f32 1e-06, %v387_v10  ;;  %v610_v10 = vmul.f32 %v560_v27, %v482_v7  ;;  %v580_v38 = vpop.permute.xlu0 %579 }
 0x102   : > { %v540_v63 = vpop.permute.xlu1 %539 }
 0x103   : > { %1106 = vrsqrt.f32 %v403_v12  ;;  %v602_v48 = vmul.f32 %v540_v63, %v474_v6  ;;  %v603_v46 = vmul.f32 %v540_v63, %v475_v23  ;;  %v441_v6 = vmul.f32 %v1097_v41, %v1365_v59 }
 0x104   : > { %v449_v63 = vmul.f32 %v1105_v9, %v1429_v51 }
 0x105   : > { %v628_v52 = vadd.f32 %v627_v1, %v602_v48  ;;  %v649_v31 = vadd.f32 %v648_v44, %v603_v46  ;;  %v485_v36 = vmul.f32 %v1543_v24, %v441_v6  ;;  %v490_v48 = vmul.f32 %v1535_v42, %v446_v20  ;;  %v746_v20 = vld [vmem:[%s1674_s4] sm:$0x1] }
 0x106   : > { %v565_v8 = vpop.permute.xlu1 %564  ;;  %v491_v46 = vmul.f32 %v1543_v24, %v447_v62  ;;  %v493_v51 = vmul.f32 %v1543_v24, %v449_v63 }
 0x107   : > { %v629_v57 = vadd.f32 %v628_v52, %v604_v13  ;;  %v650_v4 = vadd.f32 %v649_v31, %v605_v17  ;;  %v612_v40 = vmul.f32 %v565_v8, %v484_v33  ;;  %v613_v12 = vmul.f32 %v565_v8, %v485_v36  ;;  %v590_v8 = vpop.permute.xlu0 %589 }
 0x108   : > { %v618_v2 = vmul.f32 %v580_v38, %v490_v48  ;;  %v619_v13 = vmul.f32 %v580_v38, %v491_v46 }
 0x109   : > { %v630_v59 = vadd.f32 %v629_v57, %v606_v53  ;;  %v651_v56 = vadd.f32 %v650_v4, %v607_v54 }
 0x10a   : > { %v575_v23 = vpop.permute.xlu1 %574 }
 0x10b   : > { %v631_v18 = vadd.f32 %v630_v59, %v608_v14  ;;  %v652_v39 = vadd.f32 %v651_v56, %v609_v58  ;;  %v616_v15 = vmul.f32 %v575_v23, %v488_v19  ;;  %v617_v43 = vmul.f32 %v575_v23, %v489_v37 }
 0x10d   : > { %v1107_v55 = vpop.eup %1106  ;;  %v632_v41 = vadd.f32 %v631_v18, %v610_v10  ;;  %v653_v1 = vadd.f32 %v652_v39, %v611_v11 }
 0x10e   : > { %v450_v28 = vmul.f32 %v1107_v55, %v1463_v29  ;;  %v451_v27 = vmul.f32 %v1107_v55, %v1465_v34  ;;  %v585_v17 = vpop.permute.xlu1 %584 }
 0x10f   : > { %v633_v25 = vadd.f32 %v632_v41, %v612_v40  ;;  %v654_v44 = vadd.f32 %v653_v1, %v613_v12  ;;  %v620_v35 = vmul.f32 %v585_v17, %v492_v45  ;;  %v621_v49 = vmul.f32 %v585_v17, %v493_v51 }
 0x110   : > { %v494_v29 = vmul.f32 %v1535_v42, %v450_v28  ;;  %v495_v34 = vmul.f32 %v1543_v24, %v451_v27 }
 0x111   : > { %v634_v47 = vadd.f32 %v633_v25, %v614_v26  ;;  %v655_v50 = vadd.f32 %v654_v44, %v615_v61 }
 0x112   : > { %v622_v53 = vmul.f32 %v590_v8, %v494_v29  ;;  %v623_v54 = vmul.f32 %v590_v8, %v495_v34 }
 0x113   : > { %v635_v52 = vadd.f32 %v634_v47, %v616_v15  ;;  %v656_v31 = vadd.f32 %v655_v50, %v617_v43  ;;  %s1016_s15 = spop %1015 }
 0x114   : > { %s707_s17 = smax.f32 %s1175_s16, %s1016_s15 }
 0x115   : > { %v636_v22 = vadd.f32 %v635_v52, %v618_v2  ;;  %v657_v6 = vadd.f32 %v656_v31, %v619_v13  ;;  %v708_v32 = vstv %s707_s17 }
 0x116   : > { %1108 = vrcp.f32 %v708_v32 }
 0x117   : > { %v637_v57 = vadd.f32 %v636_v22, %v620_v35  ;;  %v658_v4 = vadd.f32 %v657_v6, %v621_v49 }
 0x119   : > { %v638_v7 = vadd.f32 %v637_v57, %v622_v53  ;;  %v659_v3 = vadd.f32 %v658_v4, %v623_v54 }
 0x11b   : > { %v639_v60 = vrot.slane %v638_v7, 4  ;;  %v660_v0 = vrot.slane %v659_v3, 4 }
 0x11d   : > { %v640_v42 = vadd.f32 %v639_v60, %v638_v7  ;;  %v661_v24 = vadd.f32 %v660_v0, %v659_v3 }
 0x11f   : > { %v641_v14 = vrot.slane %v640_v42, 2  ;;  %v662_v58 = vrot.slane %v661_v24, 2 }
 0x120   : > { %v1109_v36 = vpop.eup %1108 }
 0x121   : > { %v663_v21 = vadd.f32 %v662_v58, %v661_v24  ;;  %v642_v59 = vadd.f32 %v641_v14, %v640_v42 }
 0x123   : > { %v664_v56 = vrot.slane %v663_v21, 1  ;;  %v643_v5 = vrot.slane %v642_v59, 1 }
 0x125   : > { %v665_v16 = vadd.f32 %v664_v56, %v663_v21  ;;  %v644_v33 = vadd.f32 %v643_v5, %v642_v59 }
 0x127   : > { %v711_v9 = vmul.f32 %v1109_v36, %v665_v16  ;;  %v710_v10 = vmul.f32 %v1109_v36, %v644_v33 }
 0x129   : > { %v713_v11 = vpack.c.bf16 %v711_v9, %v711_v9  ;;  %v712_v18 = vpack.c.bf16 %v710_v10, %v710_v10 }
 0x12b   : > { %875 = vmatprep.mubr.bf16.mxu0 %v713_v11 }
 0x12c   : > { %876 = vmatmul.mubr.bf16.vlgmr.msra.gmra.mrb[0].mxu0 %v712_v18 }
 0x1ff   : > { %v1009_v39 = vpop.f32.mrb[0].mxu0 }
 0x200   : > { %v1010_v62 = vpop.f32.mrb[1].mxu0 }
 0x201   : > { %v1011_v19 = vadd.f32 %v1010_v62, %v1009_v39  ;;  %v1012_v37 = vpop.f32.mrb[2].mxu0 }
 0x202   : > { %v1013_v23 = vpop.f32.mrb[3].mxu0 }
 0x203   : > { %v878_v55 = vadd.f32 %v1011_v19, %v746_v20 }
 0x205   : > { %883 = vst [vmem:[%s231_s6] sm:$0x1] %v878_v55 }
 0x206   : > { %1123 = shalt.err (!%p1120_p3)
}
 0x207   : > { %s1124_s15 = scalar_lea.hbm %s1628_s10, 16  ;;  %s1128_s23 = scalar_lea.hbm %s1675_s5, 32 }
 0x208   : > { %p1125_p4 = scmp.ne.s32.totalorder %s1628_s10, %s1124_s15  ;;  %p1129_p9 = scmp.lt.u32.totalorder %s1628_s10, %s1675_s5 }
 0x209   : > { %p1130_p10 = scmp.lt.u32.totalorder %s1128_s23, %s1124_s15  ;;  %p1132_p12 = scmp.lt.u32.totalorder %s1124_s15, %s1628_s10 }
 0x20a   : > { %p1126_p7 = pnand %p1125_p4, %p1245_p5 }
 0x20b   : > { %p1131_p11 = por %p1130_p10, %p1129_p9 }
 0x20c   : > { %p1127_p8 = pneg %p1126_p7 }
 0x20d   : > { %p1133_p13 = por %p1132_p12, %p1131_p11 }
 0x20f   : > { %p1134_p0 = pnand %p1133_p13, %p1127_p8 }
 0x211   : > { %1137 = shalt.err (!%p1134_p0)
}
 0x212   : > { %1017 = dma.vmem_to_hbm [thread:$0]  (%p1245_p5), %s1630_s7, 16, %s1628_s10, %s885_s11  }
 0x213 PF: > { %p1023_p1 = scmp.ge.s32.totalorder %s1172_s21, 2  ;;  %s909_s30 = sand.u32 1, %s1160_s18  }
 0x214   : > { %s910_s6 = scalar_lea.sflag [#allocation3], %s909_s30 }
 0x215   : > { %p1020_p2 = pnand %p1023_p1, %p1249_p6 }
 0x217   : > { %1155 = dma.done.wait (!%p1020_p2), %s910_s6, 16  }
 0x218   : > { %1157 = vsyncadd (!%p1020_p2), %s910_s6, 4294967280  ;;  %p15_p3 = scmp.ge.s32.totalorder %s1232_s24, 4   ;;  %s1678_s18 = smov %s1164_s19 }
 0x219   : > { %s1679_s19 = smov %s1168_s20  ;;  %s1680_s20 = smov %s1243_s27 }
 0x21a   : > { %s1681_s21 = smov %s1232_s24  ;;  %17 = sbr.rel (!%p15_p3) target bundleno = 3 (0x3), region = 78 }
 0x221   :  { %914 = vsyncpa [#allocation3], 1 }
 0x222   :  { %916 = vsyncpa [#allocation3 + $0x1], 1 }

// kernel: mt5_retriever_encoder.6
= control target key start
LH: loop header
LB: loop body
LE: loop exit
PB: predicated region body
PF: predicated region fallthrough
CT: control target
= control target key end

     0   :  { %s8137_s0 = inlined_call_operand.vmem [shape: bf16[256,256], index: 0, kind: input, shape index: {}, may-alias: {0,4}]   ;;  %s8138_s2 = inlined_call_operand.vmem [shape: bf16[256,1024], index: 2, kind: input, shape index: {}]   ;;  %s8139_s1 = inlined_call_operand.vmem [shape: f32[1,256], index: 1, kind: input, shape index: {}]   ;;  %s8140_s3 = inlined_call_operand.vmem [shape: bf16[512,256], index: 3, kind: input, shape index: {}]   ;;  %s8141_s4 = inlined_call_operand.vmem [shape: bf16[256,256], index: 4, kind: output, shape index: {}, may-alias: {0,4}]  }
   0x1   :  { %v17_v0 = vld [vmem:[%s8137_s0] sm:$0xff]  ;;  %v19_v1 = vld [vmem:[%s8137_s0 + $0x10] sm:$0xff]  ;;  %v18_v2 = vld [vmem:[%s8137_s0 + $0x8] sm:$0xff] }
   0x2   :  { %v5258_v3 = vunpack.c.l.bf16 %v17_v0  ;;  %v5260_v4 = vunpack.c.h.bf16 %v17_v0  ;;  %v5262_v5 = vunpack.c.l.bf16 %v19_v1  ;;  %v5264_v6 = vunpack.c.h.bf16 %v19_v1  ;;  %v20_v7 = vld [vmem:[%s8137_s0 + $0x18] sm:$0xff]  ;;  %v22_v12 = vld [vmem:[%s8137_s0 + $0x28] sm:$0xff]  ;;  %v21_v17 = vld [vmem:[%s8137_s0 + $0x20] sm:$0xff] }
   0x3   :  { %v5269_v8 = vunpack.c.l.bf16 %v18_v2  ;;  %v5271_v9 = vunpack.c.h.bf16 %v18_v2  ;;  %v5273_v10 = vunpack.c.l.bf16 %v20_v7  ;;  %v5275_v11 = vunpack.c.h.bf16 %v20_v7  ;;  %v24_v22 = vld [vmem:[%s8137_s0 + $0x38] sm:$0xff]  ;;  %v23_v27 = vld [vmem:[%s8137_s0 + $0x30] sm:$0xff]  ;;  %v26_v32 = vld [vmem:[%s8137_s0 + $0x48] sm:$0xff] }
   0x4   :  { %8321 = vst [vmem:[#allocation2_spill] sm:$0xff] %v5258_v3  ;;  %8322 = vst [vmem:[#allocation3_spill] sm:$0xff] %v5260_v4  ;;  %v113_v13 = vmul.f32 %v5258_v3, %v5258_v3  ;;  %v114_v14 = vmul.f32 %v5260_v4, %v5260_v4  ;;  %v117_v15 = vmul.f32 %v5262_v5, %v5262_v5  ;;  %v5302_v25 = vunpack.c.l.bf16 %v22_v12  ;;  %v25_v41 = vld [vmem:[%s8137_s0 + $0x40] sm:$0xff]  ;;  %v28_v52 = vld [vmem:[%s8137_s0 + $0x58] sm:$0xff] }
   0x5   :  { %8323 = vst [vmem:[#allocation4_spill] sm:$0xff] %v5262_v5  ;;  %8324 = vst [vmem:[#allocation5_spill] sm:$0xff] %v5264_v6  ;;  %v118_v16 = vmul.f32 %v5264_v6, %v5264_v6  ;;  %v115_v18 = vmul.f32 %v5269_v8, %v5269_v8  ;;  %v116_v19 = vmul.f32 %v5271_v9, %v5271_v9  ;;  %v5304_v26 = vunpack.c.h.bf16 %v22_v12  ;;  %v27_v53 = vld [vmem:[%s8137_s0 + $0x50] sm:$0xff]  ;;  %v30_v60 = vld [vmem:[%s8137_s0 + $0x68] sm:$0xff] }
   0x6   :  { %8325 = vst [vmem:[#allocation6_spill] sm:$0xff] %v5269_v8  ;;  %8326 = vst [vmem:[#allocation7_spill] sm:$0xff] %v5271_v9  ;;  %v119_v20 = vmul.f32 %v5273_v10, %v5273_v10  ;;  %v120_v21 = vmul.f32 %v5275_v11, %v5275_v11  ;;  %v177_v23 = vadd.f32 %v114_v14, %v113_v13  ;;  %v5309_v30 = vunpack.c.l.bf16 %v21_v17  ;;  %v29_v1 = vld [vmem:[%s8137_s0 + $0x60] sm:$0xff] }
   0x7   :  { %8327 = vst [vmem:[#allocation8_spill] sm:$0xff] %v5273_v10  ;;  %8328 = vst [vmem:[#allocation9_spill] sm:$0xff] %v5275_v11  ;;  %v183_v24 = vadd.f32 %v118_v16, %v117_v15  ;;  %v180_v28 = vadd.f32 %v116_v19, %v115_v18  ;;  %v5311_v31 = vunpack.c.h.bf16 %v21_v17  ;;  %v123_v33 = vmul.f32 %v5302_v25, %v5302_v25 }
   0x8   :  { %8329 = vst [vmem:[#allocation10_spill] sm:$0xff] %v5302_v25  ;;  %8330 = vst [vmem:[#allocation11_spill] sm:$0xff] %v5304_v26  ;;  %v186_v29 = vadd.f32 %v120_v21, %v119_v20  ;;  %178 = vadd.xlane.f32.xlu0 %v177_v23  ;;  %v124_v34 = vmul.f32 %v5304_v26, %v5304_v26  ;;  %v5320_v35 = vunpack.c.l.bf16 %v24_v22  ;;  %v5322_v36 = vunpack.c.h.bf16 %v24_v22  ;;  %v32_v20 = vld [vmem:[%s8137_s0 + $0x78] sm:$0xff]  ;;  %v31_v21 = vld [vmem:[%s8137_s0 + $0x70] sm:$0xff] }
   0x9   :  { %8331 = vst [vmem:[#allocation12_spill] sm:$0xff] %v5309_v30  ;;  %8332 = vst [vmem:[#allocation13_spill] sm:$0xff] %v5311_v31  ;;  %184 = vadd.xlane.f32.xlu1 %v183_v24  ;;  %v121_v37 = vmul.f32 %v5309_v30, %v5309_v30  ;;  %v122_v38 = vmul.f32 %v5311_v31, %v5311_v31  ;;  %v5328_v39 = vunpack.c.l.bf16 %v23_v27  ;;  %v5330_v40 = vunpack.c.h.bf16 %v23_v27 }
   0xa   :  { %8333 = vst [vmem:[#allocation14_spill] sm:$0xff] %v5320_v35  ;;  %8334 = vst [vmem:[#allocation15_spill] sm:$0xff] %v5322_v36  ;;  %v127_v42 = vmul.f32 %v5320_v35, %v5320_v35  ;;  %v5337_v43 = vunpack.c.l.bf16 %v26_v32  ;;  %v128_v44 = vmul.f32 %v5322_v36, %v5322_v36  ;;  %v5345_v47 = vunpack.c.h.bf16 %v26_v32  ;;  %v34_v32 = vld [vmem:[%s8137_s0 + $0x88] sm:$0xff] }
   0xb   :  { %8335 = vst [vmem:[#allocation16_spill] sm:$0xff] %v5328_v39  ;;  %8336 = vst [vmem:[#allocation17_spill] sm:$0xff] %v5330_v40  ;;  %v125_v45 = vmul.f32 %v5328_v39, %v5328_v39  ;;  %v126_v46 = vmul.f32 %v5330_v40, %v5330_v40  ;;  %v192_v48 = vadd.f32 %v124_v34, %v123_v33  ;;  %v5347_v50 = vunpack.c.l.bf16 %v25_v41 }
   0xc   :  { %8337 = vst [vmem:[#allocation18_spill] sm:$0xff] %v5337_v43  ;;  %8338 = vst [vmem:[#allocation19_spill] sm:$0xff] %v5345_v47  ;;  %181 = vadd.xlane.f32.xlu0 %v180_v28  ;;  %v189_v49 = vadd.f32 %v122_v38, %v121_v37  ;;  %v5349_v51 = vunpack.c.h.bf16 %v25_v41  ;;  %v131_v54 = vmul.f32 %v5337_v43, %v5337_v43  ;;  %v5361_v58 = vunpack.c.l.bf16 %v28_v52  ;;  %v33_v41 = vld [vmem:[%s8137_s0 + $0x80] sm:$0xff] }
   0xd   :  { %187 = vadd.xlane.f32.xlu1 %v186_v29  ;;  %8339 = vst [vmem:[#allocation20_spill] sm:$0xff] %v5347_v50  ;;  %v132_v55 = vmul.f32 %v5345_v47, %v5345_v47  ;;  %v198_v56 = vadd.f32 %v128_v44, %v127_v42  ;;  %v195_v57 = vadd.f32 %v126_v46, %v125_v45  ;;  %v5363_v59 = vunpack.c.h.bf16 %v28_v52  ;;  %v36_v45 = vld [vmem:[%s8137_s0 + $0x98] sm:$0xff] }
   0xe   :  { %8340 = vst [vmem:[#allocation21_spill] sm:$0xff] %v5349_v51  ;;  %8341 = vst [vmem:[#allocation22_spill] sm:$0xff] %v5361_v58  ;;  %v129_v61 = vmul.f32 %v5347_v50, %v5347_v50  ;;  %v130_v62 = vmul.f32 %v5349_v51, %v5349_v51  ;;  %v5372_v63 = vunpack.c.l.bf16 %v27_v53  ;;  %v5374_v0 = vunpack.c.h.bf16 %v27_v53 }
   0xf   :  { %8342 = vst [vmem:[#allocation23_spill] sm:$0xff] %v5363_v59  ;;  %v204_v2 = vadd.f32 %v132_v55, %v131_v54  ;;  %v5379_v7 = vunpack.c.l.bf16 %v30_v60  ;;  %v5381_v12 = vunpack.c.h.bf16 %v30_v60  ;;  %v135_v13 = vmul.f32 %v5361_v58, %v5361_v58 }
  0x10   :  { %190 = vadd.xlane.f32.xlu0 %v189_v49  ;;  %8343 = vst [vmem:[#allocation24_spill] sm:$0xff] %v5372_v63  ;;  %8344 = vst [vmem:[#allocation25_spill] sm:$0xff] %v5374_v0  ;;  %v136_v14 = vmul.f32 %v5363_v59, %v5363_v59  ;;  %v5387_v15 = vunpack.c.l.bf16 %v29_v1  ;;  %v5389_v16 = vunpack.c.h.bf16 %v29_v1  ;;  %v201_v17 = vadd.f32 %v130_v62, %v129_v61 }
  0x11   :  { %193 = vadd.xlane.f32.xlu1 %v192_v48  ;;  %8345 = vst [vmem:[#allocation26_spill] sm:$0xff] %v5379_v7  ;;  %8346 = vst [vmem:[#allocation27_spill] sm:$0xff] %v5381_v12  ;;  %v133_v18 = vmul.f32 %v5372_v63, %v5372_v63  ;;  %v134_v19 = vmul.f32 %v5374_v0, %v5374_v0  ;;  %v139_v22 = vmul.f32 %v5379_v7, %v5379_v7 }
  0x12   :  { %8347 = vst [vmem:[#allocation28_spill] sm:$0xff] %v5387_v15  ;;  %8348 = vst [vmem:[#allocation29_spill] sm:$0xff] %v5389_v16  ;;  %v140_v23 = vmul.f32 %v5381_v12, %v5381_v12  ;;  %v137_v24 = vmul.f32 %v5387_v15, %v5387_v15  ;;  %v138_v27 = vmul.f32 %v5389_v16, %v5389_v16  ;;  %v5409_v28 = vunpack.c.l.bf16 %v32_v20 }
  0x13   :  { %v5411_v29 = vunpack.c.h.bf16 %v32_v20  ;;  %v210_v33 = vadd.f32 %v136_v14, %v135_v13  ;;  %v207_v34 = vadd.f32 %v134_v19, %v133_v18  ;;  %v5416_v37 = vunpack.c.l.bf16 %v31_v21  ;;  %v542_v13 = vld [vmem:[%s8138_s2] sm:$0xff]  ;;  %v544_v20 = vld [vmem:[%s8138_s2 + $0x10] sm:$0xff] }
  0x14   :  { %196 = vadd.xlane.f32.xlu0 %v195_v57  ;;  %8349 = vst [vmem:[#allocation30_spill] sm:$0xff] %v5409_v28  ;;  %v5418_v38 = vunpack.c.h.bf16 %v31_v21  ;;  %v5423_v42 = vunpack.c.l.bf16 %v34_v32  ;;  %v5425_v44 = vunpack.c.h.bf16 %v34_v32  ;;  %v216_v46 = vadd.f32 %v140_v23, %v139_v22  ;;  %v35_v57 = vld [vmem:[%s8137_s0 + $0x90] sm:$0xff]  ;;  %v546_v14 = vld [vmem:[%s8138_s2 + $0x20] sm:$0xff] }
  0x15   :  { %199 = vadd.xlane.f32.xlu1 %v198_v56  ;;  %8350 = vst [vmem:[#allocation31_spill] sm:$0xff] %v5411_v29  ;;  %8351 = vst [vmem:[#allocation32_spill] sm:$0xff] %v5416_v37  ;;  %v213_v48 = vadd.f32 %v138_v27, %v137_v24  ;;  %v143_v49 = vmul.f32 %v5409_v28, %v5409_v28  ;;  %v144_v52 = vmul.f32 %v5411_v29, %v5411_v29  ;;  %v548_v21 = vld [vmem:[%s8138_s2 + $0x30] sm:$0xff]  ;;  %v5475_v22 = vld [vmem:[%s8138_s2 + $0x40] sm:$0xff] }
  0x16   :  { %8352 = vst [vmem:[#allocation33_spill] sm:$0xff] %v5418_v38  ;;  %8353 = vst [vmem:[#allocation34_spill] sm:$0xff] %v5423_v42  ;;  %v141_v53 = vmul.f32 %v5416_v37, %v5416_v37  ;;  %v142_v54 = vmul.f32 %v5418_v38, %v5418_v38  ;;  %v5438_v55 = vunpack.c.l.bf16 %v33_v41  ;;  %v5440_v56 = vunpack.c.h.bf16 %v33_v41  ;;  %v554_v32 = vld [vmem:[%s8138_s2 + $0x60] sm:$0xff] }
  0x17   :  { %8354 = vst [vmem:[#allocation35_spill] sm:$0xff] %v5425_v44  ;;  %v5445_v60 = vunpack.c.l.bf16 %v36_v45  ;;  %v5447_v61 = vunpack.c.h.bf16 %v36_v45  ;;  %v147_v62 = vmul.f32 %v5423_v42, %v5423_v42  ;;  %v148_v1 = vmul.f32 %v5425_v44, %v5425_v44 }
  0x18   :  { %202 = vadd.xlane.f32.xlu0 %v201_v17  ;;  %8355 = vst [vmem:[#allocation36_spill] sm:$0xff] %v5438_v55  ;;  %8356 = vst [vmem:[#allocation37_spill] sm:$0xff] %v5440_v56  ;;  %v222_v17 = vadd.f32 %v144_v52, %v143_v49  ;;  %v5462_v18 = vunpack.c.l.bf16 %v35_v57  ;;  %v5464_v19 = vunpack.c.h.bf16 %v35_v57  ;;  %v219_v23 = vadd.f32 %v142_v54, %v141_v53  ;;  %v40_v54 = vld [vmem:[%s8137_s0 + $0xb8] sm:$0xff] }
  0x19   :  { %205 = vadd.xlane.f32.xlu1 %v204_v2  ;;  %8357 = vst [vmem:[#allocation38_spill] sm:$0xff] %v5445_v60  ;;  %8358 = vst [vmem:[#allocation39_spill] sm:$0xff] %v5447_v61  ;;  %v38_v2 = vld [vmem:[%s8137_s0 + $0xa8] sm:$0xff]  ;;  %v145_v24 = vmul.f32 %v5438_v55, %v5438_v55  ;;  %v146_v27 = vmul.f32 %v5440_v56, %v5440_v56  ;;  %v151_v41 = vmul.f32 %v5445_v60, %v5445_v60 }
  0x1a   :  { %8359 = vst [vmem:[#allocation40_spill] sm:$0xff] %v5462_v18  ;;  %8360 = vst [vmem:[#allocation41_spill] sm:$0xff] %v5464_v19  ;;  %v152_v45 = vmul.f32 %v5447_v61, %v5447_v61  ;;  %v4488_v49 = vcombine.low %v542_v13, %v546_v14  ;;  %v228_v52 = vadd.f32 %v148_v1, %v147_v62  ;;  %v5497_v53 = vunpack.c.l.bf16 %v38_v2  ;;  %v5510_v62 = vld [vmem:[%s8138_s2 + $0x80] sm:$0xff] }
  0x1b   :  { %v4493_v57 = vcombine.high %v544_v20, %v548_v21  ;;  %v4492_v42 = vcombine.low %v544_v20, %v548_v21  ;;  %v149_v60 = vmul.f32 %v5462_v18, %v5462_v18  ;;  %v150_v61 = vmul.f32 %v5464_v19, %v5464_v19  ;;  %v5515_v1 = vld [vmem:[%s8138_s2 + $0xa0] sm:$0xff]  ;;  %v560_v18 = vld [vmem:[%s8138_s2 + $0x90] sm:$0xff] }
  0x1c   :  { %208 = vadd.xlane.f32.xlu0 %v207_v34  ;;  %v556_v34 = vld [vmem:[%s8138_s2 + $0x70] sm:$0xff]  ;;  %8361 = vst [vmem:[#allocation42_spill] sm:$0xff] %v5497_v53  ;;  %v4497_v55 = vcombine.high %v5475_v22, %v554_v32  ;;  %v4505_v56 = vcombine.high %v5510_v62, %v5515_v1 }
  0x1d   :  { %211 = vadd.xlane.f32.xlu1 %v210_v33  ;;  %v552_v33 = vld [vmem:[%s8138_s2 + $0x50] sm:$0xff]  ;;  %1696 = vmatprep.subr.bf16.mxu0 %v4493_v57  ;;  %v231_v28 = vadd.f32 %v150_v61, %v149_v60 }
  0x1e   :  { %v4501_v44 = vcombine.high %v552_v33, %v556_v34  ;;  %1697 = vmatpush1.bf16.msra.mxu0 %v4492_v42  ;;  %v4500_v19 = vcombine.low %v552_v33, %v556_v34  ;;  %v5551_v42 = vld [vmem:[%s8138_s2 + $0xc0] sm:$0xff]  ;;  %v568_v33 = vld [vmem:[%s8138_s2 + $0xd0] sm:$0xff] }
  0x1f   :  { %v572_v34 = vld [vmem:[%s8138_s2 + $0xf0] sm:$0xff] }
  0x20   :  { %214 = vadd.xlane.f32.xlu0 %v213_v48  ;;  %v4489_v48 = vcombine.high %v542_v13, %v546_v14  ;;  %v225_v13 = vadd.f32 %v146_v27, %v145_v24  ;;  %v5517_v14 = vunpack.c.h.bf16 %v38_v2  ;;  %v5532_v24 = vunpack.c.l.bf16 %v40_v54  ;;  %1698 = vmatprep.subr.bf16.mxu0 %v4501_v44 }
  0x21   :  { %217 = vadd.xlane.f32.xlu1 %v216_v46  ;;  %v37_v46 = vld [vmem:[%s8137_s0 + $0xa0] sm:$0xff]  ;;  %v4496_v2 = vcombine.low %v5475_v22, %v554_v32  ;;  %v155_v27 = vmul.f32 %v5497_v53, %v5497_v53  ;;  %v42_v22 = vld [vmem:[%s8137_s0 + $0xc8] sm:$0xff] }
  0x22   :  { %1310 = vmatprep.subr.bf16.mxu1 %v4489_v48  ;;  %8362 = vst [vmem:[#allocation43_spill] sm:$0xff] %v5517_v14  ;;  %v5519_v20 = vunpack.c.l.bf16 %v37_v46  ;;  %v5521_v21 = vunpack.c.h.bf16 %v37_v46  ;;  %v39_v48 = vld [vmem:[%s8137_s0 + $0xb0] sm:$0xff]  ;;  %8365 = vst [vmem:[#allocation46_spill] sm:$0xff] %v5532_v24  ;;  %v5537_v46 = vunpack.c.h.bf16 %v40_v54  ;;  %v156_v60 = vmul.f32 %v5517_v14, %v5517_v14  ;;  %1699 = vmatpush1.bf16.msra.mxu0 %v4500_v19  ;;  %v5595_v53 = vld [vmem:[%s8138_s2 + $0x100] sm:$0xff] }
  0x23   :  { %1311 = vmatpush1.bf16.msra.mxu1 %v4488_v49  ;;  %v5541_v37 = vunpack.c.l.bf16 %v39_v48  ;;  %v41_v49 = vld [vmem:[%s8137_s0 + $0xc0] sm:$0xff]  ;;  %v5579_v57 = vunpack.c.l.bf16 %v42_v22 }
  0x24   :  { %220 = vadd.xlane.f32.xlu0 %v219_v23  ;;  %8363 = vst [vmem:[#allocation44_spill] sm:$0xff] %v5519_v20  ;;  %8364 = vst [vmem:[#allocation45_spill] sm:$0xff] %v5521_v21  ;;  %v234_v23 = vadd.f32 %v152_v45, %v151_v41  ;;  %1312 = vmatprep.subr.bf16.mxu1 %v4497_v55  ;;  %v5543_v41 = vunpack.c.h.bf16 %v39_v48  ;;  %v5556_v55 = vld [vmem:[%s8138_s2 + $0xe0] sm:$0xff]  ;;  %v153_v61 = vmul.f32 %v5519_v20, %v5519_v20 }
  0x25   :  { %223 = vadd.xlane.f32.xlu1 %v222_v17  ;;  %v564_v17 = vld [vmem:[%s8138_s2 + $0xb0] sm:$0xff]  ;;  %8366 = vst [vmem:[#allocation47_spill] sm:$0xff] %v5537_v46  ;;  %8367 = vst [vmem:[#allocation48_spill] sm:$0xff] %v5541_v37  ;;  %v154_v44 = vmul.f32 %v5521_v21, %v5521_v21  ;;  %v159_v45 = vmul.f32 %v5532_v24, %v5532_v24  ;;  %v160_v54 = vmul.f32 %v5537_v46, %v5537_v46 }
  0x26   :  { %8368 = vst [vmem:[#allocation49_spill] sm:$0xff] %v5543_v41  ;;  %v4509_v32 = vcombine.high %v560_v18, %v564_v17  ;;  %8369 = vst [vmem:[#allocation50_spill] sm:$0xff] %v5579_v57  ;;  %v4508_v48 = vcombine.low %v560_v18, %v564_v17  ;;  %v4513_v24 = vcombine.high %v5551_v42, %v5556_v55  ;;  %v5602_v17 = vunpack.c.l.bf16 %v41_v49 }
  0x27   :  { %1313 = vmatpush1.bf16.msra.mxu1 %v4496_v2  ;;  %v157_v2 = vmul.f32 %v5541_v37, %v5541_v37  ;;  %v4517_v46 = vcombine.high %v568_v33, %v572_v34  ;;  %v240_v18 = vadd.f32 %v156_v60, %v155_v27  ;;  %v237_v19 = vadd.f32 %v154_v44, %v153_v61  ;;  %v580_v37 = vld [vmem:[%s8138_s2 + $0x130] sm:$0xff]  ;;  %v46_v60 = vld [vmem:[%s8137_s0 + $0xe8] sm:$0xff] }
  0x28   :  { %226 = vadd.xlane.f32.xlu0 %v225_v13  ;;  %v44_v13 = vld [vmem:[%s8137_s0 + $0xd8] sm:$0xff]  ;;  %1314 = vmatprep.subr.bf16.mxu1 %v4505_v56  ;;  %v5600_v56 = vld [vmem:[%s8138_s2 + $0x120] sm:$0xff]  ;;  %8371 = vst [vmem:[#allocation52_spill] sm:$0xff] %v5602_v17  ;;  %v246_v27 = vadd.f32 %v160_v54, %v159_v45  ;;  %v4516_v61 = vcombine.low %v568_v33, %v572_v34 }
  0x29   :  { %229 = vadd.xlane.f32.xlu1 %v228_v52  ;;  %v4504_v52 = vcombine.low %v5510_v62, %v5515_v1  ;;  %v158_v62 = vmul.f32 %v5543_v41, %v5543_v41  ;;  %v5590_v1 = vunpack.c.h.bf16 %v42_v22  ;;  %1700 = vmatprep.subr.bf16.mxu0 %v4509_v32  ;;  %v5604_v22 = vunpack.c.h.bf16 %v41_v49  ;;  %v576_v32 = vld [vmem:[%s8138_s2 + $0x110] sm:$0xff]  ;;  %v45_v54 = vld [vmem:[%s8137_s0 + $0xe0] sm:$0xff] }
  0x2a   :  { %v5612_v41 = vunpack.c.l.bf16 %v44_v13  ;;  %v5614_v20 = vunpack.c.h.bf16 %v44_v13  ;;  %1701 = vmatpush1.bf16.msra.mxu0 %v4508_v48  ;;  %v4521_v44 = vcombine.high %v5595_v53, %v5600_v56  ;;  %v163_v13 = vmul.f32 %v5579_v57, %v5579_v57  ;;  %v584_v48 = vld [vmem:[%s8138_s2 + $0x150] sm:$0xff] }
  0x2b   :  { %8370 = vst [vmem:[#allocation51_spill] sm:$0xff] %v5590_v1  ;;  %8372 = vst [vmem:[#allocation53_spill] sm:$0xff] %v5604_v22  ;;  %1315 = vmatpush1.bf16.msra.mxu1 %v4504_v52  ;;  %v243_v49 = vadd.f32 %v158_v62, %v157_v2  ;;  %v164_v52 = vmul.f32 %v5590_v1, %v5590_v1  ;;  %1702 = vmatprep.subr.bf16.mxu0 %v4517_v46  ;;  %v588_v2 = vld [vmem:[%s8138_s2 + $0x170] sm:$0xff]  ;;  %v5663_v57 = vunpack.c.h.bf16 %v46_v60 }
  0x2c   :  { %232 = vadd.xlane.f32.xlu0 %v231_v28  ;;  %8373 = vst [vmem:[#allocation54_spill] sm:$0xff] %v5612_v41  ;;  %8374 = vst [vmem:[#allocation55_spill] sm:$0xff] %v5614_v20  ;;  %v43_v28 = vld [vmem:[%s8137_s0 + $0xd0] sm:$0xff]  ;;  %1316 = vmatprep.subr.bf16.mxu1 %v4513_v24  ;;  %v5633_v24 = vld [vmem:[%s8138_s2 + $0x140] sm:$0xff]  ;;  %v161_v33 = vmul.f32 %v5602_v17, %v5602_v17  ;;  %v162_v34 = vmul.f32 %v5604_v22, %v5604_v22  ;;  %v5666_v14 = vunpack.c.l.bf16 %v45_v54 }
  0x2d   :  { %235 = vadd.xlane.f32.xlu1 %v234_v23  ;;  %v4512_v23 = vcombine.low %v5551_v42, %v5556_v55  ;;  %v4525_v42 = vcombine.high %v576_v32, %v580_v37  ;;  %v586_v55 = vld [vmem:[%s8138_s2 + $0x160] sm:$0xff]  ;;  %v5642_v45 = vunpack.c.l.bf16 %v43_v28  ;;  %v5644_v46 = vunpack.c.h.bf16 %v43_v28  ;;  %8378 = vst [vmem:[#allocation59_spill] sm:$0xff] %v5663_v57 }
  0x2e   :  { %v167_v62 = vmul.f32 %v5612_v41, %v5612_v41  ;;  %v4520_v28 = vcombine.low %v5595_v53, %v5600_v56  ;;  %1703 = vmatpush1.bf16.msra.mxu0 %v4516_v61  ;;  %v4524_v17 = vcombine.low %v576_v32, %v580_v37  ;;  %v4529_v1 = vcombine.high %v5633_v24, %v586_v55  ;;  %v594_v53 = vld [vmem:[%s8138_s2 + $0x1a0] sm:$0xff]  ;;  %v592_v61 = vld [vmem:[%s8138_s2 + $0x190] sm:$0xff] }
  0x2f   :  { %8375 = vst [vmem:[#allocation56_spill] sm:$0xff] %v5642_v45  ;;  %8376 = vst [vmem:[#allocation57_spill] sm:$0xff] %v5644_v46  ;;  %1317 = vmatpush1.bf16.msra.mxu1 %v4512_v23  ;;  %v252_v22 = vadd.f32 %v164_v52, %v163_v13  ;;  %v5668_v41 = vunpack.c.h.bf16 %v45_v54  ;;  %1704 = vmatprep.subr.bf16.mxu0 %v4525_v42  ;;  %v590_v23 = vld [vmem:[%s8138_s2 + $0x180] sm:$0xff]  ;;  %v249_v37 = vadd.f32 %v162_v34, %v161_v33  ;;  %v47_v52 = vld [vmem:[%s8137_s0 + $0xf0] sm:$0xff] }
  0x30   :  { %238 = vadd.xlane.f32.xlu0 %v237_v19  ;;  %v5659_v19 = vunpack.c.l.bf16 %v46_v60  ;;  %1318 = vmatprep.subr.bf16.mxu1 %v4521_v44  ;;  %8379 = vst [vmem:[#allocation60_spill] sm:$0xff] %v5666_v14  ;;  %v165_v56 = vmul.f32 %v5642_v45, %v5642_v45  ;;  %v166_v32 = vmul.f32 %v5644_v46, %v5644_v46  ;;  %v48_v60 = vld [vmem:[%s8137_s0 + $0xf8] sm:$0xff]  ;;  %v606_v45 = vld [vmem:[%s8138_s2 + $0x200] sm:$0xff] }
  0x31   :  { %241 = vadd.xlane.f32.xlu1 %v240_v18  ;;  %v168_v18 = vmul.f32 %v5614_v20, %v5614_v20  ;;  %8380 = vst [vmem:[#allocation61_spill] sm:$0xff] %v5668_v41  ;;  %v4533_v20 = vcombine.high %v584_v48, %v588_v2  ;;  %v4528_v13 = vcombine.low %v5633_v24, %v586_v55  ;;  %v598_v55 = vld [vmem:[%s8138_s2 + $0x1c0] sm:$0xff] }
  0x32   :  { %8377 = vst [vmem:[#allocation58_spill] sm:$0xff] %v5659_v19  ;;  %v172_v42 = vmul.f32 %v5663_v57, %v5663_v57  ;;  %1705 = vmatpush1.bf16.msra.mxu0 %v4524_v17  ;;  %v4532_v33 = vcombine.low %v584_v48, %v588_v2  ;;  %v4537_v34 = vcombine.high %v590_v23, %v594_v53  ;;  %v600_v17 = vld [vmem:[%s8138_s2 + $0x1d0] sm:$0xff]  ;;  %v5712_v2 = vunpack.c.h.bf16 %v48_v60 }
  0x33   :  { %v258_v44 = vadd.f32 %v168_v18, %v167_v62  ;;  %1319 = vmatpush1.bf16.msra.mxu1 %v4520_v28  ;;  %v169_v54 = vmul.f32 %v5666_v14, %v5666_v14  ;;  %v170_v62 = vmul.f32 %v5668_v41, %v5668_v41  ;;  %1706 = vmatprep.subr.bf16.mxu0 %v4533_v20  ;;  %v5701_v18 = vunpack.c.l.bf16 %v48_v60  ;;  %v5724_v14 = vld [vmem:[%s8138_s2 + $0x8] sm:$0xff] }
  0x34   :  { %244 = vadd.xlane.f32.xlu0 %v243_v49  ;;  %v171_v49 = vmul.f32 %v5659_v19, %v5659_v19  ;;  %1320 = vmatprep.subr.bf16.mxu1 %v4529_v1  ;;  %v602_v1 = vld [vmem:[%s8138_s2 + $0x1e0] sm:$0xff]  ;;  %v255_v48 = vadd.f32 %v166_v32, %v165_v56  ;;  %8382 = vst [vmem:[#allocation63_spill] sm:$0xff] %v5712_v2  ;;  %v5714_v20 = vunpack.c.l.bf16 %v47_v52  ;;  %v5716_v28 = vunpack.c.h.bf16 %v47_v52  ;;  %v604_v19 = vld [vmem:[%s8138_s2 + $0x1f0] sm:$0xff] }
  0x35   :  { %247 = vadd.xlane.f32.xlu1 %v246_v27  ;;  %v596_v27 = vld [vmem:[%s8138_s2 + $0x1b0] sm:$0xff]  ;;  %8381 = vst [vmem:[#allocation62_spill] sm:$0xff] %v5701_v18  ;;  %v4545_v60 = vcombine.high %v598_v55, %v602_v1  ;;  %v261_v52 = vadd.f32 %v170_v62, %v169_v54  ;;  %v175_v57 = vmul.f32 %v5701_v18, %v5701_v18  ;;  %v614_v62 = vld [vmem:[%s8138_s2 + $0x240] sm:$0xff] }
  0x36   :  { %v4541_v24 = vcombine.high %v592_v61, %v596_v27  ;;  %8383 = vst [vmem:[#allocation64_spill] sm:$0xff] %v5714_v20  ;;  %8384 = vst [vmem:[#allocation65_spill] sm:$0xff] %v5716_v28  ;;  %v264_v56 = vadd.f32 %v172_v42, %v171_v49  ;;  %1707 = vmatpush1.bf16.msra.mxu0 %v4532_v33  ;;  %v4540_v32 = vcombine.low %v592_v61, %v596_v27  ;;  %v608_v49 = vld [vmem:[%s8138_s2 + $0x210] sm:$0xff] }
  0x37   :  { %1321 = vmatpush1.bf16.msra.mxu1 %v4528_v13  ;;  %v4549_v41 = vcombine.high %v600_v17, %v604_v19  ;;  %v610_v13 = vld [vmem:[%s8138_s2 + $0x220] sm:$0xff]  ;;  %v173_v61 = vmul.f32 %v5714_v20, %v5714_v20  ;;  %v174_v27 = vmul.f32 %v5716_v28, %v5716_v28  ;;  %v612_v42 = vld [vmem:[%s8138_s2 + $0x230] sm:$0xff]  ;;  %v4548_v33 = vcombine.low %v600_v17, %v604_v19 }
  0x38   :  { %250 = vadd.xlane.f32.xlu0 %v249_v37  ;;  %v4536_v37 = vcombine.low %v590_v23, %v594_v53  ;;  %1322 = vmatprep.subr.bf16.mxu1 %v4537_v34  ;;  %v176_v53 = vmul.f32 %v5712_v2, %v5712_v2  ;;  %v4553_v34 = vcombine.high %v606_v45, %v610_v13 }
  0x39   :  { %253 = vadd.xlane.f32.xlu1 %v252_v22  ;;  %v5729_v22 = vld [vmem:[%s8138_s2 + $0x28] sm:$0xff]  ;;  %1708 = vmatprep.subr.bf16.mxu0 %v4541_v24  ;;  %v4557_v54 = vcombine.high %v608_v49, %v612_v42  ;;  %v618_v24 = vld [vmem:[%s8138_s2 + $0x260] sm:$0xff]  ;;  %v267_v23 = vadd.f32 %v174_v27, %v173_v61  ;;  %v4552_v19 = vcombine.low %v606_v45, %v610_v13  ;;  %v624_v45 = vld [vmem:[%s8138_s2 + $0x290] sm:$0xff] }
  0x3a   :  { %1709 = vmatpush1.bf16.msra.mxu0 %v4540_v32  ;;  %v4561_v17 = vcombine.high %v614_v62, %v618_v24  ;;  %v628_v32 = vld [vmem:[%s8138_s2 + $0x2b0] sm:$0xff]  ;;  %v634_v61 = vld [vmem:[%s8138_s2 + $0x2e0] sm:$0xff] }
  0x3b   :  { %1323 = vmatpush1.bf16.msra.mxu1 %v4536_v37  ;;  %1710 = vmatprep.subr.bf16.mxu0 %v4549_v41  ;;  %v620_v41 = vld [vmem:[%s8138_s2 + $0x270] sm:$0xff] }
  0x3c   :  { %256 = vadd.xlane.f32.xlu0 %v255_v48  ;;  %1324 = vmatprep.subr.bf16.mxu1 %v4545_v60  ;;  %v270_v48 = vadd.f32 %v176_v53, %v175_v57  ;;  %v622_v57 = vld [vmem:[%s8138_s2 + $0x280] sm:$0xff]  ;;  %v4560_v60 = vcombine.low %v614_v62, %v618_v24  ;;  %v4573_v53 = vcombine.high %v624_v45, %v628_v32  ;;  %v632_v27 = vld [vmem:[%s8138_s2 + $0x2d0] sm:$0xff] }
  0x3d   :  { %259 = vadd.xlane.f32.xlu1 %v258_v44  ;;  %v4544_v44 = vcombine.low %v598_v55, %v602_v1  ;;  %v616_v55 = vld [vmem:[%s8138_s2 + $0x250] sm:$0xff]  ;;  %v4556_v1 = vcombine.low %v608_v49, %v612_v42  ;;  %v642_v62 = vld [vmem:[%s8138_s2 + $0x320] sm:$0xff] }
  0x3e   :  { %1711 = vmatpush1.bf16.msra.mxu0 %v4548_v33  ;;  %v4565_v37 = vcombine.high %v616_v55, %v620_v41  ;;  %v636_v49 = vld [vmem:[%s8138_s2 + $0x2f0] sm:$0xff] }
  0x3f   :  { %1325 = vmatpush1.bf16.msra.mxu1 %v4544_v44  ;;  %1712 = vmatprep.subr.bf16.mxu0 %v4557_v54  ;;  %v4572_v44 = vcombine.low %v624_v45, %v628_v32  ;;  %v638_v54 = vld [vmem:[%s8138_s2 + $0x300] sm:$0xff]  ;;  %v640_v24 = vld [vmem:[%s8138_s2 + $0x310] sm:$0xff] }
  0x40   :  { %262 = vadd.xlane.f32.xlu0 %v261_v52  ;;  %1326 = vmatprep.subr.bf16.mxu1 %v4553_v34  ;;  %v4564_v52 = vcombine.low %v616_v55, %v620_v41  ;;  %v4581_v34 = vcombine.high %v632_v27, %v636_v49  ;;  %v4580_v41 = vcombine.low %v632_v27, %v636_v49 }
  0x41   :  { %265 = vadd.xlane.f32.xlu1 %v264_v56  ;;  %v626_v56 = vld [vmem:[%s8138_s2 + $0x2a0] sm:$0xff]  ;;  %v4584_v45 = vcombine.low %v638_v54, %v642_v62 }
  0x42   :  { %1713 = vmatpush1.bf16.msra.mxu0 %v4556_v1  ;;  %v4569_v13 = vcombine.high %v622_v57, %v626_v56  ;;  %v4568_v42 = vcombine.low %v622_v57, %v626_v56  ;;  %v648_v57 = vld [vmem:[%s8138_s2 + $0x350] sm:$0xff] }
  0x43   :  { %1327 = vmatpush1.bf16.msra.mxu1 %v4552_v19  ;;  %1714 = vmatprep.subr.bf16.mxu0 %v4565_v37  ;;  %v4585_v19 = vcombine.high %v638_v54, %v642_v62  ;;  %v650_v37 = vld [vmem:[%s8138_s2 + $0x360] sm:$0xff]  ;;  %v652_v56 = vld [vmem:[%s8138_s2 + $0x370] sm:$0xff] }
  0x44   :  { %268 = vadd.xlane.f32.xlu0 %v267_v23  ;;  %1328 = vmatprep.subr.bf16.mxu1 %v4561_v17  ;;  %v630_v23 = vld [vmem:[%s8138_s2 + $0x2c0] sm:$0xff]  ;;  %v4596_v49 = vcombine.low %v648_v57, %v652_v56  ;;  %v664_v54 = vld [vmem:[%s8138_s2 + $0x3d0] sm:$0xff] }
  0x45   :  { %271 = vadd.xlane.f32.xlu1 %v270_v48  ;;  %v4577_v33 = vcombine.high %v630_v23, %v634_v61  ;;  %v644_v48 = vld [vmem:[%s8138_s2 + $0x330] sm:$0xff]  ;;  %v4576_v55 = vcombine.low %v630_v23, %v634_v61  ;;  %v646_v17 = vld [vmem:[%s8138_s2 + $0x340] sm:$0xff] }
  0x46   :  { %1715 = vmatpush1.bf16.msra.mxu0 %v4564_v52  ;;  %v4589_v1 = vcombine.high %v640_v24, %v644_v48  ;;  %v4588_v32 = vcombine.low %v640_v24, %v644_v48  ;;  %v4597_v52 = vcombine.high %v648_v57, %v652_v56  ;;  %v656_v23 = vld [vmem:[%s8138_s2 + $0x390] sm:$0xff]  ;;  %v4592_v27 = vcombine.low %v646_v17, %v650_v37 }
  0x47   :  { %1329 = vmatpush1.bf16.msra.mxu1 %v4560_v60  ;;  %1716 = vmatprep.subr.bf16.mxu0 %v4573_v53  ;;  %v4593_v60 = vcombine.high %v646_v17, %v650_v37  ;;  %v658_v53 = vld [vmem:[%s8138_s2 + $0x3a0] sm:$0xff]  ;;  %v660_v61 = vld [vmem:[%s8138_s2 + $0x3b0] sm:$0xff]  ;;  %v4491_v17 = vcombine.high %v5724_v14, %v5729_v22 }
  0x48   :  { %1330 = vmatprep.subr.bf16.mxu1 %v4569_v13  ;;  %v654_v13 = vld [vmem:[%s8138_s2 + $0x380] sm:$0xff]  ;;  %v668_v62 = vld [vmem:[%s8138_s2 + $0x3f0] sm:$0xff]  ;;  %v4604_v48 = vcombine.low %v656_v23, %v660_v61 }
  0x49   :  { %v4600_v24 = vcombine.low %v654_v13, %v658_v53 }
  0x4a   :  { %1717 = vmatpush1.bf16.msra.mxu0 %v4572_v44  ;;  %v4605_v44 = vcombine.high %v656_v23, %v660_v61  ;;  %v436_v61 = vlaneseq }
  0x4b   :  { %1331 = vmatpush1.bf16.msra.mxu1 %v4568_v42  ;;  %1718 = vmatprep.subr.bf16.mxu0 %v4581_v34  ;;  %v4601_v42 = vcombine.high %v654_v13, %v658_v53  ;;  %v666_v34 = vld [vmem:[%s8138_s2 + $0x3e0] sm:$0xff] }
  0x4c   :  { %1332 = vmatprep.subr.bf16.mxu1 %v4577_v33  ;;  %v662_v33 = vld [vmem:[%s8138_s2 + $0x3c0] sm:$0xff] }
  0x4e   :  { %1719 = vmatpush1.bf16.msra.mxu0 %v4580_v41  ;;  %v4613_v41 = vcombine.high %v664_v54, %v668_v62 }
  0x4f   :  { %1333 = vmatpush1.bf16.msra.mxu1 %v4576_v55  ;;  %1720 = vmatprep.subr.bf16.mxu0 %v4589_v1  ;;  %v4609_v55 = vcombine.high %v662_v33, %v666_v34  ;;  %v4612_v1 = vcombine.low %v664_v54, %v668_v62  ;;  %v437_v54 = vshrl.u32 %v436_v61, 7 }
  0x50   :  { %1334 = vmatprep.subr.bf16.mxu1 %v4585_v19  ;;  %v4608_v19 = vcombine.low %v662_v33, %v666_v34 }
  0x52   :  { %1721 = vmatpush1.bf16.msra.mxu0 %v4588_v32 }
  0x53   :  { %1335 = vmatpush1.bf16.msra.mxu1 %v4584_v45  ;;  %1722 = vmatprep.subr.bf16.mxu0 %v4597_v52 }
  0x54   :  { %1336 = vmatprep.subr.bf16.mxu1 %v4593_v60 }
  0x56   :  { %1723 = vmatpush1.bf16.msra.mxu0 %v4596_v49 }
  0x57   :  { %1337 = vmatpush1.bf16.msra.mxu1 %v4592_v27  ;;  %1724 = vmatprep.subr.bf16.mxu0 %v4605_v44 }
  0x58   :  { %1338 = vmatprep.subr.bf16.mxu1 %v4601_v42 }
  0x5a   :  { %1725 = vmatpush1.bf16.msra.mxu0 %v4604_v48 }
  0x5b   :  { %1339 = vmatpush1.bf16.msra.mxu1 %v4600_v24  ;;  %1726 = vmatprep.subr.bf16.mxu0 %v4613_v41  ;;  %v442_v41 = vsub.s32 1, %v437_v54 }
  0x5c   :  { %1340 = vmatprep.subr.bf16.mxu1 %v4609_v55 }
  0x5e   :  { %1727 = vmatpush1.bf16.msra.mxu0 %v4612_v1 }
  0x5f   :  { %1341 = vmatpush1.bf16.msra.mxu1 %v4608_v19 }
  0x60   :  { %1503 = vmatprep.subr.bf16.mxu1 %v4491_v17  ;;  %v434_v17 = vld [vmem:[%s8139_s1] sm:$0x3] }
  0x95   :  { %v179_v37 = vpop.xlane.xlu0 %178 }
  0x96   :  { %v185_v57 = vpop.xlane.xlu1 %184  ;;  %v274_v56 = vmul.f32 0.00390625, %v179_v37  ;;  %v438_v37 = vsub.s32 0, %v437_v54 }
  0x97   :  { %v276_v45 = vmul.f32 0.00390625, %v185_v57 }
  0x98   :  { %v306_v32 = vadd.f32 1e-06, %v274_v56 }
  0x99   :  { %v308_v60 = vadd.f32 1e-06, %v276_v45  ;;  %v182_v52 = vpop.xlane.xlu0 %181 }
  0x9a   :  { %v188_v13 = vpop.xlane.xlu1 %187  ;;  %4904 = vrsqrt.f32 %v306_v32  ;;  %v275_v53 = vmul.f32 0.00390625, %v182_v52 }
  0x9b   :  { %v277_v23 = vmul.f32 0.00390625, %v188_v13  ;;  %4906 = vrsqrt.f32 %v308_v60 }
  0x9c   :  { %v307_v27 = vadd.f32 1e-06, %v275_v53  ;;  %v5843_v53 = vrot.slane %v434_v17, %v442_v41 }
  0x9d   :  { %v309_v49 = vadd.f32 1e-06, %v277_v23  ;;  %v191_v44 = vpop.xlane.xlu0 %190 }
  0x9e   :  { %v194_v42 = vpop.xlane.xlu1 %193  ;;  %4908 = vrsqrt.f32 %v307_v27  ;;  %v278_v34 = vmul.f32 0.00390625, %v191_v44  ;;  %v5847_v27 = vrot.slane %v434_v17, %v438_v37 }
  0x9f   :  { %v279_v33 = vmul.f32 0.00390625, %v194_v42  ;;  %4910 = vrsqrt.f32 %v309_v49 }
  0xa0   :  { %v310_v24 = vadd.f32 1e-06, %v278_v34 }
  0xa1   :  { %v311_v62 = vadd.f32 1e-06, %v279_v33  ;;  %v197_v55 = vpop.xlane.xlu0 %196 }
  0xa2   :  { %v200_v48 = vpop.xlane.xlu1 %199  ;;  %v280_v1 = vmul.f32 0.00390625, %v197_v55 }
  0xa3   :  { %4912 = vrsqrt.f32 %v311_v62  ;;  %v281_v19 = vmul.f32 0.00390625, %v200_v48  ;;  %v5854_v62 = vld [vmem:[%s8138_s2 + $0x18] sm:$0xff] }
  0xa4   :  { %4914 = vrsqrt.f32 %v310_v24  ;;  %v4905_v57 = vpop.eup %4904  ;;  %v312_v45 = vadd.f32 1e-06, %v280_v1  ;;  %v5859_v24 = vld [vmem:[%s8138_s2 + $0x38] sm:$0xff]  ;;  %v555_v1 = vld [vmem:[%s8138_s2 + $0x68] sm:$0xff] }
  0xa5   :  { %v313_v56 = vadd.f32 1e-06, %v281_v19  ;;  %v4907_v32 = vpop.eup %4906  ;;  %v203_v52 = vpop.xlane.xlu0 %202  ;;  %v371_v13 = vmul.f32 %v4905_v57, %v5260_v4  ;;  %v370_v61 = vmul.f32 %v4905_v57, %v5258_v3  ;;  %v551_v19 = vld [vmem:[%s8138_s2 + $0x48] sm:$0xff] }
  0xa6   :  { %v206_v60 = vpop.xlane.xlu1 %205  ;;  %v375_v23 = vmul.f32 %v4907_v32, %v5264_v6  ;;  %v282_v44 = vmul.f32 0.00390625, %v203_v52 }
  0xa7   :  { %4916 = vrsqrt.f32 %v313_v56  ;;  %v283_v49 = vmul.f32 0.00390625, %v206_v60  ;;  %v447_v48 = vmul.f32 %v5843_v53, %v371_v13  ;;  %v446_v37 = vmul.f32 %v5847_v27, %v370_v61 }
  0xa8   :  { %v4909_v42 = vpop.eup %4908  ;;  %4918 = vrsqrt.f32 %v312_v45  ;;  %v451_v41 = vmul.f32 %v5843_v53, %v375_v23  ;;  %v314_v52 = vadd.f32 1e-06, %v282_v44 }
  0xa9   :  { %v4911_v33 = vpop.eup %4910  ;;  %v373_v34 = vmul.f32 %v4909_v42, %v5271_v9  ;;  %v372_v54 = vmul.f32 %v4909_v42, %v5269_v8  ;;  %v315_v56 = vadd.f32 1e-06, %v283_v49  ;;  %v4499_v9 = vcombine.high %v551_v19, %v555_v1  ;;  %v209_v61 = vpop.xlane.xlu0 %208 }
  0xaa   :  { %v377_v55 = vmul.f32 %v4911_v33, %v5275_v11  ;;  %v212_v13 = vpop.xlane.xlu1 %211  ;;  %v374_v49 = vmul.f32 %v4907_v32, %v5262_v5  ;;  %v284_v32 = vmul.f32 0.00390625, %v209_v61 }
  0xab   :  { %v449_v17 = vmul.f32 %v5843_v53, %v373_v34  ;;  %v448_v57 = vmul.f32 %v5847_v27, %v372_v54  ;;  %v376_v54 = vmul.f32 %v4911_v33, %v5273_v10  ;;  %4920 = vrsqrt.f32 %v315_v56 }
  0xac   :  { %v453_v60 = vmul.f32 %v5843_v53, %v377_v55  ;;  %v563_v55 = vld [vmem:[%s8138_s2 + $0xa8] sm:$0xff]  ;;  %4922 = vrsqrt.f32 %v314_v52 }
  0xad   :  { %v4913_v45 = vpop.eup %4912  ;;  %v5876_v11 = vpack.c.bf16 %v449_v17, %v447_v48  ;;  %v5878_v6 = vpack.c.bf16 %v448_v57, %v446_v37  ;;  %v559_v48 = vld [vmem:[%s8138_s2 + $0x88] sm:$0xff]  ;;  %v8385_v17 = vcombine.low %v5724_v14, %v5729_v22  ;;  %v4498_v37 = vcombine.low %v551_v19, %v555_v1 }
  0xae   :  { %v4915_v42 = vpop.eup %4914  ;;  %v381_v34 = vmul.f32 %v4913_v45, %v5304_v26  ;;  %v5881_v8 = vpack.c.bf16 %v453_v60, %v451_v41  ;;  %v285_v41 = vmul.f32 0.00390625, %v212_v13  ;;  %v450_v13 = vmul.f32 %v5847_v27, %v374_v49  ;;  %v567_v19 = vld [vmem:[%s8138_s2 + $0xc8] sm:$0xff] }
  0xaf   :  { %v379_v44 = vmul.f32 %v4915_v42, %v5311_v31  ;;  %1342 = vmatprep.mubr.bf16.mxu1 %v5876_v11  ;;  %1728 = vmatprep.mubr.bf16.mxu0 %v5876_v11  ;;  %v452_v52 = vmul.f32 %v5847_v27, %v376_v54  ;;  %v4507_v61 = vcombine.high %v559_v48, %v563_v55  ;;  %v571_v1 = vld [vmem:[%s8138_s2 + $0xe8] sm:$0xff] }
  0xb0   :  { %1343 = vmatmul.mubr.bf16.vlgmr.msra.gmra.mrb[0].mxu1 %v5878_v6  ;;  %1729 = vmatmul.mubr.bf16.vlgmr.msra.gmra.mrb[0].mxu0 %v5878_v6  ;;  %v457_v56 = vmul.f32 %v5843_v53, %v381_v34  ;;  %v317_v23 = vadd.f32 1e-06, %v285_v41  ;;  %v378_v14 = vmul.f32 %v4915_v42, %v5309_v30  ;;  %v380_v22 = vmul.f32 %v4913_v45, %v5302_v25  ;;  %v215_v42 = vpop.xlane.xlu0 %214 }
  0xb1   :  { %v4917_v33 = vpop.eup %4916  ;;  %1504 = vmatpush1.bf16.msra.mxu1 %v8385_v17  ;;  %1352 = vmatprep.mubr.bf16.mxu1 %v5881_v8  ;;  %v455_v57 = vmul.f32 %v5843_v53, %v379_v44  ;;  %v316_v17 = vadd.f32 1e-06, %v284_v32  ;;  %v5917_v44 = vpack.c.bf16 %v452_v52, %v450_v13  ;;  %v4506_v45 = vcombine.low %v559_v48, %v563_v55  ;;  %v575_v13 = vld [vmem:[%s8138_s2 + $0x108] sm:$0xff] }
  0xb2   :  { %v4919_v60 = vpop.eup %4918  ;;  %1738 = vmatprep.mubr.bf16.mxu0 %v5881_v8  ;;  %1505 = vmatprep.subr.bf16.mxu1 %v4499_v9  ;;  %v218_v9 = vpop.xlane.xlu1 %217  ;;  %v385_v54 = vmul.f32 %v4917_v33, %v5322_v36  ;;  %4924 = vrsqrt.f32 %v317_v23  ;;  %v4515_v41 = vcombine.high %v567_v19, %v571_v1  ;;  %v579_v23 = vld [vmem:[%s8138_s2 + $0x128] sm:$0xff]  ;;  %v384_v36 = vmul.f32 %v4917_v33, %v5320_v35 }
  0xb3   :  { %v5913_v34 = vpack.c.bf16 %v457_v56, %v455_v57  ;;  %v383_v49 = vmul.f32 %v4919_v60, %v5330_v40  ;;  %v287_v32 = vmul.f32 0.00390625, %v218_v9  ;;  %v456_v57 = vmul.f32 %v5847_v27, %v380_v22  ;;  %v8397_v35 = vld [vmem:[#allocation39_spill] sm:$0xff] }
  0xb4   :  { %4926 = vrsqrt.f32 %v316_v17  ;;  %v286_v56 = vmul.f32 0.00390625, %v215_v42  ;;  %v461_v52 = vmul.f32 %v5843_v53, %v385_v54  ;;  %v4523_v17 = vcombine.high %v575_v13, %v579_v23  ;;  %v587_v54 = vld [vmem:[%s8138_s2 + $0x168] sm:$0xff] }
  0xb5   :  { %1506 = vmatpush1.bf16.msra.mxu1 %v4498_v37  ;;  %v454_v37 = vmul.f32 %v5847_v27, %v378_v14  ;;  %v4921_v48 = vpop.eup %4920  ;;  %v459_v55 = vmul.f32 %v5843_v53, %v383_v49  ;;  %v4514_v14 = vcombine.low %v567_v19, %v571_v1  ;;  %v319_v22 = vadd.f32 1e-06, %v287_v32  ;;  %v583_v49 = vld [vmem:[%s8138_s2 + $0x148] sm:$0xff] }
  0xb6   :  { %1507 = vmatprep.subr.bf16.mxu1 %v4507_v61  ;;  %v4923_v61 = vpop.eup %4922  ;;  %v382_v42 = vmul.f32 %v4919_v60, %v5328_v39  ;;  %v318_v40 = vadd.f32 1e-06, %v286_v56  ;;  %v224_v26 = vpop.xlane.xlu1 %223  ;;  %v4522_v60 = vcombine.low %v575_v13, %v579_v23  ;;  %v4531_v32 = vcombine.high %v583_v49, %v587_v54  ;;  %v595_v13 = vld [vmem:[%s8138_s2 + $0x1a8] sm:$0xff] }
  0xb7   :  { %v5933_v9 = vpack.c.bf16 %v456_v57, %v454_v37  ;;  %v5943_v19 = vpack.c.bf16 %v461_v52, %v459_v55  ;;  %v387_v1 = vmul.f32 %v4923_v61, %v5349_v51  ;;  %4928 = vrsqrt.f32 %v319_v22  ;;  %v591_v55 = vld [vmem:[%s8138_s2 + $0x188] sm:$0xff] }
  0xb8   :  { %1353 = vmatmul.mubr.bf16.gmra.mrb[4].mxu1 %v5917_v44  ;;  %1739 = vmatmul.mubr.bf16.gmra.mrb[4].mxu0 %v5917_v44  ;;  %v289_v33 = vmul.f32 0.00390625, %v224_v26  ;;  %v458_v37 = vmul.f32 %v5847_v27, %v382_v42  ;;  %v460_v57 = vmul.f32 %v5847_v27, %v384_v36  ;;  %4930 = vrsqrt.f32 %v318_v40 }
  0xb9   :  { %1362 = vmatprep.mubr.bf16.mxu1 %v5913_v34  ;;  %1748 = vmatprep.mubr.bf16.mxu0 %v5913_v34  ;;  %v463_v23 = vmul.f32 %v5843_v53, %v387_v1  ;;  %v4530_v40 = vcombine.low %v583_v49, %v587_v54  ;;  %v4539_v22 = vcombine.high %v591_v55, %v595_v13  ;;  %v599_v1 = vld [vmem:[%s8138_s2 + $0x1c8] sm:$0xff] }
  0xba   :  { %1508 = vmatpush1.bf16.msra.mxu1 %v4506_v45  ;;  %v389_v45 = vmul.f32 %v4921_v48, %v5345_v47  ;;  %v386_v42 = vmul.f32 %v4923_v61, %v5347_v50  ;;  %v230_v51 = vpop.xlane.xlu1 %229  ;;  %v4538_v61 = vcombine.low %v591_v55, %v595_v13 }
  0xbb   :  { %1509 = vmatprep.subr.bf16.mxu1 %v4515_v41  ;;  %v221_v41 = vpop.xlane.xlu0 %220 }
  0xbc   :  { %v288_v56 = vmul.f32 0.00390625, %v221_v41  ;;  %v4925_v26 = vpop.eup %4924  ;;  %v465_v52 = vmul.f32 %v5843_v53, %v389_v45  ;;  %v388_v41 = vmul.f32 %v4921_v48, %v5337_v43  ;;  %v603_v45 = vld [vmem:[%s8138_s2 + $0x1e8] sm:$0xff]  ;;  %v291_v48 = vmul.f32 0.00390625, %v230_v51  ;;  %v8396_v43 = vld [vmem:[#allocation41_spill] sm:$0xff] }
  0xbd   :  { %v611_v51 = vld [vmem:[%s8138_s2 + $0x228] sm:$0xff] }
  0xbe   :  { %1510 = vmatpush1.bf16.msra.mxu1 %v4514_v14  ;;  %v4927_v36 = vpop.eup %4926  ;;  %v321_v14 = vadd.f32 1e-06, %v289_v33  ;;  %v320_v47 = vadd.f32 1e-06, %v288_v56  ;;  %v5971_v49 = vpack.c.bf16 %v465_v52, %v463_v23  ;;  %v607_v23 = vld [vmem:[%s8138_s2 + $0x208] sm:$0xff] }
  0xbf   :  { %1511 = vmatprep.subr.bf16.mxu1 %v4523_v17  ;;  %v5961_v17 = vpack.c.bf16 %v460_v57, %v458_v37  ;;  %v391_v54 = vmul.f32 %v4927_v36, %v5374_v0  ;;  %v227_v33 = vpop.xlane.xlu0 %226  ;;  %v462_v37 = vmul.f32 %v5847_v27, %v386_v42  ;;  %v464_v57 = vmul.f32 %v5847_v27, %v388_v41  ;;  %v236_v0 = vpop.xlane.xlu1 %235 }
  0xc0   :  { %1363 = vmatmul.mubr.bf16.gmra.mrb[8].mxu1 %v5933_v9  ;;  %1749 = vmatmul.mubr.bf16.gmra.mrb[8].mxu0 %v5933_v9  ;;  %4932 = vrsqrt.f32 %v321_v14  ;;  %v290_v56 = vmul.f32 0.00390625, %v227_v33  ;;  %v323_v14 = vadd.f32 1e-06, %v291_v48  ;;  %v390_v41 = vmul.f32 %v4927_v36, %v5372_v63 }
  0xc1   :  { %1372 = vmatprep.mubr.bf16.mxu1 %v5943_v19  ;;  %1758 = vmatprep.mubr.bf16.mxu0 %v5943_v19  ;;  %4934 = vrsqrt.f32 %v320_v47  ;;  %v4929_v55 = vpop.eup %4928  ;;  %v467_v13 = vmul.f32 %v5843_v53, %v391_v54  ;;  %v4546_v47 = vcombine.low %v599_v1, %v603_v45  ;;  %v5989_v42 = vpack.c.bf16 %v464_v57, %v462_v37  ;;  %v615_v54 = vld [vmem:[%s8138_s2 + $0x248] sm:$0xff] }
  0xc2   :  { %1512 = vmatpush1.bf16.msra.mxu1 %v4522_v60  ;;  %v393_v60 = vmul.f32 %v4925_v26, %v5363_v59  ;;  %v392_v33 = vmul.f32 %v4925_v26, %v5361_v58  ;;  %v322_v59 = vadd.f32 1e-06, %v290_v56  ;;  %v4554_v36 = vcombine.low %v607_v23, %v611_v51 }
  0xc3   :  { %1513 = vmatprep.subr.bf16.mxu1 %v4531_v32  ;;  %v4547_v32 = vcombine.high %v599_v1, %v603_v45  ;;  %v233_v48 = vpop.xlane.xlu0 %232  ;;  %4936 = vrsqrt.f32 %v323_v14  ;;  %v293_v26 = vmul.f32 0.00390625, %v236_v0  ;;  %v466_v37 = vmul.f32 %v5847_v27, %v390_v41  ;;  %v627_v0 = vld [vmem:[%s8138_s2 + $0x2a8] sm:$0xff] }
  0xc4   :  { %v469_v52 = vmul.f32 %v5843_v53, %v393_v60  ;;  %v619_v60 = vld [vmem:[%s8138_s2 + $0x268] sm:$0xff]  ;;  %v468_v57 = vmul.f32 %v5847_v27, %v392_v33  ;;  %4938 = vrsqrt.f32 %v322_v59  ;;  %v292_v56 = vmul.f32 0.00390625, %v233_v48 }
  0xc5   :  { %v4562_v59 = vcombine.low %v615_v54, %v619_v60  ;;  %v325_v14 = vadd.f32 1e-06, %v293_v26  ;;  %v396_v48 = vmul.f32 %v4929_v55, %v5379_v7 }
  0xc6   :  { %1514 = vmatpush1.bf16.msra.mxu1 %v4530_v40  ;;  %v4931_v40 = vpop.eup %4930  ;;  %v5999_v1 = vpack.c.bf16 %v469_v52, %v467_v13  ;;  %v623_v13 = vld [vmem:[%s8138_s2 + $0x288] sm:$0xff]  ;;  %v6017_v41 = vpack.c.bf16 %v468_v57, %v466_v37 }
  0xc7   :  { %1515 = vmatprep.subr.bf16.mxu1 %v4539_v22  ;;  %v4555_v22 = vcombine.high %v607_v23, %v611_v51  ;;  %v395_v45 = vmul.f32 %v4931_v40, %v5389_v16  ;;  %v394_v33 = vmul.f32 %v4931_v40, %v5387_v15  ;;  %v242_v16 = vpop.xlane.xlu1 %241  ;;  %v239_v26 = vpop.xlane.xlu0 %238  ;;  %v4570_v40 = vcombine.low %v623_v13, %v627_v0 }
  0xc8   :  { %1373 = vmatmul.mubr.bf16.gmra.mrb[12].mxu1 %v5961_v17  ;;  %1759 = vmatmul.mubr.bf16.gmra.mrb[12].mxu0 %v5961_v17  ;;  %4940 = vrsqrt.f32 %v325_v14  ;;  %v472_v57 = vmul.f32 %v5847_v27, %v396_v48  ;;  %v8387_v48 = vld [vmem:[#allocation32_spill] sm:$0xff] }
  0xc9   :  { %1382 = vmatprep.mubr.bf16.mxu1 %v5971_v49  ;;  %1768 = vmatprep.mubr.bf16.mxu0 %v5971_v49  ;;  %v471_v51 = vmul.f32 %v5843_v53, %v395_v45  ;;  %v631_v45 = vld [vmem:[%s8138_s2 + $0x2c8] sm:$0xff]  ;;  %v470_v37 = vmul.f32 %v5847_v27, %v394_v33 }
  0xca   :  { %1516 = vmatpush1.bf16.msra.mxu1 %v4538_v61  ;;  %v397_v61 = vmul.f32 %v4929_v55, %v5381_v12  ;;  %v4933_v23 = vpop.eup %4932  ;;  %v324_v12 = vadd.f32 1e-06, %v292_v56  ;;  %v295_v55 = vmul.f32 0.00390625, %v242_v16  ;;  %v294_v56 = vmul.f32 0.00390625, %v239_v26  ;;  %v643_v16 = vld [vmem:[%s8138_s2 + $0x328] sm:$0xff] }
  0xcb   :  { %1517 = vmatprep.subr.bf16.mxu1 %v4547_v32  ;;  %v4563_v32 = vcombine.high %v615_v54, %v619_v60  ;;  %v6045_v33 = vpack.c.bf16 %v472_v57, %v470_v37  ;;  %v248_v15 = vpop.xlane.xlu1 %247  ;;  %v245_v37 = vpop.xlane.xlu0 %244 }
  0xcc   :  { %v473_v52 = vmul.f32 %v5843_v53, %v397_v61  ;;  %v635_v61 = vld [vmem:[%s8138_s2 + $0x2e8] sm:$0xff]  ;;  %4942 = vrsqrt.f32 %v324_v12  ;;  %v327_v14 = vadd.f32 1e-06, %v295_v55  ;;  %v326_v7 = vadd.f32 1e-06, %v294_v56 }
  0xcd   :  { %v4578_v12 = vcombine.low %v631_v45, %v635_v61  ;;  %8386 = vst [vmem:[#allocation66_spill] sm:$0xff] %v6045_v33  ;;  %v8391_v55 = vld [vmem:[#allocation35_spill] sm:$0xff] }
  0xce   :  { %1518 = vmatpush1.bf16.msra.mxu1 %v4546_v47  ;;  %v4935_v47 = vpop.eup %4934  ;;  %v6027_v54 = vpack.c.bf16 %v473_v52, %v471_v51  ;;  %v639_v51 = vld [vmem:[%s8138_s2 + $0x308] sm:$0xff]  ;;  %4944 = vrsqrt.f32 %v327_v14 }
  0xcf   :  { %1519 = vmatprep.subr.bf16.mxu1 %v4555_v22  ;;  %v4571_v22 = vcombine.high %v623_v13, %v627_v0  ;;  %v399_v60 = vmul.f32 %v4935_v47, %v5418_v38  ;;  %v4937_v13 = vpop.eup %4936  ;;  %v398_v26 = vmul.f32 %v4935_v47, %v8387_v48  ;;  %v4586_v47 = vcombine.low %v639_v51, %v643_v16  ;;  %v663_v14 = vld [vmem:[%s8138_s2 + $0x3c8] sm:$0xff]  ;;  %v254_v58 = vpop.xlane.xlu1 %253 }
  0xd0   :  { %1383 = vmatmul.mubr.bf16.gmra.mrb[16].mxu1 %v5989_v42  ;;  %1769 = vmatmul.mubr.bf16.gmra.mrb[16].mxu0 %v5989_v42  ;;  %4946 = vrsqrt.f32 %v326_v7  ;;  %v299_v25 = vmul.f32 0.00390625, %v254_v58  ;;  %v4811_v58 = vld [vmem:[%s8140_s3 + $0x10] ss:$8 sps:$4 sm:$0xff]  }
  0xd1   :  { %1392 = vmatprep.mubr.bf16.mxu1 %v5999_v1  ;;  %1778 = vmatprep.mubr.bf16.mxu0 %v5999_v1  ;;  %v475_v0 = vmul.f32 %v5843_v53, %v399_v60  ;;  %v647_v60 = vld [vmem:[%s8138_s2 + $0x348] sm:$0xff]  ;;  %v474_v56 = vmul.f32 %v5847_v27, %v398_v26 }
  0xd2   :  { %1520 = vmatpush1.bf16.msra.mxu1 %v4554_v36  ;;  %v401_v36 = vmul.f32 %v4933_v23, %v5411_v29  ;;  %v8388_v29 = vld [vmem:[#allocation30_spill] sm:$0xff] }
  0xd3   :  { %1521 = vmatprep.subr.bf16.mxu1 %v4563_v32  ;;  %v4579_v32 = vcombine.high %v631_v45, %v635_v61  ;;  %v400_v38 = vmul.f32 %v4933_v23, %v8388_v29  ;;  %v8390_v61 = vld [vmem:[#allocation37_spill] sm:$0xff]  ;;  %v297_v23 = vmul.f32 0.00390625, %v248_v15  ;;  %v659_v15 = vld [vmem:[%s8138_s2 + $0x3a8] sm:$0xff] }
  0xd4   :  { %v477_v52 = vmul.f32 %v5843_v53, %v401_v36  ;;  %v651_v36 = vld [vmem:[%s8138_s2 + $0x368] sm:$0xff] }
  0xd5   :  { %v4595_v57 = vcombine.high %v647_v60, %v651_v36  ;;  %v4594_v7 = vcombine.low %v647_v60, %v651_v36  ;;  %v4808_v26 = vld [vmem:[%s8140_s3] ss:$8 sps:$4 sm:$0xff]   ;;  %v8393_v36 = vld [vmem:[#allocation36_spill] sm:$0xff] }
  0xd6   :  { %1522 = vmatpush1.bf16.msra.mxu1 %v4562_v59  ;;  %v4939_v59 = vpop.eup %4938  ;;  %v6055_v45 = vpack.c.bf16 %v477_v52, %v475_v0  ;;  %v476_v0 = vmul.f32 %v5847_v27, %v400_v38  ;;  %v296_v52 = vmul.f32 0.00390625, %v245_v37  ;;  %v329_v37 = vadd.f32 1e-06, %v297_v23 }
  0xd7   :  { %1523 = vmatprep.subr.bf16.mxu1 %v4571_v22  ;;  %v4587_v22 = vcombine.high %v639_v51, %v643_v16  ;;  %v4941_v51 = vpop.eup %4940 }
  0xd8   :  { %1393 = vmatmul.mubr.bf16.gmra.mrb[20].mxu1 %v6017_v41  ;;  %1779 = vmatmul.mubr.bf16.gmra.mrb[20].mxu0 %v6017_v41  ;;  %8389 = vst [vmem:[#allocation67_spill] sm:$0xff] %v6055_v45  ;;  %v4943_v38 = vpop.eup %4942  ;;  %v6085_v60 = vpack.c.bf16 %v476_v0, %v474_v56  ;;  %v328_v48 = vadd.f32 1e-06, %v296_v52  ;;  %v409_v23 = vmul.f32 %v4941_v51, %v8397_v35  ;;  %4948 = vrsqrt.f32 %v329_v37 }
  0xd9   :  { %1402 = vmatprep.mubr.bf16.mxu1 %v6027_v54  ;;  %1788 = vmatprep.mubr.bf16.mxu0 %v6027_v54  ;;  %v407_v50 = vmul.f32 %v4943_v38, %v8396_v43  ;;  %v4495_v37 = vcombine.high %v5854_v62, %v5859_v24 }
  0xda   :  { %1524 = vmatpush1.bf16.msra.mxu1 %v4570_v40  ;;  %v403_v40 = vmul.f32 %v4939_v59, %v8390_v61  ;;  %8392 = vst [vmem:[#allocation68_spill] sm:$0xff] %v6085_v60  ;;  %v8394_v61 = vld [vmem:[#allocation34_spill] sm:$0xff]  ;;  %4950 = vrsqrt.f32 %v328_v48 }
  0xdb   :  { %1525 = vmatprep.subr.bf16.mxu1 %v4579_v32  ;;  %v405_v32 = vmul.f32 %v4937_v13, %v8391_v55  ;;  %v655_v55 = vld [vmem:[%s8138_s2 + $0x388] sm:$0xff]  ;;  %v404_v29 = vmul.f32 %v4937_v13, %v8394_v61  ;;  %v4813_v13 = vld [vmem:[%s8140_s3 + $0x14] ss:$8 sps:$4 sm:$0xff]  }
  0xdc   :  { %v479_v16 = vmul.f32 %v5843_v53, %v403_v40  ;;  %v4603_v40 = vcombine.high %v655_v55, %v659_v15  ;;  %v4602_v39 = vcombine.low %v655_v55, %v659_v15  ;;  %v4945_v55 = vpop.eup %4944  ;;  %v483_v15 = vmul.f32 %v5843_v53, %v407_v50 }
  0xdd   :  { %v480_v0 = vmul.f32 %v5847_v27, %v404_v29  ;;  %v4947_v29 = vpop.eup %4946 }
  0xde   :  { %1526 = vmatpush1.bf16.msra.mxu1 %v4578_v12  ;;  %v481_v12 = vmul.f32 %v5843_v53, %v405_v32  ;;  %v4810_v32 = vld [vmem:[%s8140_s3 + $0x4] ss:$8 sps:$4 sm:$0xff]  }
  0xdf   :  { %1527 = vmatprep.subr.bf16.mxu1 %v4587_v22  ;;  %v667_v22 = vld [vmem:[%s8138_s2 + $0x3e8] sm:$0xff]  ;;  %3810 = vmatprep.subr.bf16.mxu0 %v4810_v32 }
  0xe0   :  { %1403 = vmatmul.mubr.bf16.gmra.mrb[24].mxu1 %v6045_v33  ;;  %1789 = vmatmul.mubr.bf16.gmra.mrb[24].mxu0 %v6045_v33  ;;  %v6089_v63 = vpack.c.bf16 %v481_v12, %v479_v16  ;;  %v4611_v56 = vcombine.high %v663_v14, %v667_v22  ;;  %v485_v16 = vmul.f32 %v5843_v53, %v409_v23  ;;  %v4816_v12 = vld [vmem:[%s8140_s3 + $0x24] ss:$8 sps:$4 sm:$0xff]  }
  0xe1   :  { %1412 = vmatprep.mubr.bf16.mxu1 %v6055_v45  ;;  %1798 = vmatprep.mubr.bf16.mxu0 %v6055_v45  ;;  %v4610_v48 = vcombine.low %v663_v14, %v667_v22  ;;  %v411_v22 = vmul.f32 %v4947_v29, %v5521_v21 }
  0xe2   :  { %1528 = vmatpush1.bf16.msra.mxu1 %v4586_v47  ;;  %v402_v47 = vmul.f32 %v4939_v59, %v8393_v36  ;;  %8395 = vst [vmem:[#allocation69_spill] sm:$0xff] %v6089_v63  ;;  %3811 = vmatpush1.bf16.msra.mxu0 %v4808_v26  ;;  %v331_v26 = vadd.f32 1e-06, %v299_v25  ;;  %v6119_v14 = vpack.c.bf16 %v485_v16, %v483_v15 }
  0xe3   :  { %1529 = vmatprep.subr.bf16.mxu1 %v4595_v57  ;;  %v251_v57 = vpop.xlane.xlu0 %250  ;;  %3812 = vmatprep.subr.bf16.mxu0 %v4813_v13  ;;  %v8402_v13 = vld [vmem:[#allocation43_spill] sm:$0xff]  ;;  %v487_v15 = vmul.f32 %v5843_v53, %v411_v22 }
  0xe4   :  { %v478_v59 = vmul.f32 %v5847_v27, %v402_v47  ;;  %v298_v52 = vmul.f32 0.00390625, %v251_v57  ;;  %v8400_v47 = vld [vmem:[#allocation38_spill] sm:$0xff]  ;;  %8401 = vst [vmem:[#allocation71_spill] sm:$0xff] %v6119_v14  ;;  %v413_v25 = vmul.f32 %v4945_v55, %v8402_v13  ;;  %4952 = vrsqrt.f32 %v331_v26  ;;  %v8407_v13 = vld [vmem:[#allocation49_spill] sm:$0xff] }
  0xe5   :  { %v408_v23 = vmul.f32 %v4941_v51, %v8400_v47 }
  0xe6   :  { %1530 = vmatpush1.bf16.msra.mxu1 %v4594_v7  ;;  %v4814_v7 = vld [vmem:[%s8140_s3 + $0x20] ss:$8 sps:$4 sm:$0xff]   ;;  %3813 = vmatpush1.bf16.msra.mxu0 %v4811_v58  ;;  %v6115_v50 = vpack.c.bf16 %v480_v0, %v478_v59  ;;  %v330_v57 = vadd.f32 1e-06, %v298_v52  ;;  %v4817_v52 = vld [vmem:[%s8140_s3 + $0x30] ss:$8 sps:$4 sm:$0xff]   ;;  %v4949_v58 = vpop.eup %4948  ;;  %v489_v16 = vmul.f32 %v5843_v53, %v413_v25 }
  0xe7   :  { %1531 = vmatprep.subr.bf16.mxu1 %v4603_v40  ;;  %v8399_v40 = vld [vmem:[#allocation40_spill] sm:$0xff]  ;;  %3814 = vmatprep.subr.bf16.mxu0 %v4816_v12  ;;  %v484_v59 = vmul.f32 %v5847_v27, %v408_v23  ;;  %v4822_v12 = vld [vmem:[%s8140_s3 + $0x44] ss:$8 sps:$4 sm:$0xff]  }
  0xe8   :  { %1413 = vmatmul.mubr.bf16.gmra.mrb[28].mxu1 %v6085_v60  ;;  %1799 = vmatmul.mubr.bf16.gmra.mrb[28].mxu0 %v6085_v60  ;;  %8398 = vst [vmem:[#allocation70_spill] sm:$0xff] %v6115_v50  ;;  %v406_v32 = vmul.f32 %v4943_v38, %v8399_v40  ;;  %v4819_v38 = vld [vmem:[%s8140_s3 + $0x34] ss:$8 sps:$4 sm:$0xff]   ;;  %4954 = vrsqrt.f32 %v330_v57  ;;  %v8405_v57 = vld [vmem:[#allocation42_spill] sm:$0xff] }
  0xe9   :  { %1422 = vmatprep.mubr.bf16.mxu1 %v6089_v63  ;;  %1808 = vmatprep.mubr.bf16.mxu0 %v6089_v63 }
  0xea   :  { %1532 = vmatpush1.bf16.msra.mxu1 %v4602_v39  ;;  %v260_v39 = vpop.xlane.xlu1 %259  ;;  %3815 = vmatpush1.bf16.msra.mxu0 %v4814_v7  ;;  %v482_v51 = vmul.f32 %v5847_v27, %v406_v32  ;;  %v4820_v7 = vld [vmem:[%s8140_s3 + $0x40] ss:$8 sps:$4 sm:$0xff]   ;;  %v8404_v32 = vld [vmem:[#allocation44_spill] sm:$0xff] }
  0xeb   :  { %1533 = vmatprep.subr.bf16.mxu1 %v4611_v56  ;;  %v257_v56 = vpop.xlane.xlu0 %256  ;;  %v301_v35 = vmul.f32 0.00390625, %v260_v39  ;;  %3816 = vmatprep.subr.bf16.mxu0 %v4819_v38  ;;  %v410_v23 = vmul.f32 %v4947_v29, %v8404_v32  ;;  %v412_v39 = vmul.f32 %v4945_v55, %v8405_v57  ;;  %v8408_v38 = vld [vmem:[#allocation47_spill] sm:$0xff] }
  0xec   :  { %v300_v0 = vmul.f32 0.00390625, %v257_v56  ;;  %v6147_v56 = vpack.c.bf16 %v489_v16, %v487_v15  ;;  %v417_v47 = vmul.f32 %v4949_v58, %v8408_v38  ;;  %v4828_v16 = vld [vmem:[%s8140_s3 + $0x64] ss:$8 sps:$4 sm:$0xff]  }
  0xed   :  { %v333_v26 = vadd.f32 1e-06, %v301_v35  ;;  %v4825_v35 = vld [vmem:[%s8140_s3 + $0x54] ss:$8 sps:$4 sm:$0xff]   ;;  %v486_v55 = vmul.f32 %v5847_v27, %v410_v23  ;;  %v488_v29 = vmul.f32 %v5847_v27, %v412_v39 }
  0xee   :  { %1534 = vmatpush1.bf16.msra.mxu1 %v4610_v48  ;;  %v4951_v48 = vpop.eup %4950  ;;  %3817 = vmatpush1.bf16.msra.mxu0 %v4817_v52  ;;  %v332_v22 = vadd.f32 1e-06, %v300_v0  ;;  %v266_v25 = vpop.xlane.xlu1 %265  ;;  %8406 = vst [vmem:[#allocation73_spill] sm:$0xff] %v6147_v56  ;;  %v493_v15 = vmul.f32 %v5843_v53, %v417_v47  ;;  %v8410_v23 = vld [vmem:[#allocation48_spill] sm:$0xff] }
  0xef   :  { %1889 = vmatprep.subr.bf16.mxu1 %v4495_v37  ;;  %v6143_v37 = vpack.c.bf16 %v484_v59, %v482_v51  ;;  %3818 = vmatprep.subr.bf16.mxu0 %v4822_v12  ;;  %v415_v21 = vmul.f32 %v4951_v48, %v8407_v13  ;;  %v263_v43 = vpop.xlane.xlu0 %262  ;;  %4956 = vrsqrt.f32 %v333_v26  ;;  %v303_v40 = vmul.f32 0.00390625, %v266_v25  ;;  %v4823_v59 = vld [vmem:[%s8140_s3 + $0x50] ss:$8 sps:$4 sm:$0xff]   ;;  %v4953_v0 = vpop.eup %4952 }
  0xf0   :  { %1423 = vmatmul.mubr.bf16.gmra.mrb[32].mxu1 %v6115_v50  ;;  %1809 = vmatmul.mubr.bf16.gmra.mrb[32].mxu0 %v6115_v50  ;;  %4958 = vrsqrt.f32 %v332_v22  ;;  %v302_v51 = vmul.f32 0.00390625, %v263_v43  ;;  %v4826_v43 = vld [vmem:[%s8140_s3 + $0x60] ss:$8 sps:$4 sm:$0xff]   ;;  %v6171_v26 = vpack.c.bf16 %v488_v29, %v486_v55  ;;  %v414_v39 = vmul.f32 %v4951_v48, %v8410_v23  ;;  %v8413_v13 = vld [vmem:[#allocation53_spill] sm:$0xff] }
  0xf1   :  { %1432 = vmatprep.mubr.bf16.mxu1 %v6119_v14  ;;  %1818 = vmatprep.mubr.bf16.mxu0 %v6119_v14  ;;  %8403 = vst [vmem:[#allocation72_spill] sm:$0xff] %v6143_v37  ;;  %v491_v52 = vmul.f32 %v5843_v53, %v415_v21  ;;  %v8411_v22 = vld [vmem:[#allocation46_spill] sm:$0xff]  ;;  %v4829_v29 = vld [vmem:[%s8140_s3 + $0x70] ss:$8 sps:$4 sm:$0xff]  }
  0xf2   :  { %3819 = vmatpush1.bf16.msra.mxu0 %v4820_v7  ;;  %v4955_v12 = vpop.eup %4954  ;;  %v335_v7 = vadd.f32 1e-06, %v303_v40  ;;  %8409 = vst [vmem:[#allocation74_spill] sm:$0xff] %v6171_v26  ;;  %v416_v21 = vmul.f32 %v4949_v58, %v8411_v22  ;;  %v334_v25 = vadd.f32 1e-06, %v302_v51  ;;  %v272_v47 = vpop.xlane.xlu1 %271  ;;  %v490_v58 = vmul.f32 %v5847_v27, %v414_v39 }
  0xf3   :  { %3820 = vmatprep.subr.bf16.mxu0 %v4825_v35  ;;  %v6175_v38 = vpack.c.bf16 %v493_v15, %v491_v52  ;;  %v419_v57 = vmul.f32 %v4955_v12, %v8413_v13  ;;  %v8414_v35 = vld [vmem:[#allocation51_spill] sm:$0xff]  ;;  %v269_v61 = vpop.xlane.xlu0 %268  ;;  %v305_v36 = vmul.f32 0.00390625, %v272_v47  ;;  %v4831_v40 = vld [vmem:[%s8140_s3 + $0x74] ss:$8 sps:$4 sm:$0xff]  }
  0xf4   :  { %v421_v32 = vmul.f32 %v4953_v0, %v8414_v35  ;;  %4960 = vrsqrt.f32 %v335_v7  ;;  %v492_v48 = vmul.f32 %v5847_v27, %v416_v21  ;;  %v304_v55 = vmul.f32 0.00390625, %v269_v61  ;;  %v4834_v61 = vld [vmem:[%s8140_s3 + $0x84] ss:$8 sps:$4 sm:$0xff]   ;;  %v8416_v7 = vld [vmem:[#allocation52_spill] sm:$0xff] }
  0xf5   :  { %8412 = vst [vmem:[#allocation75_spill] sm:$0xff] %v6175_v38  ;;  %4962 = vrsqrt.f32 %v334_v25  ;;  %v418_v39 = vmul.f32 %v4955_v12, %v8416_v7  ;;  %v8417_v21 = vld [vmem:[#allocation50_spill] sm:$0xff]  ;;  %v4837_v12 = vld [vmem:[%s8140_s3 + $0x94] ss:$8 sps:$4 sm:$0xff]  }
  0xf6   :  { %3821 = vmatpush1.bf16.msra.mxu0 %v4823_v59  ;;  %v495_v59 = vmul.f32 %v5843_v53, %v419_v57  ;;  %v497_v52 = vmul.f32 %v5843_v53, %v421_v32  ;;  %v420_v25 = vmul.f32 %v4953_v0, %v8417_v21  ;;  %v336_v47 = vadd.f32 1e-06, %v304_v55  ;;  %v4832_v57 = vld [vmem:[%s8140_s3 + $0x80] ss:$8 sps:$4 sm:$0xff]  }
  0xf7   :  { %3822 = vmatprep.subr.bf16.mxu0 %v4828_v16  ;;  %v337_v16 = vadd.f32 1e-06, %v305_v36  ;;  %v494_v0 = vmul.f32 %v5847_v27, %v418_v39  ;;  %v8421_v39 = vld [vmem:[#allocation56_spill] sm:$0xff]  ;;  %v8425_v21 = vld [vmem:[#allocation59_spill] sm:$0xff] }
  0xf8   :  { %1433 = vmatmul.mubr.bf16.gmra.mrb[36].mxu1 %v6143_v37  ;;  %1819 = vmatmul.mubr.bf16.gmra.mrb[36].mxu0 %v6143_v37  ;;  %v6203_v32 = vpack.c.bf16 %v497_v52, %v495_v59 }
  0xf9   :  { %1442 = vmatprep.mubr.bf16.mxu1 %v6147_v56  ;;  %1828 = vmatprep.mubr.bf16.mxu0 %v6147_v56  ;;  %v4957_v51 = vpop.eup %4956  ;;  %4964 = vrsqrt.f32 %v337_v16 }
  0xfa   :  { %3823 = vmatpush1.bf16.msra.mxu0 %v4826_v43  ;;  %v4959_v15 = vpop.eup %4958  ;;  %v6196_v43 = vpack.c.bf16 %v492_v48, %v490_v58  ;;  %8418 = vst [vmem:[#allocation77_spill] sm:$0xff] %v6203_v32  ;;  %v496_v58 = vmul.f32 %v5847_v27, %v420_v25  ;;  %4966 = vrsqrt.f32 %v336_v47  ;;  %v4835_v48 = vld [vmem:[%s8140_s3 + $0x90] ss:$8 sps:$4 sm:$0xff]   ;;  %v8422_v47 = vld [vmem:[#allocation54_spill] sm:$0xff] }
  0xfb   :  { %3824 = vmatprep.subr.bf16.mxu0 %v4831_v40  ;;  %v423_v36 = vmul.f32 %v4959_v15, %v5644_v46  ;;  %v8419_v40 = vld [vmem:[#allocation55_spill] sm:$0xff]  ;;  %v422_v25 = vmul.f32 %v4959_v15, %v8421_v39  ;;  %v8424_v46 = vld [vmem:[#allocation61_spill] sm:$0xff] }
  0xfc   :  { %8415 = vst [vmem:[#allocation76_spill] sm:$0xff] %v6196_v43 }
  0xfd   :  { %v499_v59 = vmul.f32 %v5843_v53, %v423_v36  ;;  %v4840_v36 = vld [vmem:[%s8140_s3 + $0xa4] ss:$8 sps:$4 sm:$0xff]  }
  0xfe   :  { %3825 = vmatpush1.bf16.msra.mxu0 %v4829_v29  ;;  %v425_v29 = vmul.f32 %v4957_v51, %v8419_v40  ;;  %v4961_v55 = vpop.eup %4960 }
  0xff   :  { %3826 = vmatprep.subr.bf16.mxu0 %v4834_v61  ;;  %v4963_v16 = vpop.eup %4962  ;;  %v6221_v61 = vpack.c.bf16 %v496_v58, %v494_v0  ;;  %v429_v13 = vmul.f32 %v4961_v55, %v8425_v21  ;;  %v8428_v21 = vld [vmem:[#allocation58_spill] sm:$0xff] }
 0x100   :  { %1443 = vmatmul.mubr.bf16.gmra.mrb[40].mxu1 %v6171_v26  ;;  %1829 = vmatmul.mubr.bf16.gmra.mrb[40].mxu0 %v6171_v26  ;;  %v501_v52 = vmul.f32 %v5843_v53, %v425_v29  ;;  %v427_v35 = vmul.f32 %v4963_v16, %v8424_v46  ;;  %v4838_v29 = vld [vmem:[%s8140_s3 + $0xa0] ss:$8 sps:$4 sm:$0xff]   ;;  %v428_v46 = vmul.f32 %v4961_v55, %v8428_v21 }
 0x101   :  { %1452 = vmatprep.mubr.bf16.mxu1 %v6175_v38  ;;  %1838 = vmatprep.mubr.bf16.mxu0 %v6175_v38  ;;  %8420 = vst [vmem:[#allocation78_spill] sm:$0xff] %v6221_v61  ;;  %v505_v58 = vmul.f32 %v5843_v53, %v429_v13 }
 0x102   :  { %3827 = vmatpush1.bf16.msra.mxu0 %v4832_v57  ;;  %v424_v57 = vmul.f32 %v4957_v51, %v8422_v47  ;;  %v6225_v40 = vpack.c.bf16 %v501_v52, %v499_v59  ;;  %v498_v51 = vmul.f32 %v5847_v27, %v422_v25  ;;  %v503_v0 = vmul.f32 %v5843_v53, %v427_v35  ;;  %v4841_v52 = vld [vmem:[%s8140_s3 + $0xb0] ss:$8 sps:$4 sm:$0xff]  }
 0x103   :  { %3828 = vmatprep.subr.bf16.mxu0 %v4837_v12  ;;  %v4965_v12 = vpop.eup %4964 }
 0x104   :  { %8423 = vst [vmem:[#allocation79_spill] sm:$0xff] %v6225_v40  ;;  %v500_v15 = vmul.f32 %v5847_v27, %v424_v57  ;;  %v4967_v59 = vpop.eup %4966  ;;  %v8427_v57 = vld [vmem:[#allocation60_spill] sm:$0xff]  ;;  %v6253_v35 = vpack.c.bf16 %v505_v58, %v503_v0  ;;  %v433_v47 = vmul.f32 %v4965_v12, %v5712_v2 }
 0x105   :  { %v431_v13 = vmul.f32 %v4967_v59, %v5716_v28 }
 0x106   :  { %3829 = vmatpush1.bf16.msra.mxu0 %v4835_v48  ;;  %v4843_v48 = vld [vmem:[%s8140_s3 + $0xb4] ss:$8 sps:$4 sm:$0xff]   ;;  %v6249_v25 = vpack.c.bf16 %v500_v15, %v498_v51  ;;  %8429 = vst [vmem:[#allocation81_spill] sm:$0xff] %v6253_v35  ;;  %v4844_v51 = vld [vmem:[%s8140_s3 + $0xc0] ss:$8 sps:$4 sm:$0xff]   ;;  %v509_v0 = vmul.f32 %v5843_v53, %v433_v47 }
 0x107   :  { %3830 = vmatprep.subr.bf16.mxu0 %v4840_v36  ;;  %v426_v36 = vmul.f32 %v4963_v16, %v8427_v57  ;;  %v504_v16 = vmul.f32 %v5847_v27, %v428_v46  ;;  %v507_v15 = vmul.f32 %v5843_v53, %v431_v13  ;;  %v4849_v46 = vld [vmem:[%s8140_s3 + $0xd4] ss:$8 sps:$4 sm:$0xff]  }
 0x108   :  { %1453 = vmatmul.mubr.bf16.gmra.mrb[44].mxu1 %v6196_v43  ;;  %1839 = vmatmul.mubr.bf16.gmra.mrb[44].mxu0 %v6196_v43  ;;  %8426 = vst [vmem:[#allocation80_spill] sm:$0xff] %v6249_v25 }
 0x109   :  { %1462 = vmatprep.mubr.bf16.mxu1 %v6203_v32  ;;  %1848 = vmatprep.mubr.bf16.mxu0 %v6203_v32  ;;  %v502_v55 = vmul.f32 %v5847_v27, %v426_v36  ;;  %v4847_v36 = vld [vmem:[%s8140_s3 + $0xd0] ss:$8 sps:$4 sm:$0xff]  }
 0x10a   :  { %3831 = vmatpush1.bf16.msra.mxu0 %v4838_v29  ;;  %v4846_v29 = vld [vmem:[%s8140_s3 + $0xc4] ss:$8 sps:$4 sm:$0xff]  }
 0x10b   :  { %3832 = vmatprep.subr.bf16.mxu0 %v4843_v48  ;;  %v6271_v58 = vpack.c.bf16 %v504_v16, %v502_v55  ;;  %v430_v48 = vmul.f32 %v4967_v59, %v5714_v20  ;;  %v4850_v59 = vld [vmem:[%s8140_s3 + $0xe0] ss:$8 sps:$4 sm:$0xff]   ;;  %v553_v55 = vld [vmem:[%s8138_s2 + $0x58] sm:$0xff] }
 0x10c   :  { %v557_v16 = vld [vmem:[%s8138_s2 + $0x78] sm:$0xff] }
 0x10d   :  { %v506_v53 = vmul.f32 %v5847_v27, %v430_v48  ;;  %v565_v48 = vld [vmem:[%s8138_s2 + $0xb8] sm:$0xff] }
 0x10e   :  { %3833 = vmatpush1.bf16.msra.mxu0 %v4841_v52  ;;  %v432_v52 = vmul.f32 %v4965_v12, %v5701_v18  ;;  %v4852_v12 = vld [vmem:[%s8140_s3 + $0xe4] ss:$8 sps:$4 sm:$0xff]  }
 0x10f   :  { %3834 = vmatprep.subr.bf16.mxu0 %v4846_v29  ;;  %v6275_v29 = vpack.c.bf16 %v509_v0, %v507_v15  ;;  %v4503_v15 = vcombine.high %v553_v55, %v557_v16  ;;  %v561_v0 = vld [vmem:[%s8138_s2 + $0x98] sm:$0xff] }
 0x110   :  { %1463 = vmatmul.mubr.bf16.gmra.mrb[48].mxu1 %v6221_v61  ;;  %1849 = vmatmul.mubr.bf16.gmra.mrb[48].mxu0 %v6221_v61  ;;  %v508_v47 = vmul.f32 %v5847_v27, %v432_v52  ;;  %v4855_v27 = vld [vmem:[%s8140_s3 + $0xf4] ss:$8 sps:$4 sm:$0xff]   ;;  %v8432_v52 = vcombine.low %v5854_v62, %v5859_v24 }
 0x111   :  { %1472 = vmatprep.mubr.bf16.mxu1 %v6225_v40  ;;  %1858 = vmatprep.mubr.bf16.mxu0 %v6225_v40  ;;  %8430 = vst [vmem:[#allocation82_spill] sm:$0xff] %v6275_v29  ;;  %v577_v62 = vld [vmem:[%s8138_s2 + $0x118] sm:$0xff] }
 0x112   :  { %3835 = vmatpush1.bf16.msra.mxu0 %v4844_v51  ;;  %v6295_v13 = vpack.c.bf16 %v508_v47, %v506_v53  ;;  %v4853_v51 = vld [vmem:[%s8140_s3 + $0xf0] ss:$8 sps:$4 sm:$0xff]  }
 0x113   :  { %3836 = vmatprep.subr.bf16.mxu0 %v4849_v46  ;;  %v4502_v46 = vcombine.low %v553_v55, %v557_v16  ;;  %v569_v53 = vld [vmem:[%s8138_s2 + $0xd8] sm:$0xff] }
 0x114   :  { %8431 = vst [vmem:[#allocation83_spill] sm:$0xff] %v6295_v13  ;;  %v573_v47 = vld [vmem:[%s8138_s2 + $0xf8] sm:$0xff] }
 0x115   :  { %v581_v24 = vld [vmem:[%s8138_s2 + $0x138] sm:$0xff] }
 0x116   :  { %3837 = vmatpush1.bf16.msra.mxu0 %v4847_v36  ;;  %v4511_v36 = vcombine.high %v561_v0, %v565_v48  ;;  %v585_v55 = vld [vmem:[%s8138_s2 + $0x158] sm:$0xff] }
 0x117   :  { %3838 = vmatprep.subr.bf16.mxu0 %v4852_v12  ;;  %v4510_v12 = vcombine.low %v561_v0, %v565_v48  ;;  %v589_v16 = vld [vmem:[%s8138_s2 + $0x178] sm:$0xff] }
 0x118   :  { %1473 = vmatmul.mubr.bf16.gmra.mrb[52].mxu1 %v6249_v25  ;;  %1859 = vmatmul.mubr.bf16.gmra.mrb[52].mxu0 %v6249_v25  ;;  %v4535_v0 = vcombine.high %v585_v55, %v589_v16  ;;  %v593_v48 = vld [vmem:[%s8138_s2 + $0x198] sm:$0xff] }
 0x119   :  { %1482 = vmatprep.mubr.bf16.mxu1 %v6253_v35  ;;  %1868 = vmatprep.mubr.bf16.mxu0 %v6253_v35 }
 0x11a   :  { %3839 = vmatpush1.bf16.msra.mxu0 %v4850_v59  ;;  %v4519_v59 = vcombine.high %v569_v53, %v573_v47 }
 0x11b   :  { %3840 = vmatprep.subr.bf16.mxu0 %v4855_v27  ;;  %v4518_v27 = vcombine.low %v569_v53, %v573_v47  ;;  %v601_v53 = vld [vmem:[%s8138_s2 + $0x1d8] sm:$0xff] }
 0x11c   :  { %v605_v47 = vld [vmem:[%s8138_s2 + $0x1f8] sm:$0xff] }
 0x11e   :  { %3841 = vmatpush1.bf16.msra.mxu0 %v4853_v51  ;;  %v4527_v51 = vcombine.high %v577_v62, %v581_v24 }
 0x120   :  { %1483 = vmatmul.mubr.bf16.gmra.mrb[56].mxu1 %v6271_v58  ;;  %1869 = vmatmul.mubr.bf16.gmra.mrb[56].mxu0 %v6271_v58 }
 0x121   :  { %1492 = vmatprep.mubr.bf16.mxu1 %v6275_v29  ;;  %1878 = vmatprep.mubr.bf16.mxu0 %v6275_v29 }
 0x128   :  { %1493 = vmatmul.mubr.bf16.gmra.mrb[60].mxu1 %v6295_v13  ;;  %1879 = vmatmul.mubr.bf16.gmra.mrb[60].mxu0 %v6295_v13 }
 0x129   :  { %1535 = vmatprep.mubr.bf16.mxu1 %v5876_v11 }
 0x130   :  { %1536 = vmatmul.mubr.bf16.vlgmr.msra.gmra.mrb[64].mxu1 %v5878_v6 }
 0x131   :  { %1890 = vmatpush1.bf16.msra.mxu1 %v8432_v52  ;;  %1545 = vmatprep.mubr.bf16.mxu1 %v5881_v8  ;;  %v597_v52 = vld [vmem:[%s8138_s2 + $0x1b8] sm:$0xff] }
 0x132   :  { %1891 = vmatprep.subr.bf16.mxu1 %v4503_v15  ;;  %v4526_v15 = vcombine.low %v577_v62, %v581_v24  ;;  %v609_v62 = vld [vmem:[%s8138_s2 + $0x218] sm:$0xff] }
 0x133   :  { %v613_v24 = vld [vmem:[%s8138_s2 + $0x238] sm:$0xff] }
 0x135   :  { %1892 = vmatpush1.bf16.msra.mxu1 %v4502_v46  ;;  %v4534_v46 = vcombine.low %v585_v55, %v589_v16  ;;  %v617_v55 = vld [vmem:[%s8138_s2 + $0x258] sm:$0xff] }
 0x136   :  { %1893 = vmatprep.subr.bf16.mxu1 %v4511_v36  ;;  %v4543_v36 = vcombine.high %v593_v48, %v597_v52  ;;  %v621_v16 = vld [vmem:[%s8138_s2 + $0x278] sm:$0xff] }
 0x138   :  { %1546 = vmatmul.mubr.bf16.gmra.mrb[68].mxu1 %v5917_v44 }
 0x139   :  { %1555 = vmatprep.mubr.bf16.mxu1 %v5913_v34  ;;  %1894 = vmatpush1.bf16.msra.mxu1 %v4510_v12  ;;  %v4542_v12 = vcombine.low %v593_v48, %v597_v52  ;;  %v625_v48 = vld [vmem:[%s8138_s2 + $0x298] sm:$0xff] }
 0x13a   :  { %1895 = vmatprep.subr.bf16.mxu1 %v4519_v59  ;;  %v4551_v59 = vcombine.high %v601_v53, %v605_v47  ;;  %v629_v52 = vld [vmem:[%s8138_s2 + $0x2b8] sm:$0xff] }
 0x13d   :  { %1896 = vmatpush1.bf16.msra.mxu1 %v4518_v27  ;;  %v4550_v27 = vcombine.low %v601_v53, %v605_v47  ;;  %v633_v53 = vld [vmem:[%s8138_s2 + $0x2d8] sm:$0xff] }
 0x13e   :  { %1897 = vmatprep.subr.bf16.mxu1 %v4527_v51  ;;  %v4559_v51 = vcombine.high %v609_v62, %v613_v24  ;;  %v637_v47 = vld [vmem:[%s8138_s2 + $0x2f8] sm:$0xff] }
 0x140   :  { %1556 = vmatmul.mubr.bf16.gmra.mrb[72].mxu1 %v5933_v9 }
 0x141   :  { %1565 = vmatprep.mubr.bf16.mxu1 %v5943_v19  ;;  %1898 = vmatpush1.bf16.msra.mxu1 %v4526_v15  ;;  %v4558_v15 = vcombine.low %v609_v62, %v613_v24  ;;  %v641_v62 = vld [vmem:[%s8138_s2 + $0x318] sm:$0xff] }
 0x142   :  { %1899 = vmatprep.subr.bf16.mxu1 %v4535_v0  ;;  %v4567_v0 = vcombine.high %v617_v55, %v621_v16  ;;  %v645_v24 = vld [vmem:[%s8138_s2 + $0x338] sm:$0xff] }
 0x145   :  { %1900 = vmatpush1.bf16.msra.mxu1 %v4534_v46  ;;  %v4566_v46 = vcombine.low %v617_v55, %v621_v16  ;;  %v649_v55 = vld [vmem:[%s8138_s2 + $0x358] sm:$0xff] }
 0x146   :  { %1901 = vmatprep.subr.bf16.mxu1 %v4543_v36  ;;  %v4575_v36 = vcombine.high %v625_v48, %v629_v52  ;;  %v653_v16 = vld [vmem:[%s8138_s2 + $0x378] sm:$0xff] }
 0x148   :  { %1566 = vmatmul.mubr.bf16.gmra.mrb[76].mxu1 %v5961_v17 }
 0x149   :  { %1575 = vmatprep.mubr.bf16.mxu1 %v5971_v49  ;;  %1902 = vmatpush1.bf16.msra.mxu1 %v4542_v12  ;;  %v4574_v12 = vcombine.low %v625_v48, %v629_v52  ;;  %v657_v48 = vld [vmem:[%s8138_s2 + $0x398] sm:$0xff] }
 0x14a   :  { %1903 = vmatprep.subr.bf16.mxu1 %v4551_v59  ;;  %v4583_v59 = vcombine.high %v633_v53, %v637_v47  ;;  %v661_v52 = vld [vmem:[%s8138_s2 + $0x3b8] sm:$0xff] }
 0x14d   :  { %1904 = vmatpush1.bf16.msra.mxu1 %v4550_v27  ;;  %v4582_v27 = vcombine.low %v633_v53, %v637_v47  ;;  %v665_v53 = vld [vmem:[%s8138_s2 + $0x3d8] sm:$0xff] }
 0x14e   :  { %1905 = vmatprep.subr.bf16.mxu1 %v4559_v51  ;;  %v4591_v51 = vcombine.high %v641_v62, %v645_v24  ;;  %v669_v47 = vld [vmem:[%s8138_s2 + $0x3f8] sm:$0xff] }
 0x150   :  { %1576 = vmatmul.mubr.bf16.gmra.mrb[80].mxu1 %v5989_v42 }
 0x151   :  { %1585 = vmatprep.mubr.bf16.mxu1 %v5999_v1  ;;  %1906 = vmatpush1.bf16.msra.mxu1 %v4558_v15  ;;  %v4590_v15 = vcombine.low %v641_v62, %v645_v24  ;;  %v4614_v62 = vcombine.low %v665_v53, %v669_v47 }
 0x152   :  { %1907 = vmatprep.subr.bf16.mxu1 %v4567_v0  ;;  %v4599_v0 = vcombine.high %v649_v55, %v653_v16 }
 0x155   :  { %1908 = vmatpush1.bf16.msra.mxu1 %v4566_v46  ;;  %v4598_v46 = vcombine.low %v649_v55, %v653_v16 }
 0x156   :  { %1909 = vmatprep.subr.bf16.mxu1 %v4575_v36  ;;  %v4607_v36 = vcombine.high %v657_v48, %v661_v52 }
 0x158   :  { %1586 = vmatmul.mubr.bf16.gmra.mrb[84].mxu1 %v6017_v41 }
 0x159   :  { %1595 = vmatprep.mubr.bf16.mxu1 %v6027_v54  ;;  %1910 = vmatpush1.bf16.msra.mxu1 %v4574_v12  ;;  %v4606_v12 = vcombine.low %v657_v48, %v661_v52 }
 0x15a   :  { %1911 = vmatprep.subr.bf16.mxu1 %v4583_v59  ;;  %v4615_v59 = vcombine.high %v665_v53, %v669_v47 }
 0x15d   :  { %1912 = vmatpush1.bf16.msra.mxu1 %v4582_v27 }
 0x15e   :  { %1913 = vmatprep.subr.bf16.mxu1 %v4591_v51 }
 0x160   :  { %1596 = vmatmul.mubr.bf16.gmra.mrb[88].mxu1 %v6045_v33 }
 0x161   :  { %1605 = vmatprep.mubr.bf16.mxu1 %v6055_v45  ;;  %1914 = vmatpush1.bf16.msra.mxu1 %v4590_v15 }
 0x162   :  { %1915 = vmatprep.subr.bf16.mxu1 %v4599_v0 }
 0x165   :  { %1916 = vmatpush1.bf16.msra.mxu1 %v4598_v46 }
 0x166   :  { %1917 = vmatprep.subr.bf16.mxu1 %v4607_v36 }
 0x168   :  { %1606 = vmatmul.mubr.bf16.gmra.mrb[92].mxu1 %v6085_v60 }
 0x169   :  { %1615 = vmatprep.mubr.bf16.mxu1 %v6089_v63  ;;  %1918 = vmatpush1.bf16.msra.mxu1 %v4606_v12 }
 0x16a   :  { %1919 = vmatprep.subr.bf16.mxu1 %v4615_v59 }
 0x16d   :  { %1920 = vmatpush1.bf16.msra.mxu1 %v4614_v62 }
 0x170   :  { %1616 = vmatmul.mubr.bf16.gmra.mrb[96].mxu1 %v6115_v50 }
 0x171   :  { %1625 = vmatprep.mubr.bf16.mxu1 %v6119_v14 }
 0x178   :  { %1626 = vmatmul.mubr.bf16.gmra.mrb[100].mxu1 %v6143_v37 }
 0x179   :  { %1635 = vmatprep.mubr.bf16.mxu1 %v6147_v56 }
 0x180   :  { %1636 = vmatmul.mubr.bf16.gmra.mrb[104].mxu1 %v6171_v26 }
 0x181   :  { %1645 = vmatprep.mubr.bf16.mxu1 %v6175_v38 }
 0x183   :  { %v1344_v24 = vpop.f32.mrb[0].mxu1  ;;  %v6421_v27 = vpop.f32.mrb[0].mxu0 }
 0x184   :  { %v2210_v51 = vmul.f32 0.044715, %v1344_v24  ;;  %v1346_v55 = vpop.f32.mrb[1].mxu1  ;;  %v6423_v16 = vpop.f32.mrb[1].mxu0 }
 0x185   :  { %v2211_v15 = vmul.f32 0.044715, %v1346_v55  ;;  %v1348_v0 = vpop.f32.mrb[2].mxu1  ;;  %v6425_v48 = vpop.f32.mrb[2].mxu0 }
 0x186   :  { %v2338_v52 = vmul.f32 %v2210_v51, %v1344_v24  ;;  %v2214_v46 = vmul.f32 0.044715, %v1348_v0  ;;  %v1350_v36 = vpop.f32.mrb[3].mxu1  ;;  %v6427_v53 = vpop.f32.mrb[3].mxu0  ;;  %v2086_v4 = vmul.f32 0.5, %v1348_v0 }
 0x187   :  { %v2339_v47 = vmul.f32 %v2211_v15, %v1346_v55  ;;  %v2215_v12 = vmul.f32 0.044715, %v1350_v36 }
 0x188   :  { %v2466_v59 = vmul.f32 %v2338_v52, %v1344_v24  ;;  %v2342_v62 = vmul.f32 %v2214_v46, %v1348_v0  ;;  %1646 = vmatmul.mubr.bf16.gmra.mrb[108].mxu1 %v6196_v43 }
 0x189   :  { %v2467_v2 = vmul.f32 %v2339_v47, %v1346_v55  ;;  %v2343_v18 = vmul.f32 %v2215_v12, %v1350_v36  ;;  %1655 = vmatprep.mubr.bf16.mxu1 %v6203_v32 }
 0x18a   :  { %v2594_v28 = vadd.f32 %v2466_v59, %v1344_v24  ;;  %v2470_v20 = vmul.f32 %v2342_v62, %v1348_v0 }
 0x18b   :  { %v2595_v21 = vadd.f32 %v2467_v2, %v1346_v55  ;;  %v2471_v57 = vmul.f32 %v2343_v18, %v1350_v36  ;;  %v1354_v39 = vpop.f32.mrb[4].mxu1  ;;  %v6431_v51 = vpop.f32.mrb[4].mxu0 }
 0x18c   :  { %v2722_v7 = vmul.f32 0.7978846, %v2594_v28  ;;  %v2598_v22 = vadd.f32 %v2470_v20, %v1348_v0  ;;  %v2218_v23 = vmul.f32 0.044715, %v1354_v39  ;;  %v1356_v15 = vpop.f32.mrb[5].mxu1  ;;  %v6433_v30 = vpop.f32.mrb[5].mxu0 }
 0x18d   :  { %v2723_v31 = vmul.f32 0.7978846, %v2595_v21  ;;  %v2599_v52 = vadd.f32 %v2471_v57, %v1350_v36  ;;  %v2219_v46 = vmul.f32 0.044715, %v1356_v15  ;;  %v1358_v10 = vpop.f32.mrb[6].mxu1  ;;  %v6435_v59 = vpop.f32.mrb[6].mxu0 }
 0x18e   :  { %4968 = vtanh.f32 %v2722_v7  ;;  %v2726_v47 = vmul.f32 0.7978846, %v2598_v22  ;;  %v2346_v12 = vmul.f32 %v2218_v23, %v1354_v39  ;;  %v2222_v62 = vmul.f32 0.044715, %v1358_v10  ;;  %v1360_v5 = vpop.f32.mrb[7].mxu1  ;;  %v6437_v28 = vpop.f32.mrb[7].mxu0 }
 0x18f   :  { %4970 = vtanh.f32 %v2723_v31  ;;  %v2727_v18 = vmul.f32 0.7978846, %v2599_v52  ;;  %v2347_v2 = vmul.f32 %v2219_v46, %v1356_v15  ;;  %v2223_v21 = vmul.f32 0.044715, %v1360_v5 }
 0x190   :  { %4972 = vtanh.f32 %v2726_v47  ;;  %v2474_v20 = vmul.f32 %v2346_v12, %v1354_v39  ;;  %1656 = vmatmul.mubr.bf16.gmra.mrb[112].mxu1 %v6221_v61  ;;  %v2082_v57 = vmul.f32 0.5, %v1344_v24  ;;  %v2350_v22 = vmul.f32 %v2222_v62, %v1358_v10 }
 0x191   :  { %4974 = vtanh.f32 %v2727_v18  ;;  %v2475_v7 = vmul.f32 %v2347_v2, %v1356_v15  ;;  %1665 = vmatprep.mubr.bf16.mxu1 %v6225_v40  ;;  %v2083_v23 = vmul.f32 0.5, %v1346_v55  ;;  %v2351_v52 = vmul.f32 %v2223_v21, %v1360_v5 }
 0x192   :  { %v2602_v31 = vadd.f32 %v2474_v20, %v1354_v39  ;;  %v6441_v46 = vmul.f32 0.5, %v1350_v36  ;;  %v6443_v3 = vmul.f32 0.5, %v1354_v39  ;;  %v2478_v47 = vmul.f32 %v2350_v22, %v1358_v10 }
 0x193   :  { %v2603_v32 = vadd.f32 %v2475_v7, %v1356_v15  ;;  %v1364_v12 = vpop.f32.mrb[8].mxu1  ;;  %v6445_v43 = vpop.f32.mrb[8].mxu0  ;;  %v6447_v24 = vmul.f32 0.5, %v1356_v15  ;;  %v2479_v18 = vmul.f32 %v2351_v52, %v1360_v5  ;;  %v6449_v55 = vmul.f32 0.5, %v1358_v10 }
 0x194   :  { %v2730_v61 = vmul.f32 0.7978846, %v2602_v31  ;;  %v2226_v2 = vmul.f32 0.044715, %v1364_v12  ;;  %v1366_v62 = vpop.f32.mrb[9].mxu1  ;;  %v2606_v0 = vadd.f32 %v2478_v47, %v1358_v10  ;;  %v6451_v36 = vpop.f32.mrb[9].mxu0 }
 0x195   :  { %v2731_v40 = vmul.f32 0.7978846, %v2603_v32  ;;  %v2227_v20 = vmul.f32 0.044715, %v1366_v62  ;;  %v6453_v39 = vmul.f32 0.5, %v1360_v5  ;;  %v2607_v21 = vadd.f32 %v2479_v18, %v1360_v5  ;;  %v1368_v22 = vpop.f32.mrb[10].mxu1 }
 0x196   :  { %4976 = vtanh.f32 %v2730_v61  ;;  %v2354_v7 = vmul.f32 %v2226_v2, %v1364_v12  ;;  %v6455_v38 = vpop.f32.mrb[10].mxu0  ;;  %v2734_v15 = vmul.f32 0.7978846, %v2606_v0  ;;  %v2230_v52 = vmul.f32 0.044715, %v1368_v22  ;;  %v6457_v26 = vpop.f32.mrb[11].mxu1 }
 0x197   :  { %4978 = vtanh.f32 %v2731_v40  ;;  %v2355_v31 = vmul.f32 %v2227_v20, %v1366_v62  ;;  %v6459_v32 = vpop.f32.mrb[11].mxu0  ;;  %v2735_v47 = vmul.f32 0.7978846, %v2607_v21  ;;  %v6461_v37 = vmul.f32 0.5, %v1364_v12 }
 0x198   :  { %v4969_v10 = vpop.eup %4968  ;;  %v2482_v56 = vmul.f32 %v2354_v7, %v1364_v12  ;;  %v2231_v61 = vmul.f32 0.044715, %v6457_v26  ;;  %1666 = vmatmul.mubr.bf16.gmra.mrb[116].mxu1 %v6249_v25  ;;  %4980 = vtanh.f32 %v2734_v15  ;;  %v2358_v2 = vmul.f32 %v2230_v52, %v1368_v22 }
 0x199   :  { %v4971_v5 = vpop.eup %4970  ;;  %v2978_v18 = vadd.f32 1.0, %v4969_v10  ;;  %v2483_v40 = vmul.f32 %v2355_v31, %v1366_v62  ;;  %1675 = vmatprep.mubr.bf16.mxu1 %v6253_v35  ;;  %4982 = vtanh.f32 %v2735_v47 }
 0x19a   :  { %v4973_v0 = vpop.eup %4972  ;;  %v2979_v20 = vadd.f32 1.0, %v4971_v5  ;;  %v2610_v14 = vadd.f32 %v2482_v56, %v1364_v12  ;;  %v2359_v21 = vmul.f32 %v2231_v61, %v6457_v26  ;;  %v2486_v45 = vmul.f32 %v2358_v2, %v1368_v22 }
 0x19b   :  { %v4975_v7 = vpop.eup %4974  ;;  %v3106_v50 = vmul.f32 %v2978_v18, %v2082_v57  ;;  %v2982_v63 = vadd.f32 1.0, %v4973_v0  ;;  %v2611_v60 = vadd.f32 %v2483_v40, %v1366_v62  ;;  %v6467_v33 = vpop.f32.mrb[12].mxu1 }
 0x19c   :  { %v6469_v25 = vpop.f32.mrb[12].mxu0  ;;  %v3107_v15 = vmul.f32 %v2979_v20, %v2083_v23  ;;  %v2983_v31 = vadd.f32 1.0, %v4975_v7  ;;  %v2738_v52 = vmul.f32 0.7978846, %v2610_v14  ;;  %v2487_v10 = vmul.f32 %v2359_v21, %v6457_v26  ;;  %v6472_v35 = vpop.f32.mrb[13].mxu1 }
 0x19d   :  { %v6474_v47 = vpop.f32.mrb[13].mxu0  ;;  %v3234_v56 = vmul.f32 %v3106_v50, %v6421_v27  ;;  %v3110_v12 = vmul.f32 %v2982_v63, %v2086_v4  ;;  %v2739_v57 = vmul.f32 0.7978846, %v2611_v60  ;;  %v2614_v61 = vadd.f32 %v2486_v45, %v1368_v22  ;;  %v6477_v5 = vpop.f32.mrb[14].mxu1 }
 0x19e   :  { %v6479_v18 = vpop.f32.mrb[14].mxu0  ;;  %v3235_v40 = vmul.f32 %v3107_v15, %v6423_v16  ;;  %v3111_v23 = vmul.f32 %v2983_v31, %v6441_v46  ;;  %4984 = vtanh.f32 %v2738_v52  ;;  %v6483_v14 = vmul.f32 0.5, %v1366_v62  ;;  %v6485_v2 = vpop.f32.mrb[15].mxu1 }
 0x19f   :  { %v6487_v0 = vpop.f32.mrb[15].mxu0  ;;  %v3238_v50 = vmul.f32 %v3110_v12, %v6425_v48  ;;  %4986 = vtanh.f32 %v2739_v57  ;;  %v2742_v4 = vmul.f32 0.7978846, %v2614_v61  ;;  %v2615_v63 = vadd.f32 %v2487_v10, %v6457_v26 }
 0x1a0   :  { %v4977_v45 = vpop.eup %4976  ;;  %v3239_v60 = vmul.f32 %v3111_v23, %v6427_v53  ;;  %v6492_v27 = vmul.f32 0.5, %v1368_v22  ;;  %v2234_v16 = vmul.f32 0.044715, %v6467_v33  ;;  %v2235_v46 = vmul.f32 0.044715, %v6472_v35  ;;  %1676 = vmatmul.mubr.bf16.gmra.mrb[120].mxu1 %v6271_v58 }
 0x1a1   :  { %v4979_v62 = vpop.eup %4978  ;;  %v3362_v20 = vpack.c.bf16 %v3238_v50, %v3234_v56  ;;  %v2986_v21 = vadd.f32 1.0, %v4977_v45  ;;  %4988 = vtanh.f32 %v2742_v4  ;;  %v2743_v48 = vmul.f32 0.7978846, %v2615_v63  ;;  %1685 = vmatprep.mubr.bf16.mxu1 %v6275_v29 }
 0x1a2   :  { %v3363_v7 = vpack.c.bf16 %v3239_v60, %v3235_v40  ;;  %v2987_v15 = vadd.f32 1.0, %v4979_v62  ;;  %v2362_v31 = vmul.f32 %v2234_v16, %v6467_v33  ;;  %v2363_v53 = vmul.f32 %v2235_v46, %v6472_v35  ;;  %v4981_v22 = vpop.eup %4980 }
 0x1a3   :  { %v3114_v52 = vmul.f32 %v2986_v21, %v6443_v3  ;;  %v6502_v10 = vmul.f32 0.5, %v6457_v26  ;;  %4990 = vtanh.f32 %v2743_v48  ;;  %v2238_v56 = vmul.f32 0.044715, %v6477_v5  ;;  %v6505_v12 = vpop.f32.mrb[16].mxu1  ;;  %v6507_v57 = vpop.f32.mrb[16].mxu0 }
 0x1a4   :  { %v4983_v61 = vpop.eup %4982  ;;  %v3115_v40 = vmul.f32 %v2987_v15, %v6447_v24  ;;  %v2990_v23 = vadd.f32 1.0, %v4981_v22  ;;  %v2490_v50 = vmul.f32 %v2362_v31, %v6467_v33  ;;  %v2491_v4 = vmul.f32 %v2363_v53, %v6472_v35  ;;  %v6512_v63 = vpop.f32.mrb[17].mxu1  ;;  %3842 = vmatprep.mubr.bf16.mxu0 %v3363_v7 }
 0x1a5   :  { %v6514_v3 = vpop.f32.mrb[17].mxu0  ;;  %v3242_v26 = vmul.f32 %v3114_v52, %v6431_v51  ;;  %v2991_v45 = vadd.f32 1.0, %v4983_v61  ;;  %v6518_v60 = vmul.f32 0.5, %v6467_v33  ;;  %v2366_v16 = vmul.f32 %v2238_v56, %v6477_v5  ;;  %v6521_v46 = vpop.f32.mrb[18].mxu1  ;;  %3843 = vmatmul.mubr.bf16.vlgmr.msra.gmra.mrb[64].mxu0 %v3362_v20 }
 0x1a6   :  { %v6523_v24 = vpop.f32.mrb[18].mxu0  ;;  %v3243_v62 = vmul.f32 %v3115_v40, %v6433_v30  ;;  %v3118_v21 = vmul.f32 %v2990_v23, %v6449_v55  ;;  %v2618_v48 = vadd.f32 %v2490_v50, %v6467_v33  ;;  %v2619_v7 = vadd.f32 %v2491_v4, %v6472_v35  ;;  %v6529_v51 = vpop.f32.mrb[19].mxu1 }
 0x1a7   :  { %v6531_v15 = vpop.f32.mrb[19].mxu0  ;;  %v3119_v31 = vmul.f32 %v2991_v45, %v6453_v39  ;;  %v6535_v53 = vmul.f32 0.5, %v6472_v35  ;;  %v2494_v22 = vmul.f32 %v2366_v16, %v6477_v5  ;;  %v2239_v20 = vmul.f32 0.044715, %v6485_v2 }
 0x1a8   :  { %v4985_v30 = vpop.eup %4984  ;;  %v3246_v55 = vmul.f32 %v3118_v21, %v6435_v59  ;;  %v2746_v52 = vmul.f32 0.7978846, %v2618_v48  ;;  %v2747_v33 = vmul.f32 0.7978846, %v2619_v7  ;;  %v2242_v56 = vmul.f32 0.044715, %v6505_v12  ;;  %1686 = vmatmul.mubr.bf16.gmra.mrb[124].mxu1 %v6295_v13 }
 0x1a9   :  { %v4987_v61 = vpop.eup %4986  ;;  %v3247_v40 = vmul.f32 %v3119_v31, %v6437_v28  ;;  %v2994_v39 = vadd.f32 1.0, %v4985_v30  ;;  %v2622_v35 = vadd.f32 %v2494_v22, %v6477_v5  ;;  %v2367_v23 = vmul.f32 %v2239_v20, %v6485_v2  ;;  %1921 = vmatprep.mubr.bf16.mxu1 %v5876_v11 }
 0x1aa   :  { %v3366_v50 = vpack.c.bf16 %v3246_v55, %v3242_v26  ;;  %v2995_v4 = vadd.f32 1.0, %v4987_v61  ;;  %4992 = vtanh.f32 %v2746_v52  ;;  %v2370_v59 = vmul.f32 %v2242_v56, %v6505_v12 }
 0x1ab   :  { %v4989_v45 = vpop.eup %4988  ;;  %v3367_v16 = vpack.c.bf16 %v3247_v40, %v3243_v62  ;;  %v3122_v21 = vmul.f32 %v2994_v39, %v6461_v37  ;;  %4994 = vtanh.f32 %v2747_v33  ;;  %v2750_v48 = vmul.f32 0.7978846, %v2622_v35  ;;  %v6548_v7 = vpop.f32.mrb[20].mxu1 }
 0x1ac   :  { %v6550_v28 = vpop.f32.mrb[20].mxu0  ;;  %v3123_v31 = vmul.f32 %v2995_v4, %v6483_v14  ;;  %v2998_v22 = vadd.f32 1.0, %v4989_v45  ;;  %v2495_v11 = vmul.f32 %v2367_v23, %v6485_v2  ;;  %v2498_v26 = vmul.f32 %v2370_v59, %v6505_v12  ;;  %v6555_v20 = vpop.f32.mrb[21].mxu1 }
 0x1ad   :  { %v6557_v30 = vpop.f32.mrb[21].mxu0  ;;  %v4991_v62 = vpop.eup %4990  ;;  %v6560_v37 = vmul.f32 %v3122_v21, %v6445_v43  ;;  %v6563_v55 = vmul.f32 0.5, %v6477_v5  ;;  %4996 = vtanh.f32 %v2750_v48  ;;  %v2243_v52 = vmul.f32 0.044715, %v6512_v63  ;;  %3852 = vmatprep.mubr.bf16.mxu0 %v3367_v16 }
 0x1ae   :  { %v6566_v14 = vpop.f32.mrb[22].mxu1  ;;  %v6568_v33 = vpop.f32.mrb[22].mxu0  ;;  %v3251_v56 = vmul.f32 %v3123_v31, %v6451_v36  ;;  %v3126_v61 = vmul.f32 %v2998_v22, %v6492_v27  ;;  %v2999_v40 = vadd.f32 1.0, %v4991_v62  ;;  %v2623_v39 = vadd.f32 %v2495_v11, %v6485_v2  ;;  %3853 = vmatmul.mubr.bf16.gmra.mrb[68].mxu0 %v3366_v50 }
 0x1af   :  { %v6573_v43 = vpop.f32.mrb[23].mxu1  ;;  %v6575_v5 = vpop.f32.mrb[23].mxu0  ;;  %v6578_v35 = vmul.f32 0.5, %v6485_v2  ;;  %v2626_v23 = vadd.f32 %v2498_v26, %v6505_v12  ;;  %v2371_v4 = vmul.f32 %v2243_v52, %v6512_v63  ;;  %v2246_v59 = vmul.f32 0.044715, %v6521_v46 }
 0x1b0   :  { %v3254_v36 = vmul.f32 %v3126_v61, %v6455_v38  ;;  %v3127_v27 = vmul.f32 %v2999_v40, %v6502_v10  ;;  %v2751_v45 = vmul.f32 0.7978846, %v2623_v39  ;;  %v6586_v50 = vmul.f32 0.5, %v6505_v12  ;;  %1922 = vmatmul.mubr.bf16.vlgmr.msra.gmra.mrb[128].mxu1 %v5878_v6 }
 0x1b1   :  { %v2754_v16 = vmul.f32 0.7978846, %v2626_v23  ;;  %v2499_v2 = vmul.f32 %v2371_v4, %v6512_v63  ;;  %v2374_v21 = vmul.f32 %v2246_v59, %v6521_v46  ;;  %v2247_v48 = vmul.f32 0.044715, %v6529_v51  ;;  %1931 = vmatprep.mubr.bf16.mxu1 %v5881_v8 }
 0x1b2   :  { %v3370_v31 = vpack.c.bf16 %v3254_v36, %v6560_v37  ;;  %v3255_v38 = vmul.f32 %v3127_v27, %v6459_v32  ;;  %4998 = vtanh.f32 %v2751_v45  ;;  %v6596_v10 = vmul.f32 0.5, %v6512_v63 }
 0x1b3   :  { %5000 = vtanh.f32 %v2754_v16  ;;  %v2627_v6 = vadd.f32 %v2499_v2, %v6512_v63  ;;  %v2502_v12 = vmul.f32 %v2374_v21, %v6521_v46  ;;  %v2375_v22 = vmul.f32 %v2247_v48, %v6529_v51  ;;  %v6601_v11 = vpop.f32.mrb[24].mxu1  ;;  %v6603_v26 = vpop.f32.mrb[24].mxu0 }
 0x1b4   :  { %v4993_v8 = vpop.eup %4992  ;;  %v3371_v62 = vpack.c.bf16 %v3255_v38, %v3251_v56  ;;  %v6606_v37 = vmul.f32 0.5, %v6521_v46  ;;  %v2250_v32 = vmul.f32 0.044715, %v6548_v7  ;;  %v2251_v52 = vmul.f32 0.044715, %v6555_v20  ;;  %v6610_v61 = vpop.f32.mrb[25].mxu1 }
 0x1b5   :  { %v4995_v63 = vpop.eup %4994  ;;  %v3002_v40 = vadd.f32 1.0, %v4993_v8  ;;  %v2755_v39 = vmul.f32 0.7978846, %v2627_v6  ;;  %v2630_v23 = vadd.f32 %v2502_v12, %v6521_v46  ;;  %v2503_v4 = vmul.f32 %v2375_v22, %v6529_v51  ;;  %v6614_v59 = vpop.f32.mrb[25].mxu0 }
 0x1b6   :  { %v6616_v36 = vpop.f32.mrb[26].mxu1  ;;  %v3003_v56 = vadd.f32 1.0, %v4995_v63  ;;  %v6619_v27 = vmul.f32 0.5, %v6529_v51  ;;  %v2378_v45 = vmul.f32 %v2250_v32, %v6548_v7  ;;  %v2379_v16 = vmul.f32 %v2251_v52, %v6555_v20  ;;  %3862 = vmatprep.mubr.bf16.mxu0 %v3371_v62  ;;  %v6623_v2 = vpop.f32.mrb[26].mxu0 }
 0x1b7   :  { %v6625_v21 = vpop.f32.mrb[27].mxu1  ;;  %v4997_v46 = vpop.eup %4996  ;;  %v3130_v48 = vmul.f32 %v3002_v40, %v6518_v60  ;;  %5002 = vtanh.f32 %v2755_v39  ;;  %v2758_v38 = vmul.f32 0.7978846, %v2630_v23  ;;  %v2631_v6 = vadd.f32 %v2503_v4, %v6529_v51  ;;  %3863 = vmatmul.mubr.bf16.gmra.mrb[72].mxu0 %v3370_v31 }
 0x1b8   :  { %v6629_v12 = vpop.f32.mrb[27].mxu0  ;;  %v3131_v22 = vmul.f32 %v3003_v56, %v6535_v53  ;;  %v3006_v8 = vadd.f32 1.0, %v4997_v46  ;;  %v2506_v32 = vmul.f32 %v2378_v45, %v6548_v7  ;;  %v2507_v62 = vmul.f32 %v2379_v16, %v6555_v20  ;;  %1932 = vmatmul.mubr.bf16.gmra.mrb[132].mxu1 %v5917_v44 }
 0x1b9   :  { %v6636_v52 = vmul.f32 %v3130_v48, %v6469_v25  ;;  %5004 = vtanh.f32 %v2758_v38  ;;  %v2759_v60 = vmul.f32 0.7978846, %v2631_v6  ;;  %v2254_v63 = vmul.f32 0.044715, %v6566_v14  ;;  %1941 = vmatprep.mubr.bf16.mxu1 %v5913_v34 }
 0x1ba   :  { %v6641_v51 = vmul.f32 %v3131_v22, %v6474_v47  ;;  %v3134_v53 = vmul.f32 %v3006_v8, %v6563_v55  ;;  %v2634_v31 = vadd.f32 %v2506_v32, %v6548_v7  ;;  %v2635_v40 = vadd.f32 %v2507_v62, %v6555_v20 }
 0x1bb   :  { %5006 = vtanh.f32 %v2759_v60  ;;  %v6647_v44 = vmul.f32 0.5, %v6548_v7  ;;  %v2382_v25 = vmul.f32 %v2254_v63, %v6566_v14  ;;  %v2255_v39 = vmul.f32 0.044715, %v6573_v43  ;;  %v6651_v23 = vpop.f32.mrb[28].mxu1  ;;  %v6653_v34 = vpop.f32.mrb[28].mxu0 }
 0x1bc   :  { %v4999_v47 = vpop.eup %4998  ;;  %v6656_v4 = vmul.f32 %v3134_v53, %v6479_v18  ;;  %v2762_v55 = vmul.f32 0.7978846, %v2634_v31  ;;  %v6659_v56 = vmul.f32 0.5, %v6555_v20  ;;  %v2763_v45 = vmul.f32 0.7978846, %v2635_v40  ;;  %v6661_v16 = vpop.f32.mrb[29].mxu1 }
 0x1bd   :  { %v5001_v7 = vpop.eup %5000  ;;  %v3007_v46 = vadd.f32 1.0, %v4999_v47  ;;  %v2510_v48 = vmul.f32 %v2382_v25, %v6566_v14  ;;  %v2383_v38 = vmul.f32 %v2255_v39, %v6573_v43  ;;  %v2258_v6 = vmul.f32 0.044715, %v6601_v11  ;;  %v6666_v22 = vpop.f32.mrb[29].mxu0 }
 0x1be   :  { %v6668_v8 = vpop.f32.mrb[30].mxu1  ;;  %v3374_v18 = vpack.c.bf16 %v6656_v4, %v6636_v52  ;;  %v3010_v20 = vadd.f32 1.0, %v5001_v7  ;;  %5008 = vtanh.f32 %v2762_v55  ;;  %v6673_v32 = vmul.f32 0.5, %v6566_v14  ;;  %v6675_v62 = vpop.f32.mrb[30].mxu0  ;;  %v4858_v7 = vld [vmem:[%s8140_s3 + $0x104] ss:$8 sps:$4 sm:$0xff]  }
 0x1bf   :  { %v6677_v60 = vpop.f32.mrb[31].mxu1  ;;  %v3135_v63 = vmul.f32 %v3007_v46, %v6578_v35  ;;  %5010 = vtanh.f32 %v2763_v45  ;;  %v2638_v53 = vadd.f32 %v2510_v48, %v6566_v14  ;;  %v2511_v31 = vmul.f32 %v2383_v38, %v6573_v43  ;;  %v6682_v40 = vpop.f32.mrb[31].mxu0  ;;  %v4856_v35 = vld [vmem:[%s8140_s3 + $0x100] ss:$8 sps:$4 sm:$0xff]   ;;  %4003 = vmatprep.subr.bf16.mxu0 %v4858_v7 }
 0x1c0   :  { %v3138_v52 = vmul.f32 %v3010_v20, %v6586_v50  ;;  %v6686_v25 = vmul.f32 0.5, %v6573_v43  ;;  %v2386_v39 = vmul.f32 %v2258_v6, %v6601_v11  ;;  %v2259_v47 = vmul.f32 0.044715, %v6610_v61  ;;  %1942 = vmatmul.mubr.bf16.gmra.mrb[136].mxu1 %v5933_v9  ;;  %4004 = vmatpush1.bf16.msra.mxu0 %v4856_v35  ;;  %v4864_v35 = vld [vmem:[%s8140_s3 + $0x124] ss:$8 sps:$4 sm:$0xff]  }
 0x1c1   :  { %v5003_v14 = vpop.eup %5002  ;;  %v3263_v4 = vmul.f32 %v3135_v63, %v6487_v0  ;;  %v2766_v55 = vmul.f32 0.7978846, %v2638_v53  ;;  %v2639_v45 = vadd.f32 %v2511_v31, %v6573_v43  ;;  %v2262_v50 = vmul.f32 0.044715, %v6616_v36  ;;  %1951 = vmatprep.mubr.bf16.mxu1 %v5943_v19  ;;  %v4861_v0 = vld [vmem:[%s8140_s3 + $0x114] ss:$8 sps:$4 sm:$0xff]  }
 0x1c2   :  { %v6702_v9 = vmul.f32 %v3138_v52, %v6507_v57  ;;  %v3011_v46 = vadd.f32 1.0, %v5003_v14  ;;  %v2514_v48 = vmul.f32 %v2386_v39, %v6601_v11  ;;  %v2387_v38 = vmul.f32 %v2259_v47, %v6610_v61  ;;  %4005 = vmatprep.subr.bf16.mxu0 %v4861_v0 }
 0x1c3   :  { %v5005_v43 = vpop.eup %5004  ;;  %v3375_v6 = vpack.c.bf16 %v3263_v4, %v6641_v51  ;;  %5012 = vtanh.f32 %v2766_v55  ;;  %v2767_v19 = vmul.f32 0.7978846, %v2639_v45  ;;  %v2390_v20 = vmul.f32 %v2262_v50, %v6616_v36  ;;  %v6711_v63 = vpop.f32.mrb[32].mxu1  ;;  %v4859_v51 = vld [vmem:[%s8140_s3 + $0x110] ss:$8 sps:$4 sm:$0xff]  }
 0x1c4   :  { %v6713_v57 = vpop.f32.mrb[32].mxu0  ;;  %v3139_v53 = vmul.f32 %v3011_v46, %v6596_v10  ;;  %v3014_v31 = vadd.f32 1.0, %v5005_v43  ;;  %v2642_v52 = vadd.f32 %v2514_v48, %v6601_v11  ;;  %v2515_v39 = vmul.f32 %v2387_v38, %v6610_v61  ;;  %v6718_v47 = vpop.f32.mrb[33].mxu1  ;;  %4006 = vmatpush1.bf16.msra.mxu0 %v4859_v51 }
 0x1c5   :  { %v6720_v14 = vpop.f32.mrb[33].mxu0  ;;  %v5007_v4 = vpop.eup %5006  ;;  %5014 = vtanh.f32 %v2767_v19  ;;  %v2518_v55 = vmul.f32 %v2390_v20, %v6616_v36  ;;  %v2263_v10 = vmul.f32 0.044715, %v6625_v21  ;;  %3872 = vmatprep.mubr.bf16.mxu0 %v3375_v6  ;;  %v6741_v6 = vmul.f32 0.5, %v6601_v11  ;;  %v4862_v11 = vld [vmem:[%s8140_s3 + $0x120] ss:$8 sps:$4 sm:$0xff]   ;;  %4007 = vmatprep.subr.bf16.mxu0 %v4864_v35 }
 0x1c6   :  { %v6727_v45 = vpop.f32.mrb[34].mxu1  ;;  %v6729_v50 = vpop.f32.mrb[34].mxu0  ;;  %v3267_v7 = vmul.f32 %v3139_v53, %v6514_v3  ;;  %v3142_v46 = vmul.f32 %v3014_v31, %v6606_v37  ;;  %v3015_v48 = vadd.f32 1.0, %v5007_v4  ;;  %v2770_v38 = vmul.f32 0.7978846, %v2642_v52  ;;  %3873 = vmatmul.mubr.bf16.gmra.mrb[76].mxu0 %v3374_v18 }
 0x1c7   :  { %v6736_v43 = vpop.f32.mrb[35].mxu1  ;;  %v6738_v19 = vpop.f32.mrb[35].mxu0  ;;  %v2643_v0 = vadd.f32 %v2515_v39, %v6610_v61  ;;  %v2646_v20 = vadd.f32 %v2518_v55, %v6616_v36  ;;  %v2391_v13 = vmul.f32 %v2263_v10, %v6625_v21  ;;  %v2266_v18 = vmul.f32 0.044715, %v6651_v23  ;;  %v4867_v53 = vld [vmem:[%s8140_s3 + $0x134] ss:$8 sps:$4 sm:$0xff]  }
 0x1c8   :  { %v5009_v29 = vpop.eup %5008  ;;  %v3270_v3 = vmul.f32 %v3142_v46, %v6523_v24  ;;  %v3143_v37 = vmul.f32 %v3015_v48, %v6619_v27  ;;  %5016 = vtanh.f32 %v2770_v38  ;;  %1952 = vmatmul.mubr.bf16.gmra.mrb[140].mxu1 %v5961_v17  ;;  %v6763_v46 = vmul.f32 0.5, %v6610_v61  ;;  %4008 = vmatpush1.bf16.msra.mxu0 %v4862_v11  ;;  %v4865_v61 = vld [vmem:[%s8140_s3 + $0x130] ss:$8 sps:$4 sm:$0xff]  }
 0x1c9   :  { %v5011_v31 = vpop.eup %5010  ;;  %v3018_v52 = vadd.f32 1.0, %v5009_v29  ;;  %v2771_v39 = vmul.f32 0.7978846, %v2643_v0  ;;  %v2774_v24 = vmul.f32 0.7978846, %v2646_v20  ;;  %v2519_v27 = vmul.f32 %v2391_v13, %v6625_v21  ;;  %1961 = vmatprep.mubr.bf16.mxu1 %v5971_v49  ;;  %4009 = vmatprep.subr.bf16.mxu0 %v4867_v53 }
 0x1ca   :  { %v3378_v17 = vpack.c.bf16 %v3270_v3, %v6702_v9  ;;  %v3271_v51 = vmul.f32 %v3143_v37, %v6531_v15  ;;  %v3019_v4 = vadd.f32 1.0, %v5011_v31  ;;  %v2394_v55 = vmul.f32 %v2266_v18, %v6651_v23 }
 0x1cb   :  { %v3146_v10 = vmul.f32 %v3018_v52, %v6647_v44  ;;  %5018 = vtanh.f32 %v2771_v39  ;;  %v2647_v29 = vadd.f32 %v2519_v27, %v6625_v21  ;;  %v6766_v48 = vpop.f32.mrb[36].mxu1  ;;  %v6768_v13 = vpop.f32.mrb[36].mxu0  ;;  %v4870_v44 = vld [vmem:[%s8140_s3 + $0x144] ss:$8 sps:$4 sm:$0xff]   ;;  %v2267_v3 = vmul.f32 0.044715, %v6661_v16 }
 0x1cc   :  { %v3379_v49 = vpack.c.bf16 %v3271_v51, %v3267_v7  ;;  %v3147_v9 = vmul.f32 %v3019_v4, %v6659_v56  ;;  %5020 = vtanh.f32 %v2774_v24  ;;  %v2522_v15 = vmul.f32 %v2394_v55, %v6651_v23  ;;  %v6772_v35 = vpop.f32.mrb[37].mxu1  ;;  %v6774_v38 = vpop.f32.mrb[37].mxu0  ;;  %4010 = vmatpush1.bf16.msra.mxu0 %v4865_v61 }
 0x1cd   :  { %v5013_v0 = vpop.eup %5012  ;;  %v6783_v7 = vmul.f32 %v3146_v10, %v6550_v28  ;;  %v6786_v56 = vmul.f32 0.5, %v6616_v36  ;;  %v2775_v20 = vmul.f32 0.7978846, %v2647_v29  ;;  %v6789_v37 = vpop.f32.mrb[38].mxu1  ;;  %v2270_v52 = vmul.f32 0.044715, %v6668_v8  ;;  %4011 = vmatprep.subr.bf16.mxu0 %v4870_v44 }
 0x1ce   :  { %v6792_v18 = vmul.f32 %v3147_v9, %v6557_v30  ;;  %v3022_v11 = vadd.f32 1.0, %v5013_v0  ;;  %v2650_v31 = vadd.f32 %v2522_v15, %v6651_v23  ;;  %3882 = vmatprep.mubr.bf16.mxu0 %v3379_v49  ;;  %v6796_v28 = vpop.f32.mrb[38].mxu0  ;;  %v6798_v39 = vpop.f32.mrb[39].mxu1  ;;  %v6801_v24 = vmul.f32 0.5, %v6625_v21  ;;  %v4868_v21 = vld [vmem:[%s8140_s3 + $0x140] ss:$8 sps:$4 sm:$0xff]  }
 0x1cf   :  { %v5015_v36 = vpop.eup %5014  ;;  %5022 = vtanh.f32 %v2775_v20  ;;  %v2395_v53 = vmul.f32 %v2267_v3, %v6661_v16  ;;  %v2271_v30 = vmul.f32 0.044715, %v6677_v60  ;;  %3883 = vmatmul.mubr.bf16.gmra.mrb[80].mxu0 %v3378_v17  ;;  %v6805_v27 = vpop.f32.mrb[39].mxu0  ;;  %v2398_v10 = vmul.f32 %v2270_v52, %v6668_v8 }
 0x1d0   :  { %v3150_v51 = vmul.f32 %v3022_v11, %v6673_v32  ;;  %v3023_v4 = vadd.f32 1.0, %v5015_v36  ;;  %v2778_v55 = vmul.f32 0.7978846, %v2650_v31  ;;  %1962 = vmatmul.mubr.bf16.gmra.mrb[144].mxu1 %v5989_v42  ;;  %v6814_v29 = vmul.f32 0.5, %v6651_v23  ;;  %v4873_v42 = vld [vmem:[%s8140_s3 + $0x154] ss:$8 sps:$4 sm:$0xff]   ;;  %4012 = vmatpush1.bf16.msra.mxu0 %v4868_v21 }
 0x1d1   :  { %v2523_v17 = vmul.f32 %v2395_v53, %v6661_v16  ;;  %v2399_v49 = vmul.f32 %v2271_v30, %v6677_v60  ;;  %v2274_v32 = vmul.f32 0.044715, %v6711_v63  ;;  %1971 = vmatprep.mubr.bf16.mxu1 %v5999_v1  ;;  %v2526_v23 = vmul.f32 %v2398_v10, %v6668_v8  ;;  %4013 = vmatprep.subr.bf16.mxu0 %v4873_v42  ;;  %v4876_v42 = vld [vmem:[%s8140_s3 + $0x164] ss:$8 sps:$4 sm:$0xff]  }
 0x1d2   :  { %v5017_v9 = vpop.eup %5016  ;;  %v3278_v15 = vmul.f32 %v3150_v51, %v6568_v33  ;;  %v3151_v61 = vmul.f32 %v3023_v4, %v6686_v25  ;;  %5024 = vtanh.f32 %v2778_v55  ;;  %v6836_v25 = vmul.f32 0.5, %v6661_v16 }
 0x1d3   :  { %v3026_v0 = vadd.f32 1.0, %v5017_v9  ;;  %v2651_v20 = vadd.f32 %v2523_v17, %v6661_v16  ;;  %v2527_v3 = vmul.f32 %v2399_v49, %v6677_v60  ;;  %v2402_v1 = vmul.f32 %v2274_v32, %v6711_v63  ;;  %v6829_v44 = vpop.f32.mrb[40].mxu1  ;;  %v6831_v11 = vpop.f32.mrb[40].mxu0  ;;  %v4871_v16 = vld [vmem:[%s8140_s3 + $0x150] ss:$8 sps:$4 sm:$0xff]  }
 0x1d4   :  { %v3382_v31 = vpack.c.bf16 %v3278_v15, %v6783_v7  ;;  %v3279_v33 = vmul.f32 %v3151_v61, %v6575_v5  ;;  %v2654_v52 = vadd.f32 %v2526_v23, %v6668_v8  ;;  %v6839_v36 = vpop.f32.mrb[41].mxu1  ;;  %v6841_v53 = vpop.f32.mrb[41].mxu0  ;;  %4014 = vmatpush1.bf16.msra.mxu0 %v4871_v16 }
 0x1d5   :  { %v5019_v30 = vpop.eup %5018  ;;  %v3154_v51 = vmul.f32 %v3026_v0, %v6741_v6  ;;  %v2779_v4 = vmul.f32 0.7978846, %v2651_v20  ;;  %v2655_v55 = vadd.f32 %v2527_v3, %v6677_v60  ;;  %v2530_v7 = vmul.f32 %v2402_v1, %v6711_v63  ;;  %v6846_v10 = vpop.f32.mrb[42].mxu1  ;;  %4015 = vmatprep.subr.bf16.mxu0 %v4876_v42 }
 0x1d6   :  { %v6848_v5 = vpop.f32.mrb[42].mxu0  ;;  %v5021_v17 = vpop.eup %5020  ;;  %v3383_v21 = vpack.c.bf16 %v3279_v33, %v6792_v18  ;;  %v3027_v49 = vadd.f32 1.0, %v5019_v30  ;;  %v2782_v32 = vmul.f32 0.7978846, %v2654_v52  ;;  %v2275_v6 = vmul.f32 0.044715, %v6718_v47 }
 0x1d7   :  { %v6855_v9 = vpop.f32.mrb[43].mxu1  ;;  %v6858_v15 = vmul.f32 %v3154_v51, %v6603_v26  ;;  %v3030_v61 = vadd.f32 1.0, %v5021_v17  ;;  %5026 = vtanh.f32 %v2779_v4  ;;  %v2783_v23 = vmul.f32 0.7978846, %v2655_v55  ;;  %v6860_v0 = vpop.f32.mrb[43].mxu0 }
 0x1d8   :  { %v3155_v18 = vmul.f32 %v3027_v49, %v6763_v46  ;;  %5028 = vtanh.f32 %v2782_v32  ;;  %v2658_v20 = vadd.f32 %v2530_v7, %v6711_v63  ;;  %v2403_v3 = vmul.f32 %v2275_v6, %v6718_v47  ;;  %3892 = vmatprep.mubr.bf16.mxu0 %v3383_v21  ;;  %1972 = vmatmul.mubr.bf16.gmra.mrb[148].mxu1 %v6017_v41  ;;  %v4874_v41 = vld [vmem:[%s8140_s3 + $0x160] ss:$8 sps:$4 sm:$0xff]  }
 0x1d9   :  { %v5023_v26 = vpop.eup %5022  ;;  %v3158_v1 = vmul.f32 %v3030_v61, %v6786_v56  ;;  %v6871_v33 = vmul.f32 0.5, %v6668_v8  ;;  %5030 = vtanh.f32 %v2783_v23  ;;  %v2278_v52 = vmul.f32 0.044715, %v6727_v45  ;;  %3893 = vmatmul.mubr.bf16.gmra.mrb[84].mxu0 %v3382_v31  ;;  %1981 = vmatprep.mubr.bf16.mxu1 %v6027_v54 }
 0x1da   :  { %v3283_v46 = vmul.f32 %v3155_v18, %v6614_v59  ;;  %v3031_v30 = vadd.f32 1.0, %v5023_v26  ;;  %v2786_v51 = vmul.f32 0.7978846, %v2658_v20  ;;  %v2531_v4 = vmul.f32 %v2403_v3, %v6718_v47  ;;  %v4879_v59 = vld [vmem:[%s8140_s3 + $0x174] ss:$8 sps:$4 sm:$0xff]   ;;  %4016 = vmatpush1.bf16.msra.mxu0 %v4874_v41  ;;  %v8433_v41 = vld [vmem:[#allocation66_spill] sm:$0xff] }
 0x1db   :  { %v3286_v8 = vmul.f32 %v3158_v1, %v6623_v2  ;;  %v2406_v56 = vmul.f32 %v2278_v52, %v6727_v45  ;;  %v2279_v55 = vmul.f32 0.044715, %v6736_v43  ;;  %v6883_v31 = vpop.f32.mrb[44].mxu1  ;;  %v6885_v54 = vpop.f32.mrb[44].mxu0  ;;  %v6892_v17 = vmul.f32 0.5, %v6677_v60  ;;  %4017 = vmatprep.subr.bf16.mxu0 %v4879_v59 }
 0x1dc   :  { %v5025_v7 = vpop.eup %5024  ;;  %v3159_v16 = vmul.f32 %v3031_v30, %v6801_v24  ;;  %5032 = vtanh.f32 %v2786_v51  ;;  %v2659_v2 = vadd.f32 %v2531_v4, %v6718_v47  ;;  %v6895_v21 = vpop.f32.mrb[45].mxu1  ;;  %v4877_v60 = vld [vmem:[%s8140_s3 + $0x170] ss:$8 sps:$4 sm:$0xff]   ;;  %v6911_v20 = vmul.f32 0.5, %v6711_v63 }
 0x1dd   :  { %v6897_v49 = vpop.f32.mrb[45].mxu0  ;;  %v3386_v32 = vpack.c.bf16 %v3286_v8, %v6858_v15  ;;  %v3034_v6 = vadd.f32 1.0, %v5025_v7  ;;  %v2534_v61 = vmul.f32 %v2406_v56, %v6727_v45  ;;  %v2407_v23 = vmul.f32 %v2279_v55, %v6736_v43  ;;  %v6902_v42 = vpop.f32.mrb[46].mxu1 }
 0x1de   :  { %v6904_v24 = vpop.f32.mrb[46].mxu0  ;;  %v3287_v18 = vmul.f32 %v3159_v16, %v6629_v12  ;;  %v2787_v3 = vmul.f32 0.7978846, %v2659_v2  ;;  %v2282_v15 = vmul.f32 0.044715, %v6766_v48  ;;  %v6914_v26 = vpop.f32.mrb[47].mxu1  ;;  %4018 = vmatpush1.bf16.msra.mxu0 %v4877_v60 }
 0x1df   :  { %v3162_v1 = vmul.f32 %v3034_v6, %v6814_v29  ;;  %v2662_v52 = vadd.f32 %v2534_v61, %v6727_v45  ;;  %v2535_v30 = vmul.f32 %v2407_v23, %v6736_v43  ;;  %v2283_v51 = vmul.f32 0.044715, %v6772_v35  ;;  %v6920_v4 = vpop.f32.mrb[47].mxu0  ;;  %v4882_v12 = vld [vmem:[%s8140_s3 + $0x184] ss:$8 sps:$4 sm:$0xff]  }
 0x1e0   :  { %v3387_v63 = vpack.c.bf16 %v3287_v18, %v3283_v46  ;;  %v6926_v8 = vmul.f32 0.5, %v6718_v47  ;;  %5034 = vtanh.f32 %v2787_v3  ;;  %v2410_v29 = vmul.f32 %v2282_v15, %v6766_v48  ;;  %1982 = vmatmul.mubr.bf16.gmra.mrb[152].mxu1 %v8433_v41  ;;  %v8434_v2 = vld [vmem:[#allocation67_spill] sm:$0xff]  ;;  %v4885_v18 = vld [vmem:[%s8140_s3 + $0x194] ss:$8 sps:$4 sm:$0xff]   ;;  %4019 = vmatprep.subr.bf16.mxu0 %v4882_v12 }
 0x1e1   :  { %v5027_v56 = vpop.eup %5026  ;;  %v6931_v55 = vmul.f32 %v3162_v1, %v6653_v34  ;;  %v2790_v7 = vmul.f32 0.7978846, %v2662_v52  ;;  %v2663_v59 = vadd.f32 %v2535_v30, %v6736_v43  ;;  %v2411_v16 = vmul.f32 %v2283_v51, %v6772_v35  ;;  %1991 = vmatprep.mubr.bf16.mxu1 %v8434_v2  ;;  %v4880_v47 = vld [vmem:[%s8140_s3 + $0x180] ss:$8 sps:$4 sm:$0xff]  }
 0x1e2   :  { %v5029_v46 = vpop.eup %5028  ;;  %v3035_v6 = vadd.f32 1.0, %v5027_v56  ;;  %v6940_v61 = vmul.f32 0.5, %v6727_v45  ;;  %v2538_v23 = vmul.f32 %v2410_v29, %v6766_v48  ;;  %v2286_v34 = vmul.f32 0.044715, %v6789_v37  ;;  %3902 = vmatprep.mubr.bf16.mxu0 %v3387_v63  ;;  %4020 = vmatpush1.bf16.msra.mxu0 %v4880_v47 }
 0x1e3   :  { %v5031_v3 = vpop.eup %5030  ;;  %v3038_v15 = vadd.f32 1.0, %v5029_v46  ;;  %5036 = vtanh.f32 %v2790_v7  ;;  %v2791_v1 = vmul.f32 0.7978846, %v2663_v59  ;;  %v2539_v52 = vmul.f32 %v2411_v16, %v6772_v35  ;;  %3903 = vmatmul.mubr.bf16.gmra.mrb[88].mxu0 %v3386_v32  ;;  %v6948_v30 = vpop.f32.mrb[48].mxu1  ;;  %4021 = vmatprep.subr.bf16.mxu0 %v4885_v18 }
 0x1e4   :  { %v6950_v45 = vpop.f32.mrb[48].mxu0  ;;  %v3163_v51 = vmul.f32 %v3035_v6, %v6836_v25  ;;  %v3039_v63 = vadd.f32 1.0, %v5031_v3  ;;  %v2666_v60 = vadd.f32 %v2538_v23, %v6766_v48  ;;  %v2414_v29 = vmul.f32 %v2286_v34, %v6789_v37  ;;  %v6955_v41 = vpop.f32.mrb[49].mxu1  ;;  %v4883_v3 = vld [vmem:[%s8140_s3 + $0x190] ss:$8 sps:$4 sm:$0xff]  }
 0x1e5   :  { %v6957_v56 = vpop.f32.mrb[49].mxu0  ;;  %v3166_v7 = vmul.f32 %v3038_v15, %v6871_v33  ;;  %5038 = vtanh.f32 %v2791_v1  ;;  %v2667_v32 = vadd.f32 %v2539_v52, %v6772_v35  ;;  %v2287_v59 = vmul.f32 0.044715, %v6798_v39  ;;  %v6962_v16 = vpop.f32.mrb[50].mxu1 }
 0x1e6   :  { %v6964_v12 = vpop.f32.mrb[50].mxu0  ;;  %v5033_v25 = vpop.eup %5032  ;;  %v3291_v2 = vmul.f32 %v3163_v51, %v6666_v22  ;;  %v3167_v46 = vmul.f32 %v3039_v63, %v6892_v17  ;;  %v2794_v6 = vmul.f32 0.7978846, %v2666_v60  ;;  %v2542_v23 = vmul.f32 %v2414_v29, %v6789_v37  ;;  %v4888_v17 = vld [vmem:[%s8140_s3 + $0x1a4] ss:$8 sps:$4 sm:$0xff]   ;;  %v8435_v60 = vld [vmem:[#allocation68_spill] sm:$0xff]  ;;  %4022 = vmatpush1.bf16.msra.mxu0 %v4883_v3 }
 0x1e7   :  { %v6969_v34 = vpop.f32.mrb[51].mxu1  ;;  %v6971_v33 = vpop.f32.mrb[51].mxu0  ;;  %v3294_v15 = vmul.f32 %v3166_v7, %v6675_v62  ;;  %v3042_v1 = vadd.f32 1.0, %v5033_v25  ;;  %v2795_v52 = vmul.f32 0.7978846, %v2667_v32  ;;  %v2415_v22 = vmul.f32 %v2287_v59, %v6798_v39  ;;  %v8436_v7 = vld [vmem:[#allocation69_spill] sm:$0xff]  ;;  %4023 = vmatprep.subr.bf16.mxu0 %v4888_v17 }
 0x1e8   :  { %v3295_v51 = vmul.f32 %v3167_v46, %v6682_v40  ;;  %v6983_v63 = vmul.f32 0.5, %v6736_v43  ;;  %5040 = vtanh.f32 %v2794_v6  ;;  %v2670_v47 = vadd.f32 %v2542_v23, %v6789_v37  ;;  %1992 = vmatmul.mubr.bf16.gmra.mrb[156].mxu1 %v8435_v60  ;;  %v4886_v40 = vld [vmem:[%s8140_s3 + $0x1a0] ss:$8 sps:$4 sm:$0xff]  }
 0x1e9   :  { %v3390_v62 = vpack.c.bf16 %v3294_v15, %v6931_v55  ;;  %v3170_v29 = vmul.f32 %v3042_v1, %v6911_v20  ;;  %5042 = vtanh.f32 %v2795_v52  ;;  %v2543_v18 = vmul.f32 %v2415_v22, %v6798_v39  ;;  %2001 = vmatprep.mubr.bf16.mxu1 %v8436_v7  ;;  %v4891_v55 = vld [vmem:[%s8140_s3 + $0x1b4] ss:$8 sps:$4 sm:$0xff]  }
 0x1ea   :  { %v5035_v43 = vpop.eup %5034  ;;  %v3391_v32 = vpack.c.bf16 %v3295_v51, %v3291_v2  ;;  %v2798_v59 = vmul.f32 0.7978846, %v2670_v47  ;;  %v2290_v25 = vmul.f32 0.044715, %v6829_v44  ;;  %v2291_v23 = vmul.f32 0.044715, %v6839_v36  ;;  %4024 = vmatpush1.bf16.msra.mxu0 %v4886_v40 }
 0x1eb   :  { %v6999_v20 = vmul.f32 %v3170_v29, %v6713_v57  ;;  %v3043_v46 = vadd.f32 1.0, %v5035_v43  ;;  %v2671_v6 = vadd.f32 %v2543_v18, %v6798_v39  ;;  %v7003_v15 = vpop.f32.mrb[52].mxu1  ;;  %v7005_v1 = vpop.f32.mrb[52].mxu0  ;;  %v2154_v2 = vmul.f32 0.5, %v6766_v48  ;;  %v4889_v18 = vld [vmem:[%s8140_s3 + $0x1b0] ss:$8 sps:$4 sm:$0xff]   ;;  %4025 = vmatprep.subr.bf16.mxu0 %v4891_v55 }
 0x1ec   :  { %5044 = vtanh.f32 %v2798_v59  ;;  %v2418_v3 = vmul.f32 %v2290_v25, %v6829_v44  ;;  %v2294_v52 = vmul.f32 0.044715, %v6846_v10  ;;  %3912 = vmatprep.mubr.bf16.mxu0 %v3391_v32  ;;  %v7010_v57 = vpop.f32.mrb[53].mxu1  ;;  %v7012_v22 = vpop.f32.mrb[53].mxu0  ;;  %v2419_v29 = vmul.f32 %v2291_v23, %v6839_v36  ;;  %v4894_v40 = vld [vmem:[%s8140_s3 + $0x1c4] ss:$8 sps:$4 sm:$0xff]  }
 0x1ed   :  { %8437 = vst [vmem:[#allocation66_spill] sm:$0xff] %v7012_v22  ;;  %v5037_v51 = vpop.eup %5036  ;;  %v3171_v47 = vmul.f32 %v3043_v46, %v6926_v8  ;;  %v2799_v60 = vmul.f32 0.7978846, %v2671_v6  ;;  %3913 = vmatmul.mubr.bf16.gmra.mrb[92].mxu0 %v3390_v62  ;;  %v7016_v17 = vpop.f32.mrb[54].mxu1  ;;  %v2295_v59 = vmul.f32 0.044715, %v6855_v9 }
 0x1ee   :  { %v7018_v48 = vpop.f32.mrb[54].mxu0  ;;  %v3046_v7 = vadd.f32 1.0, %v5037_v51  ;;  %v2546_v43 = vmul.f32 %v2418_v3, %v6829_v44  ;;  %v2422_v32 = vmul.f32 %v2294_v52, %v6846_v10  ;;  %v7026_v8 = vpop.f32.mrb[55].mxu1  ;;  %v2155_v6 = vmul.f32 0.5, %v6772_v35  ;;  %v8440_v22 = vld [vmem:[#allocation70_spill] sm:$0xff]  ;;  %4026 = vmatpush1.bf16.msra.mxu0 %v4889_v18 }
 0x1ef   :  { %8438 = vst [vmem:[#allocation67_spill] sm:$0xff] %v7018_v48  ;;  %v7028_v25 = vpop.f32.mrb[55].mxu0  ;;  %v5039_v62 = vpop.eup %5038  ;;  %v3299_v46 = vmul.f32 %v3171_v47, %v6720_v14  ;;  %5046 = vtanh.f32 %v2799_v60  ;;  %v2547_v23 = vmul.f32 %v2419_v29, %v6839_v36  ;;  %v2158_v14 = vmul.f32 0.5, %v6789_v37  ;;  %v4892_v37 = vld [vmem:[%s8140_s3 + $0x1c0] ss:$8 sps:$4 sm:$0xff]   ;;  %4027 = vmatprep.subr.bf16.mxu0 %v4894_v40 }
 0x1f0   :  { %8439 = vst [vmem:[#allocation68_spill] sm:$0xff] %v7028_v25  ;;  %v3174_v3 = vmul.f32 %v3046_v7, %v6940_v61  ;;  %v3047_v51 = vadd.f32 1.0, %v5039_v62  ;;  %v2674_v52 = vadd.f32 %v2546_v43, %v6829_v44  ;;  %v2550_v48 = vmul.f32 %v2422_v32, %v6846_v10  ;;  %2002 = vmatmul.mubr.bf16.gmra.mrb[160].mxu1 %v8440_v22  ;;  %v8441_v61 = vld [vmem:[#allocation71_spill] sm:$0xff] }
 0x1f1   :  { %v2675_v35 = vadd.f32 %v2547_v23, %v6839_v36  ;;  %v2423_v47 = vmul.f32 %v2295_v59, %v6855_v9  ;;  %v2298_v55 = vmul.f32 0.044715, %v6883_v31  ;;  %2011 = vmatprep.mubr.bf16.mxu1 %v8441_v61 }
 0x1f2   :  { %v5041_v60 = vpop.eup %5040  ;;  %v3302_v29 = vmul.f32 %v3174_v3, %v6729_v50  ;;  %v3175_v7 = vmul.f32 %v3047_v51, %v6983_v63  ;;  %v2802_v22 = vmul.f32 0.7978846, %v2674_v52  ;;  %v2678_v43 = vadd.f32 %v2550_v48, %v6846_v10  ;;  %4028 = vmatpush1.bf16.msra.mxu0 %v4892_v37  ;;  %v4897_v37 = vld [vmem:[%s8140_s3 + $0x1d4] ss:$8 sps:$4 sm:$0xff]  }
 0x1f3   :  { %v5043_v32 = vpop.eup %5042  ;;  %v3050_v62 = vadd.f32 1.0, %v5041_v60  ;;  %v2803_v59 = vmul.f32 0.7978846, %v2675_v35  ;;  %v2551_v23 = vmul.f32 %v2423_v47, %v6855_v9  ;;  %v2426_v61 = vmul.f32 %v2298_v55, %v6883_v31  ;;  %v7053_v25 = vpop.f32.mrb[56].mxu1  ;;  %4029 = vmatprep.subr.bf16.mxu0 %v4897_v37 }
 0x1f4   :  { %v7055_v50 = vpop.f32.mrb[56].mxu0  ;;  %v3394_v63 = vpack.c.bf16 %v3302_v29, %v6999_v20  ;;  %v3303_v48 = vmul.f32 %v3175_v7, %v6738_v19  ;;  %v3051_v18 = vadd.f32 1.0, %v5043_v32  ;;  %5048 = vtanh.f32 %v2802_v22  ;;  %v7059_v3 = vpop.f32.mrb[57].mxu1 }
 0x1f5   :  { %8442 = vst [vmem:[#allocation69_spill] sm:$0xff] %v7055_v50  ;;  %v7061_v51 = vpop.f32.mrb[57].mxu0  ;;  %v3178_v52 = vmul.f32 %v3050_v62, %v2154_v2  ;;  %5050 = vtanh.f32 %v2803_v59  ;;  %v2806_v35 = vmul.f32 0.7978846, %v2678_v43  ;;  %v2679_v47 = vadd.f32 %v2551_v23, %v6855_v9  ;;  %v7064_v55 = vpop.f32.mrb[58].mxu1  ;;  %v8443_v23 = vld [vmem:[#allocation72_spill] sm:$0xff] }
 0x1f6   :  { %v7066_v60 = vpop.f32.mrb[58].mxu0  ;;  %v5045_v40 = vpop.eup %5044  ;;  %v3395_v50 = vpack.c.bf16 %v3303_v48, %v3299_v46  ;;  %v3179_v20 = vmul.f32 %v3051_v18, %v2155_v6  ;;  %v2554_v19 = vmul.f32 %v2426_v61, %v6883_v31  ;;  %v2299_v29 = vmul.f32 0.044715, %v6895_v21  ;;  %v8444_v18 = vld [vmem:[#allocation73_spill] sm:$0xff] }
 0x1f7   :  { %v7070_v7 = vpop.f32.mrb[59].mxu1  ;;  %v7072_v22 = vpop.f32.mrb[59].mxu0  ;;  %v7075_v2 = vmul.f32 %v3178_v52, %v6768_v13  ;;  %v3054_v43 = vadd.f32 1.0, %v5045_v40  ;;  %5052 = vtanh.f32 %v2806_v35  ;;  %v2807_v32 = vmul.f32 0.7978846, %v2679_v47 }
 0x1f8   :  { %v7078_v62 = vmul.f32 %v3179_v20, %v6774_v38  ;;  %v2159_v46 = vmul.f32 0.5, %v6798_v39  ;;  %v2682_v6 = vadd.f32 %v2554_v19, %v6883_v31  ;;  %v2427_v59 = vmul.f32 %v2299_v29, %v6895_v21  ;;  %3922 = vmatprep.mubr.bf16.mxu0 %v3395_v50  ;;  %2012 = vmatmul.mubr.bf16.gmra.mrb[164].mxu1 %v8443_v23  ;;  %v4895_v13 = vld [vmem:[%s8140_s3 + $0x1d0] ss:$8 sps:$4 sm:$0xff]  }
 0x1f9   :  { %v5047_v61 = vpop.eup %5046  ;;  %v3182_v38 = vmul.f32 %v3054_v43, %v2158_v14  ;;  %v2162_v48 = vmul.f32 0.5, %v6829_v44  ;;  %5054 = vtanh.f32 %v2807_v32  ;;  %v2302_v39 = vmul.f32 0.044715, %v6902_v42  ;;  %3923 = vmatmul.mubr.bf16.gmra.mrb[96].mxu0 %v3394_v63  ;;  %2021 = vmatprep.mubr.bf16.mxu1 %v8444_v18 }
 0x1fa   :  { %v3055_v50 = vadd.f32 1.0, %v5047_v61  ;;  %v2810_v52 = vmul.f32 0.7978846, %v2682_v6  ;;  %v2555_v35 = vmul.f32 %v2427_v59, %v6895_v21  ;;  %v2303_v47 = vmul.f32 0.044715, %v6914_v26  ;;  %4030 = vmatpush1.bf16.msra.mxu0 %v4895_v13 }
 0x1fb   :  { %v3310_v40 = vmul.f32 %v3182_v38, %v6796_v28  ;;  %v2163_v20 = vmul.f32 0.5, %v6839_v36  ;;  %v2430_v14 = vmul.f32 %v2302_v39, %v6902_v42  ;;  %v2306_v44 = vmul.f32 0.044715, %v6948_v30  ;;  %v7099_v19 = vpop.f32.mrb[60].mxu1  ;;  %v7101_v63 = vpop.f32.mrb[60].mxu0 }
 0x1fc   :  { %8445 = vst [vmem:[#allocation70_spill] sm:$0xff] %v7101_v63  ;;  %v3183_v29 = vmul.f32 %v3055_v50, %v2159_v46  ;;  %5056 = vtanh.f32 %v2810_v52  ;;  %v2683_v43 = vadd.f32 %v2555_v35, %v6895_v21  ;;  %v2431_v32 = vmul.f32 %v2303_v47, %v6914_v26  ;;  %v7105_v6 = vpop.f32.mrb[61].mxu1  ;;  %v7107_v28 = vpop.f32.mrb[61].mxu0 }
 0x1fd   :  { %8446 = vst [vmem:[#allocation71_spill] sm:$0xff] %v7107_v28  ;;  %v3398_v36 = vpack.c.bf16 %v3310_v40, %v7075_v2  ;;  %v2166_v59 = vmul.f32 0.5, %v6846_v10  ;;  %v2558_v23 = vmul.f32 %v2430_v14, %v6902_v42  ;;  %v2434_v37 = vmul.f32 %v2306_v44, %v6948_v30  ;;  %v7113_v61 = vpop.f32.mrb[62].mxu1  ;;  %v7115_v46 = vpop.f32.mrb[62].mxu0 }
 0x1fe   :  { %8447 = vst [vmem:[#allocation72_spill] sm:$0xff] %v7115_v46  ;;  %v5049_v13 = vpop.eup %5048  ;;  %v3311_v38 = vmul.f32 %v3183_v29, %v6805_v27  ;;  %v2811_v39 = vmul.f32 0.7978846, %v2683_v43  ;;  %v2559_v18 = vmul.f32 %v2431_v32, %v6914_v26  ;;  %v2307_v50 = vmul.f32 0.044715, %v6955_v41  ;;  %v7120_v52 = vpop.f32.mrb[63].mxu1 }
 0x1ff   :  { %v7122_v2 = vpop.f32.mrb[63].mxu0  ;;  %v5051_v10 = vpop.eup %5050  ;;  %v3058_v35 = vadd.f32 1.0, %v5049_v13  ;;  %v2167_v47 = vmul.f32 0.5, %v6855_v9  ;;  %v2686_v40 = vadd.f32 %v2558_v23, %v6902_v42  ;;  %v2562_v14 = vmul.f32 %v2434_v37, %v6948_v30  ;;  %v8449_v43 = vld [vmem:[#allocation74_spill] sm:$0xff] }
 0x200   :  { %8448 = vst [vmem:[#allocation73_spill] sm:$0xff] %v7122_v2  ;;  %v3399_v44 = vpack.c.bf16 %v3311_v38, %v7078_v62  ;;  %v3059_v27 = vadd.f32 1.0, %v5051_v10  ;;  %5058 = vtanh.f32 %v2811_v39  ;;  %v2687_v29 = vadd.f32 %v2559_v18, %v6914_v26  ;;  %2022 = vmatmul.mubr.bf16.gmra.mrb[168].mxu1 %v8449_v43  ;;  %v4898_v32 = vld [vmem:[%s8140_s3 + $0x1e0] ss:$8 sps:$4 sm:$0xff]   ;;  %v4900_v9 = vld [vmem:[%s8140_s3 + $0x1e4] ss:$8 sps:$4 sm:$0xff]  }
 0x201   :  { %v5053_v13 = vpop.eup %5052  ;;  %v3186_v23 = vmul.f32 %v3058_v35, %v2162_v48  ;;  %v2814_v2 = vmul.f32 0.7978846, %v2686_v40  ;;  %v2690_v37 = vadd.f32 %v2562_v14, %v6948_v30  ;;  %v2435_v62 = vmul.f32 %v2307_v50, %v6955_v41  ;;  %v8450_v38 = vld [vmem:[#allocation75_spill] sm:$0xff]  ;;  %4031 = vmatprep.subr.bf16.mxu0 %v4900_v9 }
 0x202   :  { %2031 = vmatprep.mubr.bf16.mxu1 %v8450_v38  ;;  %v3187_v39 = vmul.f32 %v3059_v27, %v2163_v20  ;;  %v3062_v18 = vadd.f32 1.0, %v5053_v13  ;;  %v2815_v10 = vmul.f32 0.7978846, %v2687_v29  ;;  %v2310_v43 = vmul.f32 0.044715, %v6962_v16  ;;  %3932 = vmatprep.mubr.bf16.mxu0 %v3399_v44 }
 0x203   :  { %v5055_v46 = vpop.eup %5054  ;;  %v3314_v28 = vmul.f32 %v3186_v23, %v6831_v11  ;;  %5060 = vtanh.f32 %v2814_v2  ;;  %v2818_v63 = vmul.f32 0.7978846, %v2690_v37  ;;  %v2563_v48 = vmul.f32 %v2435_v62, %v6955_v41  ;;  %3933 = vmatmul.mubr.bf16.gmra.mrb[100].mxu0 %v3398_v36  ;;  %v7142_v35 = vpop.f32.mrb[64].mxu1  ;;  %v4901_v44 = vld [vmem:[%s8140_s3 + $0x1f0] ss:$8 sps:$4 sm:$0xff]  }
 0x204   :  { %v3315_v50 = vmul.f32 %v3187_v39, %v6841_v53  ;;  %v3190_v40 = vmul.f32 %v3062_v18, %v2166_v59  ;;  %v3063_v20 = vadd.f32 1.0, %v5055_v46  ;;  %5062 = vtanh.f32 %v2815_v10  ;;  %v7145_v14 = vpop.f32.mrb[65].mxu1  ;;  %4032 = vmatpush1.bf16.msra.mxu0 %v4898_v32  ;;  %v4903_v11 = vld [vmem:[%s8140_s3 + $0x1f4] ss:$8 sps:$4 sm:$0xff]  }
 0x205   :  { %v2170_v36 = vmul.f32 0.5, %v6883_v31  ;;  %5064 = vtanh.f32 %v2818_v63  ;;  %v2691_v2 = vadd.f32 %v2563_v48, %v6955_v41  ;;  %v2438_v53 = vmul.f32 %v2310_v43, %v6962_v16  ;;  %v7156_v59 = vpop.f32.mrb[66].mxu1  ;;  %4033 = vmatprep.subr.bf16.mxu0 %v4903_v11  ;;  %v8452_v43 = vld [vmem:[#allocation77_spill] sm:$0xff] }
 0x206   :  { %v5057_v46 = vpop.eup %5056  ;;  %v3318_v27 = vmul.f32 %v3190_v40, %v6848_v5  ;;  %v3191_v29 = vmul.f32 %v3063_v20, %v2167_v47  ;;  %v2171_v32 = vmul.f32 0.5, %v6895_v21  ;;  %v2311_v9 = vmul.f32 0.044715, %v6969_v34  ;;  %v7161_v13 = vpop.f32.mrb[67].mxu1  ;;  %v8451_v47 = vld [vmem:[#allocation76_spill] sm:$0xff] }
 0x207   :  { %v3066_v23 = vadd.f32 1.0, %v5057_v46  ;;  %v2819_v31 = vmul.f32 0.7978846, %v2691_v2  ;;  %v2566_v63 = vmul.f32 %v2438_v53, %v6962_v16  ;;  %v2314_v37 = vmul.f32 0.044715, %v7003_v15 }
 0x208   :  { %v3402_v62 = vpack.c.bf16 %v3318_v27, %v3314_v28  ;;  %v3319_v38 = vmul.f32 %v3191_v29, %v6860_v0  ;;  %v2174_v39 = vmul.f32 0.5, %v6902_v42  ;;  %v2439_v5 = vmul.f32 %v2311_v9, %v6969_v34  ;;  %2032 = vmatmul.mubr.bf16.gmra.mrb[172].mxu1 %v8451_v47  ;;  %4034 = vmatpush1.bf16.msra.mxu0 %v4901_v44 }
 0x209   :  { %v3194_v21 = vmul.f32 %v3066_v23, %v2170_v36  ;;  %5066 = vtanh.f32 %v2819_v31  ;;  %v2694_v18 = vadd.f32 %v2566_v63, %v6962_v16  ;;  %v2442_v10 = vmul.f32 %v2314_v37, %v7003_v15  ;;  %2041 = vmatprep.mubr.bf16.mxu1 %v8452_v43 }
 0x20a   :  { %v5059_v48 = vpop.eup %5058  ;;  %v3403_v40 = vpack.c.bf16 %v3319_v38, %v3315_v50  ;;  %v2175_v28 = vmul.f32 0.5, %v6914_v26  ;;  %v2567_v0 = vmul.f32 %v2439_v5, %v6969_v34  ;;  %v2315_v42 = vmul.f32 0.044715, %v7010_v57 }
 0x20b   :  { %v7176_v20 = vmul.f32 %v3194_v21, %v6885_v54  ;;  %v3067_v44 = vadd.f32 1.0, %v5059_v48  ;;  %v2822_v11 = vmul.f32 0.7978846, %v2694_v18  ;;  %v2570_v36 = vmul.f32 %v2442_v10, %v7003_v15  ;;  %v7179_v2 = vpop.f32.mrb[68].mxu1 }
 0x20c   :  { %v2178_v53 = vmul.f32 0.5, %v6948_v30  ;;  %v2695_v46 = vadd.f32 %v2567_v0, %v6969_v34  ;;  %v2443_v50 = vmul.f32 %v2315_v42, %v7010_v57  ;;  %v2318_v26 = vmul.f32 0.044715, %v7016_v17  ;;  %3942 = vmatprep.mubr.bf16.mxu0 %v3403_v40  ;;  %v7185_v27 = vpop.f32.mrb[69].mxu1  ;;  %v8453_v0 = vld [vmem:[#allocation78_spill] sm:$0xff] }
 0x20d   :  { %v5061_v29 = vpop.eup %5060  ;;  %v3195_v54 = vmul.f32 %v3067_v44, %v2171_v32  ;;  %5068 = vtanh.f32 %v2822_v11  ;;  %v2698_v9 = vadd.f32 %v2570_v36, %v7003_v15  ;;  %v2319_v23 = vmul.f32 0.044715, %v7026_v8  ;;  %3943 = vmatmul.mubr.bf16.gmra.mrb[104].mxu0 %v3402_v62  ;;  %v7189_v31 = vpop.f32.mrb[70].mxu1  ;;  %v8454_v36 = vld [vmem:[#allocation79_spill] sm:$0xff] }
 0x20e   :  { %v5063_v30 = vpop.eup %5062  ;;  %v3070_v63 = vadd.f32 1.0, %v5061_v29  ;;  %v2823_v37 = vmul.f32 0.7978846, %v2695_v46  ;;  %v2571_v38 = vmul.f32 %v2443_v50, %v7010_v57  ;;  %v2446_v5 = vmul.f32 %v2318_v26, %v7016_v17  ;;  %v7193_v47 = vpop.f32.mrb[71].mxu1 }
 0x20f   :  { %v5065_v21 = vpop.eup %5064  ;;  %v3323_v32 = vmul.f32 %v3195_v54, %v6897_v49  ;;  %v3071_v18 = vadd.f32 1.0, %v5063_v30  ;;  %v2826_v10 = vmul.f32 0.7978846, %v2698_v9  ;;  %v2447_v43 = vmul.f32 %v2319_v23, %v7026_v8 }
 0x210   :  { %v3198_v48 = vmul.f32 %v3070_v63, %v2174_v39  ;;  %v3074_v62 = vadd.f32 1.0, %v5065_v21  ;;  %5070 = vtanh.f32 %v2823_v37  ;;  %v2699_v40 = vadd.f32 %v2571_v38, %v7010_v57  ;;  %2042 = vmatmul.mubr.bf16.gmra.mrb[176].mxu1 %v8453_v0 }
 0x211   :  { %v3199_v42 = vmul.f32 %v3071_v18, %v2175_v28  ;;  %5072 = vtanh.f32 %v2826_v10  ;;  %v2574_v44 = vmul.f32 %v2446_v5, %v7016_v17  ;;  %v2575_v11 = vmul.f32 %v2447_v43, %v7026_v8  ;;  %2051 = vmatprep.mubr.bf16.mxu1 %v8454_v36  ;;  %v8459_v36 = vld [vmem:[#allocation81_spill] sm:$0xff] }
 0x212   :  { %v3326_v49 = vmul.f32 %v3198_v48, %v6904_v24  ;;  %v3202_v46 = vmul.f32 %v3074_v62, %v2178_v53  ;;  %v2179_v50 = vmul.f32 0.5, %v6955_v41  ;;  %v2827_v39 = vmul.f32 0.7978846, %v2699_v40 }
 0x213   :  { %v5067_v26 = vpop.eup %5066  ;;  %v3327_v29 = vmul.f32 %v3199_v42, %v6920_v4  ;;  %v2702_v54 = vadd.f32 %v2574_v44, %v7016_v17  ;;  %v2703_v28 = vadd.f32 %v2575_v11, %v7026_v8  ;;  %v2322_v9 = vmul.f32 0.044715, %v7053_v25  ;;  %v7208_v23 = vpop.f32.mrb[72].mxu1 }
 0x214   :  { %v3406_v30 = vpack.c.bf16 %v3326_v49, %v7176_v20  ;;  %v7212_v63 = vmul.f32 %v3202_v46, %v6950_v45  ;;  %v3075_v24 = vadd.f32 1.0, %v5067_v26  ;;  %5074 = vtanh.f32 %v2827_v39  ;;  %v7214_v41 = vpop.f32.mrb[73].mxu1 }
 0x215   :  { %8455 = vst [vmem:[#allocation74_spill] sm:$0xff] %v7214_v41  ;;  %v3407_v53 = vpack.c.bf16 %v3327_v29, %v3323_v32  ;;  %v2830_v37 = vmul.f32 0.7978846, %v2702_v54  ;;  %v2831_v4 = vmul.f32 0.7978846, %v2703_v28  ;;  %v2450_v38 = vmul.f32 %v2322_v9, %v7053_v25  ;;  %v7217_v5 = vpop.f32.mrb[74].mxu1 }
 0x216   :  { %8456 = vst [vmem:[#allocation75_spill] sm:$0xff] %v7217_v5  ;;  %v3203_v21 = vmul.f32 %v3075_v24, %v2179_v50  ;;  %v2182_v18 = vmul.f32 0.5, %v6962_v16  ;;  %v2183_v10 = vmul.f32 0.5, %v6969_v34  ;;  %v2323_v20 = vmul.f32 0.044715, %v7059_v3  ;;  %v7222_v45 = vpop.f32.mrb[75].mxu1 }
 0x217   :  { %8457 = vst [vmem:[#allocation76_spill] sm:$0xff] %v7222_v45  ;;  %v5069_v43 = vpop.eup %5068  ;;  %v2186_v48 = vmul.f32 0.5, %v7003_v15  ;;  %5076 = vtanh.f32 %v2830_v37  ;;  %v2578_v32 = vmul.f32 %v2450_v38, %v7053_v25  ;;  %v2326_v62 = vmul.f32 0.044715, %v7064_v55  ;;  %3952 = vmatprep.mubr.bf16.mxu0 %v3407_v53  ;;  %v8458_v34 = vld [vmem:[#allocation80_spill] sm:$0xff] }
 0x218   :  { %v3331_v40 = vmul.f32 %v3203_v21, %v6957_v56  ;;  %v3078_v0 = vadd.f32 1.0, %v5069_v43  ;;  %5078 = vtanh.f32 %v2831_v4  ;;  %v2451_v16 = vmul.f32 %v2323_v20, %v7059_v3  ;;  %3953 = vmatmul.mubr.bf16.gmra.mrb[108].mxu0 %v3406_v30  ;;  %2052 = vmatmul.mubr.bf16.gmra.mrb[180].mxu1 %v8458_v34 }
 0x219   :  { %v2187_v42 = vmul.f32 0.5, %v7010_v57  ;;  %v2706_v44 = vadd.f32 %v2578_v32, %v7053_v25  ;;  %v2454_v15 = vmul.f32 %v2326_v62, %v7064_v55  ;;  %v2327_v11 = vmul.f32 0.044715, %v7070_v7  ;;  %2061 = vmatprep.mubr.bf16.mxu1 %v8459_v36 }
 0x21a   :  { %v5071_v49 = vpop.eup %5070  ;;  %v3206_v46 = vmul.f32 %v3078_v0, %v2182_v18  ;;  %v2190_v56 = vmul.f32 0.5, %v7016_v17  ;;  %v2579_v50 = vmul.f32 %v2451_v16, %v7059_v3  ;;  %v2330_v39 = vmul.f32 0.044715, %v7099_v19 }
 0x21b   :  { %v5073_v26 = vpop.eup %5072  ;;  %v3079_v29 = vadd.f32 1.0, %v5071_v49  ;;  %v2834_v54 = vmul.f32 0.7978846, %v2706_v44  ;;  %v2582_v57 = vmul.f32 %v2454_v15, %v7064_v55  ;;  %v2455_v28 = vmul.f32 %v2327_v11, %v7070_v7  ;;  %v7240_v9 = vpop.f32.mrb[76].mxu1 }
 0x21c   :  { %8460 = vst [vmem:[#allocation77_spill] sm:$0xff] %v7240_v9  ;;  %v3334_v30 = vmul.f32 %v3206_v46, %v6964_v12  ;;  %v3082_v24 = vadd.f32 1.0, %v5073_v26  ;;  %v2707_v53 = vadd.f32 %v2579_v50, %v7059_v3  ;;  %v2458_v17 = vmul.f32 %v2330_v39, %v7099_v19  ;;  %v7245_v37 = vpop.f32.mrb[77].mxu1  ;;  %v8463_v50 = vld [vmem:[#allocation82_spill] sm:$0xff] }
 0x21d   :  { %8461 = vst [vmem:[#allocation78_spill] sm:$0xff] %v7245_v37  ;;  %v3207_v4 = vmul.f32 %v3079_v29, %v2183_v10  ;;  %5080 = vtanh.f32 %v2834_v54  ;;  %v2710_v38 = vadd.f32 %v2582_v57, %v7064_v55  ;;  %v2583_v21 = vmul.f32 %v2455_v28, %v7070_v7  ;;  %v7249_v18 = vpop.f32.mrb[78].mxu1  ;;  %v8464_v54 = vld [vmem:[#allocation66_spill] sm:$0xff] }
 0x21e   :  { %8462 = vst [vmem:[#allocation79_spill] sm:$0xff] %v7249_v18  ;;  %v5075_v20 = vpop.eup %5074  ;;  %v3410_v43 = vpack.c.bf16 %v3334_v30, %v7212_v63  ;;  %v3210_v32 = vmul.f32 %v3082_v24, %v2186_v48  ;;  %v2835_v12 = vmul.f32 0.7978846, %v2707_v53  ;;  %v2586_v62 = vmul.f32 %v2458_v17, %v7099_v19  ;;  %v7253_v0 = vpop.f32.mrb[79].mxu1 }
 0x21f   :  { %v3335_v16 = vmul.f32 %v3207_v4, %v6971_v33  ;;  %v3083_v34 = vadd.f32 1.0, %v5075_v20  ;;  %v2838_v10 = vmul.f32 0.7978846, %v2710_v38  ;;  %v2711_v44 = vadd.f32 %v2583_v21, %v7070_v7  ;;  %v8466_v38 = vld [vmem:[#allocation67_spill] sm:$0xff] }
 0x220   :  { %v3338_v15 = vmul.f32 %v3210_v32, %v7005_v1  ;;  %5082 = vtanh.f32 %v2835_v12  ;;  %v2714_v11 = vadd.f32 %v2586_v62, %v7099_v19  ;;  %v2331_v36 = vmul.f32 0.044715, %v7105_v6  ;;  %2062 = vmatmul.mubr.bf16.gmra.mrb[184].mxu1 %v6271_v58  ;;  %v8467_v12 = vld [vmem:[#allocation68_spill] sm:$0xff] }
 0x221   :  { %v5077_v63 = vpop.eup %5076  ;;  %v3411_v48 = vpack.c.bf16 %v3335_v16, %v3331_v40  ;;  %v3211_v49 = vmul.f32 %v3083_v34, %v2187_v42  ;;  %5084 = vtanh.f32 %v2838_v10  ;;  %v2839_v46 = vmul.f32 0.7978846, %v2711_v44  ;;  %2071 = vmatprep.mubr.bf16.mxu1 %v8463_v50 }
 0x222   :  { %v5079_v33 = vpop.eup %5078  ;;  %v3086_v39 = vadd.f32 1.0, %v5077_v63  ;;  %v2191_v26 = vmul.f32 0.5, %v7026_v8  ;;  %v2842_v29 = vmul.f32 0.7978846, %v2714_v11  ;;  %v2459_v1 = vmul.f32 %v2331_v36, %v7105_v6  ;;  %v8468_v36 = vld [vmem:[#allocation83_spill] sm:$0xff] }
 0x223   :  { %v3339_v57 = vmul.f32 %v3211_v49, %v8464_v54  ;;  %v3087_v28 = vadd.f32 1.0, %v5079_v33  ;;  %5086 = vtanh.f32 %v2839_v46  ;;  %v2334_v58 = vmul.f32 0.044715, %v7113_v61  ;;  %3962 = vmatprep.mubr.bf16.mxu0 %v3411_v48  ;;  %v7266_v40 = vpop.f32.mrb[80].mxu1 }
 0x224   :  { %v3214_v42 = vmul.f32 %v3086_v39, %v2190_v56  ;;  %5088 = vtanh.f32 %v2842_v29  ;;  %v2587_v30 = vmul.f32 %v2459_v1, %v7105_v6  ;;  %3963 = vmatmul.mubr.bf16.gmra.mrb[112].mxu0 %v3410_v43  ;;  %v7269_v24 = vpop.f32.mrb[81].mxu1  ;;  %v2335_v17 = vmul.f32 0.044715, %v7120_v52  ;;  %v8469_v1 = vld [vmem:[#allocation69_spill] sm:$0xff] }
 0x225   :  { %8465 = vst [vmem:[#allocation80_spill] sm:$0xff] %v7269_v24  ;;  %v3215_v8 = vmul.f32 %v3087_v28, %v2191_v26  ;;  %v2462_v53 = vmul.f32 %v2334_v58, %v7113_v61  ;;  %v7273_v4 = vpop.f32.mrb[82].mxu1  ;;  %v2194_v10 = vmul.f32 0.5, %v7053_v25  ;;  %v2195_v39 = vmul.f32 0.5, %v7059_v3 }
 0x226   :  { %v3342_v21 = vmul.f32 %v3214_v42, %v8466_v38  ;;  %v2715_v20 = vadd.f32 %v2587_v30, %v7105_v6  ;;  %v7277_v32 = vpop.f32.mrb[83].mxu1  ;;  %v2463_v16 = vmul.f32 %v2335_v17, %v7120_v52  ;;  %v2199_v38 = vmul.f32 0.5, %v7070_v7 }
 0x227   :  { %v5081_v56 = vpop.eup %5080  ;;  %v3343_v62 = vmul.f32 %v3215_v8, %v8467_v12  ;;  %v2590_v43 = vmul.f32 %v2462_v53, %v7113_v61 }
 0x228   :  { %v3414_v34 = vpack.c.bf16 %v3342_v21, %v3338_v15  ;;  %v3090_v44 = vadd.f32 1.0, %v5081_v56  ;;  %v2843_v11 = vmul.f32 0.7978846, %v2715_v20  ;;  %2072 = vmatmul.mubr.bf16.gmra.mrb[188].mxu1 %v8468_v36  ;;  %v2591_v49 = vmul.f32 %v2463_v16, %v7120_v52 }
 0x229   :  { %v3415_v63 = vpack.c.bf16 %v3343_v62, %v3339_v57  ;;  %v2718_v48 = vadd.f32 %v2590_v43, %v7113_v61  ;;  %v2198_v57 = vmul.f32 0.5, %v7064_v55  ;;  %v2202_v55 = vmul.f32 0.5, %v7099_v19 }
 0x22a   :  { %v5083_v46 = vpop.eup %5082  ;;  %v3218_v50 = vmul.f32 %v3090_v44, %v2194_v10  ;;  %5090 = vtanh.f32 %v2843_v11  ;;  %v2719_v15 = vadd.f32 %v2591_v49, %v7120_v52  ;;  %v8470_v44 = vld [vmem:[#allocation70_spill] sm:$0xff] }
 0x22b   :  { %v5085_v33 = vpop.eup %5084  ;;  %v3091_v26 = vadd.f32 1.0, %v5083_v46  ;;  %v2846_v29 = vmul.f32 0.7978846, %v2718_v48  ;;  %3972 = vmatprep.mubr.bf16.mxu0 %v3415_v63  ;;  %v7288_v25 = vpop.f32.mrb[84].mxu1 }
 0x22c   :  { %v3346_v54 = vmul.f32 %v3218_v50, %v8469_v1  ;;  %v3094_v28 = vadd.f32 1.0, %v5085_v33  ;;  %3973 = vmatmul.mubr.bf16.gmra.mrb[116].mxu0 %v3414_v34  ;;  %v7292_v58 = vpop.f32.mrb[85].mxu1  ;;  %v2847_v8 = vmul.f32 0.7978846, %v2719_v15  ;;  %v2207_v1 = vmul.f32 0.5, %v7120_v52 }
 0x22d   :  { %v5087_v42 = vpop.eup %5086  ;;  %v3219_v30 = vmul.f32 %v3091_v26, %v2195_v39  ;;  %5092 = vtanh.f32 %v2846_v29  ;;  %v7294_v3 = vpop.f32.mrb[86].mxu1  ;;  %v8474_v26 = vld [vmem:[#allocation71_spill] sm:$0xff] }
 0x22e   :  { %v5089_v53 = vpop.eup %5088  ;;  %v3222_v17 = vmul.f32 %v3094_v28, %v2198_v57  ;;  %v3095_v21 = vadd.f32 1.0, %v5087_v42  ;;  %v7297_v20 = vpop.f32.mrb[87].mxu1  ;;  %5094 = vtanh.f32 %v2847_v8  ;;  %v8476_v57 = vld [vmem:[#allocation72_spill] sm:$0xff] }
 0x22f   :  { %v3347_v56 = vmul.f32 %v3219_v30, %v7061_v51  ;;  %v3098_v12 = vadd.f32 1.0, %v5089_v53  ;;  %v2203_v51 = vmul.f32 0.5, %v7105_v6 }
 0x230   :  { %v3350_v62 = vmul.f32 %v3222_v17, %v7066_v60  ;;  %v3223_v43 = vmul.f32 %v3095_v21, %v2199_v38  ;;  %v8479_v17 = vld [vmem:[#allocation73_spill] sm:$0xff] }
 0x231   :  { %v3226_v16 = vmul.f32 %v3098_v12, %v2202_v55 }
 0x232   :  { %v3418_v34 = vpack.c.bf16 %v3350_v62, %v3346_v54  ;;  %v3351_v10 = vmul.f32 %v3223_v43, %v7072_v22  ;;  %v2206_v22 = vmul.f32 0.5, %v7113_v61  ;;  %v2212_v62 = vmul.f32 0.044715, %v7142_v35 }
 0x233   :  { %v3354_v11 = vmul.f32 %v3226_v16, %v8470_v44  ;;  %v7304_v36 = vpop.f32.mrb[88].mxu1  ;;  %v2213_v43 = vmul.f32 0.044715, %v7145_v14 }
 0x234   :  { %v5091_v7 = vpop.eup %5090  ;;  %v3419_v63 = vpack.c.bf16 %v3351_v10, %v3347_v56  ;;  %v7306_v48 = vpop.f32.mrb[89].mxu1  ;;  %v2217_v10 = vmul.f32 0.044715, %v7161_v13 }
 0x235   :  { %8471 = vst [vmem:[#allocation81_spill] sm:$0xff] %v7306_v48  ;;  %v3099_v19 = vadd.f32 1.0, %v5091_v7  ;;  %v7309_v49 = vpop.f32.mrb[90].mxu1 }
 0x236   :  { %8472 = vst [vmem:[#allocation82_spill] sm:$0xff] %v7309_v49  ;;  %3982 = vmatprep.mubr.bf16.mxu0 %v3419_v63  ;;  %v7311_v60 = vpop.f32.mrb[91].mxu1  ;;  %v2221_v63 = vmul.f32 0.044715, %v7185_v27 }
 0x237   :  { %8473 = vst [vmem:[#allocation66_spill] sm:$0xff] %v7311_v60  ;;  %v5093_v46 = vpop.eup %5092  ;;  %v3227_v50 = vmul.f32 %v3099_v19, %v2203_v51  ;;  %3983 = vmatmul.mubr.bf16.gmra.mrb[120].mxu0 %v3418_v34  ;;  %v2216_v34 = vmul.f32 0.044715, %v7156_v59  ;;  %v2224_v51 = vmul.f32 0.044715, %v7189_v31 }
 0x238   :  { %v3102_v33 = vadd.f32 1.0, %v5093_v46  ;;  %v5095_v39 = vpop.eup %5094  ;;  %v2340_v46 = vmul.f32 %v2212_v62, %v7142_v35 }
 0x239   :  { %v3355_v29 = vmul.f32 %v3227_v50, %v8474_v26  ;;  %v3103_v54 = vadd.f32 1.0, %v5095_v39  ;;  %v2341_v50 = vmul.f32 %v2213_v43, %v7145_v14  ;;  %v2345_v39 = vmul.f32 %v2217_v10, %v7161_v13 }
 0x23a   :  { %v3230_v15 = vmul.f32 %v3102_v33, %v2206_v22  ;;  %v2225_v22 = vmul.f32 0.044715, %v7193_v47  ;;  %v2344_v33 = vmul.f32 %v2216_v34, %v7156_v59  ;;  %v2228_v26 = vmul.f32 0.044715, %v7208_v23 }
 0x23b   :  { %v7316_v6 = vpop.f32.mrb[92].mxu1  ;;  %v3231_v42 = vmul.f32 %v3103_v54, %v2207_v1  ;;  %v2232_v1 = vmul.f32 0.044715, %v7217_v5  ;;  %v2233_v54 = vmul.f32 0.044715, %v7222_v45  ;;  %v7376_v34 = vmul.f32 %v2345_v39, %v7161_v13 }
 0x23c   :  { %8475 = vst [vmem:[#allocation67_spill] sm:$0xff] %v7316_v6  ;;  %v3358_v28 = vmul.f32 %v3230_v15, %v8476_v57  ;;  %v7319_v30 = vpop.f32.mrb[93].mxu1  ;;  %v2349_v57 = vmul.f32 %v2221_v63, %v7185_v27  ;;  %v7373_v43 = vmul.f32 %v2344_v33, %v7156_v59  ;;  %v2356_v10 = vmul.f32 %v2228_v26, %v7208_v23 }
 0x23d   :  { %8477 = vst [vmem:[#allocation68_spill] sm:$0xff] %v7319_v30  ;;  %v7321_v8 = vpop.f32.mrb[94].mxu1  ;;  %v3359_v61 = vmul.f32 %v3231_v42, %v8479_v17  ;;  %v2236_v42 = vmul.f32 0.044715, %v7240_v9  ;;  %v7366_v17 = vmul.f32 %v2341_v50, %v7145_v14  ;;  %v2361_v50 = vmul.f32 %v2233_v54, %v7222_v45 }
 0x23e   :  { %8478 = vst [vmem:[#allocation83_spill] sm:$0xff] %v7321_v8  ;;  %v3422_v53 = vpack.c.bf16 %v3358_v28, %v3354_v11  ;;  %v7324_v38 = vpop.f32.mrb[95].mxu1  ;;  %v2220_v11 = vmul.f32 0.044715, %v7179_v2  ;;  %v2352_v28 = vmul.f32 %v2224_v51, %v7189_v31  ;;  %v7391_v39 = vmul.f32 %v2349_v57, %v7185_v27 }
 0x23f   :  { %8480 = vst [vmem:[#allocation69_spill] sm:$0xff] %v7324_v38  ;;  %v3423_v21 = vpack.c.bf16 %v3359_v61, %v3355_v29  ;;  %v2229_v29 = vmul.f32 0.044715, %v7214_v41  ;;  %v2353_v61 = vmul.f32 %v2225_v22, %v7193_v47  ;;  %v2240_v22 = vmul.f32 0.044715, %v7249_v18 }
 0x240   :  { %v2348_v15 = vmul.f32 %v2220_v11, %v7179_v2  ;;  %v7394_v26 = vmul.f32 %v2352_v28, %v7189_v31  ;;  %v7407_v57 = vmul.f32 %v2356_v10, %v7208_v23 }
 0x241   :  { %3992 = vmatprep.mubr.bf16.mxu0 %v3423_v21  ;;  %v2237_v21 = vmul.f32 0.044715, %v7245_v37  ;;  %v2357_v11 = vmul.f32 %v2229_v29, %v7214_v41  ;;  %v2364_v29 = vmul.f32 %v2236_v42, %v7240_v9  ;;  %v2248_v42 = vmul.f32 0.044715, %v7273_v4 }
 0x242   :  { %3993 = vmatmul.mubr.bf16.gmra.mrb[124].mxu0 %v3422_v53  ;;  %v7363_v53 = vmul.f32 %v2340_v46, %v7142_v35  ;;  %v7383_v51 = vmul.f32 %v2348_v15, %v7179_v2  ;;  %v2360_v46 = vmul.f32 %v2232_v1, %v7217_v5  ;;  %v7401_v1 = vmul.f32 %v2353_v61, %v7193_v47 }
 0x243   :  { %v7326_v56 = vpop.f32.mrb[96].mxu1  ;;  %v2365_v54 = vmul.f32 %v2237_v21, %v7245_v37  ;;  %8494 = vst [vmem:[#allocation93_spill] sm:$0xff] %v7407_v57  ;;  %v7410_v28 = vmul.f32 %v2357_v11, %v7214_v41  ;;  %v7418_v61 = vmul.f32 %v2361_v50, %v7222_v45  ;;  %v2368_v21 = vmul.f32 %v2240_v22, %v7249_v18 }
 0x244   :  { %8481 = vst [vmem:[#allocation70_spill] sm:$0xff] %v7326_v56  ;;  %v7328_v52 = vpop.f32.mrb[97].mxu1  ;;  %8493 = vst [vmem:[#allocation92_spill] sm:$0xff] %v7401_v1  ;;  %v2252_v1 = vmul.f32 0.044715, %v7288_v25  ;;  %v7423_v10 = vmul.f32 %v2364_v29, %v7240_v9  ;;  %v2376_v29 = vmul.f32 %v2248_v42, %v7273_v4 }
 0x245   :  { %8482 = vst [vmem:[#allocation71_spill] sm:$0xff] %v7328_v52  ;;  %v7330_v55 = vpop.f32.mrb[98].mxu1  ;;  %8495 = vst [vmem:[#allocation94_spill] sm:$0xff] %v7410_v28  ;;  %v2253_v28 = vmul.f32 0.044715, %v7292_v58  ;;  %v7429_v57 = vmul.f32 %v2365_v54, %v7245_v37  ;;  %v7443_v54 = vmul.f32 %v2368_v21, %v7249_v18 }
 0x246   :  { %8483 = vst [vmem:[#allocation72_spill] sm:$0xff] %v7330_v55  ;;  %v7332_v12 = vpop.f32.mrb[99].mxu1  ;;  %8497 = vst [vmem:[#allocation96_spill] sm:$0xff] %v7418_v61  ;;  %v2256_v41 = vmul.f32 0.044715, %v7294_v3 }
 0x247   :  { %8484 = vst [vmem:[#allocation73_spill] sm:$0xff] %v7332_v12  ;;  %8498 = vst [vmem:[#allocation97_spill] sm:$0xff] %v7423_v10  ;;  %v2257_v22 = vmul.f32 0.044715, %v7297_v20  ;;  %v2261_v9 = vmul.f32 0.044715, %v7306_v48 }
 0x248   :  { %8499 = vst [vmem:[#allocation98_spill] sm:$0xff] %v7429_v57  ;;  %8501 = vst [vmem:[#allocation100_spill] sm:$0xff] %v7443_v54  ;;  %v2265_v57 = vmul.f32 0.044715, %v7311_v60  ;;  %v2269_v18 = vmul.f32 0.044715, %v7319_v30 }
 0x249   :  { %v2385_v54 = vmul.f32 %v2257_v22, %v7297_v20  ;;  %v2272_v22 = vmul.f32 0.044715, %v7321_v8 }
 0x24b   :  { %v7336_v16 = vpop.f32.mrb[100].mxu1 }
 0x24c   :  { %8485 = vst [vmem:[#allocation84_spill] sm:$0xff] %v7336_v16  ;;  %v7340_v44 = vpop.f32.mrb[101].mxu1 }
 0x24d   :  { %8486 = vst [vmem:[#allocation85_spill] sm:$0xff] %v7340_v44  ;;  %v7343_v7 = vpop.f32.mrb[102].mxu1 }
 0x24e   :  { %8487 = vst [vmem:[#allocation86_spill] sm:$0xff] %v7343_v7  ;;  %v7347_v19 = vpop.f32.mrb[103].mxu1 }
 0x24f   :  { %8488 = vst [vmem:[#allocation87_spill] sm:$0xff] %v7347_v19  ;;  %v2249_v19 = vmul.f32 0.044715, %v7277_v32 }
 0x251   :  { %v2377_v10 = vmul.f32 %v2249_v19, %v7277_v32  ;;  %v2381_v19 = vmul.f32 %v2253_v28, %v7292_v58 }
 0x253   :  { %v7370_v62 = vpop.f32.mrb[104].mxu1  ;;  %v7470_v28 = vmul.f32 %v2377_v10, %v7277_v32 }
 0x254   :  { %8489 = vst [vmem:[#allocation88_spill] sm:$0xff] %v7370_v62  ;;  %v7380_v63 = vpop.f32.mrb[105].mxu1  ;;  %v2244_v62 = vmul.f32 0.044715, %v7266_v40 }
 0x255   :  { %8490 = vst [vmem:[#allocation89_spill] sm:$0xff] %v7380_v63  ;;  %v7388_v33 = vpop.f32.mrb[106].mxu1  ;;  %v2241_v63 = vmul.f32 0.044715, %v7253_v0 }
 0x256   :  { %8491 = vst [vmem:[#allocation90_spill] sm:$0xff] %v7388_v33  ;;  %v7398_v15 = vpop.f32.mrb[107].mxu1  ;;  %v2245_v33 = vmul.f32 0.044715, %v7269_v24 }
 0x257   :  { %8492 = vst [vmem:[#allocation91_spill] sm:$0xff] %v7398_v15  ;;  %v7415_v15 = vmul.f32 %v2360_v46, %v7217_v5  ;;  %v2369_v11 = vmul.f32 %v2241_v63, %v7253_v0  ;;  %v2372_v46 = vmul.f32 %v2244_v62, %v7266_v40  ;;  %v2260_v63 = vmul.f32 0.044715, %v7304_v36 }
 0x258   :  { %v2373_v50 = vmul.f32 %v2245_v33, %v7269_v24  ;;  %v2380_v62 = vmul.f32 %v2252_v1, %v7288_v25  ;;  %v2264_v33 = vmul.f32 0.044715, %v7309_v49 }
 0x259   :  { %8496 = vst [vmem:[#allocation95_spill] sm:$0xff] %v7415_v15  ;;  %v7451_v42 = vmul.f32 %v2369_v11, %v7253_v0  ;;  %v2384_v15 = vmul.f32 %v2256_v41, %v7294_v3  ;;  %v7459_v21 = vmul.f32 %v2372_v46, %v7266_v40  ;;  %v7467_v11 = vmul.f32 %v2376_v29, %v7273_v4 }
 0x25a   :  { %v7462_v1 = vmul.f32 %v2373_v50, %v7269_v24  ;;  %v2388_v41 = vmul.f32 %v2260_v63, %v7304_v36  ;;  %v7475_v46 = vmul.f32 %v2380_v62, %v7288_v25  ;;  %v2392_v50 = vmul.f32 %v2264_v33, %v7309_v49 }
 0x25b   :  { %v7434_v61 = vpop.f32.mrb[108].mxu1  ;;  %8503 = vst [vmem:[#allocation102_spill] sm:$0xff] %v7451_v42  ;;  %v2389_v42 = vmul.f32 %v2261_v9, %v7306_v48  ;;  %v7481_v24 = vmul.f32 %v2381_v19, %v7292_v58  ;;  %v7484_v29 = vmul.f32 %v2384_v15, %v7294_v3  ;;  %v2596_v9 = vadd.f32 %v7363_v53, %v7142_v35 }
 0x25c   :  { %v7440_v45 = vpop.f32.mrb[109].mxu1  ;;  %8505 = vst [vmem:[#allocation104_spill] sm:$0xff] %v7462_v1  ;;  %v2393_v1 = vmul.f32 %v2265_v57, %v7311_v60  ;;  %v7490_v63 = vmul.f32 %v2385_v54, %v7297_v20  ;;  %v2397_v62 = vmul.f32 %v2269_v18, %v7319_v30  ;;  %v2273_v57 = vmul.f32 0.044715, %v7324_v38 }
 0x25d   :  { %8500 = vst [vmem:[#allocation99_spill] sm:$0xff] %v7440_v45  ;;  %v7448_v37 = vpop.f32.mrb[110].mxu1  ;;  %v2268_v45 = vmul.f32 0.044715, %v7316_v6  ;;  %8506 = vst [vmem:[#allocation105_spill] sm:$0xff] %v7484_v29  ;;  %v2597_v19 = vadd.f32 %v7366_v17, %v7145_v14  ;;  %v7499_v15 = vmul.f32 %v2388_v41, %v7304_v36  ;;  %v2600_v18 = vadd.f32 %v7373_v43, %v7156_v59 }
 0x25e   :  { %8502 = vst [vmem:[#allocation101_spill] sm:$0xff] %v7448_v37  ;;  %v7456_v5 = vpop.f32.mrb[111].mxu1  ;;  %8507 = vst [vmem:[#allocation106_spill] sm:$0xff] %v7490_v63  ;;  %v2276_v53 = vmul.f32 0.044715, %v7326_v56  ;;  %v7510_v54 = vmul.f32 %v2392_v50, %v7309_v49  ;;  %v7513_v63 = vmul.f32 %v2393_v1, %v7311_v60  ;;  %v2400_v17 = vmul.f32 %v2272_v22, %v7321_v8 }
 0x25f   :  { %8504 = vst [vmem:[#allocation103_spill] sm:$0xff] %v7456_v5  ;;  %v2396_v10 = vmul.f32 %v2268_v45, %v7316_v6  ;;  %8508 = vst [vmem:[#allocation107_spill] sm:$0xff] %v7499_v15  ;;  %v7502_v45 = vmul.f32 %v2389_v42, %v7306_v48  ;;  %v2277_v41 = vmul.f32 0.044715, %v7328_v52  ;;  %v2724_v43 = vmul.f32 0.7978846, %v2596_v9 }
 0x260   :  { %8510 = vst [vmem:[#allocation109_spill] sm:$0xff] %v7510_v54  ;;  %8511 = vst [vmem:[#allocation110_spill] sm:$0xff] %v7513_v63  ;;  %v2601_v50 = vadd.f32 %v7376_v34, %v7161_v13  ;;  %v7528_v1 = vmul.f32 %v2397_v62, %v7319_v30  ;;  %v2401_v22 = vmul.f32 %v2273_v57, %v7324_v38  ;;  %v2725_v63 = vmul.f32 0.7978846, %v2597_v19 }
 0x261   :  { %8509 = vst [vmem:[#allocation108_spill] sm:$0xff] %v7502_v45  ;;  %v7520_v42 = vmul.f32 %v2396_v10, %v7316_v6  ;;  %v2280_v45 = vmul.f32 0.044715, %v7330_v55  ;;  %v2604_v60 = vadd.f32 %v7383_v51, %v7179_v2  ;;  %v2404_v10 = vmul.f32 %v2276_v53, %v7326_v56 }
 0x262   :  { %8513 = vst [vmem:[#allocation112_spill] sm:$0xff] %v7528_v1  ;;  %v2728_v6 = vmul.f32 0.7978846, %v2600_v18  ;;  %v2605_v9 = vadd.f32 %v7391_v39, %v7185_v27  ;;  %v7538_v54 = vmul.f32 %v2400_v17, %v7321_v8  ;;  %v2405_v34 = vmul.f32 %v2277_v41, %v7328_v52 }
 0x263   :  { %v7494_v33 = vpop.f32.mrb[112].mxu1  ;;  %8512 = vst [vmem:[#allocation111_spill] sm:$0xff] %v7520_v42  ;;  %v2281_v42 = vmul.f32 0.044715, %v7332_v12  ;;  %v7542_v62 = vmul.f32 0.5, %v7142_v35  ;;  %v2608_v57 = vadd.f32 %v7394_v26, %v7189_v31  ;;  %v2408_v51 = vmul.f32 %v2280_v45, %v7330_v55  ;;  %v8516_v45 = vld [vmem:[#allocation92_spill] sm:$0xff] }
 0x264   :  { %v7505_v29 = vpop.f32.mrb[113].mxu1  ;;  %8514 = vst [vmem:[#allocation113_spill] sm:$0xff] %v7538_v54  ;;  %v2284_v19 = vmul.f32 0.044715, %v7336_v16  ;;  %5096 = vtanh.f32 %v2724_v43  ;;  %v2729_v53 = vmul.f32 0.7978846, %v2601_v50  ;;  %v7549_v18 = vmul.f32 %v2401_v22, %v7324_v38 }
 0x265   :  { %v7517_v15 = vpop.f32.mrb[114].mxu1  ;;  %v2285_v39 = vmul.f32 0.044715, %v7340_v44  ;;  %5098 = vtanh.f32 %v2725_v63  ;;  %v2732_v41 = vmul.f32 0.7978846, %v2604_v60  ;;  %v2609_v8 = vadd.f32 %v8516_v45, %v7193_v47  ;;  %v8518_v22 = vld [vmem:[#allocation87_spill] sm:$0xff] }
 0x266   :  { %v7523_v48 = vpop.f32.mrb[115].mxu1  ;;  %8515 = vst [vmem:[#allocation114_spill] sm:$0xff] %v7549_v18  ;;  %v2288_v35 = vmul.f32 0.044715, %v7343_v7  ;;  %5100 = vtanh.f32 %v2728_v6  ;;  %v2733_v26 = vmul.f32 0.7978846, %v2605_v9  ;;  %v7560_v43 = vmul.f32 %v2404_v10, %v7326_v56 }
 0x267   :  { %v2409_v50 = vmul.f32 %v2281_v42, %v7332_v12  ;;  %v2289_v18 = vmul.f32 0.044715, %v8518_v22  ;;  %v2736_v63 = vmul.f32 0.7978846, %v2608_v57  ;;  %v7567_v60 = vmul.f32 %v2405_v34, %v7328_v52  ;;  %v8522_v45 = vld [vmem:[#allocation88_spill] sm:$0xff]  ;;  %v8523_v34 = vld [vmem:[#allocation89_spill] sm:$0xff] }
 0x268   :  { %8517 = vst [vmem:[#allocation92_spill] sm:$0xff] %v7560_v43  ;;  %v7570_v1 = vmul.f32 %v2408_v51, %v7330_v55  ;;  %v7575_v9 = vmul.f32 0.5, %v7145_v14  ;;  %5102 = vtanh.f32 %v2729_v53  ;;  %v2412_v10 = vmul.f32 %v2284_v19, %v7336_v16  ;;  %v8525_v53 = vld [vmem:[#allocation93_spill] sm:$0xff]  ;;  %v8526_v55 = vld [vmem:[#allocation90_spill] sm:$0xff]  ;;  %v8527_v52 = vld [vmem:[#allocation91_spill] sm:$0xff] }
 0x269   :  { %8519 = vst [vmem:[#allocation115_spill] sm:$0xff] %v7567_v60  ;;  %v2413_v42 = vmul.f32 %v2285_v39, %v7340_v44  ;;  %v2292_v43 = vmul.f32 0.044715, %v8522_v45  ;;  %5104 = vtanh.f32 %v2732_v41  ;;  %v2416_v57 = vmul.f32 %v2288_v35, %v7343_v7  ;;  %v8541_v30 = vld [vmem:[#allocation99_spill] sm:$0xff] }
 0x26a   :  { %8520 = vst [vmem:[#allocation116_spill] sm:$0xff] %v7570_v1  ;;  %v2293_v60 = vmul.f32 0.044715, %v8523_v34  ;;  %5106 = vtanh.f32 %v2733_v26  ;;  %v2737_v51 = vmul.f32 0.7978846, %v2609_v8  ;;  %v7583_v1 = vmul.f32 %v2409_v50, %v7332_v12 }
 0x26b   :  { %v7552_v17 = vpop.f32.mrb[116].mxu1  ;;  %v2417_v14 = vmul.f32 %v2289_v18, %v8518_v22  ;;  %5108 = vtanh.f32 %v2736_v63  ;;  %v2612_v19 = vadd.f32 %v8525_v53, %v7208_v23  ;;  %v2296_v39 = vmul.f32 0.044715, %v8526_v55 }
 0x26c   :  { %v7555_v54 = vpop.f32.mrb[117].mxu1  ;;  %8524 = vst [vmem:[#allocation118_spill] sm:$0xff] %v7583_v1  ;;  %v2297_v56 = vmul.f32 0.044715, %v8527_v52  ;;  %v2088_v41 = vmul.f32 0.5, %v7156_v59  ;;  %v7592_v35 = vmul.f32 0.5, %v7161_v13  ;;  %v7595_v8 = vmul.f32 %v2412_v10, %v7336_v16 }
 0x26d   :  { %v7564_v38 = vpop.f32.mrb[118].mxu1  ;;  %v7598_v26 = vmul.f32 %v2413_v42, %v7340_v44  ;;  %v2420_v18 = vmul.f32 %v2292_v43, %v8522_v45  ;;  %v7604_v63 = vmul.f32 0.5, %v7179_v2  ;;  %v7607_v1 = vmul.f32 %v2416_v57, %v7343_v7  ;;  %v8532_v10 = vld [vmem:[#allocation74_spill] sm:$0xff] }
 0x26e   :  { %v7572_v6 = vpop.f32.mrb[119].mxu1  ;;  %8528 = vst [vmem:[#allocation93_spill] sm:$0xff] %v7595_v8  ;;  %v5097_v53 = vpop.eup %5096  ;;  %v2421_v59 = vmul.f32 %v2293_v60, %v8523_v34  ;;  %5110 = vtanh.f32 %v2737_v51  ;;  %v8533_v8 = vld [vmem:[#allocation94_spill] sm:$0xff]  ;;  %v7615_v43 = vmul.f32 %v2417_v14, %v8518_v22  ;;  %v7620_v2 = vmul.f32 0.5, %v7185_v27  ;;  %v8539_v22 = vld [vmem:[#allocation95_spill] sm:$0xff] }
 0x26f   :  { %8521 = vst [vmem:[#allocation117_spill] sm:$0xff] %v7572_v6  ;;  %8529 = vst [vmem:[#allocation119_spill] sm:$0xff] %v7598_v26  ;;  %v2613_v42 = vadd.f32 %v8533_v8, %v8532_v10  ;;  %v5099_v26 = vpop.eup %5098  ;;  %v7623_v57 = vmul.f32 0.5, %v7189_v31  ;;  %v2424_v7 = vmul.f32 %v2296_v39, %v8526_v55  ;;  %v2425_v51 = vmul.f32 %v2297_v56, %v8527_v52 }
 0x270   :  { %8530 = vst [vmem:[#allocation120_spill] sm:$0xff] %v7607_v1  ;;  %8534 = vst [vmem:[#allocation74_spill] sm:$0xff] %v7615_v43  ;;  %v2740_v1 = vmul.f32 0.7978846, %v2612_v19  ;;  %v5101_v60 = vpop.eup %5100  ;;  %v2300_v8 = vmul.f32 0.044715, %v7434_v61  ;;  %v7634_v43 = vmul.f32 %v2420_v18, %v8522_v45  ;;  %v7642_v56 = vmul.f32 %v2421_v59, %v8523_v34 }
 0x271   :  { %v7631_v14 = vmul.f32 0.5, %v7193_v47  ;;  %v2980_v27 = vadd.f32 1.0, %v5097_v53  ;;  %v7637_v31 = vmul.f32 0.5, %v7208_v23  ;;  %v8538_v19 = vld [vmem:[#allocation75_spill] sm:$0xff]  ;;  %v2741_v47 = vmul.f32 0.7978846, %v2613_v42 }
 0x272   :  { %8537 = vst [vmem:[#allocation123_spill] sm:$0xff] %v7634_v43  ;;  %v2616_v12 = vadd.f32 %v8539_v22, %v8538_v19  ;;  %v5103_v39 = vpop.eup %5102  ;;  %8540 = vst [vmem:[#allocation75_spill] sm:$0xff] %v7642_v56  ;;  %v2305_v18 = vmul.f32 0.044715, %v7456_v5  ;;  %v2981_v43 = vadd.f32 1.0, %v5099_v26  ;;  %v2984_v53 = vadd.f32 1.0, %v5101_v60 }
 0x273   :  { %v7601_v50 = vpop.f32.mrb[120].mxu1  ;;  %5112 = vtanh.f32 %v2740_v1  ;;  %v7648_v45 = vmul.f32 %v2424_v7, %v8526_v55  ;;  %v7651_v22 = vmul.f32 %v2425_v51, %v8527_v52  ;;  %v2428_v59 = vmul.f32 %v2300_v8, %v7434_v61  ;;  %v8545_v60 = vld [vmem:[#allocation76_spill] sm:$0xff] }
 0x274   :  { %v7610_v13 = vpop.f32.mrb[121].mxu1  ;;  %v7655_v56 = vmul.f32 0.5, %v8532_v10  ;;  %v3108_v49 = vmul.f32 %v2980_v27, %v7542_v62  ;;  %v7661_v26 = vmul.f32 0.5, %v8538_v19  ;;  %v2744_v1 = vmul.f32 0.7978846, %v2616_v12  ;;  %v8546_v7 = vld [vmem:[#allocation96_spill] sm:$0xff] }
 0x275   :  { %8531 = vst [vmem:[#allocation121_spill] sm:$0xff] %v7610_v13  ;;  %v7617_v44 = vpop.f32.mrb[122].mxu1  ;;  %v5105_v13 = vpop.eup %5104  ;;  %8542 = vst [vmem:[#allocation95_spill] sm:$0xff] %v7648_v45  ;;  %v2617_v45 = vadd.f32 %v8546_v7, %v8545_v60  ;;  %v2985_v10 = vadd.f32 1.0, %v5103_v39  ;;  %5114 = vtanh.f32 %v2741_v47  ;;  %v2433_v52 = vmul.f32 %v2305_v18, %v7456_v5 }
 0x276   :  { %8535 = vst [vmem:[#allocation94_spill] sm:$0xff] %v7617_v44  ;;  %v7628_v16 = vpop.f32.mrb[123].mxu1  ;;  %v2301_v44 = vmul.f32 0.044715, %v8541_v30  ;;  %v5107_v23 = vpop.eup %5106  ;;  %8543 = vst [vmem:[#allocation124_spill] sm:$0xff] %v7651_v22  ;;  %v3109_v62 = vmul.f32 %v2981_v43, %v7575_v9  ;;  %v3112_v27 = vmul.f32 %v2984_v53, %v2088_v41  ;;  %v7674_v12 = vmul.f32 0.5, %v8545_v60 }
 0x277   :  { %8536 = vst [vmem:[#allocation122_spill] sm:$0xff] %v7628_v16  ;;  %v2304_v16 = vmul.f32 0.044715, %v7448_v37  ;;  %v5109_v34 = vpop.eup %5108  ;;  %v7677_v7 = vmul.f32 %v2428_v59, %v7434_v61  ;;  %v2308_v47 = vmul.f32 0.044715, %v7494_v33  ;;  %5116 = vtanh.f32 %v2744_v1  ;;  %v8555_v60 = vld [vmem:[#allocation78_spill] sm:$0xff] }
 0x278   :  { %v2429_v51 = vmul.f32 %v2301_v44, %v8541_v30  ;;  %v5111_v19 = vpop.eup %5110  ;;  %v2992_v39 = vadd.f32 1.0, %v5109_v34  ;;  %v2745_v18 = vmul.f32 0.7978846, %v2617_v45  ;;  %v2309_v53 = vmul.f32 0.044715, %v7505_v29 }
 0x279   :  { %v2432_v22 = vmul.f32 %v2304_v16, %v7448_v37  ;;  %v2988_v16 = vadd.f32 1.0, %v5105_v13  ;;  %v3113_v59 = vmul.f32 %v2985_v10, %v7592_v35  ;;  %v7693_v13 = vmul.f32 %v2433_v52, %v7456_v5 }
 0x27a   :  { %v7685_v41 = vmul.f32 %v2429_v51, %v8541_v30  ;;  %v2312_v34 = vmul.f32 0.044715, %v7517_v15  ;;  %v8556_v51 = vld [vmem:[#allocation98_spill] sm:$0xff]  ;;  %v2436_v35 = vmul.f32 %v2308_v47, %v7494_v33  ;;  %5118 = vtanh.f32 %v2745_v18 }
 0x27b   :  { %v7657_v42 = vpop.f32.mrb[124].mxu1  ;;  %v7688_v43 = vmul.f32 %v2432_v22, %v7448_v37  ;;  %8554 = vst [vmem:[#allocation127_spill] sm:$0xff] %v7693_v13  ;;  %v3120_v22 = vmul.f32 %v2992_v39, %v7623_v57  ;;  %v8557_v13 = vld [vmem:[#allocation79_spill] sm:$0xff]  ;;  %v8559_v57 = vld [vmem:[#allocation102_spill] sm:$0xff]  ;;  %v7714_v18 = vmul.f32 0.5, %v8555_v60 }
 0x27c   :  { %8544 = vst [vmem:[#allocation125_spill] sm:$0xff] %v7657_v42  ;;  %v7667_v8 = vpop.f32.mrb[125].mxu1  ;;  %v8551_v42 = vld [vmem:[#allocation97_spill] sm:$0xff]  ;;  %v2440_v39 = vmul.f32 %v2312_v34, %v7517_v15 }
 0x27d   :  { %8547 = vst [vmem:[#allocation76_spill] sm:$0xff] %v7667_v8  ;;  %v7670_v55 = vpop.f32.mrb[126].mxu1  ;;  %v2989_v8 = vadd.f32 1.0, %v5107_v23  ;;  %8553 = vst [vmem:[#allocation97_spill] sm:$0xff] %v7688_v43  ;;  %v2993_v23 = vadd.f32 1.0, %v5111_v19  ;;  %v5113_v43 = vpop.eup %5112  ;;  %v8558_v19 = vld [vmem:[#allocation100_spill] sm:$0xff] }
 0x27e   :  { %8548 = vst [vmem:[#allocation96_spill] sm:$0xff] %v7670_v55  ;;  %v7679_v44 = vpop.f32.mrb[127].mxu1  ;;  %v8550_v55 = vld [vmem:[#allocation77_spill] sm:$0xff]  ;;  %v2624_v5 = vadd.f32 %v8558_v19, %v8557_v13 }
 0x27f   :  { %8549 = vst [vmem:[#allocation126_spill] sm:$0xff] %v7679_v44  ;;  %v2620_v9 = vadd.f32 %v8551_v42, %v8550_v55  ;;  %8552 = vst [vmem:[#allocation77_spill] sm:$0xff] %v7685_v41  ;;  %v7697_v45 = vmul.f32 0.5, %v8550_v55  ;;  %v3116_v42 = vmul.f32 %v2988_v16, %v7604_v63  ;;  %v3117_v1 = vmul.f32 %v2989_v8, %v7620_v2 }
 0x280   :  { %v2621_v44 = vadd.f32 %v8556_v51, %v8555_v60  ;;  %v2437_v55 = vmul.f32 %v2309_v53, %v7505_v29  ;;  %v2313_v63 = vmul.f32 0.044715, %v7523_v48  ;;  %v2625_v8 = vadd.f32 %v8559_v57, %v7253_v0 }
 0x281   :  { %v2748_v10 = vmul.f32 0.7978846, %v2620_v9  ;;  %v3121_v47 = vmul.f32 %v2993_v23, %v7631_v14  ;;  %v5115_v9 = vpop.eup %5114  ;;  %v2996_v53 = vadd.f32 1.0, %v5113_v43 }
 0x282   :  { %v2749_v30 = vmul.f32 0.7978846, %v2621_v44  ;;  %v7723_v34 = vmul.f32 %v2437_v55, %v7505_v29  ;;  %v2441_v14 = vmul.f32 %v2313_v63, %v7523_v48  ;;  %v2753_v60 = vmul.f32 0.7978846, %v2625_v8 }
 0x283   :  { %v1923_v52 = vpop.f32.mrb[128].mxu1  ;;  %5120 = vtanh.f32 %v2748_v10  ;;  %v2997_v43 = vadd.f32 1.0, %v5115_v9  ;;  %v2316_v55 = vmul.f32 0.044715, %v7552_v17  ;;  %v2317_v63 = vmul.f32 0.044715, %v7555_v54 }
 0x284   :  { %v3236_v16 = vmul.f32 %v3108_v49, %v1923_v52  ;;  %v1925_v2 = vpop.f32.mrb[129].mxu1  ;;  %v7717_v49 = vmul.f32 0.5, %v8557_v13  ;;  %v7720_v52 = vmul.f32 %v2436_v35, %v7494_v33  ;;  %v2628_v13 = vadd.f32 %v7459_v21, %v7266_v40  ;;  %v8561_v35 = vld [vmem:[#allocation104_spill] sm:$0xff] }
 0x285   :  { %v3237_v51 = vmul.f32 %v3109_v62, %v1925_v2  ;;  %v1927_v37 = vpop.f32.mrb[130].mxu1  ;;  %v2752_v62 = vmul.f32 0.7978846, %v2624_v5  ;;  %5122 = vtanh.f32 %v2749_v30  ;;  %v7733_v5 = vmul.f32 0.5, %v7253_v0 }
 0x286   :  { %v3240_v19 = vmul.f32 %v3112_v27, %v1927_v37  ;;  %v1929_v41 = vpop.f32.mrb[131].mxu1  ;;  %v5117_v37 = vpop.eup %5116  ;;  %v7727_v27 = vmul.f32 %v2440_v39, %v7517_v15  ;;  %v2632_v2 = vadd.f32 %v7467_v11, %v7273_v4  ;;  %v2320_v21 = vmul.f32 0.044715, %v7564_v38 }
 0x287   :  { %v3241_v57 = vmul.f32 %v3113_v59, %v1929_v41  ;;  %v3124_v41 = vmul.f32 %v2996_v53, %v7637_v31  ;;  %v8560_v59 = vld [vmem:[#allocation80_spill] sm:$0xff]  ;;  %5124 = vtanh.f32 %v2752_v62  ;;  %v2633_v0 = vadd.f32 %v7470_v28, %v7277_v32  ;;  %v5119_v8 = vpop.eup %5118 }
 0x288   :  { %v3364_v23 = vpack.c.bf16 %v3240_v19, %v3236_v16  ;;  %v2629_v10 = vadd.f32 %v8561_v35, %v8560_v59  ;;  %5126 = vtanh.f32 %v2753_v60  ;;  %v7745_v39 = vmul.f32 %v2441_v14, %v7523_v48 }
 0x289   :  { %v3365_v44 = vpack.c.bf16 %v3241_v57, %v3237_v51  ;;  %v3125_v19 = vmul.f32 %v2997_v43, %v7655_v56  ;;  %v2756_v53 = vmul.f32 0.7978846, %v2628_v13  ;;  %v3000_v62 = vadd.f32 1.0, %v5117_v37 }
 0x28a   :  { %v2444_v60 = vmul.f32 %v2316_v55, %v7552_v17  ;;  %v2321_v28 = vmul.f32 0.044715, %v7572_v6  ;;  %v2760_v35 = vmul.f32 0.7978846, %v2632_v2  ;;  %v2445_v14 = vmul.f32 %v2317_v63, %v7555_v54 }
 0x28b   :  { %v1933_v16 = vpop.f32.mrb[132].mxu1  ;;  %4035 = vmatprep.mubr.bf16.mxu0 %v3365_v44  ;;  %v2761_v56 = vmul.f32 0.7978846, %v2633_v0  ;;  %v3001_v13 = vadd.f32 1.0, %v5119_v8  ;;  %5128 = vtanh.f32 %v2756_v53  ;;  %v3128_v37 = vmul.f32 %v3000_v62, %v7661_v26 }
 0x28c   :  { %v3244_v31 = vmul.f32 %v3116_v42, %v1933_v16  ;;  %v1935_v30 = vpop.f32.mrb[133].mxu1  ;;  %4036 = vmatmul.mubr.bf16.vlgmr.msra.gmra.mrb[64].mxu0 %v3364_v23  ;;  %v7749_v42 = vmul.f32 0.5, %v7266_v40  ;;  %v2757_v23 = vmul.f32 0.7978846, %v2629_v10  ;;  %v2636_v40 = vadd.f32 %v7475_v46, %v7288_v25 }
 0x28d   :  { %v3245_v51 = vmul.f32 %v3117_v1, %v1935_v30  ;;  %v1937_v9 = vpop.f32.mrb[134].mxu1  ;;  %v2448_v1 = vmul.f32 %v2320_v21, %v7564_v38  ;;  %v5121_v43 = vpop.eup %5120  ;;  %v7759_v10 = vmul.f32 0.5, %v8560_v59  ;;  %v7764_v55 = vmul.f32 %v2444_v60, %v7552_v17  ;;  %v8562_v21 = vld [vmem:[#allocation105_spill] sm:$0xff] }
 0x28e   :  { %v3248_v57 = vmul.f32 %v3120_v22, %v1937_v9  ;;  %v1939_v11 = vpop.f32.mrb[135].mxu1  ;;  %5130 = vtanh.f32 %v2757_v23  ;;  %v2449_v63 = vmul.f32 %v2321_v28, %v7572_v6  ;;  %v2640_v46 = vadd.f32 %v8562_v21, %v7294_v3 }
 0x28f   :  { %v3249_v44 = vmul.f32 %v3121_v47, %v1939_v11  ;;  %v2637_v47 = vadd.f32 %v7481_v24, %v7292_v58  ;;  %5132 = vtanh.f32 %v2760_v35  ;;  %v7770_v26 = vmul.f32 %v2445_v14, %v7555_v54  ;;  %v8563_v24 = vld [vmem:[#allocation106_spill] sm:$0xff] }
 0x290   :  { %v3368_v16 = vpack.c.bf16 %v3248_v57, %v3244_v31  ;;  %v5123_v31 = vpop.eup %5122  ;;  %5134 = vtanh.f32 %v2761_v56  ;;  %v2641_v0 = vadd.f32 %v8563_v24, %v7297_v20  ;;  %v3129_v57 = vmul.f32 %v3001_v13, %v7674_v12  ;;  %v8569_v24 = vld [vmem:[#allocation109_spill] sm:$0xff] }
 0x291   :  { %v3369_v22 = vpack.c.bf16 %v3249_v44, %v3245_v51  ;;  %v5125_v8 = vpop.eup %5124  ;;  %v7775_v51 = vmul.f32 %v2448_v1, %v7564_v38  ;;  %v2764_v11 = vmul.f32 0.7978846, %v2636_v40  ;;  %v3004_v28 = vadd.f32 1.0, %v5121_v43  ;;  %v8565_v43 = vld [vmem:[#allocation107_spill] sm:$0xff] }
 0x292   :  { %v5127_v62 = vpop.eup %5126  ;;  %v2765_v44 = vmul.f32 0.7978846, %v2637_v47  ;;  %v7782_v35 = vmul.f32 %v2449_v63, %v7572_v6  ;;  %v2768_v1 = vmul.f32 0.7978846, %v2640_v46  ;;  %v2769_v12 = vmul.f32 0.7978846, %v2641_v0 }
 0x293   :  { %v1943_v2 = vpop.f32.mrb[136].mxu1  ;;  %4045 = vmatprep.mubr.bf16.mxu0 %v3369_v22  ;;  %v7785_v22 = vmul.f32 0.5, %v7277_v32  ;;  %v3009_v40 = vadd.f32 1.0, %v5127_v62  ;;  %5136 = vtanh.f32 %v2764_v11  ;;  %v3132_v47 = vmul.f32 %v3004_v28, %v7697_v45  ;;  %v8566_v63 = vld [vmem:[#allocation81_spill] sm:$0xff]  ;;  %v8571_v11 = vld [vmem:[#allocation110_spill] sm:$0xff] }
 0x294   :  { %v3252_v59 = vmul.f32 %v3124_v41, %v1943_v2  ;;  %v1945_v30 = vpop.f32.mrb[137].mxu1  ;;  %4046 = vmatmul.mubr.bf16.gmra.mrb[68].mxu0 %v3368_v16  ;;  %v7779_v41 = vmul.f32 0.5, %v7273_v4  ;;  %8564 = vst [vmem:[#allocation78_spill] sm:$0xff] %v7782_v35  ;;  %v3005_v16 = vadd.f32 1.0, %v5123_v31  ;;  %v2644_v4 = vadd.f32 %v8565_v43, %v7304_v36  ;;  %v8567_v2 = vld [vmem:[#allocation108_spill] sm:$0xff] }
 0x295   :  { %v3253_v9 = vmul.f32 %v3125_v19, %v1945_v30  ;;  %v1947_v53 = vpop.f32.mrb[138].mxu1  ;;  %v3008_v19 = vadd.f32 1.0, %v5125_v8  ;;  %5138 = vtanh.f32 %v2765_v44  ;;  %v2645_v21 = vadd.f32 %v8567_v2, %v8566_v63  ;;  %v5129_v46 = vpop.eup %5128  ;;  %v8568_v30 = vld [vmem:[#allocation82_spill] sm:$0xff] }
 0x296   :  { %v3256_v23 = vmul.f32 %v3128_v37, %v1947_v53  ;;  %v1949_v60 = vpop.f32.mrb[139].mxu1  ;;  %v2324_v37 = vmul.f32 0.044715, %v7601_v50  ;;  %v3133_v32 = vmul.f32 %v3005_v16, %v7714_v18  ;;  %5140 = vtanh.f32 %v2768_v1 }
 0x297   :  { %v3257_v14 = vmul.f32 %v3129_v57, %v1949_v60  ;;  %v2648_v0 = vadd.f32 %v8569_v24, %v8568_v30  ;;  %v3136_v45 = vmul.f32 %v3008_v19, %v7717_v49  ;;  %5142 = vtanh.f32 %v2769_v12  ;;  %v8570_v57 = vld [vmem:[#allocation66_spill] sm:$0xff]  ;;  %v8572_v60 = vld [vmem:[#allocation121_spill] sm:$0xff] }
 0x298   :  { %v3372_v56 = vpack.c.bf16 %v3256_v23, %v3252_v59  ;;  %v7795_v59 = vmul.f32 0.5, %v7288_v25  ;;  %v5131_v8 = vpop.eup %5130  ;;  %v2649_v62 = vadd.f32 %v8571_v11, %v8570_v57  ;;  %v2325_v18 = vmul.f32 0.044715, %v8572_v60 }
 0x299   :  { %v3373_v13 = vpack.c.bf16 %v3257_v14, %v3253_v9  ;;  %v5133_v23 = vpop.eup %5132  ;;  %v3137_v44 = vmul.f32 %v3009_v40, %v7733_v5  ;;  %v2772_v14 = vmul.f32 0.7978846, %v2644_v4  ;;  %v3012_v43 = vadd.f32 1.0, %v5129_v46  ;;  %v8574_v4 = vld [vmem:[#allocation67_spill] sm:$0xff] }
 0x29a   :  { %v5135_v16 = vpop.eup %5134  ;;  %v2773_v49 = vmul.f32 0.7978846, %v2645_v21  ;;  %v2452_v19 = vmul.f32 %v2324_v37, %v7601_v50  ;;  %v2776_v2 = vmul.f32 0.7978846, %v2648_v0  ;;  %v2777_v11 = vmul.f32 0.7978846, %v2649_v62 }
 0x29b   :  { %v1953_v31 = vpop.f32.mrb[140].mxu1  ;;  %4055 = vmatprep.mubr.bf16.mxu0 %v3373_v13  ;;  %v3017_v40 = vadd.f32 1.0, %v5135_v16  ;;  %5144 = vtanh.f32 %v2772_v14  ;;  %v3140_v21 = vmul.f32 %v3012_v43, %v7749_v42  ;;  %v8576_v37 = vld [vmem:[#allocation68_spill] sm:$0xff]  ;;  %v8581_v43 = vld [vmem:[#allocation69_spill] sm:$0xff] }
 0x29c   :  { %v3260_v9 = vmul.f32 %v3132_v47, %v1953_v31  ;;  %v1955_v53 = vpop.f32.mrb[141].mxu1  ;;  %4056 = vmatmul.mubr.bf16.gmra.mrb[72].mxu0 %v3372_v56  ;;  %v7805_v56 = vmul.f32 0.5, %v7292_v58  ;;  %v3013_v47 = vadd.f32 1.0, %v5131_v8  ;;  %v8573_v31 = vld [vmem:[#allocation94_spill] sm:$0xff]  ;;  %v2453_v58 = vmul.f32 %v2325_v18, %v8572_v60 }
 0x29d   :  { %v3261_v28 = vmul.f32 %v3133_v32, %v1955_v53  ;;  %v1957_v25 = vpop.f32.mrb[142].mxu1  ;;  %v2328_v24 = vmul.f32 0.044715, %v8573_v31  ;;  %v3016_v53 = vadd.f32 1.0, %v5133_v23  ;;  %5146 = vtanh.f32 %v2773_v49  ;;  %v5137_v0 = vpop.eup %5136  ;;  %v8579_v23 = vld [vmem:[#allocation83_spill] sm:$0xff]  ;;  %v8582_v49 = vld [vmem:[#allocation114_spill] sm:$0xff] }
 0x29e   :  { %v3264_v1 = vmul.f32 %v3136_v45, %v1957_v25  ;;  %v1959_v13 = vpop.f32.mrb[143].mxu1  ;;  %v8575_v45 = vld [vmem:[#allocation111_spill] sm:$0xff]  ;;  %v8577_v25 = vld [vmem:[#allocation112_spill] sm:$0xff]  ;;  %v3141_v62 = vmul.f32 %v3013_v47, %v7759_v10  ;;  %5148 = vtanh.f32 %v2776_v2  ;;  %v3145_v47 = vmul.f32 %v3017_v40, %v7785_v22 }
 0x29f   :  { %v3265_v12 = vmul.f32 %v3137_v44, %v1959_v13  ;;  %v2652_v46 = vadd.f32 %v8575_v45, %v8574_v4  ;;  %v2653_v8 = vadd.f32 %v8577_v25, %v8576_v37  ;;  %v8578_v44 = vld [vmem:[#allocation122_spill] sm:$0xff]  ;;  %v5139_v16 = vpop.eup %5138  ;;  %v3144_v42 = vmul.f32 %v3016_v53, %v7779_v41 }
 0x2a0   :  { %v3376_v32 = vpack.c.bf16 %v3264_v1, %v3260_v9  ;;  %v2329_v13 = vmul.f32 0.044715, %v8578_v44  ;;  %5150 = vtanh.f32 %v2777_v11  ;;  %v5141_v45 = vpop.eup %5140  ;;  %v7823_v25 = vmul.f32 %v2452_v19, %v7601_v50 }
 0x2a1   :  { %v3377_v5 = vpack.c.bf16 %v3265_v12, %v3261_v28  ;;  %v8580_v28 = vld [vmem:[#allocation113_spill] sm:$0xff]  ;;  %v2657_v12 = vadd.f32 %v8582_v49, %v8581_v43  ;;  %v2780_v2 = vmul.f32 0.7978846, %v2652_v46  ;;  %v3020_v35 = vadd.f32 1.0, %v5137_v0  ;;  %v8585_v46 = vld [vmem:[#allocation70_spill] sm:$0xff] }
 0x2a2   :  { %v2656_v14 = vadd.f32 %v8580_v28, %v8579_v23  ;;  %8583 = vst [vmem:[#allocation98_spill] sm:$0xff] %v7823_v25  ;;  %v5143_v28 = vpop.eup %5142  ;;  %v2781_v41 = vmul.f32 0.7978846, %v2653_v8  ;;  %v7828_v53 = vmul.f32 %v2453_v58, %v8572_v60  ;;  %v3021_v49 = vadd.f32 1.0, %v5139_v16  ;;  %v8587_v58 = vld [vmem:[#allocation71_spill] sm:$0xff] }
 0x2a3   :  { %v1963_v9 = vpop.f32.mrb[144].mxu1  ;;  %4065 = vmatprep.mubr.bf16.mxu0 %v3377_v5  ;;  %v2457_v19 = vmul.f32 %v2329_v13, %v8578_v44  ;;  %v2785_v25 = vmul.f32 0.7978846, %v2657_v12  ;;  %v3025_v40 = vadd.f32 1.0, %v5143_v28  ;;  %5152 = vtanh.f32 %v2780_v2  ;;  %v8589_v12 = vld [vmem:[#allocation72_spill] sm:$0xff] }
 0x2a4   :  { %v3268_v1 = vmul.f32 %v3140_v21, %v1963_v9  ;;  %v1965_v18 = vpop.f32.mrb[145].mxu1  ;;  %4066 = vmatmul.mubr.bf16.gmra.mrb[76].mxu0 %v3376_v32  ;;  %v2456_v21 = vmul.f32 %v2328_v24, %v8573_v31  ;;  %8584 = vst [vmem:[#allocation79_spill] sm:$0xff] %v7828_v53  ;;  %v2784_v6 = vmul.f32 0.7978846, %v2656_v14  ;;  %v8586_v24 = vld [vmem:[#allocation92_spill] sm:$0xff]  ;;  %v3148_v0 = vmul.f32 %v3020_v35, %v7795_v59  ;;  %v8591_v59 = vld [vmem:[#allocation73_spill] sm:$0xff] }
 0x2a5   :  { %v3269_v5 = vmul.f32 %v3141_v62, %v1965_v18  ;;  %v1967_v10 = vpop.f32.mrb[146].mxu1  ;;  %v3024_v18 = vadd.f32 1.0, %v5141_v45  ;;  %v2128_v8 = vmul.f32 0.5, %v7294_v3  ;;  %5154 = vtanh.f32 %v2781_v41  ;;  %v5145_v14 = vpop.eup %5144  ;;  %v8590_v45 = vld [vmem:[#allocation116_spill] sm:$0xff] }
 0x2a6   :  { %v3272_v9 = vmul.f32 %v3144_v42, %v1967_v10  ;;  %v1969_v32 = vpop.f32.mrb[147].mxu1  ;;  %v2660_v42 = vadd.f32 %v8586_v24, %v8585_v46  ;;  %v8588_v10 = vld [vmem:[#allocation115_spill] sm:$0xff]  ;;  %v3149_v13 = vmul.f32 %v3021_v49, %v7805_v56  ;;  %5156 = vtanh.f32 %v2784_v6 }
 0x2a7   :  { %v3273_v11 = vmul.f32 %v3145_v47, %v1969_v32  ;;  %v2661_v16 = vadd.f32 %v8588_v10, %v8587_v58  ;;  %v5147_v2 = vpop.eup %5146  ;;  %v3152_v3 = vmul.f32 %v3024_v18, %v2128_v8  ;;  %5158 = vtanh.f32 %v2785_v25 }
 0x2a8   :  { %v3380_v62 = vpack.c.bf16 %v3272_v9, %v3268_v1  ;;  %v2129_v1 = vmul.f32 0.5, %v7297_v20  ;;  %v8592_v9 = vld [vmem:[#allocation118_spill] sm:$0xff]  ;;  %v5149_v41 = vpop.eup %5148  ;;  %v2788_v6 = vmul.f32 0.7978846, %v2660_v42  ;;  %v7847_v24 = vmul.f32 %v2457_v19, %v8578_v44  ;;  %v8596_v19 = vld [vmem:[#allocation93_spill] sm:$0xff] }
 0x2a9   :  { %v3381_v22 = vpack.c.bf16 %v3273_v11, %v3269_v5  ;;  %v2664_v5 = vadd.f32 %v8590_v45, %v8589_v12  ;;  %v2665_v32 = vadd.f32 %v8592_v9, %v8591_v59  ;;  %v7844_v11 = vmul.f32 %v2456_v21, %v8573_v31  ;;  %v8606_v31 = vld [vmem:[#allocation123_spill] sm:$0xff] }
 0x2aa   :  { %v3153_v20 = vmul.f32 %v3025_v40, %v2129_v1  ;;  %8594 = vst [vmem:[#allocation102_spill] sm:$0xff] %v7847_v24  ;;  %v2789_v18 = vmul.f32 0.7978846, %v2661_v16  ;;  %v2132_v8 = vmul.f32 0.5, %v7304_v36  ;;  %v2133_v21 = vmul.f32 0.5, %v8566_v63  ;;  %v8595_v1 = vld [vmem:[#allocation84_spill] sm:$0xff] }
 0x2ab   :  { %v1973_v47 = vpop.f32.mrb[148].mxu1  ;;  %4075 = vmatprep.mubr.bf16.mxu0 %v3381_v22  ;;  %8593 = vst [vmem:[#allocation100_spill] sm:$0xff] %v7844_v11  ;;  %v5151_v22 = vpop.eup %5150  ;;  %v2792_v45 = vmul.f32 0.7978846, %v2664_v5  ;;  %5160 = vtanh.f32 %v2788_v6  ;;  %v2668_v24 = vadd.f32 %v8596_v19, %v8595_v1  ;;  %v8597_v16 = vld [vmem:[#allocation85_spill] sm:$0xff]  ;;  %v2137_v63 = vmul.f32 0.5, %v8570_v57 }
 0x2ac   :  { %v3276_v28 = vmul.f32 %v3148_v0, %v1973_v47  ;;  %v1975_v35 = vpop.f32.mrb[149].mxu1  ;;  %4076 = vmatmul.mubr.bf16.gmra.mrb[80].mxu0 %v3380_v62  ;;  %v3028_v62 = vadd.f32 1.0, %v5145_v14  ;;  %v3029_v47 = vadd.f32 1.0, %v5147_v2  ;;  %v3033_v42 = vadd.f32 1.0, %v5151_v22  ;;  %v8604_v19 = vld [vmem:[#allocation76_spill] sm:$0xff] }
 0x2ad   :  { %v3277_v56 = vmul.f32 %v3149_v13, %v1975_v35  ;;  %v1977_v49 = vpop.f32.mrb[150].mxu1  ;;  %v3032_v13 = vadd.f32 1.0, %v5149_v41  ;;  %v2793_v35 = vmul.f32 0.7978846, %v2665_v32  ;;  %v2136_v14 = vmul.f32 0.5, %v8568_v30  ;;  %v5153_v2 = vpop.eup %5152  ;;  %v8599_v32 = vld [vmem:[#allocation86_spill] sm:$0xff] }
 0x2ae   :  { %v3280_v0 = vmul.f32 %v3152_v3, %v1977_v49  ;;  %v1979_v10 = vpop.f32.mrb[151].mxu1  ;;  %v3156_v3 = vmul.f32 %v3028_v62, %v2132_v8  ;;  %5162 = vtanh.f32 %v2789_v18  ;;  %v8598_v49 = vld [vmem:[#allocation119_spill] sm:$0xff]  ;;  %v8600_v41 = vld [vmem:[#allocation120_spill] sm:$0xff]  ;;  %v2796_v57 = vmul.f32 0.7978846, %v2668_v24 }
 0x2af   :  { %v3281_v25 = vmul.f32 %v3153_v20, %v1979_v10  ;;  %v2669_v36 = vadd.f32 %v8598_v49, %v8597_v16  ;;  %5164 = vtanh.f32 %v2792_v45  ;;  %v5155_v20 = vpop.eup %5154  ;;  %v8601_v30 = vld [vmem:[#allocation87_spill] sm:$0xff]  ;;  %v8602_v10 = vld [vmem:[#allocation74_spill] sm:$0xff]  ;;  %v7863_v49 = vmul.f32 0.044715, %v8604_v19 }
 0x2b0   :  { %v3384_v9 = vpack.c.bf16 %v3280_v0, %v3276_v28  ;;  %v3157_v28 = vmul.f32 %v3029_v47, %v2133_v21  ;;  %v3160_v0 = vmul.f32 %v3032_v13, %v2136_v14  ;;  %5166 = vtanh.f32 %v2793_v35  ;;  %v5157_v18 = vpop.eup %5156 }
 0x2b1   :  { %v3385_v40 = vpack.c.bf16 %v3281_v25, %v3277_v56  ;;  %v2672_v56 = vadd.f32 %v8600_v41, %v8599_v32  ;;  %v2673_v62 = vadd.f32 %v8602_v10, %v8601_v30  ;;  %v8603_v25 = vld [vmem:[#allocation125_spill] sm:$0xff]  ;;  %v3161_v21 = vmul.f32 %v3033_v42, %v2137_v63  ;;  %v5159_v45 = vpop.eup %5158  ;;  %v8605_v63 = vld [vmem:[#allocation88_spill] sm:$0xff] }
 0x2b2   :  { %v2332_v8 = vmul.f32 0.044715, %v8603_v25  ;;  %v2140_v35 = vmul.f32 0.5, %v8574_v4  ;;  %v3037_v14 = vadd.f32 1.0, %v5155_v20  ;;  %v2141_v11 = vmul.f32 0.5, %v8576_v37 }
 0x2b3   :  { %v1983_v5 = vpop.f32.mrb[152].mxu1  ;;  %4085 = vmatprep.mubr.bf16.mxu0 %v3385_v40  ;;  %v2800_v10 = vmul.f32 0.7978846, %v2672_v56  ;;  %v3041_v24 = vadd.f32 1.0, %v5159_v45  ;;  %5168 = vtanh.f32 %v2796_v57  ;;  %v2676_v53 = vadd.f32 %v8606_v31, %v8605_v63 }
 0x2b4   :  { %v3284_v6 = vmul.f32 %v3156_v3, %v1983_v5  ;;  %v1985_v22 = vpop.f32.mrb[153].mxu1  ;;  %4086 = vmatmul.mubr.bf16.gmra.mrb[84].mxu0 %v3384_v9  ;;  %v3036_v5 = vadd.f32 1.0, %v5153_v2  ;;  %v2797_v9 = vmul.f32 0.7978846, %v2669_v36  ;;  %v2144_v2 = vmul.f32 0.5, %v8579_v23  ;;  %v8607_v36 = vld [vmem:[#allocation89_spill] sm:$0xff] }
 0x2b5   :  { %v3285_v40 = vmul.f32 %v3157_v28, %v1985_v22  ;;  %v1987_v47 = vpop.f32.mrb[154].mxu1  ;;  %v3040_v28 = vadd.f32 1.0, %v5157_v18  ;;  %v2801_v22 = vmul.f32 0.7978846, %v2673_v62  ;;  %v5161_v20 = vpop.eup %5160  ;;  %v2145_v37 = vmul.f32 0.5, %v8581_v43  ;;  %v8609_v62 = vld [vmem:[#allocation90_spill] sm:$0xff] }
 0x2b6   :  { %v3288_v41 = vmul.f32 %v3160_v0, %v1987_v47  ;;  %v1989_v3 = vpop.f32.mrb[155].mxu1  ;;  %v3164_v0 = vmul.f32 %v3036_v5, %v2140_v35  ;;  %5170 = vtanh.f32 %v2797_v9  ;;  %v8608_v47 = vld [vmem:[#allocation75_spill] sm:$0xff]  ;;  %v7878_v9 = vmul.f32 %v2332_v8, %v8603_v25 }
 0x2b7   :  { %v3289_v13 = vmul.f32 %v3161_v21, %v1989_v3  ;;  %v2677_v4 = vadd.f32 %v8608_v47, %v8607_v36  ;;  %5172 = vtanh.f32 %v2800_v10  ;;  %v8610_v18 = vld [vmem:[#allocation95_spill] sm:$0xff]  ;;  %v3168_v45 = vmul.f32 %v3040_v28, %v2144_v2  ;;  %v8613_v10 = vld [vmem:[#allocation96_spill] sm:$0xff] }
 0x2b8   :  { %v3388_v44 = vpack.c.bf16 %v3288_v41, %v3284_v6  ;;  %v3165_v6 = vmul.f32 %v3037_v14, %v2141_v11  ;;  %v5163_v21 = vpop.eup %5162  ;;  %5174 = vtanh.f32 %v2801_v22  ;;  %v8611_v23 = vld [vmem:[#allocation91_spill] sm:$0xff]  ;;  %v8612_v41 = vld [vmem:[#allocation124_spill] sm:$0xff]  ;;  %v3169_v43 = vmul.f32 %v3041_v24, %v2145_v37 }
 0x2b9   :  { %v3389_v42 = vpack.c.bf16 %v3289_v13, %v3285_v40  ;;  %v2680_v40 = vadd.f32 %v8610_v18, %v8609_v62  ;;  %v2681_v3 = vadd.f32 %v8612_v41, %v8611_v23  ;;  %v5165_v5 = vpop.eup %5164  ;;  %v2804_v35 = vmul.f32 0.7978846, %v2676_v53 }
 0x2ba   :  { %v5167_v14 = vpop.eup %5166  ;;  %v2805_v28 = vmul.f32 0.7978846, %v2677_v4  ;;  %v2148_v2 = vmul.f32 0.5, %v8585_v46  ;;  %v2149_v8 = vmul.f32 0.5, %v8587_v58  ;;  %v2684_v37 = vadd.f32 %v7677_v7, %v7434_v61  ;;  %v8614_v4 = vld [vmem:[#allocation99_spill] sm:$0xff] }
 0x2bb   :  { %v1993_v56 = vpop.f32.mrb[156].mxu1  ;;  %4095 = vmatprep.mubr.bf16.mxu0 %v3389_v42  ;;  %v7881_v42 = vmul.f32 0.044715, %v8613_v10  ;;  %v2808_v18 = vmul.f32 0.7978846, %v2680_v40  ;;  %v3049_v53 = vadd.f32 1.0, %v5167_v14  ;;  %5176 = vtanh.f32 %v2804_v35 }
 0x2bc   :  { %v3292_v57 = vmul.f32 %v3164_v0, %v1993_v56  ;;  %v1995_v31 = vpop.f32.mrb[157].mxu1  ;;  %4096 = vmatmul.mubr.bf16.gmra.mrb[88].mxu0 %v3388_v44  ;;  %v3044_v44 = vadd.f32 1.0, %v5161_v20  ;;  %v3045_v56 = vadd.f32 1.0, %v5163_v21  ;;  %v2152_v20 = vmul.f32 0.5, %v8589_v12  ;;  %v8618_v12 = vld [vmem:[#allocation103_spill] sm:$0xff] }
 0x2bd   :  { %v3293_v11 = vmul.f32 %v3165_v6, %v1995_v31  ;;  %v1997_v13 = vpop.f32.mrb[158].mxu1  ;;  %v3048_v6 = vadd.f32 1.0, %v5165_v5  ;;  %v2809_v31 = vmul.f32 0.7978846, %v2681_v3  ;;  %5178 = vtanh.f32 %v2805_v28  ;;  %v5169_v21 = vpop.eup %5168  ;;  %v8616_v3 = vld [vmem:[#allocation101_spill] sm:$0xff] }
 0x2be   :  { %v3296_v0 = vmul.f32 %v3168_v45, %v1997_v13  ;;  %v1999_v47 = vpop.f32.mrb[159].mxu1  ;;  %v3172_v45 = vmul.f32 %v3044_v44, %v2148_v2  ;;  %v8615_v13 = vld [vmem:[#allocation77_spill] sm:$0xff]  ;;  %v2153_v58 = vmul.f32 0.5, %v8591_v59  ;;  %5180 = vtanh.f32 %v2808_v18 }
 0x2bf   :  { %v3297_v22 = vmul.f32 %v3169_v43, %v1999_v47  ;;  %v2685_v46 = vadd.f32 %v8615_v13, %v8614_v4  ;;  %v8617_v5 = vld [vmem:[#allocation97_spill] sm:$0xff]  ;;  %v3176_v14 = vmul.f32 %v3048_v6, %v2152_v20  ;;  %5182 = vtanh.f32 %v2809_v31 }
 0x2c0   :  { %v3392_v41 = vpack.c.bf16 %v3296_v0, %v3292_v57  ;;  %v3173_v57 = vmul.f32 %v3045_v56, %v2149_v8  ;;  %v5171_v43 = vpop.eup %5170  ;;  %v8619_v0 = vld [vmem:[#allocation127_spill] sm:$0xff]  ;;  %v7897_v28 = vmul.f32 %v7863_v49, %v8604_v19  ;;  %v3177_v2 = vmul.f32 %v3049_v53, %v2153_v58  ;;  %v8620_v8 = vld [vmem:[#allocation126_spill] sm:$0xff] }
 0x2c1   :  { %v3393_v24 = vpack.c.bf16 %v3297_v22, %v3293_v11  ;;  %v2688_v11 = vadd.f32 %v8617_v5, %v8616_v3  ;;  %v2689_v47 = vadd.f32 %v8619_v0, %v8618_v12  ;;  %v5173_v44 = vpop.eup %5172  ;;  %v2812_v56 = vmul.f32 0.7978846, %v2684_v37 }
 0x2c2   :  { %v5175_v18 = vpop.eup %5174  ;;  %v3052_v6 = vadd.f32 1.0, %v5169_v21  ;;  %v2813_v31 = vmul.f32 0.7978846, %v2685_v46  ;;  %v2156_v13 = vmul.f32 0.5, %v8595_v1  ;;  %v2157_v49 = vmul.f32 0.5, %v8597_v16 }
 0x2c3   :  { %v2003_v40 = vpop.f32.mrb[160].mxu1  ;;  %4105 = vmatprep.mubr.bf16.mxu0 %v3393_v24  ;;  %v7900_v24 = vmul.f32 0.044715, %v8620_v8  ;;  %v2816_v5 = vmul.f32 0.7978846, %v2688_v11  ;;  %v3057_v37 = vadd.f32 1.0, %v5175_v18  ;;  %5184 = vtanh.f32 %v2812_v56 }
 0x2c4   :  { %v3300_v35 = vmul.f32 %v3172_v45, %v2003_v40  ;;  %v2005_v7 = vpop.f32.mrb[161].mxu1  ;;  %4106 = vmatmul.mubr.bf16.gmra.mrb[92].mxu0 %v3392_v41  ;;  %v3053_v40 = vadd.f32 1.0, %v5171_v43  ;;  %v2692_v58 = vadd.f32 %v7720_v52, %v7494_v33  ;;  %v2160_v21 = vmul.f32 0.5, %v8599_v32 }
 0x2c5   :  { %v3301_v22 = vmul.f32 %v3173_v57, %v2005_v7  ;;  %v2007_v59 = vpop.f32.mrb[162].mxu1  ;;  %v3056_v57 = vadd.f32 1.0, %v5173_v44  ;;  %v2817_v7 = vmul.f32 0.7978846, %v2689_v47  ;;  %5186 = vtanh.f32 %v2813_v31  ;;  %v5177_v46 = vpop.eup %5176 }
 0x2c6   :  { %v3304_v45 = vmul.f32 %v3176_v14, %v2007_v59  ;;  %v2009_v41 = vpop.f32.mrb[163].mxu1  ;;  %v3180_v14 = vmul.f32 %v3052_v6, %v2156_v13  ;;  %v2693_v1 = vadd.f32 %v7723_v34, %v7505_v29  ;;  %v3181_v43 = vmul.f32 %v3053_v40, %v2157_v49 }
 0x2c7   :  { %v3305_v20 = vmul.f32 %v3177_v2, %v2009_v41  ;;  %v2161_v16 = vmul.f32 0.5, %v8601_v30  ;;  %5188 = vtanh.f32 %v2816_v5  ;;  %v5179_v47 = vpop.eup %5178  ;;  %v2697_v32 = vadd.f32 %v7745_v39, %v7523_v48 }
 0x2c8   :  { %v3396_v0 = vpack.c.bf16 %v3304_v45, %v3300_v35  ;;  %v2696_v35 = vadd.f32 %v7727_v27, %v7517_v15  ;;  %5190 = vtanh.f32 %v2817_v7  ;;  %v5181_v34 = vpop.eup %5180  ;;  %v7916_v59 = vmul.f32 %v7878_v9, %v8603_v25 }
 0x2c9   :  { %v3397_v53 = vpack.c.bf16 %v3305_v20, %v3301_v22  ;;  %v3184_v22 = vmul.f32 %v3056_v57, %v2160_v21  ;;  %v3185_v56 = vmul.f32 %v3057_v37, %v2161_v16  ;;  %v2820_v18 = vmul.f32 0.7978846, %v2692_v58  ;;  %v5183_v45 = vpop.eup %5182 }
 0x2ca   :  { %v7920_v27 = vmul.f32 %v7881_v42, %v8613_v10  ;;  %v3060_v31 = vadd.f32 1.0, %v5177_v46  ;;  %v2821_v20 = vmul.f32 0.7978846, %v2693_v1  ;;  %v2164_v39 = vmul.f32 0.5, %v8605_v63 }
 0x2cb   :  { %v2013_v11 = vpop.f32.mrb[164].mxu1  ;;  %4115 = vmatprep.mubr.bf16.mxu0 %v3397_v53  ;;  %v3061_v40 = vadd.f32 1.0, %v5179_v47  ;;  %v2824_v5 = vmul.f32 0.7978846, %v2696_v35  ;;  %v3064_v49 = vadd.f32 1.0, %v5181_v34  ;;  %v3065_v53 = vadd.f32 1.0, %v5183_v45 }
 0x2cc   :  { %v3308_v44 = vmul.f32 %v3180_v14, %v2013_v11  ;;  %v2015_v52 = vpop.f32.mrb[165].mxu1  ;;  %4116 = vmatmul.mubr.bf16.gmra.mrb[96].mxu0 %v3396_v0  ;;  %v2165_v0 = vmul.f32 0.5, %v8607_v36  ;;  %v2825_v57 = vmul.f32 0.7978846, %v2697_v32  ;;  %5192 = vtanh.f32 %v2820_v18  ;;  %v8622_v35 = vld [vmem:[#allocation78_spill] sm:$0xff] }
 0x2cd   :  { %v3309_v2 = vmul.f32 %v3181_v43, %v2015_v52  ;;  %v2017_v30 = vpop.f32.mrb[166].mxu1  ;;  %v2700_v42 = vadd.f32 %v7764_v55, %v7552_v17  ;;  %v3188_v37 = vmul.f32 %v3060_v31, %v2164_v39  ;;  %v2168_v58 = vmul.f32 0.5, %v8609_v62  ;;  %v5185_v14 = vpop.eup %5184  ;;  %v8621_v62 = vld [vmem:[#allocation117_spill] sm:$0xff] }
 0x2ce   :  { %v3312_v41 = vmul.f32 %v3184_v22, %v2017_v30  ;;  %v2019_v6 = vpop.f32.mrb[167].mxu1  ;;  %5194 = vtanh.f32 %v2821_v20  ;;  %v2701_v63 = vadd.f32 %v7770_v26, %v7555_v54  ;;  %v3189_v1 = vmul.f32 %v3061_v40, %v2165_v0 }
 0x2cf   :  { %v3313_v13 = vmul.f32 %v3185_v56, %v2019_v6  ;;  %v2169_v36 = vmul.f32 0.5, %v8611_v23  ;;  %5196 = vtanh.f32 %v2824_v5  ;;  %v2704_v46 = vadd.f32 %v7775_v51, %v7564_v38  ;;  %v5187_v11 = vpop.eup %5186 }
 0x2d0   :  { %v3400_v9 = vpack.c.bf16 %v3312_v41, %v3308_v44  ;;  %v3192_v16 = vmul.f32 %v3064_v49, %v2168_v58  ;;  %5198 = vtanh.f32 %v2825_v57  ;;  %v2705_v47 = vadd.f32 %v8622_v35, %v8621_v62  ;;  %v8624_v57 = vld [vmem:[#allocation79_spill] sm:$0xff]  ;;  %v8626_v58 = vld [vmem:[#allocation100_spill] sm:$0xff] }
 0x2d1   :  { %v3401_v7 = vpack.c.bf16 %v3313_v13, %v3309_v2  ;;  %v5189_v26 = vpop.eup %5188  ;;  %v7936_v44 = vmul.f32 %v7897_v28, %v8604_v19  ;;  %v3193_v22 = vmul.f32 %v3065_v53, %v2169_v36  ;;  %v2828_v32 = vmul.f32 0.7978846, %v2700_v42 }
 0x2d2   :  { %v5191_v34 = vpop.eup %5190  ;;  %v2465_v51 = vmul.f32 %v7900_v24, %v8620_v8  ;;  %v3068_v56 = vadd.f32 1.0, %v5185_v14  ;;  %v2829_v18 = vmul.f32 0.7978846, %v2701_v63  ;;  %v2172_v41 = vmul.f32 0.5, %v7434_v61 }
 0x2d3   :  { %v2023_v21 = vpop.f32.mrb[168].mxu1  ;;  %4125 = vmatprep.mubr.bf16.mxu0 %v3401_v7  ;;  %v3069_v6 = vadd.f32 1.0, %v5187_v11  ;;  %v2832_v31 = vmul.f32 0.7978846, %v2704_v46  ;;  %v2173_v28 = vmul.f32 0.5, %v8614_v4  ;;  %v3072_v13 = vadd.f32 1.0, %v5189_v26 }
 0x2d4   :  { %v3316_v43 = vmul.f32 %v3188_v37, %v2023_v21  ;;  %v2025_v55 = vpop.f32.mrb[169].mxu1  ;;  %4126 = vmatmul.mubr.bf16.gmra.mrb[100].mxu0 %v3400_v9  ;;  %v2833_v39 = vmul.f32 0.7978846, %v2705_v47  ;;  %v3073_v5 = vadd.f32 1.0, %v5191_v34  ;;  %5200 = vtanh.f32 %v2828_v32  ;;  %v8623_v9 = vld [vmem:[#allocation98_spill] sm:$0xff] }
 0x2d5   :  { %v3317_v52 = vmul.f32 %v3189_v1, %v2025_v55  ;;  %v2027_v23 = vpop.f32.mrb[170].mxu1  ;;  %v2708_v24 = vadd.f32 %v8623_v9, %v7601_v50  ;;  %v3196_v0 = vmul.f32 %v3068_v56, %v2172_v41  ;;  %v2176_v49 = vmul.f32 0.5, %v8616_v3  ;;  %v8625_v37 = vld [vmem:[#allocation94_spill] sm:$0xff] }
 0x2d6   :  { %v3320_v2 = vmul.f32 %v3192_v16, %v2027_v23  ;;  %v2029_v30 = vpop.f32.mrb[171].mxu1  ;;  %5202 = vtanh.f32 %v2829_v18  ;;  %v2709_v61 = vadd.f32 %v8624_v57, %v8572_v60  ;;  %v5193_v7 = vpop.eup %5192  ;;  %v3197_v42 = vmul.f32 %v3069_v6, %v2173_v28  ;;  %v8627_v3 = vld [vmem:[#allocation122_spill] sm:$0xff] }
 0x2d7   :  { %v3321_v45 = vmul.f32 %v3193_v22, %v2029_v30  ;;  %v2177_v4 = vmul.f32 0.5, %v8618_v12  ;;  %5204 = vtanh.f32 %v2832_v31  ;;  %v2712_v63 = vadd.f32 %v8626_v58, %v8625_v37  ;;  %v8628_v46 = vld [vmem:[#allocation102_spill] sm:$0xff] }
 0x2d8   :  { %v3404_v20 = vpack.c.bf16 %v3320_v2, %v3316_v43  ;;  %v5195_v14 = vpop.eup %5194  ;;  %v3200_v36 = vmul.f32 %v3072_v13, %v2176_v49  ;;  %5206 = vtanh.f32 %v2833_v39  ;;  %v2713_v11 = vadd.f32 %v8628_v46, %v8627_v3 }
 0x2d9   :  { %v3405_v40 = vpack.c.bf16 %v3321_v45, %v3317_v52  ;;  %v5197_v43 = vpop.eup %5196  ;;  %v2592_v55 = vmul.f32 %v7920_v27, %v8613_v10  ;;  %v3201_v12 = vmul.f32 %v3073_v5, %v2177_v4  ;;  %v2836_v47 = vmul.f32 0.7978846, %v2708_v24 }
 0x2da   :  { %v5199_v26 = vpop.eup %5198  ;;  %v2593_v52 = vmul.f32 %v2465_v51, %v8620_v8  ;;  %v3076_v32 = vadd.f32 1.0, %v5193_v7  ;;  %v2837_v34 = vmul.f32 0.7978846, %v2709_v61  ;;  %v2180_v30 = vmul.f32 0.5, %v7494_v33 }
 0x2db   :  { %v2033_v53 = vpop.f32.mrb[172].mxu1  ;;  %4135 = vmatprep.mubr.bf16.mxu0 %v3405_v40  ;;  %v3077_v56 = vadd.f32 1.0, %v5195_v14  ;;  %v2840_v18 = vmul.f32 0.7978846, %v2712_v63  ;;  %v2181_v41 = vmul.f32 0.5, %v7505_v29  ;;  %v3080_v27 = vadd.f32 1.0, %v5197_v43 }
 0x2dc   :  { %v3324_v21 = vmul.f32 %v3196_v0, %v2033_v53  ;;  %v2035_v1 = vpop.f32.mrb[173].mxu1  ;;  %4136 = vmatmul.mubr.bf16.gmra.mrb[104].mxu0 %v3404_v20  ;;  %v2841_v6 = vmul.f32 0.7978846, %v2713_v11  ;;  %v3081_v20 = vadd.f32 1.0, %v5199_v26  ;;  %5208 = vtanh.f32 %v2836_v47 }
 0x2dd   :  { %v3325_v16 = vmul.f32 %v3197_v42, %v2035_v1  ;;  %v2037_v35 = vpop.f32.mrb[174].mxu1  ;;  %v2716_v51 = vadd.f32 %v7916_v59, %v8603_v25  ;;  %v3204_v28 = vmul.f32 %v3076_v32, %v2180_v30  ;;  %v2184_v13 = vmul.f32 0.5, %v7517_v15 }
 0x2de   :  { %v3328_v23 = vmul.f32 %v3200_v36, %v2037_v35  ;;  %v2039_v22 = vpop.f32.mrb[175].mxu1  ;;  %5210 = vtanh.f32 %v2837_v34  ;;  %v2717_v33 = vadd.f32 %v7936_v44, %v8604_v19  ;;  %v5201_v39 = vpop.eup %5200  ;;  %v3205_v5 = vmul.f32 %v3077_v56, %v2181_v41 }
 0x2df   :  { %v3329_v2 = vmul.f32 %v3201_v12, %v2039_v22  ;;  %v2185_v29 = vmul.f32 0.5, %v7523_v48  ;;  %5212 = vtanh.f32 %v2840_v18  ;;  %v2720_v9 = vadd.f32 %v2592_v55, %v8613_v10 }
 0x2e0   :  { %v3408_v45 = vpack.c.bf16 %v3328_v23, %v3324_v21  ;;  %v5203_v24 = vpop.eup %5202  ;;  %v3208_v59 = vmul.f32 %v3080_v27, %v2184_v13  ;;  %5214 = vtanh.f32 %v2841_v6  ;;  %v2721_v15 = vadd.f32 %v2593_v52, %v8620_v8 }
 0x2e1   :  { %v3409_v31 = vpack.c.bf16 %v3329_v2, %v3325_v16  ;;  %v5205_v57 = vpop.eup %5204  ;;  %v3209_v7 = vmul.f32 %v3081_v20, %v2185_v29  ;;  %v2844_v53 = vmul.f32 0.7978846, %v2716_v51  ;;  %v3084_v48 = vadd.f32 1.0, %v5201_v39 }
 0x2e2   :  { %v5207_v42 = vpop.eup %5206  ;;  %v2845_v63 = vmul.f32 0.7978846, %v2717_v33  ;;  %v3085_v21 = vadd.f32 1.0, %v5203_v24  ;;  %v2848_v1 = vmul.f32 0.7978846, %v2720_v9  ;;  %v2188_v46 = vmul.f32 0.5, %v7552_v17 }
 0x2e3   :  { %v2043_v40 = vpop.f32.mrb[176].mxu1  ;;  %4145 = vmatprep.mubr.bf16.mxu0 %v3409_v31  ;;  %v3088_v11 = vadd.f32 1.0, %v5205_v57  ;;  %v2849_v43 = vmul.f32 0.7978846, %v2721_v15  ;;  %v2189_v16 = vmul.f32 0.5, %v7555_v54  ;;  %v3089_v35 = vadd.f32 1.0, %v5207_v42 }
 0x2e4   :  { %v3332_v0 = vmul.f32 %v3204_v28, %v2043_v40  ;;  %v2045_v49 = vpop.f32.mrb[177].mxu1  ;;  %4146 = vmatmul.mubr.bf16.gmra.mrb[108].mxu0 %v3408_v45  ;;  %5216 = vtanh.f32 %v2844_v53  ;;  %v3212_v12 = vmul.f32 %v3084_v48, %v2188_v46  ;;  %v2192_v47 = vmul.f32 0.5, %v7564_v38 }
 0x2e5   :  { %v3333_v61 = vmul.f32 %v3205_v5, %v2045_v49  ;;  %v2047_v44 = vpop.f32.mrb[178].mxu1  ;;  %5218 = vtanh.f32 %v2845_v63  ;;  %v3213_v23 = vmul.f32 %v3085_v21, %v2189_v16  ;;  %v2193_v22 = vmul.f32 0.5, %v8621_v62 }
 0x2e6   :  { %v3336_v4 = vmul.f32 %v3208_v59, %v2047_v44  ;;  %v2049_v58 = vpop.f32.mrb[179].mxu1  ;;  %v5209_v26 = vpop.eup %5208  ;;  %5220 = vtanh.f32 %v2848_v1  ;;  %v3216_v2 = vmul.f32 %v3088_v11, %v2192_v47  ;;  %v2196_v62 = vmul.f32 0.5, %v7601_v50 }
 0x2e7   :  { %v3337_v14 = vmul.f32 %v3209_v7, %v2049_v58  ;;  %5222 = vtanh.f32 %v2849_v43  ;;  %v3217_v18 = vmul.f32 %v3089_v35, %v2193_v22  ;;  %v3092_v27 = vadd.f32 1.0, %v5209_v26 }
 0x2e8   :  { %v3412_v36 = vpack.c.bf16 %v3336_v4, %v3332_v0  ;;  %v5211_v32 = vpop.eup %5210  ;;  %v2197_v13 = vmul.f32 0.5, %v8572_v60  ;;  %v2200_v40 = vmul.f32 0.5, %v8625_v37  ;;  %v2201_v24 = vmul.f32 0.5, %v8627_v3 }
 0x2e9   :  { %v3413_v55 = vpack.c.bf16 %v3337_v14, %v3333_v61  ;;  %v5213_v54 = vpop.eup %5212  ;;  %v3093_v31 = vadd.f32 1.0, %v5211_v32  ;;  %v3220_v39 = vmul.f32 %v3092_v27, %v2196_v62  ;;  %v2204_v48 = vmul.f32 0.5, %v8603_v25  ;;  %v8629_v32 = vld [vmem:[#allocation2_spill] sm:$0xff] }
 0x2ea   :  { %v5215_v45 = vpop.eup %5214  ;;  %v3096_v51 = vadd.f32 1.0, %v5213_v54  ;;  %v2205_v14 = vmul.f32 0.5, %v8604_v19  ;;  %v2209_v43 = vmul.f32 0.5, %v8620_v8 }
 0x2eb   :  { %v2053_v52 = vpop.f32.mrb[180].mxu1  ;;  %4155 = vmatprep.mubr.bf16.mxu0 %v3413_v55  ;;  %v3097_v33 = vadd.f32 1.0, %v5215_v45  ;;  %v3221_v9 = vmul.f32 %v3093_v31, %v2197_v13  ;;  %v8633_v31 = vld [vmem:[#allocation4_spill] sm:$0xff] }
 0x2ec   :  { %v3340_v17 = vmul.f32 %v3212_v12, %v2053_v52  ;;  %v2055_v34 = vpop.f32.mrb[181].mxu1  ;;  %4156 = vmatmul.mubr.bf16.gmra.mrb[112].mxu0 %v3412_v36  ;;  %v3224_v15 = vmul.f32 %v3096_v51, %v2200_v40  ;;  %v2208_v36 = vmul.f32 0.5, %v8613_v10  ;;  %v8634_v51 = vld [vmem:[#allocation5_spill] sm:$0xff] }
 0x2ed   :  { %v3341_v30 = vmul.f32 %v3213_v23, %v2055_v34  ;;  %v2057_v56 = vpop.f32.mrb[182].mxu1  ;;  %v3225_v44 = vmul.f32 %v3097_v33, %v2201_v24  ;;  %v8635_v33 = vld [vmem:[#allocation8_spill] sm:$0xff] }
 0x2ee   :  { %v3344_v38 = vmul.f32 %v3216_v2, %v2057_v56  ;;  %v2059_v41 = vpop.f32.mrb[183].mxu1  ;;  %v5217_v5 = vpop.eup %5216  ;;  %v8630_v2 = vld [vmem:[#allocation3_spill] sm:$0xff] }
 0x2ef   :  { %v3345_v6 = vmul.f32 %v3217_v18, %v2059_v41  ;;  %v5219_v0 = vpop.eup %5218  ;;  %v3100_v42 = vadd.f32 1.0, %v5217_v5 }
 0x2f0   :  { %v3416_v20 = vpack.c.bf16 %v3344_v38, %v3340_v17  ;;  %v5221_v50 = vpop.eup %5220  ;;  %v3101_v4 = vadd.f32 1.0, %v5219_v0  ;;  %v8632_v38 = vld [vmem:[#allocation7_spill] sm:$0xff] }
 0x2f1   :  { %v3417_v28 = vpack.c.bf16 %v3345_v6, %v3341_v30  ;;  %v5223_v60 = vpop.eup %5222  ;;  %v3104_v63 = vadd.f32 1.0, %v5221_v50  ;;  %v3228_v1 = vmul.f32 %v3100_v42, %v2204_v48  ;;  %v8631_v30 = vld [vmem:[#allocation6_spill] sm:$0xff]  ;;  %v8638_v50 = vld [vmem:[#allocation13_spill] sm:$0xff]  ;;  %v8640_v42 = vld [vmem:[#allocation11_spill] sm:$0xff] }
 0x2f2   :  { %v3105_v21 = vadd.f32 1.0, %v5223_v60  ;;  %v3229_v11 = vmul.f32 %v3101_v4, %v2205_v14  ;;  %v8641_v48 = vld [vmem:[#allocation16_spill] sm:$0xff]  ;;  %v8642_v14 = vld [vmem:[#allocation17_spill] sm:$0xff] }
 0x2f3   :  { %v2063_v29 = vpop.f32.mrb[184].mxu1  ;;  %4165 = vmatprep.mubr.bf16.mxu0 %v3417_v28  ;;  %v3232_v35 = vmul.f32 %v3104_v63, %v2208_v36  ;;  %v8643_v36 = vld [vmem:[#allocation14_spill] sm:$0xff] }
 0x2f4   :  { %v3348_v49 = vmul.f32 %v3220_v39, %v2063_v29  ;;  %v2065_v59 = vpop.f32.mrb[185].mxu1  ;;  %4166 = vmatmul.mubr.bf16.gmra.mrb[116].mxu0 %v3416_v20  ;;  %v3233_v25 = vmul.f32 %v3105_v21, %v2209_v43  ;;  %v8636_v29 = vld [vmem:[#allocation9_spill] sm:$0xff] }
 0x2f5   :  { %v3349_v57 = vmul.f32 %v3221_v9, %v2065_v59  ;;  %v2067_v61 = vpop.f32.mrb[186].mxu1 }
 0x2f6   :  { %v3352_v7 = vmul.f32 %v3224_v15, %v2067_v61  ;;  %v2069_v53 = vpop.f32.mrb[187].mxu1 }
 0x2f7   :  { %v3353_v37 = vmul.f32 %v3225_v44, %v2069_v53  ;;  %v8639_v44 = vld [vmem:[#allocation10_spill] sm:$0xff] }
 0x2f8   :  { %v3420_v58 = vpack.c.bf16 %v3352_v7, %v3348_v49  ;;  %v8637_v49 = vld [vmem:[#allocation12_spill] sm:$0xff] }
 0x2f9   :  { %v3421_v3 = vpack.c.bf16 %v3353_v37, %v3349_v57 }
 0x2fb   :  { %v2073_v46 = vpop.f32.mrb[188].mxu1  ;;  %4175 = vmatprep.mubr.bf16.mxu0 %v3421_v3 }
 0x2fc   :  { %v3356_v55 = vmul.f32 %v3228_v1, %v2073_v46  ;;  %v2075_v16 = vpop.f32.mrb[189].mxu1  ;;  %4176 = vmatmul.mubr.bf16.gmra.mrb[120].mxu0 %v3420_v58 }
 0x2fd   :  { %v3357_v12 = vmul.f32 %v3229_v11, %v2075_v16  ;;  %v2077_v47 = vpop.f32.mrb[190].mxu1 }
 0x2fe   :  { %v3360_v26 = vmul.f32 %v3232_v35, %v2077_v47  ;;  %v2079_v52 = vpop.f32.mrb[191].mxu1  ;;  %v8645_v47 = vld [vmem:[#allocation20_spill] sm:$0xff] }
 0x2ff   :  { %v3361_v23 = vmul.f32 %v3233_v25, %v2079_v52  ;;  %v8646_v52 = vld [vmem:[#allocation21_spill] sm:$0xff] }
 0x300   :  { %v3424_v19 = vpack.c.bf16 %v3360_v26, %v3356_v55  ;;  %v8644_v55 = vld [vmem:[#allocation15_spill] sm:$0xff] }
 0x301   :  { %v3425_v22 = vpack.c.bf16 %v3361_v23, %v3357_v12 }
 0x303   :  { %4185 = vmatprep.mubr.bf16.mxu0 %v3425_v22  ;;  %v8647_v22 = vld [vmem:[#allocation18_spill] sm:$0xff] }
 0x304   :  { %4186 = vmatmul.mubr.bf16.gmra.mrb[124].mxu0 %v3424_v19 }
 0x35f   :  { %v4037_v10 = vpop.f32.mrb[64].mxu0 }
 0x360   :  { %v4196_v17 = vadd.f32 %v4037_v10, %v8629_v32  ;;  %v4039_v34 = vpop.f32.mrb[65].mxu0 }
 0x361   :  { %v4197_v8 = vadd.f32 %v4039_v34, %v8630_v2  ;;  %v4041_v54 = vpop.f32.mrb[66].mxu0  ;;  %v8648_v34 = vld [vmem:[#allocation19_spill] sm:$0xff] }
 0x362   :  { %v4198_v56 = vadd.f32 %v4041_v54, %v8631_v30  ;;  %v4043_v18 = vpop.f32.mrb[67].mxu0  ;;  %v8649_v30 = vld [vmem:[#allocation24_spill] sm:$0xff] }
 0x363   :  { %v4712_v45 = vpack.c.bf16 %v4197_v8, %v4196_v17  ;;  %v4199_v41 = vadd.f32 %v4043_v18, %v8632_v38 }
 0x365   :  { %4452 = vst [vmem:[%s8141_s4] sm:$0xff] %v4712_v45  ;;  %v4713_v27 = vpack.c.bf16 %v4199_v41, %v4198_v56  ;;  %v8650_v45 = vld [vmem:[#allocation25_spill] sm:$0xff] }
 0x367   :  { %4453 = vst [vmem:[%s8141_s4 + $0x8] sm:$0xff] %v4713_v27  ;;  %v4047_v6 = vpop.f32.mrb[68].mxu0  ;;  %v8651_v27 = vld [vmem:[#allocation22_spill] sm:$0xff] }
 0x368   :  { %v4200_v20 = vadd.f32 %v4047_v6, %v8633_v31  ;;  %v4049_v62 = vpop.f32.mrb[69].mxu0 }
 0x369   :  { %v4201_v28 = vadd.f32 %v4049_v62, %v8634_v51  ;;  %v4051_v13 = vpop.f32.mrb[70].mxu0  ;;  %v8652_v62 = vld [vmem:[#allocation23_spill] sm:$0xff] }
 0x36a   :  { %v4202_v39 = vadd.f32 %v4051_v13, %v8635_v33  ;;  %v4053_v40 = vpop.f32.mrb[71].mxu0  ;;  %v8653_v33 = vld [vmem:[#allocation28_spill] sm:$0xff] }
 0x36b   :  { %v4714_v5 = vpack.c.bf16 %v4201_v28, %v4200_v20  ;;  %v4203_v9 = vadd.f32 %v4053_v40, %v8636_v29 }
 0x36d   :  { %4454 = vst [vmem:[%s8141_s4 + $0x10] sm:$0xff] %v4714_v5  ;;  %v4715_v24 = vpack.c.bf16 %v4203_v9, %v4202_v39  ;;  %v8654_v5 = vld [vmem:[#allocation29_spill] sm:$0xff] }
 0x36f   :  { %4455 = vst [vmem:[%s8141_s4 + $0x18] sm:$0xff] %v4715_v24  ;;  %v4057_v0 = vpop.f32.mrb[72].mxu0  ;;  %v8655_v24 = vld [vmem:[#allocation26_spill] sm:$0xff] }
 0x370   :  { %v4204_v59 = vadd.f32 %v4057_v0, %v8637_v49  ;;  %v4059_v15 = vpop.f32.mrb[73].mxu0 }
 0x371   :  { %v4205_v57 = vadd.f32 %v4059_v15, %v8638_v50  ;;  %v4061_v61 = vpop.f32.mrb[74].mxu0  ;;  %v8656_v15 = vld [vmem:[#allocation27_spill] sm:$0xff] }
 0x372   :  { %v4206_v60 = vadd.f32 %v4061_v61, %v8639_v44  ;;  %v4063_v7 = vpop.f32.mrb[75].mxu0  ;;  %v8657_v44 = vld [vmem:[#allocation32_spill] sm:$0xff] }
 0x373   :  { %v4716_v53 = vpack.c.bf16 %v4205_v57, %v4204_v59  ;;  %v4207_v37 = vadd.f32 %v4063_v7, %v8640_v42 }
 0x375   :  { %4456 = vst [vmem:[%s8141_s4 + $0x20] sm:$0xff] %v4716_v53  ;;  %v4717_v4 = vpack.c.bf16 %v4207_v37, %v4206_v60  ;;  %v8658_v53 = vld [vmem:[#allocation33_spill] sm:$0xff] }
 0x377   :  { %4457 = vst [vmem:[%s8141_s4 + $0x28] sm:$0xff] %v4717_v4  ;;  %v4067_v58 = vpop.f32.mrb[76].mxu0  ;;  %v8659_v4 = vld [vmem:[#allocation30_spill] sm:$0xff] }
 0x378   :  { %v4208_v63 = vadd.f32 %v4067_v58, %v8641_v48  ;;  %v4069_v3 = vpop.f32.mrb[77].mxu0 }
 0x379   :  { %v4209_v21 = vadd.f32 %v4069_v3, %v8642_v14  ;;  %v4071_v1 = vpop.f32.mrb[78].mxu0  ;;  %v8660_v3 = vld [vmem:[#allocation31_spill] sm:$0xff] }
 0x37a   :  { %v4210_v46 = vadd.f32 %v4071_v1, %v8643_v36  ;;  %v4073_v11 = vpop.f32.mrb[79].mxu0  ;;  %v8661_v36 = vld [vmem:[#allocation36_spill] sm:$0xff] }
 0x37b   :  { %v4718_v43 = vpack.c.bf16 %v4209_v21, %v4208_v63  ;;  %v4211_v16 = vadd.f32 %v4073_v11, %v8644_v55 }
 0x37d   :  { %4458 = vst [vmem:[%s8141_s4 + $0x30] sm:$0xff] %v4718_v43  ;;  %v4719_v35 = vpack.c.bf16 %v4211_v16, %v4210_v46  ;;  %v8662_v43 = vld [vmem:[#allocation37_spill] sm:$0xff] }
 0x37f   :  { %4459 = vst [vmem:[%s8141_s4 + $0x38] sm:$0xff] %v4719_v35  ;;  %v4077_v12 = vpop.f32.mrb[80].mxu0  ;;  %v8663_v35 = vld [vmem:[#allocation34_spill] sm:$0xff] }
 0x380   :  { %v4212_v25 = vadd.f32 %v4077_v12, %v8645_v47  ;;  %v4079_v26 = vpop.f32.mrb[81].mxu0 }
 0x381   :  { %v4213_v23 = vadd.f32 %v4079_v26, %v8646_v52  ;;  %v4081_v19 = vpop.f32.mrb[82].mxu0  ;;  %v8664_v26 = vld [vmem:[#allocation35_spill] sm:$0xff] }
 0x382   :  { %v4214_v10 = vadd.f32 %v4081_v19, %v8647_v22  ;;  %v4083_v32 = vpop.f32.mrb[83].mxu0  ;;  %v8665_v22 = vld [vmem:[#allocation40_spill] sm:$0xff] }
 0x383   :  { %v4720_v17 = vpack.c.bf16 %v4213_v23, %v4212_v25  ;;  %v4215_v2 = vadd.f32 %v4083_v32, %v8648_v34 }
 0x385   :  { %4460 = vst [vmem:[%s8141_s4 + $0x40] sm:$0xff] %v4720_v17  ;;  %v4721_v8 = vpack.c.bf16 %v4215_v2, %v4214_v10  ;;  %v8666_v17 = vld [vmem:[#allocation41_spill] sm:$0xff] }
 0x387   :  { %4461 = vst [vmem:[%s8141_s4 + $0x48] sm:$0xff] %v4721_v8  ;;  %v4087_v54 = vpop.f32.mrb[84].mxu0  ;;  %v8667_v8 = vld [vmem:[#allocation38_spill] sm:$0xff] }
 0x388   :  { %v4216_v56 = vadd.f32 %v4087_v54, %v8649_v30  ;;  %v4089_v18 = vpop.f32.mrb[85].mxu0 }
 0x389   :  { %v4217_v38 = vadd.f32 %v4089_v18, %v8650_v45  ;;  %v4091_v41 = vpop.f32.mrb[86].mxu0  ;;  %v8668_v18 = vld [vmem:[#allocation39_spill] sm:$0xff] }
 0x38a   :  { %v4218_v6 = vadd.f32 %v4091_v41, %v8651_v27  ;;  %v4093_v31 = vpop.f32.mrb[87].mxu0  ;;  %v8669_v27 = vld [vmem:[#allocation44_spill] sm:$0xff] }
 0x38b   :  { %v4722_v20 = vpack.c.bf16 %v4217_v38, %v4216_v56  ;;  %v4219_v51 = vadd.f32 %v4093_v31, %v8652_v62 }
 0x38d   :  { %4462 = vst [vmem:[%s8141_s4 + $0x50] sm:$0xff] %v4722_v20  ;;  %v4723_v28 = vpack.c.bf16 %v4219_v51, %v4218_v6  ;;  %v8670_v20 = vld [vmem:[#allocation45_spill] sm:$0xff] }
 0x38f   :  { %4463 = vst [vmem:[%s8141_s4 + $0x58] sm:$0xff] %v4723_v28  ;;  %v4097_v13 = vpop.f32.mrb[88].mxu0  ;;  %v8671_v28 = vld [vmem:[#allocation42_spill] sm:$0xff] }
 0x390   :  { %v4220_v39 = vadd.f32 %v4097_v13, %v8653_v33  ;;  %v4099_v40 = vpop.f32.mrb[89].mxu0 }
 0x391   :  { %v4221_v29 = vadd.f32 %v4099_v40, %v8654_v5  ;;  %v4101_v9 = vpop.f32.mrb[90].mxu0  ;;  %v8672_v40 = vld [vmem:[#allocation43_spill] sm:$0xff] }
 0x392   :  { %v4222_v0 = vadd.f32 %v4101_v9, %v8655_v24  ;;  %v4103_v49 = vpop.f32.mrb[91].mxu0  ;;  %v8673_v24 = vld [vmem:[#allocation48_spill] sm:$0xff] }
 0x393   :  { %v4724_v59 = vpack.c.bf16 %v4221_v29, %v4220_v39  ;;  %v4223_v50 = vadd.f32 %v4103_v49, %v8656_v15 }
 0x395   :  { %4464 = vst [vmem:[%s8141_s4 + $0x60] sm:$0xff] %v4724_v59  ;;  %v4725_v57 = vpack.c.bf16 %v4223_v50, %v4222_v0  ;;  %v8674_v59 = vld [vmem:[#allocation49_spill] sm:$0xff] }
 0x397   :  { %4465 = vst [vmem:[%s8141_s4 + $0x68] sm:$0xff] %v4725_v57  ;;  %v4107_v61 = vpop.f32.mrb[92].mxu0  ;;  %v8675_v57 = vld [vmem:[#allocation46_spill] sm:$0xff] }
 0x398   :  { %v4224_v60 = vadd.f32 %v4107_v61, %v8657_v44  ;;  %v4109_v7 = vpop.f32.mrb[93].mxu0 }
 0x399   :  { %v4225_v42 = vadd.f32 %v4109_v7, %v8658_v53  ;;  %v4111_v37 = vpop.f32.mrb[94].mxu0  ;;  %v8676_v7 = vld [vmem:[#allocation47_spill] sm:$0xff] }
 0x39a   :  { %v4226_v58 = vadd.f32 %v4111_v37, %v8659_v4  ;;  %v4113_v48 = vpop.f32.mrb[95].mxu0  ;;  %v8677_v4 = vld [vmem:[#allocation52_spill] sm:$0xff] }
 0x39b   :  { %v4726_v63 = vpack.c.bf16 %v4225_v42, %v4224_v60  ;;  %v4227_v14 = vadd.f32 %v4113_v48, %v8660_v3 }
 0x39d   :  { %4466 = vst [vmem:[%s8141_s4 + $0x70] sm:$0xff] %v4726_v63  ;;  %v4727_v21 = vpack.c.bf16 %v4227_v14, %v4226_v58  ;;  %v8678_v63 = vld [vmem:[#allocation53_spill] sm:$0xff] }
 0x39f   :  { %4467 = vst [vmem:[%s8141_s4 + $0x78] sm:$0xff] %v4727_v21  ;;  %v4117_v1 = vpop.f32.mrb[96].mxu0  ;;  %v8679_v21 = vld [vmem:[#allocation50_spill] sm:$0xff] }
 0x3a0   :  { %v4228_v46 = vadd.f32 %v4117_v1, %v8661_v36  ;;  %v4119_v11 = vpop.f32.mrb[97].mxu0 }
 0x3a1   :  { %v4229_v55 = vadd.f32 %v4119_v11, %v8662_v43  ;;  %v4121_v16 = vpop.f32.mrb[98].mxu0  ;;  %v8680_v11 = vld [vmem:[#allocation51_spill] sm:$0xff] }
 0x3a2   :  { %v4230_v12 = vadd.f32 %v4121_v16, %v8663_v35  ;;  %v4123_v47 = vpop.f32.mrb[99].mxu0  ;;  %v8681_v35 = vld [vmem:[#allocation56_spill] sm:$0xff] }
 0x3a3   :  { %v4728_v25 = vpack.c.bf16 %v4229_v55, %v4228_v46  ;;  %v4231_v52 = vadd.f32 %v4123_v47, %v8664_v26 }
 0x3a5   :  { %4468 = vst [vmem:[%s8141_s4 + $0x80] sm:$0xff] %v4728_v25  ;;  %v4729_v23 = vpack.c.bf16 %v4231_v52, %v4230_v12  ;;  %v8682_v25 = vld [vmem:[#allocation57_spill] sm:$0xff] }
 0x3a7   :  { %4469 = vst [vmem:[%s8141_s4 + $0x88] sm:$0xff] %v4729_v23  ;;  %v4127_v19 = vpop.f32.mrb[100].mxu0  ;;  %v8683_v23 = vld [vmem:[#allocation54_spill] sm:$0xff] }
 0x3a8   :  { %v4232_v10 = vadd.f32 %v4127_v19, %v8665_v22  ;;  %v4129_v32 = vpop.f32.mrb[101].mxu0 }
 0x3a9   :  { %v4233_v34 = vadd.f32 %v4129_v32, %v8666_v17  ;;  %v4131_v2 = vpop.f32.mrb[102].mxu0  ;;  %v8684_v32 = vld [vmem:[#allocation55_spill] sm:$0xff] }
 0x3aa   :  { %v4234_v54 = vadd.f32 %v4131_v2, %v8667_v8  ;;  %v4133_v30 = vpop.f32.mrb[103].mxu0  ;;  %v8685_v8 = vld [vmem:[#allocation60_spill] sm:$0xff] }
 0x3ab   :  { %v4730_v56 = vpack.c.bf16 %v4233_v34, %v4232_v10  ;;  %v4235_v45 = vadd.f32 %v4133_v30, %v8668_v18 }
 0x3ad   :  { %4470 = vst [vmem:[%s8141_s4 + $0x90] sm:$0xff] %v4730_v56  ;;  %v4731_v38 = vpack.c.bf16 %v4235_v45, %v4234_v54  ;;  %v8686_v56 = vld [vmem:[#allocation61_spill] sm:$0xff] }
 0x3af   :  { %4471 = vst [vmem:[%s8141_s4 + $0x98] sm:$0xff] %v4731_v38  ;;  %v4137_v41 = vpop.f32.mrb[104].mxu0  ;;  %v8687_v38 = vld [vmem:[#allocation58_spill] sm:$0xff] }
 0x3b0   :  { %v4236_v6 = vadd.f32 %v4137_v41, %v8669_v27  ;;  %v4139_v31 = vpop.f32.mrb[105].mxu0 }
 0x3b1   :  { %v4237_v62 = vadd.f32 %v4139_v31, %v8670_v20  ;;  %v4141_v51 = vpop.f32.mrb[106].mxu0  ;;  %v8688_v31 = vld [vmem:[#allocation59_spill] sm:$0xff] }
 0x3b2   :  { %v4238_v13 = vadd.f32 %v4141_v51, %v8671_v28  ;;  %v4143_v33 = vpop.f32.mrb[107].mxu0  ;;  %v8689_v28 = vld [vmem:[#allocation64_spill] sm:$0xff] }
 0x3b3   :  { %v4732_v39 = vpack.c.bf16 %v4237_v62, %v4236_v6  ;;  %v4239_v5 = vadd.f32 %v4143_v33, %v8672_v40 }
 0x3b5   :  { %4472 = vst [vmem:[%s8141_s4 + $0xa0] sm:$0xff] %v4732_v39  ;;  %v4733_v29 = vpack.c.bf16 %v4239_v5, %v4238_v13  ;;  %v8690_v39 = vld [vmem:[#allocation65_spill] sm:$0xff] }
 0x3b7   :  { %4473 = vst [vmem:[%s8141_s4 + $0xa8] sm:$0xff] %v4733_v29  ;;  %v4147_v9 = vpop.f32.mrb[108].mxu0  ;;  %v8691_v29 = vld [vmem:[#allocation62_spill] sm:$0xff] }
 0x3b8   :  { %v4240_v0 = vadd.f32 %v4147_v9, %v8673_v24  ;;  %v4149_v49 = vpop.f32.mrb[109].mxu0 }
 0x3b9   :  { %v4241_v15 = vadd.f32 %v4149_v49, %v8674_v59  ;;  %v4151_v50 = vpop.f32.mrb[110].mxu0  ;;  %v8692_v49 = vld [vmem:[#allocation63_spill] sm:$0xff] }
 0x3ba   :  { %v4242_v61 = vadd.f32 %v4151_v50, %v8675_v57  ;;  %v4153_v44 = vpop.f32.mrb[111].mxu0 }
 0x3bb   :  { %v4734_v60 = vpack.c.bf16 %v4241_v15, %v4240_v0  ;;  %v4243_v53 = vadd.f32 %v4153_v44, %v8676_v7 }
 0x3bd   :  { %4474 = vst [vmem:[%s8141_s4 + $0xb0] sm:$0xff] %v4734_v60  ;;  %v4735_v42 = vpack.c.bf16 %v4243_v53, %v4242_v61 }
 0x3bf   :  { %4475 = vst [vmem:[%s8141_s4 + $0xb8] sm:$0xff] %v4735_v42  ;;  %v4157_v37 = vpop.f32.mrb[112].mxu0 }
 0x3c0   :  { %v4244_v58 = vadd.f32 %v4157_v37, %v8677_v4  ;;  %v4159_v48 = vpop.f32.mrb[113].mxu0 }
 0x3c1   :  { %v4245_v3 = vadd.f32 %v4159_v48, %v8678_v63  ;;  %v4161_v14 = vpop.f32.mrb[114].mxu0 }
 0x3c2   :  { %v4246_v1 = vadd.f32 %v4161_v14, %v8679_v21  ;;  %v4163_v36 = vpop.f32.mrb[115].mxu0 }
 0x3c3   :  { %v4736_v46 = vpack.c.bf16 %v4245_v3, %v4244_v58  ;;  %v4247_v43 = vadd.f32 %v4163_v36, %v8680_v11 }
 0x3c5   :  { %4476 = vst [vmem:[%s8141_s4 + $0xc0] sm:$0xff] %v4736_v46  ;;  %v4737_v55 = vpack.c.bf16 %v4247_v43, %v4246_v1 }
 0x3c7   :  { %4477 = vst [vmem:[%s8141_s4 + $0xc8] sm:$0xff] %v4737_v55  ;;  %v4167_v16 = vpop.f32.mrb[116].mxu0 }
 0x3c8   :  { %v4248_v12 = vadd.f32 %v4167_v16, %v8681_v35  ;;  %v4169_v47 = vpop.f32.mrb[117].mxu0 }
 0x3c9   :  { %v4249_v26 = vadd.f32 %v4169_v47, %v8682_v25  ;;  %v4171_v52 = vpop.f32.mrb[118].mxu0 }
 0x3ca   :  { %v4250_v19 = vadd.f32 %v4171_v52, %v8683_v23  ;;  %v4173_v22 = vpop.f32.mrb[119].mxu0 }
 0x3cb   :  { %v4738_v10 = vpack.c.bf16 %v4249_v26, %v4248_v12  ;;  %v4251_v17 = vadd.f32 %v4173_v22, %v8684_v32 }
 0x3cd   :  { %4478 = vst [vmem:[%s8141_s4 + $0xd0] sm:$0xff] %v4738_v10  ;;  %v4739_v34 = vpack.c.bf16 %v4251_v17, %v4250_v19 }
 0x3cf   :  { %4479 = vst [vmem:[%s8141_s4 + $0xd8] sm:$0xff] %v4739_v34  ;;  %v4177_v2 = vpop.f32.mrb[120].mxu0 }
 0x3d0   :  { %v4252_v54 = vadd.f32 %v4177_v2, %v8685_v8  ;;  %v4179_v30 = vpop.f32.mrb[121].mxu0 }
 0x3d1   :  { %v4253_v18 = vadd.f32 %v4179_v30, %v8686_v56  ;;  %v4181_v45 = vpop.f32.mrb[122].mxu0 }
 0x3d2   :  { %v4254_v41 = vadd.f32 %v4181_v45, %v8687_v38  ;;  %v4183_v27 = vpop.f32.mrb[123].mxu0 }
 0x3d3   :  { %v4740_v6 = vpack.c.bf16 %v4253_v18, %v4252_v54  ;;  %v4255_v20 = vadd.f32 %v4183_v27, %v8688_v31 }
 0x3d5   :  { %4480 = vst [vmem:[%s8141_s4 + $0xe0] sm:$0xff] %v4740_v6  ;;  %v4741_v62 = vpack.c.bf16 %v4255_v20, %v4254_v41 }
 0x3d7   :  { %4481 = vst [vmem:[%s8141_s4 + $0xe8] sm:$0xff] %v4741_v62  ;;  %v4187_v51 = vpop.f32.mrb[124].mxu0 }
 0x3d8   :  { %v4256_v13 = vadd.f32 %v4187_v51, %v8689_v28  ;;  %v4189_v33 = vpop.f32.mrb[125].mxu0 }
 0x3d9   :  { %v4257_v40 = vadd.f32 %v4189_v33, %v8690_v39  ;;  %v4191_v5 = vpop.f32.mrb[126].mxu0 }
 0x3da   :  { %v4258_v9 = vadd.f32 %v4191_v5, %v8691_v29  ;;  %v4193_v24 = vpop.f32.mrb[127].mxu0 }
 0x3db   :  { %v4742_v0 = vpack.c.bf16 %v4257_v40, %v4256_v13  ;;  %v4259_v59 = vadd.f32 %v4193_v24, %v8692_v49 }
 0x3dd   :  { %4482 = vst [vmem:[%s8141_s4 + $0xf0] sm:$0xff] %v4742_v0  ;;  %v4743_v15 = vpack.c.bf16 %v4259_v59, %v4258_v9 }
 0x3df   :  { %4483 = vst [vmem:[%s8141_s4 + $0xf8] sm:$0xff] %v4743_v15 }

// kernel: mt5_retriever_encoder.5
= control target key start
LH: loop header
LB: loop body
LE: loop exit
PB: predicated region body
PF: predicated region fallthrough
CT: control target
= control target key end

     0   :  { %s6281_s21 = smov 0   ;;  %s6283_s22 = smov 0   ;;  %s8202_s0 = inlined_call_operand.vmem [shape: bf16[2,128,256], index: 0, kind: input, shape index: {}]   ;;  %s8203_s1 = inlined_call_operand.vmem [shape: f32[1,256], index: 1, kind: input, shape index: {}]   ;;  %s8204_s2 = inlined_call_operand.vmem [shape: bf16[256,768], index: 2, kind: input, shape index: {}]   ;;  %s8205_s3 = inlined_call_operand.vmem [shape: bf16[4,128,128], index: 3, kind: input, shape index: {}]   ;;  %s8206_s4 = inlined_call_operand.vmem [shape: f32[2,1,128], index: 4, kind: input, shape index: {}]   ;;  %s8207_s5 = inlined_call_operand.vmem [shape: bf16[256,256], index: 5, kind: input, shape index: {}]   ;;  %s8208_s6 = inlined_call_operand.vmem [shape: bf16[2,128,256], index: 6, kind: output, shape index: {}]  }
   0x1   :  { %s6285_s23 = smov 0  }
   0x2 LB: > { %s28_s24 = sadd.s32 1, %s6238_s22  ;;  %p4744_p0 = scmp.ge.s32.totalorder %s6242_s23, 1  ;;  %s6242_s23 = sphi %s6285_s23, %s16_s23   ;;  %s6238_s22 = sphi %s6283_s22, %s8329_s22   ;;  %s6234_s21 = sphi %s6281_s21, %s8328_s21  }
   0x3   : > { %p30_p1 = scmp.ge.s32.totalorder %s28_s24, 2  ;;  %p245_p2 = scmp.lt.s32.totalorder %s6242_s23, 3 }
   0x5   : > { %s8331_s24 = smov (%p30_p1, %s28_s24), 0  ;;  %p246_p3 = pnand %p4744_p0, %p245_p2 }
   0x7   : > { %249 = sbr.rel (%p246_p3) target bundleno = 3167 (0xc5f), region = 44 }
   0xe   : > { %p288_p4 = scmp.lt.s32.totalorder %s6234_s21, 1  ;;  %v5739_v0 = vld [vmem:[%s8204_s2 + $0x4] ss:$24 sps:$4 sm:$0xff]   ;;  %v5743_v2 = vld [vmem:[%s8204_s2] ss:$24 sps:$4 sm:$0xff]   ;;  %vm1746_vm0 = vcmask 523264  }
   0xf   : > { %v5741_v1 = vld [vmem:[%s8204_s2 + $0xc] ss:$24 sps:$4 sm:$0xff]   ;;  %1163 = vmatprep.subr.bf16.mxu0 %v5739_v0  ;;  %v5744_v3 = vld [vmem:[%s8204_s2 + $0x8] ss:$24 sps:$4 sm:$0xff]   ;;  %v5747_v5 = vld [vmem:[%s8204_s2 + $0x3c] ss:$24 sps:$4 sm:$0xff]  }
  0x10   : > { %s8333_s21 = smov (!%p288_p4, %s6234_s21), 1  ;;  %1276 = vmatprep.subr.bf16.mxu1 %v5741_v1  ;;  %v5745_v4 = vld [vmem:[%s8204_s2 + $0x34] ss:$24 sps:$4 sm:$0xff]   ;;  %1164 = vmatpush1.bf16.msra.mxu0 %v5743_v2  ;;  %v5749_v6 = vld [vmem:[%s8204_s2 + $0x30] ss:$24 sps:$4 sm:$0xff]   ;;  %s6244_s19 = smov 64  }
  0x11   : > { %s5008_s11 = sshll.u32 %s8333_s21, 7  ;;  %1277 = vmatpush1.bf16.msra.mxu1 %v5744_v3  ;;  %1165 = vmatprep.subr.bf16.mxu0 %v5745_v4  ;;  %v5750_v7 = vld [vmem:[%s8204_s2 + $0x38] ss:$24 sps:$4 sm:$0xff]   ;;  %v5751_v37 = vld [vmem:[%s8204_s2 + $0x64] ss:$24 sps:$4 sm:$0xff]   ;;  %s7055_s30 = scalar_lea.vmem %s8206_s4, %s8333_s21 }
  0x12   : > { %s6328_s18 = scalar_lea.vmem %s8202_s0, %s5008_s11  ;;  %1278 = vmatprep.subr.bf16.mxu1 %v5747_v5  ;;  %v5753_v43 = vld [vmem:[%s8204_s2 + $0x6c] ss:$24 sps:$4 sm:$0xff]   ;;  %v5755_v48 = vld [vmem:[%s8204_s2 + $0x60] ss:$24 sps:$4 sm:$0xff]   ;;  %v5759_v59 = vld [vmem:[%s8204_s2 + $0x9c] ss:$24 sps:$4 sm:$0xff]  }
  0x13   : > { %v318_v8 = vld [vmem:[%s6328_s18] sm:$0xff]  ;;  %v320_v9 = vld [vmem:[%s6328_s18 + $0x10] sm:$0xff]  ;;  %v319_v10 = vld [vmem:[%s6328_s18 + $0x8] sm:$0xff] }
  0x14   : > { %v6336_v11 = vunpack.c.l.bf16 %v318_v8  ;;  %v6338_v12 = vunpack.c.h.bf16 %v318_v8  ;;  %v6340_v13 = vunpack.c.l.bf16 %v320_v9  ;;  %v6342_v14 = vunpack.c.h.bf16 %v320_v9  ;;  %v321_v15 = vld [vmem:[%s6328_s18 + $0x18] sm:$0xff]  ;;  %v323_v20 = vld [vmem:[%s6328_s18 + $0x28] sm:$0xff]  ;;  %1166 = vmatpush1.bf16.msra.mxu0 %v5749_v6  ;;  %v322_v25 = vld [vmem:[%s6328_s18 + $0x20] sm:$0xff] }
  0x15   : > { %v6345_v16 = vunpack.c.l.bf16 %v319_v10  ;;  %v6347_v17 = vunpack.c.h.bf16 %v319_v10  ;;  %v6349_v18 = vunpack.c.l.bf16 %v321_v15  ;;  %v6351_v19 = vunpack.c.h.bf16 %v321_v15  ;;  %1279 = vmatpush1.bf16.msra.mxu1 %v5750_v7  ;;  %v325_v30 = vld [vmem:[%s6328_s18 + $0x38] sm:$0xff]  ;;  %v324_v31 = vld [vmem:[%s6328_s18 + $0x30] sm:$0xff]  ;;  %v327_v36 = vld [vmem:[%s6328_s18 + $0x48] sm:$0xff]  ;;  %1167 = vmatprep.subr.bf16.mxu0 %v5751_v37 }
  0x16   : > { %v366_v21 = vmul.f32 %v6336_v11, %v6336_v11  ;;  %v367_v22 = vmul.f32 %v6338_v12, %v6338_v12  ;;  %v370_v23 = vmul.f32 %v6340_v13, %v6340_v13  ;;  %v371_v24 = vmul.f32 %v6342_v14, %v6342_v14  ;;  %v326_v42 = vld [vmem:[%s6328_s18 + $0x40] sm:$0xff]  ;;  %v329_v54 = vld [vmem:[%s6328_s18 + $0x58] sm:$0xff]  ;;  %1280 = vmatprep.subr.bf16.mxu1 %v5753_v43  ;;  %v5757_v55 = vld [vmem:[%s8204_s2 + $0x94] ss:$24 sps:$4 sm:$0xff]  }
  0x17   : > { %v368_v26 = vmul.f32 %v6345_v16, %v6345_v16  ;;  %v369_v27 = vmul.f32 %v6347_v17, %v6347_v17  ;;  %v372_v28 = vmul.f32 %v6349_v18, %v6349_v18  ;;  %v373_v29 = vmul.f32 %v6351_v19, %v6351_v19  ;;  %v5756_v49 = vld [vmem:[%s8204_s2 + $0x68] ss:$24 sps:$4 sm:$0xff]   ;;  %v328_v58 = vld [vmem:[%s6328_s18 + $0x50] sm:$0xff]  ;;  %v5763_v6 = vld [vmem:[%s8204_s2 + $0xc4] ss:$24 sps:$4 sm:$0xff]  }
  0x18   : > { %v398_v32 = vadd.f32 %v367_v22, %v366_v21  ;;  %v404_v33 = vadd.f32 %v371_v24, %v370_v23  ;;  %v6373_v34 = vunpack.c.l.bf16 %v323_v20  ;;  %v6375_v35 = vunpack.c.h.bf16 %v323_v20  ;;  %1168 = vmatpush1.bf16.msra.mxu0 %v5755_v48  ;;  %v5761_v60 = vld [vmem:[%s8204_s2 + $0x90] ss:$24 sps:$4 sm:$0xff]   ;;  %v5765_v8 = vld [vmem:[%s8204_s2 + $0xcc] ss:$24 sps:$4 sm:$0xff]   ;;  %v5767_v9 = vld [vmem:[%s8204_s2 + $0xc0] ss:$24 sps:$4 sm:$0xff]  }
  0x19   : > { %v401_v38 = vadd.f32 %v369_v27, %v368_v26  ;;  %v407_v39 = vadd.f32 %v373_v29, %v372_v28  ;;  %v6381_v40 = vunpack.c.l.bf16 %v322_v25  ;;  %v6383_v41 = vunpack.c.h.bf16 %v322_v25  ;;  %1281 = vmatpush1.bf16.msra.mxu1 %v5756_v49  ;;  %1169 = vmatprep.subr.bf16.mxu0 %v5757_v55  ;;  %v5762_v1 = vld [vmem:[%s8204_s2 + $0x98] ss:$24 sps:$4 sm:$0xff]   ;;  %v331_v7 = vld [vmem:[%s6328_s18 + $0x68] sm:$0xff]  ;;  %v5771_v27 = vld [vmem:[%s8204_s2 + $0xfc] ss:$24 sps:$4 sm:$0xff]  }
  0x1a   : > { %399 = vadd.xlane.f32.xlu0 %v398_v32  ;;  %405 = vadd.xlane.f32.xlu1 %v404_v33  ;;  %v376_v44 = vmul.f32 %v6373_v34, %v6373_v34  ;;  %v377_v45 = vmul.f32 %v6375_v35, %v6375_v35  ;;  %v6393_v46 = vunpack.c.l.bf16 %v325_v30  ;;  %v6395_v47 = vunpack.c.h.bf16 %v325_v30  ;;  %v5768_v10 = vld [vmem:[%s8204_s2 + $0xc8] ss:$24 sps:$4 sm:$0xff]   ;;  %v5769_v22 = vld [vmem:[%s8204_s2 + $0xf4] ss:$24 sps:$4 sm:$0xff]  }
  0x1b   : > { %v374_v50 = vmul.f32 %v6381_v40, %v6381_v40  ;;  %v375_v51 = vmul.f32 %v6383_v41, %v6383_v41  ;;  %v6407_v52 = vunpack.c.l.bf16 %v324_v31  ;;  %v6409_v53 = vunpack.c.h.bf16 %v324_v31  ;;  %1282 = vmatprep.subr.bf16.mxu1 %v5759_v59  ;;  %v330_v31 = vld [vmem:[%s6328_s18 + $0x60] sm:$0xff]  ;;  %v5773_v32 = vld [vmem:[%s8204_s2 + $0xf0] ss:$24 sps:$4 sm:$0xff]  }
  0x1c   : > { %v380_v56 = vmul.f32 %v6393_v46, %v6393_v46  ;;  %v381_v57 = vmul.f32 %v6395_v47, %v6395_v47  ;;  %v413_v61 = vadd.f32 %v377_v45, %v376_v44  ;;  %v6430_v0 = vunpack.c.l.bf16 %v327_v36  ;;  %1170 = vmatpush1.bf16.msra.mxu0 %v5761_v60  ;;  %v5777_v45 = vld [vmem:[%s8204_s2 + $0x12c] ss:$24 sps:$4 sm:$0xff]   ;;  %v332_v55 = vld [vmem:[%s6328_s18 + $0x70] sm:$0xff] }
  0x1d   : > { %v378_v62 = vmul.f32 %v6407_v52, %v6407_v52  ;;  %v379_v63 = vmul.f32 %v6409_v53, %v6409_v53  ;;  %v410_v2 = vadd.f32 %v375_v51, %v374_v50  ;;  %v6435_v3 = vunpack.c.h.bf16 %v327_v36  ;;  %1283 = vmatpush1.bf16.msra.mxu1 %v5762_v1  ;;  %1171 = vmatprep.subr.bf16.mxu0 %v5763_v6  ;;  %v5781_v60 = vld [vmem:[%s8204_s2 + $0x154] ss:$24 sps:$4 sm:$0xff]  }
  0x1e   : > { %402 = vadd.xlane.f32.xlu0 %v401_v38  ;;  %408 = vadd.xlane.f32.xlu1 %v407_v39  ;;  %v6437_v4 = vunpack.c.l.bf16 %v326_v42  ;;  %v6439_v5 = vunpack.c.h.bf16 %v326_v42  ;;  %v419_v15 = vadd.f32 %v381_v57, %v380_v56  ;;  %v6454_v20 = vunpack.c.l.bf16 %v329_v54  ;;  %v5774_v38 = vld [vmem:[%s8204_s2 + $0xf8] ss:$24 sps:$4 sm:$0xff]   ;;  %v5775_v39 = vld [vmem:[%s8204_s2 + $0x124] ss:$24 sps:$4 sm:$0xff]   ;;  %v5780_v57 = vld [vmem:[%s8204_s2 + $0x128] ss:$24 sps:$4 sm:$0xff]  }
  0x1f   : > { %v6456_v21 = vunpack.c.h.bf16 %v329_v54  ;;  %v416_v23 = vadd.f32 %v379_v63, %v378_v62  ;;  %v384_v24 = vmul.f32 %v6430_v0, %v6430_v0  ;;  %v6463_v25 = vunpack.c.l.bf16 %v328_v58  ;;  %1284 = vmatprep.subr.bf16.mxu1 %v5765_v8  ;;  %v333_v54 = vld [vmem:[%s6328_s18 + $0x78] sm:$0xff] }
  0x20   : > { %v6465_v26 = vunpack.c.h.bf16 %v328_v58  ;;  %v385_v28 = vmul.f32 %v6435_v3, %v6435_v3  ;;  %v382_v29 = vmul.f32 %v6437_v4, %v6437_v4  ;;  %v383_v30 = vmul.f32 %v6439_v5, %v6439_v5  ;;  %1172 = vmatpush1.bf16.msra.mxu0 %v5767_v9  ;;  %v5779_v56 = vld [vmem:[%s8204_s2 + $0x120] ss:$24 sps:$4 sm:$0xff]  }
  0x21   : > { %v388_v33 = vmul.f32 %v6454_v20, %v6454_v20  ;;  %v389_v36 = vmul.f32 %v6456_v21, %v6456_v21  ;;  %v6484_v37 = vunpack.c.l.bf16 %v331_v7  ;;  %1285 = vmatpush1.bf16.msra.mxu1 %v5768_v10  ;;  %v386_v42 = vmul.f32 %v6463_v25, %v6463_v25  ;;  %1173 = vmatprep.subr.bf16.mxu0 %v5769_v22  ;;  %v5785_v10 = vld [vmem:[%s8204_s2 + $0x150] ss:$24 sps:$4 sm:$0xff]   ;;  %v5787_v22 = vld [vmem:[%s8204_s2 + $0x184] ss:$24 sps:$4 sm:$0xff]  }
  0x22   : > { %414 = vadd.xlane.f32.xlu1 %v413_v61  ;;  %411 = vadd.xlane.f32.xlu0 %v410_v2  ;;  %v387_v43 = vmul.f32 %v6465_v26, %v6465_v26  ;;  %v6496_v44 = vunpack.c.h.bf16 %v331_v7  ;;  %v425_v48 = vadd.f32 %v385_v28, %v384_v24  ;;  %v422_v49 = vadd.f32 %v383_v30, %v382_v29  ;;  %v5783_v2 = vld [vmem:[%s8204_s2 + $0x15c] ss:$24 sps:$4 sm:$0xff]   ;;  %v5789_v28 = vld [vmem:[%s8204_s2 + $0x18c] ss:$24 sps:$4 sm:$0xff]  }
  0x23   : > { %1286 = vmatprep.subr.bf16.mxu1 %v5771_v27  ;;  %v6501_v50 = vunpack.c.l.bf16 %v330_v31  ;;  %v6503_v51 = vunpack.c.h.bf16 %v330_v31  ;;  %v431_v58 = vadd.f32 %v389_v36, %v388_v33  ;;  %v392_v59 = vmul.f32 %v6484_v37, %v6484_v37  ;;  %v5792_v33 = vld [vmem:[%s8204_s2 + $0x188] ss:$24 sps:$4 sm:$0xff]   ;;  %v5793_v36 = vld [vmem:[%s8204_s2 + $0x1b4] ss:$24 sps:$4 sm:$0xff]  }
  0x24   : > { %1174 = vmatpush1.bf16.msra.mxu0 %v5773_v32  ;;  %v428_v61 = vadd.f32 %v387_v43, %v386_v42  ;;  %v393_v62 = vmul.f32 %v6496_v44, %v6496_v44  ;;  %v6520_v63 = vunpack.c.l.bf16 %v333_v54  ;;  %v6522_v1 = vunpack.c.h.bf16 %v333_v54  ;;  %v5791_v32 = vld [vmem:[%s8204_s2 + $0x180] ss:$24 sps:$4 sm:$0xff]   ;;  %v5797_v43 = vld [vmem:[%s8204_s2 + $0x1b0] ss:$24 sps:$4 sm:$0xff]  }
  0x25   : > { %1287 = vmatpush1.bf16.msra.mxu1 %v5774_v38  ;;  %1175 = vmatprep.subr.bf16.mxu0 %v5775_v39  ;;  %v390_v6 = vmul.f32 %v6501_v50, %v6501_v50  ;;  %v391_v7 = vmul.f32 %v6503_v51, %v6503_v51  ;;  %v6531_v8 = vunpack.c.l.bf16 %v332_v55  ;;  %v6533_v9 = vunpack.c.h.bf16 %v332_v55  ;;  %v5795_v38 = vld [vmem:[%s8204_s2 + $0x1bc] ss:$24 sps:$4 sm:$0xff]   ;;  %v5803_v54 = vld [vmem:[%s8204_s2 + $0x1e0] ss:$24 sps:$4 sm:$0xff]  }
  0x26   : > { %420 = vadd.xlane.f32.xlu1 %v419_v15  ;;  %417 = vadd.xlane.f32.xlu0 %v416_v23  ;;  %v5786_v15 = vld [vmem:[%s8204_s2 + $0x158] ss:$24 sps:$4 sm:$0xff]   ;;  %v437_v23 = vadd.f32 %v393_v62, %v392_v59  ;;  %v396_v24 = vmul.f32 %v6520_v63, %v6520_v63  ;;  %v397_v27 = vmul.f32 %v6522_v1, %v6522_v1  ;;  %v5804_v55 = vld [vmem:[%s8204_s2 + $0x1e8] ss:$24 sps:$4 sm:$0xff]  }
  0x27   : > { %1288 = vmatprep.subr.bf16.mxu1 %v5777_v45  ;;  %v434_v29 = vadd.f32 %v391_v7, %v390_v6  ;;  %v394_v30 = vmul.f32 %v6531_v8, %v6531_v8  ;;  %v395_v31 = vmul.f32 %v6533_v9, %v6533_v9  ;;  %v5798_v45 = vld [vmem:[%s8204_s2 + $0x1b8] ss:$24 sps:$4 sm:$0xff]   ;;  %v5817_v6 = vld [vmem:[%s8204_s2 + $0x274] ss:$24 sps:$4 sm:$0xff]  }
  0x28   : > { %1176 = vmatpush1.bf16.msra.mxu0 %v5779_v56  ;;  %v443_v39 = vadd.f32 %v397_v27, %v396_v24  ;;  %v5805_v56 = vld [vmem:[%s8204_s2 + $0x214] ss:$24 sps:$4 sm:$0xff]   ;;  %v5810_v59 = vld [vmem:[%s8204_s2 + $0x218] ss:$24 sps:$4 sm:$0xff]   ;;  %v5828_v27 = vld [vmem:[%s8204_s2 + $0x2a8] ss:$24 sps:$4 sm:$0xff]  }
  0x29   : > { %1289 = vmatpush1.bf16.msra.mxu1 %v5780_v57  ;;  %1177 = vmatprep.subr.bf16.mxu0 %v5781_v60  ;;  %v440_v42 = vadd.f32 %v395_v31, %v394_v30  ;;  %v5807_v57 = vld [vmem:[%s8204_s2 + $0x21c] ss:$24 sps:$4 sm:$0xff]   ;;  %v5815_v62 = vld [vmem:[%s8204_s2 + $0x240] ss:$24 sps:$4 sm:$0xff]   ;;  %v5833_v30 = vld [vmem:[%s8204_s2 + $0x2d0] ss:$24 sps:$4 sm:$0xff]  }
  0x2a   : > { %426 = vadd.xlane.f32.xlu1 %v425_v48  ;;  %423 = vadd.xlane.f32.xlu0 %v422_v49  ;;  %v5799_v48 = vld [vmem:[%s8204_s2 + $0x1e4] ss:$24 sps:$4 sm:$0xff]   ;;  %v5827_v24 = vld [vmem:[%s8204_s2 + $0x2a0] ss:$24 sps:$4 sm:$0xff]  }
  0x2b   : > { %1290 = vmatprep.subr.bf16.mxu1 %v5783_v2  ;;  %v5801_v49 = vld [vmem:[%s8204_s2 + $0x1ec] ss:$24 sps:$4 sm:$0xff]   ;;  %v5816_v2 = vld [vmem:[%s8204_s2 + $0x248] ss:$24 sps:$4 sm:$0xff]   ;;  %v5819_v7 = vld [vmem:[%s8204_s2 + $0x27c] ss:$24 sps:$4 sm:$0xff]  }
  0x2c   : > { %1178 = vmatpush1.bf16.msra.mxu0 %v5785_v10  ;;  %v5811_v60 = vld [vmem:[%s8204_s2 + $0x244] ss:$24 sps:$4 sm:$0xff]   ;;  %v5821_v10 = vld [vmem:[%s8204_s2 + $0x270] ss:$24 sps:$4 sm:$0xff]  }
  0x2d   : > { %1291 = vmatpush1.bf16.msra.mxu1 %v5786_v15  ;;  %1179 = vmatprep.subr.bf16.mxu0 %v5787_v22  ;;  %v5822_v15 = vld [vmem:[%s8204_s2 + $0x278] ss:$24 sps:$4 sm:$0xff]   ;;  %v5823_v22 = vld [vmem:[%s8204_s2 + $0x2a4] ss:$24 sps:$4 sm:$0xff]  }
  0x2e   : > { %432 = vadd.xlane.f32.xlu1 %v431_v58  ;;  %429 = vadd.xlane.f32.xlu0 %v428_v61  ;;  %v5809_v58 = vld [vmem:[%s8204_s2 + $0x210] ss:$24 sps:$4 sm:$0xff]   ;;  %v5813_v61 = vld [vmem:[%s8204_s2 + $0x24c] ss:$24 sps:$4 sm:$0xff]  }
  0x2f   : > { %1292 = vmatprep.subr.bf16.mxu1 %v5789_v28  ;;  %v5829_v28 = vld [vmem:[%s8204_s2 + $0x2d4] ss:$24 sps:$4 sm:$0xff]   ;;  %v5834_v31 = vld [vmem:[%s8204_s2 + $0x2d8] ss:$24 sps:$4 sm:$0xff]  }
  0x30   : > { %1180 = vmatpush1.bf16.msra.mxu0 %v5791_v32  ;;  %v5837_v32 = vld [vmem:[%s8204_s2 + $0x14] ss:$24 sps:$4 sm:$0xff]  }
  0x31   : > { %1293 = vmatpush1.bf16.msra.mxu1 %v5792_v33  ;;  %1181 = vmatprep.subr.bf16.mxu0 %v5793_v36 }
  0x32   : > { %438 = vadd.xlane.f32.xlu1 %v437_v23  ;;  %435 = vadd.xlane.f32.xlu0 %v434_v29  ;;  %v5825_v23 = vld [vmem:[%s8204_s2 + $0x2ac] ss:$24 sps:$4 sm:$0xff]   ;;  %v5831_v29 = vld [vmem:[%s8204_s2 + $0x2dc] ss:$24 sps:$4 sm:$0xff]  }
  0x33   : > { %1294 = vmatprep.subr.bf16.mxu1 %v5795_v38 }
  0x34   : > { %1182 = vmatpush1.bf16.msra.mxu0 %v5797_v43 }
  0x35   : > { %1295 = vmatpush1.bf16.msra.mxu1 %v5798_v45  ;;  %1183 = vmatprep.subr.bf16.mxu0 %v5799_v48 }
  0x36   : > { %444 = vadd.xlane.f32.xlu1 %v443_v39  ;;  %441 = vadd.xlane.f32.xlu0 %v440_v42 }
  0x37   : > { %1296 = vmatprep.subr.bf16.mxu1 %v5801_v49 }
  0x38   : > { %1184 = vmatpush1.bf16.msra.mxu0 %v5803_v54 }
  0x39   : > { %1297 = vmatpush1.bf16.msra.mxu1 %v5804_v55  ;;  %1185 = vmatprep.subr.bf16.mxu0 %v5805_v56  ;;  %v529_v55 = vlaneseq }
  0x3a   : > { %1298 = vmatprep.subr.bf16.mxu1 %v5807_v57 }
  0x3c   : > { %1186 = vmatpush1.bf16.msra.mxu0 %v5809_v58 }
  0x3d   : > { %1299 = vmatpush1.bf16.msra.mxu1 %v5810_v59  ;;  %1187 = vmatprep.subr.bf16.mxu0 %v5811_v60 }
  0x3e   : > { %1300 = vmatprep.subr.bf16.mxu1 %v5813_v61 }
  0x40   : > { %1188 = vmatpush1.bf16.msra.mxu0 %v5815_v62  ;;  %v530_v62 = vshrl.u32 %v529_v55, 7 }
  0x41   : > { %1301 = vmatpush1.bf16.msra.mxu1 %v5816_v2  ;;  %1189 = vmatprep.subr.bf16.mxu0 %v5817_v6 }
  0x42   : > { %1302 = vmatprep.subr.bf16.mxu1 %v5819_v7 }
  0x44   : > { %1190 = vmatpush1.bf16.msra.mxu0 %v5821_v10 }
  0x45   : > { %1303 = vmatpush1.bf16.msra.mxu1 %v5822_v15  ;;  %1191 = vmatprep.subr.bf16.mxu0 %v5823_v22  ;;  %v535_v15 = vsub.s32 1, %v530_v62 }
  0x46   : > { %1304 = vmatprep.subr.bf16.mxu1 %v5825_v23 }
  0x48   : > { %1192 = vmatpush1.bf16.msra.mxu0 %v5827_v24  ;;  %v527_v24 = vld [vmem:[%s8203_s1] sm:$0x3] }
  0x49   : > { %1305 = vmatpush1.bf16.msra.mxu1 %v5828_v27  ;;  %1193 = vmatprep.subr.bf16.mxu0 %v5829_v28  ;;  %v531_v27 = vsub.s32 0, %v530_v62 }
  0x4a   : > { %1306 = vmatprep.subr.bf16.mxu1 %v5831_v29 }
  0x4c   : > { %1194 = vmatpush1.bf16.msra.mxu0 %v5833_v30 }
  0x4d   : > { %1307 = vmatpush1.bf16.msra.mxu1 %v5834_v31  ;;  %1389 = vmatprep.subr.bf16.mxu0 %v5837_v32 }
  0xa7   : > { %v400_v33 = vpop.xlane.xlu0 %399  ;;  %v406_v36 = vpop.xlane.xlu1 %405 }
  0xa8   : > { %v447_v38 = vmul.f32 0.00390625, %v400_v33  ;;  %v449_v39 = vmul.f32 0.00390625, %v406_v36 }
  0xaa   : > { %v463_v42 = vadd.f32 1e-06, %v447_v38  ;;  %v465_v43 = vadd.f32 1e-06, %v449_v39  ;;  %v6652_v38 = vrot.slane %v527_v24, %v535_v15 }
  0xab   : > { %v403_v45 = vpop.xlane.xlu0 %402  ;;  %v409_v48 = vpop.xlane.xlu1 %408 }
  0xac   : > { %5931 = vrsqrt.f32 %v463_v42  ;;  %v448_v49 = vmul.f32 0.00390625, %v403_v45  ;;  %v450_v54 = vmul.f32 0.00390625, %v409_v48 }
  0xad   : > { %5933 = vrsqrt.f32 %v465_v43  ;;  %v6656_v43 = vrot.slane %v527_v24, %v531_v27 }
  0xae   : > { %v464_v56 = vadd.f32 1e-06, %v448_v49  ;;  %v466_v57 = vadd.f32 1e-06, %v450_v54 }
  0xaf   : > { %v415_v58 = vpop.xlane.xlu1 %414  ;;  %v412_v59 = vpop.xlane.xlu0 %411 }
  0xb0   : > { %5935 = vrsqrt.f32 %v464_v56  ;;  %v452_v60 = vmul.f32 0.00390625, %v415_v58  ;;  %v451_v61 = vmul.f32 0.00390625, %v412_v59 }
  0xb1   : > { %5937 = vrsqrt.f32 %v466_v57 }
  0xb2   : > { %v468_v2 = vadd.f32 1e-06, %v452_v60  ;;  %v467_v6 = vadd.f32 1e-06, %v451_v61 }
  0xb3   : > { %v421_v7 = vpop.xlane.xlu1 %420  ;;  %v418_v10 = vpop.xlane.xlu0 %417 }
  0xb4   : > { %5939 = vrsqrt.f32 %v468_v2  ;;  %v454_v22 = vmul.f32 0.00390625, %v421_v7  ;;  %v453_v23 = vmul.f32 0.00390625, %v418_v10 }
  0xb5   : > { %5941 = vrsqrt.f32 %v467_v6 }
  0xb6   : > { %v5932_v28 = vpop.eup %5931  ;;  %v470_v29 = vadd.f32 1e-06, %v454_v22  ;;  %v469_v30 = vadd.f32 1e-06, %v453_v23  ;;  %v5840_v23 = vld [vmem:[%s8204_s2 + $0x44] ss:$24 sps:$4 sm:$0xff]  }
  0xb7   : > { %v5934_v31 = vpop.eup %5933  ;;  %v427_v32 = vpop.xlane.xlu1 %426  ;;  %v496_v36 = vmul.f32 %v5932_v28, %v6338_v12  ;;  %v495_v42 = vmul.f32 %v5932_v28, %v6336_v11 }
  0xb8   : > { %v424_v33 = vpop.xlane.xlu0 %423  ;;  %v500_v39 = vmul.f32 %v5934_v31, %v6342_v14  ;;  %5943 = vrsqrt.f32 %v470_v29  ;;  %v456_v45 = vmul.f32 0.00390625, %v427_v32  ;;  %v499_v24 = vmul.f32 %v5934_v31, %v6340_v13  ;;  %v5838_v13 = vld [vmem:[%s8204_s2 + $0x40] ss:$24 sps:$4 sm:$0xff]  }
  0xb9   : > { %5945 = vrsqrt.f32 %v469_v30  ;;  %v455_v49 = vmul.f32 0.00390625, %v424_v33  ;;  %v540_v12 = vmul.f32 %v6652_v38, %v496_v36  ;;  %v539_v58 = vmul.f32 %v6656_v43, %v495_v42  ;;  %v5843_v36 = vld [vmem:[%s8204_s2 + $0x74] ss:$24 sps:$4 sm:$0xff]  }
  0xba   : > { %v5936_v48 = vpop.eup %5935  ;;  %v544_v14 = vmul.f32 %v6652_v38, %v500_v39  ;;  %v472_v60 = vadd.f32 1e-06, %v456_v45  ;;  %v543_v32 = vmul.f32 %v6656_v43, %v499_v24  ;;  %v5847_v24 = vld [vmem:[%s8204_s2 + $0xd0] ss:$24 sps:$4 sm:$0xff]  }
  0xbb   : > { %v5938_v54 = vpop.eup %5937  ;;  %v498_v55 = vmul.f32 %v5936_v48, %v6347_v17  ;;  %v497_v56 = vmul.f32 %v5936_v48, %v6345_v16  ;;  %v471_v2 = vadd.f32 1e-06, %v455_v49  ;;  %v433_v17 = vpop.xlane.xlu1 %432 }
  0xbc   : > { %v502_v57 = vmul.f32 %v5938_v54, %v6351_v19  ;;  %v5835_v19 = vld [vmem:[%s8204_s2 + $0x10] ss:$24 sps:$4 sm:$0xff]   ;;  %v430_v15 = vpop.xlane.xlu0 %429  ;;  %v501_v27 = vmul.f32 %v5938_v54, %v6349_v18  ;;  %5947 = vrsqrt.f32 %v472_v60  ;;  %v458_v29 = vmul.f32 0.00390625, %v433_v17 }
  0xbd   : > { %v542_v11 = vmul.f32 %v6652_v38, %v498_v55  ;;  %v541_v59 = vmul.f32 %v6656_v43, %v497_v56  ;;  %5949 = vrsqrt.f32 %v471_v2  ;;  %v5841_v54 = vld [vmem:[%s8204_s2 + $0x70] ss:$24 sps:$4 sm:$0xff]   ;;  %v5849_v2 = vld [vmem:[%s8204_s2 + $0xd4] ss:$24 sps:$4 sm:$0xff]  }
  0xbe   : > { %v5940_v61 = vpop.eup %5939  ;;  %v546_v62 = vmul.f32 %v6652_v38, %v502_v57  ;;  %v545_v33 = vmul.f32 %v6656_v43, %v501_v27  ;;  %v474_v39 = vadd.f32 1e-06, %v458_v29 }
  0xbf   : > { %v5942_v6 = vpop.eup %5941  ;;  %v6667_v16 = vpack.c.bf16 %v542_v11, %v540_v12  ;;  %v6669_v7 = vpack.c.bf16 %v541_v59, %v539_v58  ;;  %v506_v10 = vmul.f32 %v5940_v61, %v6375_v35  ;;  %v457_v35 = vmul.f32 0.00390625, %v430_v15  ;;  %v439_v49 = vpop.xlane.xlu1 %438  ;;  %v5844_v59 = vld [vmem:[%s8204_s2 + $0xa0] ss:$24 sps:$4 sm:$0xff]  }
  0xc0   : > { %v6675_v22 = vpack.c.bf16 %v546_v62, %v544_v14  ;;  %v504_v28 = vmul.f32 %v5942_v6, %v6383_v41  ;;  %v503_v42 = vmul.f32 %v5942_v6, %v6381_v40  ;;  %v505_v45 = vmul.f32 %v5940_v61, %v6373_v34  ;;  %v436_v57 = vpop.xlane.xlu0 %435  ;;  %v5846_v34 = vld [vmem:[%s8204_s2 + $0xa4] ss:$24 sps:$4 sm:$0xff]  }
  0xc1   : > { %1195 = vmatprep.mubr.bf16.mxu0 %v6667_v16  ;;  %1308 = vmatprep.mubr.bf16.mxu1 %v6667_v16  ;;  %v550_v41 = vmul.f32 %v6652_v38, %v506_v10  ;;  %v473_v48 = vadd.f32 1e-06, %v457_v35  ;;  %v6708_v14 = vpack.c.bf16 %v545_v33, %v543_v32  ;;  %5951 = vrsqrt.f32 %v474_v39  ;;  %v5855_v33 = vld [vmem:[%s8204_s2 + $0x134] ss:$24 sps:$4 sm:$0xff]  }
  0xc2   : > { %1196 = vmatmul.mubr.bf16.vlgmr.msra.gmra.mrb[0].mxu0 %v6669_v7  ;;  %1309 = vmatmul.mubr.bf16.vlgmr.msra.gmra.mrb[0].mxu1 %v6669_v7  ;;  %v5944_v30 = vpop.eup %5943  ;;  %v548_v18 = vmul.f32 %v6652_v38, %v504_v28  ;;  %v460_v40 = vmul.f32 0.00390625, %v439_v49  ;;  %v547_v11 = vmul.f32 %v6656_v43, %v503_v42  ;;  %v5853_v49 = vld [vmem:[%s8204_s2 + $0x130] ss:$24 sps:$4 sm:$0xff]  }
  0xc3   : > { %1390 = vmatpush1.bf16.msra.mxu0 %v5835_v19  ;;  %1205 = vmatprep.mubr.bf16.mxu0 %v6675_v22  ;;  %v5946_v31 = vpop.eup %5945  ;;  %v510_v12 = vmul.f32 %v5944_v30, %v6395_v47  ;;  %5953 = vrsqrt.f32 %v473_v48  ;;  %v459_v47 = vmul.f32 0.00390625, %v436_v57  ;;  %v509_v10 = vmul.f32 %v5944_v30, %v6393_v46  ;;  %v5858_v57 = vld [vmem:[%s8204_s2 + $0x164] ss:$24 sps:$4 sm:$0xff]  }
  0xc4   : > { %1318 = vmatprep.mubr.bf16.mxu1 %v6675_v22  ;;  %1391 = vmatprep.subr.bf16.mxu0 %v5840_v23  ;;  %v6704_v55 = vpack.c.bf16 %v550_v41, %v548_v18  ;;  %v508_v56 = vmul.f32 %v5946_v31, %v6409_v53  ;;  %v549_v53 = vmul.f32 %v6656_v43, %v505_v45  ;;  %v476_v17 = vadd.f32 1e-06, %v460_v40  ;;  %v445_v23 = vpop.xlane.xlu1 %444  ;;  %v442_v35 = vpop.xlane.xlu0 %441 }
  0xc5   : > { %v554_v61 = vmul.f32 %v6652_v38, %v510_v12  ;;  %v507_v19 = vmul.f32 %v5946_v31, %v6407_v52  ;;  %v475_v15 = vadd.f32 1e-06, %v459_v47  ;;  %v5852_v52 = vld [vmem:[%s8204_s2 + $0x104] ss:$24 sps:$4 sm:$0xff]   ;;  %v462_v46 = vmul.f32 0.00390625, %v445_v23 }
  0xc6   : > { %v5948_v58 = vpop.eup %5947  ;;  %v552_v60 = vmul.f32 %v6652_v38, %v508_v56  ;;  %v6727_v6 = vpack.c.bf16 %v549_v53, %v547_v11  ;;  %5955 = vrsqrt.f32 %v476_v17  ;;  %v5861_v53 = vld [vmem:[%s8204_s2 + $0x194] ss:$24 sps:$4 sm:$0xff]   ;;  %v5864_v17 = vld [vmem:[%s8204_s2 + $0x1c4] ss:$24 sps:$4 sm:$0xff]  }
  0xc7   : > { %1392 = vmatpush1.bf16.msra.mxu0 %v5838_v13  ;;  %v5950_v62 = vpop.eup %5949  ;;  %v514_v29 = vmul.f32 %v5948_v58, %v6435_v3  ;;  %v551_v30 = vmul.f32 %v6656_v43, %v507_v19  ;;  %v553_v13 = vmul.f32 %v6656_v43, %v509_v10  ;;  %5957 = vrsqrt.f32 %v475_v15  ;;  %v5850_v3 = vld [vmem:[%s8204_s2 + $0x100] ss:$24 sps:$4 sm:$0xff]   ;;  %v5867_v23 = vld [vmem:[%s8204_s2 + $0x1f4] ss:$24 sps:$4 sm:$0xff]  }
  0xc8   : > { %1393 = vmatprep.subr.bf16.mxu0 %v5843_v36  ;;  %v6734_v27 = vpack.c.bf16 %v554_v61, %v552_v60  ;;  %v512_v28 = vmul.f32 %v5950_v62, %v6439_v5  ;;  %v461_v5 = vmul.f32 0.00390625, %v442_v35  ;;  %v478_v36 = vadd.f32 1e-06, %v462_v46  ;;  %v5859_v60 = vld [vmem:[%s8204_s2 + $0x190] ss:$24 sps:$4 sm:$0xff]  }
  0xc9   : > { %v558_v31 = vmul.f32 %v6652_v38, %v514_v29  ;;  %v6755_v39 = vpack.c.bf16 %v553_v13, %v551_v30  ;;  %v511_v42 = vmul.f32 %v5950_v62, %v6437_v4  ;;  %v513_v45 = vmul.f32 %v5948_v58, %v6430_v0  ;;  %v5865_v35 = vld [vmem:[%s8204_s2 + $0x1f0] ss:$24 sps:$4 sm:$0xff]   ;;  %v5870_v13 = vld [vmem:[%s8204_s2 + $0x224] ss:$24 sps:$4 sm:$0xff]  }
  0xca   : > { %1206 = vmatmul.mubr.bf16.gmra.mrb[4].mxu0 %v6708_v14  ;;  %1319 = vmatmul.mubr.bf16.gmra.mrb[4].mxu1 %v6708_v14  ;;  %v556_v41 = vmul.f32 %v6652_v38, %v512_v28  ;;  %v477_v48 = vadd.f32 1e-06, %v461_v5  ;;  %5959 = vrsqrt.f32 %v478_v36  ;;  %v5868_v5 = vld [vmem:[%s8204_s2 + $0x220] ss:$24 sps:$4 sm:$0xff]  }
  0xcb   : > { %1394 = vmatpush1.bf16.msra.mxu0 %v5841_v54  ;;  %1215 = vmatprep.mubr.bf16.mxu0 %v6704_v55  ;;  %v5952_v18 = vpop.eup %5951  ;;  %v555_v0 = vmul.f32 %v6656_v43, %v511_v42  ;;  %v557_v4 = vmul.f32 %v6656_v43, %v513_v45 }
  0xcc   : > { %1395 = vmatprep.subr.bf16.mxu0 %v5846_v34  ;;  %1328 = vmatprep.mubr.bf16.mxu1 %v6704_v55  ;;  %v6762_v54 = vpack.c.bf16 %v558_v31, %v556_v41  ;;  %v518_v12 = vmul.f32 %v5952_v18, %v6456_v21  ;;  %5961 = vrsqrt.f32 %v477_v48  ;;  %v5856_v21 = vld [vmem:[%s8204_s2 + $0x160] ss:$24 sps:$4 sm:$0xff]   ;;  %v5877_v48 = vld [vmem:[%s8204_s2 + $0x2b0] ss:$24 sps:$4 sm:$0xff]  }
  0xcd   : > { %v5954_v32 = vpop.eup %5953  ;;  %v6783_v47 = vpack.c.bf16 %v557_v4, %v555_v0 }
  0xce   : > { %v516_v56 = vmul.f32 %v5954_v32, %v6465_v26  ;;  %v562_v40 = vmul.f32 %v6652_v38, %v518_v12  ;;  %v515_v58 = vmul.f32 %v5954_v32, %v6463_v25  ;;  %v5871_v32 = vld [vmem:[%s8204_s2 + $0x250] ss:$24 sps:$4 sm:$0xff]  }
  0xcf   : > { %1396 = vmatpush1.bf16.msra.mxu0 %v5844_v59  ;;  %v517_v59 = vmul.f32 %v5952_v18, %v6454_v20  ;;  %v5873_v18 = vld [vmem:[%s8204_s2 + $0x254] ss:$24 sps:$4 sm:$0xff]  }
  0xd0   : > { %1397 = vmatprep.subr.bf16.mxu0 %v5849_v2  ;;  %v5956_v34 = vpop.eup %5955  ;;  %v560_v26 = vmul.f32 %v6652_v38, %v516_v56  ;;  %v559_v20 = vmul.f32 %v6656_v43, %v515_v58 }
  0xd1   : > { %v5958_v11 = vpop.eup %5957  ;;  %v522_v2 = vmul.f32 %v5956_v34, %v6496_v44  ;;  %v561_v25 = vmul.f32 %v6656_v43, %v517_v59  ;;  %v521_v29 = vmul.f32 %v5956_v34, %v6484_v37 }
  0xd2   : > { %1216 = vmatmul.mubr.bf16.gmra.mrb[8].mxu0 %v6727_v6  ;;  %1329 = vmatmul.mubr.bf16.gmra.mrb[8].mxu1 %v6727_v6  ;;  %v6790_v61 = vpack.c.bf16 %v562_v40, %v560_v26  ;;  %v520_v62 = vmul.f32 %v5958_v11, %v6503_v51  ;;  %v5862_v51 = vld [vmem:[%s8204_s2 + $0x1c0] ss:$24 sps:$4 sm:$0xff]   ;;  %v519_v28 = vmul.f32 %v5958_v11, %v6501_v50 }
  0xd3   : > { %1398 = vmatpush1.bf16.msra.mxu0 %v5847_v24  ;;  %1225 = vmatprep.mubr.bf16.mxu0 %v6734_v27  ;;  %v566_v10 = vmul.f32 %v6652_v38, %v522_v2  ;;  %v581_v24 = vpack.c.bf16 %v561_v25, %v559_v20  ;;  %v565_v37 = vmul.f32 %v6656_v43, %v521_v29 }
  0xd4   : > { %1399 = vmatprep.subr.bf16.mxu0 %v5852_v52  ;;  %1338 = vmatprep.mubr.bf16.mxu1 %v6734_v27  ;;  %v5960_v19 = vpop.eup %5959  ;;  %v564_v44 = vmul.f32 %v6652_v38, %v520_v62  ;;  %v563_v50 = vmul.f32 %v6656_v43, %v519_v28 }
  0xd5   : > { %v526_v30 = vmul.f32 %v5960_v19, %v6522_v1  ;;  %v525_v31 = vmul.f32 %v5960_v19, %v6520_v63  ;;  %v5874_v63 = vld [vmem:[%s8204_s2 + $0x280] ss:$24 sps:$4 sm:$0xff]  }
  0xd6   : > { %v5962_v15 = vpop.eup %5961  ;;  %v584_v52 = vpack.c.bf16 %v566_v10, %v564_v44 }
  0xd7   : > { %1400 = vmatpush1.bf16.msra.mxu0 %v5850_v3  ;;  %v524_v46 = vmul.f32 %v5962_v15, %v6533_v9  ;;  %v570_v1 = vmul.f32 %v6652_v38, %v526_v30  ;;  %v583_v3 = vpack.c.bf16 %v565_v37, %v563_v50  ;;  %v523_v41 = vmul.f32 %v5962_v15, %v6531_v8  ;;  %v5879_v8 = vld [vmem:[%s8204_s2 + $0x2b4] ss:$24 sps:$4 sm:$0xff]  }
  0xd8   : > { %1401 = vmatprep.subr.bf16.mxu0 %v5855_v33  ;;  %v569_v42 = vmul.f32 %v6656_v43, %v525_v31 }
  0xd9   : > { %v568_v9 = vmul.f32 %v6652_v38, %v524_v46  ;;  %v5876_v38 = vld [vmem:[%s8204_s2 + $0x284] ss:$24 sps:$4 sm:$0xff]   ;;  %v567_v36 = vmul.f32 %v6656_v43, %v523_v41 }
  0xda   : > { %1226 = vmatmul.mubr.bf16.gmra.mrb[12].mxu0 %v6755_v39  ;;  %1339 = vmatmul.mubr.bf16.gmra.mrb[12].mxu1 %v6755_v39  ;;  %v5882_v43 = vld [vmem:[%s8204_s2 + $0x2e4] ss:$24 sps:$4 sm:$0xff]  }
  0xdb   : > { %1402 = vmatpush1.bf16.msra.mxu0 %v5853_v49  ;;  %1235 = vmatprep.mubr.bf16.mxu0 %v6762_v54  ;;  %v586_v33 = vpack.c.bf16 %v570_v1, %v568_v9  ;;  %v585_v45 = vpack.c.bf16 %v569_v42, %v567_v36  ;;  %v5880_v49 = vld [vmem:[%s8204_s2 + $0x2e0] ss:$24 sps:$4 sm:$0xff]  }
  0xdc   : > { %1403 = vmatprep.subr.bf16.mxu0 %v5858_v57  ;;  %1348 = vmatprep.mubr.bf16.mxu1 %v6762_v54 }
  0xdf   : > { %1404 = vmatpush1.bf16.msra.mxu0 %v5856_v21 }
  0xe0   : > { %1405 = vmatprep.subr.bf16.mxu0 %v5861_v53 }
  0xe2   : > { %1236 = vmatmul.mubr.bf16.gmra.mrb[16].mxu0 %v6783_v47  ;;  %1349 = vmatmul.mubr.bf16.gmra.mrb[16].mxu1 %v6783_v47 }
  0xe3   : > { %1406 = vmatpush1.bf16.msra.mxu0 %v5859_v60  ;;  %1245 = vmatprep.mubr.bf16.mxu0 %v6790_v61 }
  0xe4   : > { %1407 = vmatprep.subr.bf16.mxu0 %v5864_v17  ;;  %1358 = vmatprep.mubr.bf16.mxu1 %v6790_v61 }
  0xe7   : > { %1408 = vmatpush1.bf16.msra.mxu0 %v5862_v51 }
  0xe8   : > { %1409 = vmatprep.subr.bf16.mxu0 %v5867_v23 }
  0xea   : > { %1246 = vmatmul.mubr.bf16.gmra.mrb[20].mxu0 %v581_v24  ;;  %1359 = vmatmul.mubr.bf16.gmra.mrb[20].mxu1 %v581_v24 }
  0xeb   : > { %1410 = vmatpush1.bf16.msra.mxu0 %v5865_v35  ;;  %1255 = vmatprep.mubr.bf16.mxu0 %v584_v52 }
  0xec   : > { %1411 = vmatprep.subr.bf16.mxu0 %v5870_v13  ;;  %1368 = vmatprep.mubr.bf16.mxu1 %v584_v52 }
  0xef   : > { %1412 = vmatpush1.bf16.msra.mxu0 %v5868_v5 }
  0xf0   : > { %1413 = vmatprep.subr.bf16.mxu0 %v5873_v18 }
  0xf2   : > { %1256 = vmatmul.mubr.bf16.gmra.mrb[24].mxu0 %v583_v3  ;;  %1369 = vmatmul.mubr.bf16.gmra.mrb[24].mxu1 %v583_v3 }
  0xf3   : > { %1414 = vmatpush1.bf16.msra.mxu0 %v5871_v32  ;;  %1265 = vmatprep.mubr.bf16.mxu0 %v586_v33 }
  0xf4   : > { %1415 = vmatprep.subr.bf16.mxu0 %v5876_v38  ;;  %1378 = vmatprep.mubr.bf16.mxu1 %v586_v33 }
  0xf7   : > { %1416 = vmatpush1.bf16.msra.mxu0 %v5874_v63 }
  0xf8   : > { %1417 = vmatprep.subr.bf16.mxu0 %v5879_v8 }
  0xfa   : > { %1266 = vmatmul.mubr.bf16.gmra.mrb[28].mxu0 %v585_v45  ;;  %1379 = vmatmul.mubr.bf16.gmra.mrb[28].mxu1 %v585_v45 }
  0xfb   : > { %1418 = vmatpush1.bf16.msra.mxu0 %v5877_v48  ;;  %1421 = vmatprep.mubr.bf16.mxu0 %v6667_v16 }
  0xfc   : > { %1419 = vmatprep.subr.bf16.mxu0 %v5882_v43 }
  0xff   : > { %1420 = vmatpush1.bf16.msra.mxu0 %v5880_v49 }
 0x102   : > { %1422 = vmatmul.mubr.bf16.vlgmr.msra.gmra.mrb[32].mxu0 %v6669_v7 }
 0x103   : > { %1431 = vmatprep.mubr.bf16.mxu0 %v6675_v22 }
 0x10a   : > { %1432 = vmatmul.mubr.bf16.gmra.mrb[36].mxu0 %v6708_v14 }
 0x10b   : > { %1441 = vmatprep.mubr.bf16.mxu0 %v6704_v55 }
 0x112   : > { %1442 = vmatmul.mubr.bf16.gmra.mrb[40].mxu0 %v6727_v6 }
 0x113   : > { %1451 = vmatprep.mubr.bf16.mxu0 %v6734_v27 }
 0x11a   : > { %1452 = vmatmul.mubr.bf16.gmra.mrb[44].mxu0 %v6755_v39 }
 0x11b   : > { %1461 = vmatprep.mubr.bf16.mxu0 %v6762_v54 }
 0x122   : > { %1462 = vmatmul.mubr.bf16.gmra.mrb[48].mxu0 %v6783_v47 }
 0x123   : > { %1471 = vmatprep.mubr.bf16.mxu0 %v6790_v61 }
 0x12a   : > { %1472 = vmatmul.mubr.bf16.gmra.mrb[52].mxu0 %v581_v24 }
 0x12b   : > { %1481 = vmatprep.mubr.bf16.mxu0 %v584_v52 }
 0x132   : > { %1482 = vmatmul.mubr.bf16.gmra.mrb[56].mxu0 %v583_v3 }
 0x133   : > { %1491 = vmatprep.mubr.bf16.mxu0 %v586_v33 }
 0x13a   : > { %1492 = vmatmul.mubr.bf16.gmra.mrb[60].mxu0 %v585_v45 }
 0x195   : > { %v1197_v16 = vpop.f32.mrb[0].mxu0  ;;  %v1310_v7 = vpop.f32.mrb[0].mxu1 }
 0x196   : > { %v1199_v22 = vpop.f32.mrb[1].mxu0  ;;  %v1312_v55 = vpop.f32.mrb[1].mxu1 }
 0x197   : > { %v1201_v14 = vpop.f32.mrb[2].mxu0  ;;  %v1314_v6 = vpop.f32.mrb[2].mxu1 }
 0x198   : > { %v6867_v27 = vpack.c.bf16 %v1201_v14, %v1197_v16  ;;  %v1504_v39 = vpack.c.bf16 %v1314_v6, %v1310_v7  ;;  %v1203_v54 = vpop.f32.mrb[3].mxu0  ;;  %v1316_v56 = vpop.f32.mrb[3].mxu1 }
 0x199   : > { %v6869_v12 = vpack.c.bf16 %v1203_v54, %v1199_v22  ;;  %v6871_v57 = vpack.c.bf16 %v1316_v56, %v1312_v55 }
 0x19a   : > { %2236 = vrot.lane.b32.xlu0 %v1504_v39, %s6244_s19  ;;  %5681 = vmatprep.subr.msk.bf16.mxu1 %vm1746_vm0, %v1504_v39  ;;  %v1772_v0 = vsel %vm1746_vm0, %v1504_v39, 0 }
 0x19b   : > { %8233 = vst [vmem:[#allocation3_spill] sm:$0xff] %v6869_v12  ;;  %5329 = vmatprep.mubr.msk.bf16.mxu1 %vm1746_vm0, %v6867_v27  ;;  %5314 = vmatpush3.bf16.xpose.msra.mxu1 %v1772_v0 }
 0x19d   : > { %v1207_v4 = vpop.f32.mrb[4].mxu0  ;;  %v1320_v34 = vpop.f32.mrb[4].mxu1 }
 0x19e   : > { %v1209_v21 = vpop.f32.mrb[5].mxu0  ;;  %v1322_v26 = vpop.f32.mrb[5].mxu1 }
 0x19f   : > { %v1211_v40 = vpop.f32.mrb[6].mxu0  ;;  %v1324_v11 = vpop.f32.mrb[6].mxu1 }
 0x1a0   : > { %v6878_v53 = vpack.c.bf16 %v1211_v40, %v1207_v4  ;;  %v1510_v47 = vpack.c.bf16 %v1324_v11, %v1320_v34  ;;  %v1213_v58 = vpop.f32.mrb[7].mxu0  ;;  %v1326_v59 = vpop.f32.mrb[7].mxu1 }
 0x1a1   : > { %v6880_v60 = vpack.c.bf16 %v1213_v58, %v1209_v21  ;;  %v6882_v61 = vpack.c.bf16 %v1326_v59, %v1322_v26 }
 0x1a2   : > { %2238 = vrot.lane.b32.xlu1 %v1510_v47, %s6244_s19  ;;  %5682 = vmatprep.subr.msk.bf16.mxu1 %vm1746_vm0, %v1510_v47  ;;  %v1775_v62 = vsel %vm1746_vm0, %v1510_v47, 0 }
 0x1a3   : > { %8234 = vst [vmem:[#allocation4_spill] sm:$0xff] %v6880_v60  ;;  %5316 = vmatpush3.bf16.xpose.msra.mxu1 %v1775_v62 }
 0x1a5   : > { %v1217_v2 = vpop.f32.mrb[8].mxu0  ;;  %v1330_v17 = vpop.f32.mrb[8].mxu1 }
 0x1a6   : > { %v1219_v20 = vpop.f32.mrb[9].mxu0  ;;  %v1332_v25 = vpop.f32.mrb[9].mxu1 }
 0x1a7   : > { %v1221_v19 = vpop.f32.mrb[10].mxu0  ;;  %v1334_v51 = vpop.f32.mrb[10].mxu1 }
 0x1a8   : > { %v6887_v44 = vpack.c.bf16 %v1221_v19, %v1217_v2  ;;  %v1516_v10 = vpack.c.bf16 %v1334_v51, %v1330_v17  ;;  %v1223_v15 = vpop.f32.mrb[11].mxu0  ;;  %v1336_v23 = vpop.f32.mrb[11].mxu1 }
 0x1a9   : > { %v6889_v24 = vpack.c.bf16 %v1223_v15, %v1219_v20  ;;  %v6891_v28 = vpack.c.bf16 %v1336_v23, %v1332_v25 }
 0x1aa   : > { %2240 = vrot.lane.b32.xlu1 %v1516_v10, %s6244_s19  ;;  %5683 = vmatprep.subr.msk.bf16.mxu1 %vm1746_vm0, %v1516_v10  ;;  %v1778_v29 = vsel %vm1746_vm0, %v1516_v10, 0 }
 0x1ab   : > { %8235 = vst [vmem:[#allocation5_spill] sm:$0xff] %v6889_v24  ;;  %8236 = vst [vmem:[#allocation6_spill] sm:$0xff] %v6891_v28  ;;  %5318 = vmatpush3.bf16.xpose.msra.mxu1 %v1778_v29 }
 0x1ad   : > { %v1227_v35 = vpop.f32.mrb[12].mxu0  ;;  %v1340_v52 = vpop.f32.mrb[12].mxu1 }
 0x1ae   : > { %v1229_v46 = vpop.f32.mrb[13].mxu0  ;;  %v1342_v30 = vpop.f32.mrb[13].mxu1 }
 0x1af   : > { %v1231_v13 = vpop.f32.mrb[14].mxu0  ;;  %v1344_v50 = vpop.f32.mrb[14].mxu1 }
 0x1b0   : > { %v6896_v37 = vpack.c.bf16 %v1231_v13, %v1227_v35  ;;  %v1522_v5 = vpack.c.bf16 %v1344_v50, %v1340_v52  ;;  %v1233_v9 = vpop.f32.mrb[15].mxu0  ;;  %v1346_v1 = vpop.f32.mrb[15].mxu1 }
 0x1b1   : > { %v6898_v18 = vpack.c.bf16 %v1233_v9, %v1229_v46  ;;  %v6900_v3 = vpack.c.bf16 %v1346_v1, %v1342_v30 }
 0x1b2   : > { %2242 = vrot.lane.b32.xlu1 %v1522_v5, %s6244_s19  ;;  %5684 = vmatprep.subr.msk.bf16.mxu1 %vm1746_vm0, %v1522_v5  ;;  %v1781_v41 = vsel %vm1746_vm0, %v1522_v5, 0 }
 0x1b3   : > { %8237 = vst [vmem:[#allocation7_spill] sm:$0xff] %v6898_v18  ;;  %8238 = vst [vmem:[#allocation8_spill] sm:$0xff] %v6900_v3  ;;  %5320 = vmatpush3.bf16.xpose.msra.mxu1 %v1781_v41 }
 0x1b5   : > { %v1237_v31 = vpop.f32.mrb[16].mxu0  ;;  %v1350_v32 = vpop.f32.mrb[16].mxu1 }
 0x1b6   : > { %v1239_v33 = vpop.f32.mrb[17].mxu0  ;;  %v1352_v38 = vpop.f32.mrb[17].mxu1 }
 0x1b7   : > { %v1241_v36 = vpop.f32.mrb[18].mxu0  ;;  %v1354_v42 = vpop.f32.mrb[18].mxu1 }
 0x1b8   : > { %v6905_v63 = vpack.c.bf16 %v1241_v36, %v1237_v31  ;;  %v1528_v8 = vpack.c.bf16 %v1354_v42, %v1350_v32  ;;  %v1243_v45 = vpop.f32.mrb[19].mxu0  ;;  %v1356_v48 = vpop.f32.mrb[19].mxu1 }
 0x1b9   : > { %v6907_v43 = vpack.c.bf16 %v1243_v45, %v1239_v33  ;;  %v6909_v49 = vpack.c.bf16 %v1356_v48, %v1352_v38 }
 0x1ba   : > { %2244 = vrot.lane.b32.xlu0 %v1528_v8, %s6244_s19  ;;  %5685 = vmatprep.subr.msk.bf16.mxu1 %vm1746_vm0, %v1528_v8  ;;  %v1784_v16 = vsel %vm1746_vm0, %v1528_v8, 0 }
 0x1bb   : > { %8239 = vst [vmem:[#allocation9_spill] sm:$0xff] %v6907_v43  ;;  %8240 = vst [vmem:[#allocation10_spill] sm:$0xff] %v6909_v49  ;;  %5322 = vmatpush3.bf16.xpose.msra.mxu1 %v1784_v16 }
 0x1bd   : > { %v1247_v7 = vpop.f32.mrb[20].mxu0  ;;  %v1360_v22 = vpop.f32.mrb[20].mxu1 }
 0x1be   : > { %v1249_v55 = vpop.f32.mrb[21].mxu0  ;;  %v1362_v14 = vpop.f32.mrb[21].mxu1 }
 0x1bf   : > { %v1251_v6 = vpop.f32.mrb[22].mxu0  ;;  %v1364_v39 = vpop.f32.mrb[22].mxu1 }
 0x1c0   : > { %v6914_v54 = vpack.c.bf16 %v1251_v6, %v1247_v7  ;;  %v1534_v56 = vpack.c.bf16 %v1364_v39, %v1360_v22  ;;  %v1253_v0 = vpop.f32.mrb[23].mxu0  ;;  %v1366_v4 = vpop.f32.mrb[23].mxu1 }
 0x1c1   : > { %v6916_v34 = vpack.c.bf16 %v1253_v0, %v1249_v55  ;;  %v6918_v21 = vpack.c.bf16 %v1366_v4, %v1362_v14 }
 0x1c2   : > { %2246 = vrot.lane.b32.xlu1 %v1534_v56, %s6244_s19  ;;  %5686 = vmatprep.subr.msk.bf16.mxu1 %vm1746_vm0, %v1534_v56  ;;  %v1787_v26 = vsel %vm1746_vm0, %v1534_v56, 0 }
 0x1c3   : > { %8241 = vst [vmem:[#allocation11_spill] sm:$0xff] %v6916_v34  ;;  %8242 = vst [vmem:[#allocation12_spill] sm:$0xff] %v6918_v21  ;;  %5324 = vmatpush3.bf16.xpose.msra.mxu1 %v1787_v26 }
 0x1c5   : > { %v1257_v40 = vpop.f32.mrb[24].mxu0  ;;  %v1370_v11 = vpop.f32.mrb[24].mxu1 }
 0x1c6   : > { %v1259_v47 = vpop.f32.mrb[25].mxu0  ;;  %v1372_v58 = vpop.f32.mrb[25].mxu1 }
 0x1c7   : > { %v1261_v59 = vpop.f32.mrb[26].mxu0  ;;  %v1374_v62 = vpop.f32.mrb[26].mxu1 }
 0x1c8   : > { %v6923_v2 = vpack.c.bf16 %v1261_v59, %v1257_v40  ;;  %v1540_v17 = vpack.c.bf16 %v1374_v62, %v1370_v11  ;;  %v1263_v20 = vpop.f32.mrb[27].mxu0  ;;  %v1376_v25 = vpop.f32.mrb[27].mxu1 }
 0x1c9   : > { %v6925_v19 = vpack.c.bf16 %v1263_v20, %v1259_v47  ;;  %v6927_v51 = vpack.c.bf16 %v1376_v25, %v1372_v58 }
 0x1ca   : > { %2248 = vrot.lane.b32.xlu0 %v1540_v17, %s6244_s19  ;;  %5687 = vmatprep.subr.msk.bf16.mxu1 %vm1746_vm0, %v1540_v17  ;;  %v1790_v10 = vsel %vm1746_vm0, %v1540_v17, 0 }
 0x1cb   : > { %8243 = vst [vmem:[#allocation13_spill] sm:$0xff] %v6925_v19  ;;  %8244 = vst [vmem:[#allocation14_spill] sm:$0xff] %v6927_v51  ;;  %5326 = vmatpush3.bf16.xpose.msra.mxu1 %v1790_v10 }
 0x1cd   : > { %v1267_v15 = vpop.f32.mrb[28].mxu0  ;;  %v1380_v23 = vpop.f32.mrb[28].mxu1 }
 0x1ce   : > { %2212 = vrot.lane.b32.xlu0 %v6867_v27, %s6244_s19  ;;  %v1269_v29 = vpop.f32.mrb[29].mxu0  ;;  %v1382_v35 = vpop.f32.mrb[29].mxu1 }
 0x1cf   : > { %v1271_v52 = vpop.f32.mrb[30].mxu0  ;;  %v1384_v46 = vpop.f32.mrb[30].mxu1 }
 0x1d0   : > { %v1544_v30 = vpack.c.bf16 %v1271_v52, %v1267_v15  ;;  %v1546_v13 = vpack.c.bf16 %v1384_v46, %v1380_v23  ;;  %v1273_v50 = vpop.f32.mrb[31].mxu0  ;;  %v1386_v5 = vpop.f32.mrb[31].mxu1 }
 0x1d1   : > { %v6934_v9 = vpack.c.bf16 %v1273_v50, %v1269_v29  ;;  %v6936_v1 = vpack.c.bf16 %v1386_v5, %v1382_v35 }
 0x1d2   : > { %2216 = vrot.lane.b32.xlu0 %v6887_v44, %s6244_s19  ;;  %2250 = vrot.lane.b32.xlu1 %v1546_v13, %s6244_s19  ;;  %v1793_v41 = vsel %vm1746_vm0, %v1546_v13, 0 }
 0x1d3   : > { %8245 = vst [vmem:[#allocation15_spill] sm:$0xff] %v6934_v9  ;;  %8246 = vst [vmem:[#allocation16_spill] sm:$0xff] %v6936_v1  ;;  %5688 = vmatprep.subr.msk.bf16.mxu1 %vm1746_vm0, %v1546_v13 }
 0x1d4   : > { %5328 = vmatpush3.bf16.xpose.msra.mxu1 %v1793_v41 }
 0x1d5   : > { %v1423_v27 = vpop.f32.mrb[32].mxu0 }
 0x1d6   : > { %2220 = vrot.lane.b32.xlu0 %v6905_v63, %s6244_s19  ;;  %2214 = vrot.lane.b32.xlu1 %v6878_v53, %s6244_s19  ;;  %v1425_v31 = vpop.f32.mrb[33].mxu0 }
 0x1d7   : > { %v1427_v32 = vpop.f32.mrb[34].mxu0 }
 0x1d8   : > { %v1506_v33 = vpack.c.bf16 %v1427_v32, %v1423_v27  ;;  %v1429_v38 = vpop.f32.mrb[35].mxu0 }
 0x1d9   : > { %v6947_v36 = vpack.c.bf16 %v1429_v38, %v1425_v31 }
 0x1da   : > { %2224 = vrot.lane.b32.xlu0 %v6923_v2, %s6244_s19  ;;  %2218 = vrot.lane.b32.xlu1 %v6896_v37, %s6244_s19 }
 0x1db   : > { %8247 = vst [vmem:[#allocation17_spill] sm:$0xff] %v6947_v36  ;;  %5330 = vmatmul.mubr.msk.bf16.vlgmr.msra.gmra.mrb[32].mxu1 %vm1746_vm0, %v6878_v53  ;;  %5345 = vmatprep.subr.bf16.mxu1 %v1506_v33 }
 0x1dc   : > { %5333 = vmatprep.mubr.msk.bf16.mxu1 %vm1746_vm0, %v6887_v44  ;;  %5346 = vmatpush3.bf16.msra.mxu1 %v1506_v33 }
 0x1dd   : > { %v1433_v42 = vpop.f32.mrb[36].mxu0 }
 0x1de   : > { %2222 = vrot.lane.b32.xlu1 %v6914_v54, %s6244_s19  ;;  %2573 = vrot.lane.b32.xlu0 %v1506_v33, %s6244_s19  ;;  %v1435_v8 = vpop.f32.mrb[37].mxu0 }
 0x1df   : > { %v1437_v45 = vpop.f32.mrb[38].mxu0 }
 0x1e0   : > { %v1512_v48 = vpack.c.bf16 %v1437_v45, %v1433_v42  ;;  %v1439_v16 = vpop.f32.mrb[39].mxu0 }
 0x1e1   : > { %v6960_v7 = vpack.c.bf16 %v1439_v16, %v1435_v8 }
 0x1e2   : > { %2226 = vrot.lane.b32.xlu1 %v1544_v30, %s6244_s19  ;;  %5347 = vmatprep.subr.bf16.mxu1 %v1512_v48 }
 0x1e3   : > { %8248 = vst [vmem:[#allocation18_spill] sm:$0xff] %v6960_v7  ;;  %5334 = vmatmul.mubr.msk.bf16.gmra.mrb[36].mxu1 %vm1746_vm0, %v6896_v37 }
 0x1e4   : > { %5337 = vmatprep.mubr.msk.bf16.mxu1 %vm1746_vm0, %v6905_v63  ;;  %5348 = vmatpush3.bf16.msra.mxu1 %v1512_v48 }
 0x1e5   : > { %v1443_v53 = vpop.f32.mrb[40].mxu0 }
 0x1e6   : > { %2575 = vrot.lane.b32.xlu1 %v1512_v48, %s6244_s19  ;;  %v1445_v44 = vpop.f32.mrb[41].mxu0 }
 0x1e7   : > { %v1447_v22 = vpop.f32.mrb[42].mxu0 }
 0x1e8   : > { %v1518_v55 = vpack.c.bf16 %v1447_v22, %v1443_v53  ;;  %v1449_v14 = vpop.f32.mrb[43].mxu0 }
 0x1e9   : > { %v6968_v6 = vpack.c.bf16 %v1449_v14, %v1445_v44 }
 0x1ea   : > { %2577 = vrot.lane.b32.xlu1 %v1518_v55, %s6244_s19  ;;  %5349 = vmatprep.subr.bf16.mxu1 %v1518_v55 }
 0x1eb   : > { %8249 = vst [vmem:[#allocation19_spill] sm:$0xff] %v6968_v6  ;;  %5338 = vmatmul.mubr.msk.bf16.gmra.mrb[40].mxu1 %vm1746_vm0, %v6914_v54 }
 0x1ec   : > { %5341 = vmatprep.mubr.msk.bf16.mxu1 %vm1746_vm0, %v6923_v2  ;;  %5350 = vmatpush3.bf16.msra.mxu1 %v1518_v55 }
 0x1ed   : > { %v1453_v37 = vpop.f32.mrb[44].mxu0 }
 0x1ee   : > { %v1455_v63 = vpop.f32.mrb[45].mxu0 }
 0x1ef   : > { %v1457_v39 = vpop.f32.mrb[46].mxu0 }
 0x1f0   : > { %v1524_v56 = vpack.c.bf16 %v1457_v39, %v1453_v37  ;;  %v1459_v0 = vpop.f32.mrb[47].mxu0 }
 0x1f1   : > { %v6975_v4 = vpack.c.bf16 %v1459_v0, %v1455_v63 }
 0x1f2   : > { %2579 = vrot.lane.b32.xlu0 %v1524_v56, %s6244_s19  ;;  %5351 = vmatprep.subr.bf16.mxu1 %v1524_v56 }
 0x1f3   : > { %8250 = vst [vmem:[#allocation20_spill] sm:$0xff] %v6975_v4  ;;  %5342 = vmatmul.mubr.msk.bf16.gmra.mrb[44].mxu1 %vm1746_vm0, %v1544_v30 }
 0x1f4   : > { %5352 = vmatpush3.bf16.msra.mxu1 %v1524_v56 }
 0x1f5   : > { %v1463_v26 = vpop.f32.mrb[48].mxu0 }
 0x1f6   : > { %v1465_v40 = vpop.f32.mrb[49].mxu0 }
 0x1f7   : > { %v1467_v54 = vpop.f32.mrb[50].mxu0 }
 0x1f8   : > { %v1530_v11 = vpack.c.bf16 %v1467_v54, %v1463_v26  ;;  %v1469_v47 = vpop.f32.mrb[51].mxu0 }
 0x1f9   : > { %v6979_v58 = vpack.c.bf16 %v1469_v47, %v1465_v40 }
 0x1fa   : > { %2581 = vrot.lane.b32.xlu1 %v1530_v11, %s6244_s19  ;;  %5353 = vmatprep.subr.bf16.mxu1 %v1530_v11 }
 0x1fb   : > { %8251 = vst [vmem:[#allocation21_spill] sm:$0xff] %v6979_v58  ;;  %5354 = vmatpush3.bf16.msra.mxu1 %v1530_v11 }
 0x1fd   : > { %v1473_v59 = vpop.f32.mrb[52].mxu0 }
 0x1fe   : > { %v1475_v62 = vpop.f32.mrb[53].mxu0 }
 0x1ff   : > { %v1477_v2 = vpop.f32.mrb[54].mxu0 }
 0x200   : > { %v6982_v17 = vpack.c.bf16 %v1477_v2, %v1473_v59  ;;  %v1479_v20 = vpop.f32.mrb[55].mxu0 }
 0x201   : > { %v6984_v25 = vpack.c.bf16 %v1479_v20, %v1475_v62 }
 0x202   : > { %5355 = vmatprep.subr.bf16.mxu1 %v6982_v17 }
 0x203   : > { %8252 = vst [vmem:[#allocation22_spill] sm:$0xff] %v6984_v25  ;;  %5356 = vmatpush3.bf16.msra.mxu1 %v6982_v17 }
 0x205   : > { %v1483_v10 = vpop.f32.mrb[56].mxu0 }
 0x206   : > { %v1485_v15 = vpop.f32.mrb[57].mxu0 }
 0x207   : > { %v1487_v23 = vpop.f32.mrb[58].mxu0 }
 0x208   : > { %v6988_v29 = vpack.c.bf16 %v1487_v23, %v1483_v10  ;;  %v1489_v35 = vpop.f32.mrb[59].mxu0  ;;  %v5154_v10 = vld [vmem:[%s8205_s3 + $0x8] sm:$0xff]  }
 0x209   : > { %v6990_v52 = vpack.c.bf16 %v1489_v35, %v1485_v15  ;;  %v5027_v15 = vld [vmem:[%s8205_s3] sm:$0xff]   ;;  %v5032_v23 = vunpack.c.l.bf16 %v5154_v10 }
 0x20a   : > { %5357 = vmatprep.subr.bf16.mxu1 %v6988_v29  ;;  %v5028_v35 = vunpack.c.l.bf16 %v5027_v15 }
 0x20b   : > { %8253 = vst [vmem:[#allocation23_spill] sm:$0xff] %v6990_v52  ;;  %5358 = vmatpush3.bf16.msra.mxu1 %v6988_v29 }
 0x20c   : > { %v2237_v46 = vpop.permute.xlu0 %2236 }
 0x20d   : > { %v1493_v30 = vpop.f32.mrb[60].mxu0  ;;  %5689 = vmatprep.subr.msk.bf16.mxu0 %vm1746_vm0, %v2237_v46  ;;  %v2277_v13 = vsel %vm1746_vm0, %v2237_v46, 0  ;;  %v5033_v46 = vunpack.c.h.bf16 %v5154_v10 }
 0x20e   : > { %v1495_v50 = vpop.f32.mrb[61].mxu0  ;;  %5378 = vmatpush3.bf16.xpose.msra.mxu0 %v2277_v13 }
 0x20f   : > { %v1497_v5 = vpop.f32.mrb[62].mxu0 }
 0x210   : > { %v6996_v41 = vpack.c.bf16 %v1497_v5, %v1493_v30  ;;  %v1499_v27 = vpop.f32.mrb[63].mxu0  ;;  %v7058_v30 = vld [vmem:[%s7055_s30] ss:$0 sm:$0xff] }
 0x211   : > { %v6998_v31 = vpack.c.bf16 %v1499_v27, %v1495_v50  ;;  %v5029_v27 = vunpack.c.h.bf16 %v5027_v15 }
 0x212   : > { %5359 = vmatprep.subr.bf16.mxu1 %v6996_v41 }
 0x213   : > { %8254 = vst [vmem:[#allocation24_spill] sm:$0xff] %v6998_v31  ;;  %5360 = vmatpush3.bf16.msra.mxu1 %v6996_v41 }
 0x214   : > { %v2239_v32 = vpop.permute.xlu1 %2238 }
 0x215   : > { %5690 = vmatprep.subr.msk.bf16.mxu0 %vm1746_vm0, %v2239_v32  ;;  %v2280_v33 = vsel %vm1746_vm0, %v2239_v32, 0 }
 0x216   : > { %5380 = vmatpush3.bf16.xpose.msra.mxu0 %v2280_v33  ;;  %v5156_v33 = vld [vmem:[%s8205_s3 + $0x18] sm:$0xff]  }
 0x21c   : > { %v2241_v38 = vpop.permute.xlu1 %2240 }
 0x21d   : > { %5691 = vmatprep.subr.msk.bf16.mxu0 %vm1746_vm0, %v2241_v38  ;;  %v2283_v42 = vsel %vm1746_vm0, %v2241_v38, 0 }
 0x21e   : > { %5382 = vmatpush3.bf16.xpose.msra.mxu0 %v2283_v42 }
 0x224   : > { %v2243_v8 = vpop.permute.xlu1 %2242 }
 0x225   : > { %5692 = vmatprep.subr.msk.bf16.mxu0 %vm1746_vm0, %v2243_v8  ;;  %v2286_v45 = vsel %vm1746_vm0, %v2243_v8, 0 }
 0x226   : > { %5384 = vmatpush3.bf16.xpose.msra.mxu0 %v2286_v45 }
 0x22c   : > { %v2245_v48 = vpop.permute.xlu0 %2244 }
 0x22d   : > { %5693 = vmatprep.subr.msk.bf16.mxu0 %vm1746_vm0, %v2245_v48  ;;  %v2289_v16 = vsel %vm1746_vm0, %v2245_v48, 0  ;;  %v5155_v48 = vld [vmem:[%s8205_s3 + $0x10] sm:$0xff]  }
 0x22e   : > { %5386 = vmatpush3.bf16.xpose.msra.mxu0 %v2289_v16 }
 0x234   : > { %v2247_v53 = vpop.permute.xlu1 %2246 }
 0x235   : > { %5694 = vmatprep.subr.msk.bf16.mxu0 %vm1746_vm0, %v2247_v53  ;;  %v2292_v44 = vsel %vm1746_vm0, %v2247_v53, 0 }
 0x236   : > { %5388 = vmatpush3.bf16.xpose.msra.mxu0 %v2292_v44  ;;  %v5040_v44 = vunpack.c.l.bf16 %v5156_v33 }
 0x23c   : > { %v2249_v22 = vpop.permute.xlu0 %2248 }
 0x23d   : > { %5695 = vmatprep.subr.msk.bf16.mxu0 %vm1746_vm0, %v2249_v22  ;;  %v2295_v55 = vsel %vm1746_vm0, %v2249_v22, 0  ;;  %v5036_v22 = vunpack.c.l.bf16 %v5155_v48 }
 0x23e   : > { %5390 = vmatpush3.bf16.xpose.msra.mxu0 %v2295_v55 }
 0x240   : > { %v2213_v14 = vpop.permute.xlu0 %2212 }
 0x241   : > { %5393 = vmatprep.mubr.msk.bf16.mxu0 %vm1746_vm0, %v2213_v14  ;;  %v5041_v14 = vunpack.c.h.bf16 %v5156_v33 }
 0x244   : > { %v2251_v37 = vpop.permute.xlu1 %2250  ;;  %v2217_v63 = vpop.permute.xlu0 %2216 }
 0x245   : > { %5696 = vmatprep.subr.msk.bf16.mxu0 %vm1746_vm0, %v2251_v37  ;;  %v2298_v39 = vsel %vm1746_vm0, %v2251_v37, 0 }
 0x246   : > { %5392 = vmatpush3.bf16.xpose.msra.mxu0 %v2298_v39 }
 0x248   : > { %v2215_v56 = vpop.permute.xlu1 %2214  ;;  %v2221_v0 = vpop.permute.xlu0 %2220 }
 0x24c   : > { %v2219_v26 = vpop.permute.xlu1 %2218  ;;  %v2225_v40 = vpop.permute.xlu0 %2224 }
 0x24d   : > { %5394 = vmatmul.mubr.msk.bf16.vlgmr.msra.gmra.mrb[64].mxu0 %vm1746_vm0, %v2215_v56  ;;  %v5037_v56 = vunpack.c.h.bf16 %v5155_v48 }
 0x24e   : > { %5397 = vmatprep.mubr.msk.bf16.mxu0 %vm1746_vm0, %v2217_v63 }
 0x250   : > { %v2223_v54 = vpop.permute.xlu1 %2222  ;;  %v7019_v11 = vpop.permute.xlu0 %2573 }
 0x251   : > { %5409 = vmatprep.subr.bf16.mxu0 %v7019_v11  ;;  %5569 = vmatprep.subr.bf16.mxu1 %v7019_v11 }
 0x252   : > { %5410 = vmatpush3.bf16.msra.mxu0 %v7019_v11 }
 0x254   : > { %v2227_v47 = vpop.permute.xlu1 %2226 }
 0x255   : > { %5398 = vmatmul.mubr.msk.bf16.gmra.mrb[68].mxu0 %vm1746_vm0, %v2219_v26 }
 0x256   : > { %5401 = vmatprep.mubr.msk.bf16.mxu0 %vm1746_vm0, %v2221_v0 }
 0x258   : > { %v7026_v59 = vpop.permute.xlu1 %2575 }
 0x259   : > { %5411 = vmatprep.subr.bf16.mxu0 %v7026_v59 }
 0x25a   : > { %5412 = vmatpush3.bf16.msra.mxu0 %v7026_v59 }
 0x25c   : > { %v7030_v62 = vpop.permute.xlu1 %2577 }
 0x25d   : > { %5402 = vmatmul.mubr.msk.bf16.gmra.mrb[72].mxu0 %vm1746_vm0, %v2223_v54  ;;  %5413 = vmatprep.subr.bf16.mxu0 %v7030_v62 }
 0x25e   : > { %5405 = vmatprep.mubr.msk.bf16.mxu0 %vm1746_vm0, %v2225_v40  ;;  %5414 = vmatpush3.bf16.msra.mxu0 %v7030_v62  ;;  %v5158_v40 = vld [vmem:[%s8205_s3 + $0x28] sm:$0xff]  }
 0x264   : > { %v7036_v2 = vpop.permute.xlu0 %2579 }
 0x265   : > { %5406 = vmatmul.mubr.msk.bf16.gmra.mrb[76].mxu0 %vm1746_vm0, %v2227_v47  ;;  %5415 = vmatprep.subr.bf16.mxu0 %v7036_v2 }
 0x266   : > { %5416 = vmatpush3.bf16.msra.mxu0 %v7036_v2 }
 0x26c   : > { %v7041_v20 = vpop.permute.xlu1 %2581 }
 0x26d   : > { %5417 = vmatprep.subr.bf16.mxu0 %v7041_v20 }
 0x26e   : > { %5418 = vmatpush3.bf16.msra.mxu0 %v7041_v20 }
 0x2ae   : > { %v5331_v13 = vpop.f32.mrb[32].mxu1 }
 0x2af   : > { %v1838_v50 = vadd.f32 %v5331_v13, %v5032_v23  ;;  %v1829_v5 = vpop.f32.mrb[33].mxu1  ;;  %v5157_v23 = vld [vmem:[%s8205_s3 + $0x20] sm:$0xff]   ;;  %v5048_v13 = vunpack.c.l.bf16 %v5158_v40 }
 0x2b0   : > { %v5332_v32 = vpop.f32.mrb[34].mxu1  ;;  %v1830_v38 = vadd.f32 %v5028_v35, %v1829_v5 }
 0x2b1   : > { %v1841_v42 = vadd.f32 %v5332_v32, %v5033_v46  ;;  %v1832_v8 = vpop.f32.mrb[35].mxu1  ;;  %v7064_v45 = vadd.f32 %v7058_v30, %v1838_v50  ;;  %v5044_v50 = vunpack.c.l.bf16 %v5157_v23 }
 0x2b2   : > { %v1833_v16 = vadd.f32 %v5029_v27, %v1832_v8  ;;  %v7075_v55 = vadd.f32 %v7058_v30, %v1830_v38  ;;  %v5049_v27 = vunpack.c.h.bf16 %v5158_v40 }
 0x2b3   : > { %1918 = vmax.xlane.f32.xlu0 %v7064_v45  ;;  %v7071_v53 = vadd.f32 %v7058_v30, %v1841_v42  ;;  %v5045_v42 = vunpack.c.h.bf16 %v5157_v23 }
 0x2b4   : > { %v7079_v0 = vadd.f32 %v7058_v30, %v1833_v16  ;;  %v5160_v16 = vld [vmem:[%s8205_s3 + $0x38] sm:$0xff]  }
 0x2b5   : > { %1920 = vmax.xlane.f32.xlu1 %v7071_v53 }
 0x2b6   : > { %v5335_v37 = vpop.f32.mrb[36].mxu1 }
 0x2b7   : > { %v1854_v63 = vadd.f32 %v5335_v37, %v5040_v44  ;;  %v1845_v39 = vpop.f32.mrb[37].mxu1  ;;  %1914 = vmax.xlane.f32.xlu0 %v7075_v55 }
 0x2b8   : > { %v5336_v26 = vpop.f32.mrb[38].mxu1  ;;  %v1846_v54 = vadd.f32 %v5036_v22, %v1845_v39 }
 0x2b9   : > { %v1857_v47 = vadd.f32 %v5336_v26, %v5041_v14  ;;  %v1848_v10 = vpop.f32.mrb[39].mxu1  ;;  %1916 = vmax.xlane.f32.xlu1 %v7079_v0  ;;  %v7086_v15 = vadd.f32 %v7058_v30, %v1854_v63  ;;  %v5159_v63 = vld [vmem:[%s8205_s3 + $0x30] sm:$0xff]   ;;  %v5056_v26 = vunpack.c.l.bf16 %v5160_v16 }
 0x2ba   : > { %v1849_v35 = vadd.f32 %v5037_v56, %v1848_v10  ;;  %v7097_v5 = vadd.f32 %v7058_v30, %v1846_v54  ;;  %v5052_v40 = vunpack.c.l.bf16 %v5159_v63 }
 0x2bb   : > { %1926 = vmax.xlane.f32.xlu0 %v7086_v15  ;;  %v7093_v46 = vadd.f32 %v7058_v30, %v1857_v47  ;;  %v5057_v47 = vunpack.c.h.bf16 %v5160_v16 }
 0x2bc   : > { %v7101_v8 = vadd.f32 %v7058_v30, %v1849_v35 }
 0x2bd   : > { %1928 = vmax.xlane.f32.xlu1 %v7093_v46 }
 0x2be   : > { %v5339_v32 = vpop.f32.mrb[40].mxu1 }
 0x2bf   : > { %v1870_v33 = vadd.f32 %v5339_v32, %v5048_v13  ;;  %v1861_v38 = vpop.f32.mrb[41].mxu1  ;;  %1922 = vmax.xlane.f32.xlu0 %v7097_v5  ;;  %v5053_v13 = vunpack.c.h.bf16 %v5159_v63  ;;  %v5161_v63 = vld [vmem:[%s8205_s3 + $0x40] sm:$0xff]  }
 0x2c0   : > { %v5340_v48 = vpop.f32.mrb[42].mxu1  ;;  %v1862_v44 = vadd.f32 %v5044_v50, %v1861_v38 }
 0x2c1   : > { %v1873_v22 = vadd.f32 %v5340_v48, %v5049_v27  ;;  %v1864_v14 = vpop.f32.mrb[43].mxu1  ;;  %1924 = vmax.xlane.f32.xlu1 %v7101_v8  ;;  %v7108_v37 = vadd.f32 %v7058_v30, %v1870_v33 }
 0x2c2   : > { %v1865_v39 = vadd.f32 %v5045_v42, %v1864_v14  ;;  %v7119_v54 = vadd.f32 %v7058_v30, %v1862_v44  ;;  %v5162_v14 = vld [vmem:[%s8205_s3 + $0x48] sm:$0xff]  }
 0x2c3   : > { %1934 = vmax.xlane.f32.xlu0 %v7108_v37  ;;  %v7115_v56 = vadd.f32 %v7058_v30, %v1873_v22 }
 0x2c4   : > { %v7123_v50 = vadd.f32 %v7058_v30, %v1865_v39  ;;  %v5064_v39 = vunpack.c.l.bf16 %v5162_v14 }
 0x2c5   : > { %1936 = vmax.xlane.f32.xlu1 %v7115_v56 }
 0x2c6   : > { %v5343_v10 = vpop.f32.mrb[44].mxu1 }
 0x2c7   : > { %v1886_v23 = vadd.f32 %v5343_v10, %v5056_v26  ;;  %v1877_v35 = vpop.f32.mrb[45].mxu1  ;;  %1930 = vmax.xlane.f32.xlu0 %v7119_v54  ;;  %v5060_v26 = vunpack.c.l.bf16 %v5161_v63 }
 0x2c8   : > { %v5344_v27 = vpop.f32.mrb[46].mxu1  ;;  %v1878_v32 = vadd.f32 %v5052_v40, %v1877_v35  ;;  %v5065_v40 = vunpack.c.h.bf16 %v5162_v14 }
 0x2c9   : > { %v1889_v33 = vadd.f32 %v5344_v27, %v5057_v47  ;;  %v1880_v38 = vpop.f32.mrb[47].mxu1  ;;  %1932 = vmax.xlane.f32.xlu1 %v7123_v50  ;;  %v7127_v42 = vadd.f32 %v7058_v30, %v1886_v23 }
 0x2ca   : > { %v1881_v48 = vadd.f32 %v5053_v13, %v1880_v38  ;;  %v7135_v44 = vadd.f32 %v7058_v30, %v1878_v32  ;;  %v5061_v32 = vunpack.c.h.bf16 %v5161_v63 }
 0x2cb   : > { %1942 = vmax.xlane.f32.xlu0 %v7127_v42  ;;  %v7131_v16 = vadd.f32 %v7058_v30, %v1889_v33 }
 0x2cc   : > { %v7139_v22 = vadd.f32 %v7058_v30, %v1881_v48  ;;  %v5164_v48 = vld [vmem:[%s8205_s3 + $0x58] sm:$0xff]  }
 0x2cd   : > { %1944 = vmax.xlane.f32.xlu1 %v7131_v16  ;;  %v5073_v63 = vunpack.c.h.bf16 %v5164_v48 }
 0x2cf   : > { %1938 = vmax.xlane.f32.xlu0 %v7135_v44 }
 0x2d1   : > { %1940 = vmax.xlane.f32.xlu1 %v7139_v22 }
 0x320   : > { %v5395_v47 = vpop.f32.mrb[64].mxu0 }
 0x321   : > { %v2343_v10 = vadd.f32 %v5395_v47, %v5064_v39  ;;  %v2334_v23 = vpop.f32.mrb[65].mxu0  ;;  %v5072_v39 = vunpack.c.l.bf16 %v5164_v48  ;;  %v5163_v47 = vld [vmem:[%s8205_s3 + $0x50] sm:$0xff]  }
 0x322   : > { %v5396_v35 = vpop.f32.mrb[66].mxu0  ;;  %v2335_v13 = vadd.f32 %v5060_v26, %v2334_v23  ;;  %v5069_v23 = vunpack.c.h.bf16 %v5163_v47  ;;  %v5068_v9 = vunpack.c.l.bf16 %v5163_v47 }
 0x323   : > { %v2346_v27 = vadd.f32 %v5396_v35, %v5065_v40  ;;  %v2337_v33 = vpop.f32.mrb[67].mxu0  ;;  %v7149_v38 = vadd.f32 %v7058_v30, %v2343_v10 }
 0x324   : > { %v2338_v14 = vadd.f32 %v5061_v32, %v2337_v33  ;;  %v7160_v26 = vadd.f32 %v7058_v30, %v2335_v13  ;;  %v5166_v13 = vld [vmem:[%s8205_s3 + $0x68] sm:$0xff]  }
 0x325   : > { %2417 = vmax.xlane.f32.xlu0 %v7149_v38  ;;  %v7156_v31 = vadd.f32 %v7058_v30, %v2346_v27 }
 0x326   : > { %v7167_v52 = vadd.f32 %v7058_v30, %v2338_v14  ;;  %v5165_v14 = vld [vmem:[%s8205_s3 + $0x60] sm:$0xff]  }
 0x327   : > { %2419 = vmax.xlane.f32.xlu1 %v7156_v31  ;;  %v5077_v12 = vunpack.c.h.bf16 %v5165_v14 }
 0x328   : > { %v5399_v40 = vpop.f32.mrb[68].mxu0 }
 0x329   : > { %2413 = vmax.xlane.f32.xlu0 %v7160_v26  ;;  %v2350_v10 = vpop.f32.mrb[69].mxu0  ;;  %v2359_v27 = vadd.f32 %v5399_v40, %v5072_v39  ;;  %v5080_v39 = vunpack.c.l.bf16 %v5166_v13 }
 0x32a   : > { %v5400_v35 = vpop.f32.mrb[70].mxu0  ;;  %v2351_v19 = vadd.f32 %v5068_v9, %v2350_v10  ;;  %v5076_v9 = vunpack.c.l.bf16 %v5165_v14 }
 0x32b   : > { %v2362_v32 = vadd.f32 %v5400_v35, %v5073_v63  ;;  %v2353_v33 = vpop.f32.mrb[71].mxu0  ;;  %v7178_v63 = vadd.f32 %v7058_v30, %v2359_v27 }
 0x32c   : > { %v2354_v48 = vadd.f32 %v5069_v23, %v2353_v33  ;;  %v7189_v27 = vadd.f32 %v7058_v30, %v2351_v19  ;;  %v5168_v33 = vld [vmem:[%s8205_s3 + $0x78] sm:$0xff]  }
 0x32d   : > { %2415 = vmax.xlane.f32.xlu0 %v7167_v52  ;;  %v7174_v25 = vadd.f32 %v7058_v30, %v2362_v32  ;;  %v5088_v58 = vunpack.c.l.bf16 %v5168_v33  ;;  %v5089_v51 = vunpack.c.h.bf16 %v5168_v33 }
 0x32e   : > { %v7185_v23 = vadd.f32 %v7058_v30, %v2354_v48 }
 0x32f   : > { %2427 = vmax.xlane.f32.xlu1 %v7174_v25 }
 0x330   : > { %v5403_v40 = vpop.f32.mrb[72].mxu0 }
 0x331   : > { %2425 = vmax.xlane.f32.xlu0 %v7178_v63  ;;  %v2366_v47 = vpop.f32.mrb[73].mxu0  ;;  %v2375_v32 = vadd.f32 %v5403_v40, %v5080_v39  ;;  %v5167_v39 = vld [vmem:[%s8205_s3 + $0x70] sm:$0xff]  }
 0x332   : > { %v5404_v35 = vpop.f32.mrb[74].mxu0  ;;  %v2367_v34 = vadd.f32 %v5076_v9, %v2366_v47  ;;  %v5084_v18 = vunpack.c.l.bf16 %v5167_v39  ;;  %v5085_v28 = vunpack.c.h.bf16 %v5167_v39 }
 0x333   : > { %2423 = vmax.xlane.f32.xlu1 %v7185_v23  ;;  %v2369_v10 = vpop.f32.mrb[75].mxu0  ;;  %v7196_v48 = vadd.f32 %v7058_v30, %v2375_v32 }
 0x334   : > { %v7203_v7 = vadd.f32 %v7058_v30, %v2367_v34  ;;  %v2370_v1 = vadd.f32 %v5077_v12, %v2369_v10 }
 0x335   : > { %2421 = vmax.xlane.f32.xlu0 %v7189_v27 }
 0x336   : > { %v7226_v14 = vadd.f32 %v7058_v30, %v2370_v1 }
 0x338   : > { %v5407_v4 = vpop.f32.mrb[76].mxu0 }
 0x339   : > { %2433 = vmax.xlane.f32.xlu0 %v7196_v48  ;;  %v2382_v19 = vpop.f32.mrb[77].mxu0  ;;  %v2391_v43 = vadd.f32 %v5407_v4, %v5088_v58 }
 0x33a   : > { %v5408_v40 = vpop.f32.mrb[78].mxu0  ;;  %v2383_v47 = vadd.f32 %v5084_v18, %v2382_v19  ;;  %v5081_v18 = vunpack.c.h.bf16 %v5166_v13 }
 0x33b   : > { %v2385_v6 = vpop.f32.mrb[79].mxu0  ;;  %v7207_v32 = vadd.f32 %v7058_v30, %v2391_v43  ;;  %v2394_v13 = vadd.f32 %v5408_v40, %v5089_v51 }
 0x33c   : > { %v7211_v9 = vadd.f32 %v7058_v30, %v2383_v47  ;;  %v2378_v60 = vadd.f32 %v5404_v35, %v5081_v18  ;;  %v2386_v33 = vadd.f32 %v5085_v28, %v2385_v6 }
 0x33d   : > { %2429 = vmax.xlane.f32.xlu0 %v7203_v7 }
 0x33e   : > { %v7220_v21 = vadd.f32 %v7058_v30, %v2378_v60 }
 0x340   : > { %v1919_v58 = vpop.xlane.xlu0 %1918 }
 0x341   : > { %2441 = vmax.xlane.f32.xlu0 %v7207_v32  ;;  %v1948_v47 = vsub.f32 %v7064_v45, %v1919_v58  ;;  %v7232_v58 = vadd.f32 %v7058_v30, %v2394_v13 }
 0x342   : > { %v1921_v4 = vpop.xlane.xlu1 %1920 }
 0x343   : > { %v1966_v3 = vmul.f32 1.442695, %v1948_v47  ;;  %v1949_v60 = vsub.f32 %v7071_v53, %v1921_v4 }
 0x344   : > { %2583 = vrot.lane.b32.xlu1 %v6982_v17, %s6244_s19  ;;  %v1915_v24 = vpop.xlane.xlu0 %1914 }
 0x345   : > { %2437 = vmax.xlane.f32.xlu0 %v7211_v9  ;;  %5963 = vpow2.f32 %v1966_v3  ;;  %v7238_v3 = vadd.f32 %v7058_v30, %v2386_v33 }
 0x346   : > { %v1917_v34 = vpop.xlane.xlu1 %1916 }
 0x348   : > { %v1927_v19 = vpop.xlane.xlu0 %1926 }
 0x349   : > { %v1952_v49 = vsub.f32 %v7086_v15, %v1927_v19 }
 0x34a   : > { %v1929_v43 = vpop.xlane.xlu1 %1928 }
 0x34b   : > { %v1974_v45 = vmul.f32 1.442695, %v1952_v49  ;;  %v1953_v12 = vsub.f32 %v7093_v46, %v1929_v43  ;;  %v1968_v49 = vmul.f32 1.442695, %v1949_v60 }
 0x34c   : > { %v1923_v17 = vpop.xlane.xlu0 %1922 }
 0x34d   : > { %5965 = vpow2.f32 %v1974_v45 }
 0x34e   : > { %v1925_v36 = vpop.xlane.xlu1 %1924 }
 0x34f   : > { %v1951_v51 = vsub.f32 %v7101_v8, %v1925_v36  ;;  %v1950_v36 = vsub.f32 %v7097_v5, %v1923_v17  ;;  %v7245_v39 = vpop.eup %5963 }
 0x350   : > { %v1935_v10 = vpop.xlane.xlu0 %1934 }
 0x351   : > { %v1972_v28 = vmul.f32 1.442695, %v1951_v51  ;;  %v1956_v6 = vsub.f32 %v7108_v37, %v1935_v10  ;;  %v1970_v37 = vmul.f32 1.442695, %v1950_v36 }
 0x352   : > { %v1937_v35 = vpop.xlane.xlu1 %1936 }
 0x353   : > { %v1957_v18 = vsub.f32 %v7115_v56, %v1937_v35 }
 0x354   : > { %v1931_v46 = vpop.xlane.xlu0 %1930 }
 0x355   : > { %v1954_v40 = vsub.f32 %v7119_v54, %v1931_v46  ;;  %v1984_v13 = vmul.f32 1.442695, %v1957_v18 }
 0x356   : > { %v1933_v1 = vpop.xlane.xlu1 %1932 }
 0x357   : > { %v7249_v4 = vpop.eup %5965  ;;  %v1978_v43 = vmul.f32 1.442695, %v1954_v40 }
 0x358   : > { %v1943_v30 = vpop.xlane.xlu0 %1942 }
 0x359   : > { %v1960_v17 = vsub.f32 %v7127_v42, %v1943_v30 }
 0x35a   : > { %v7243_v8 = vpop.xlane.xlu1 %1944 }
 0x35b   : > { %2585 = vrot.lane.b32.xlu0 %v6988_v29, %s6244_s19  ;;  %v1946_v29 = vsub.f32 %v7075_v55, %v1915_v24  ;;  %v1976_v24 = vmul.f32 1.442695, %v1953_v12  ;;  %v1947_v55 = vsub.f32 %v7079_v0, %v1917_v34  ;;  %v1982_v0 = vmul.f32 1.442695, %v1956_v6 }
 0x35c   : > { %v1955_v34 = vsub.f32 %v7123_v50, %v1933_v1  ;;  %v1990_v35 = vmul.f32 1.442695, %v1960_v17 }
 0x35d   : > { %v1962_v15 = vmul.f32 1.442695, %v1946_v29  ;;  %v1964_v53 = vmul.f32 1.442695, %v1947_v55  ;;  %v1939_v29 = vpop.xlane.xlu0 %1938 }
 0x35e   : > { %v1941_v19 = vpop.xlane.xlu1 %1940  ;;  %v1980_v47 = vmul.f32 1.442695, %v1955_v34  ;;  %v1958_v12 = vsub.f32 %v7135_v44, %v1939_v29 }
 0x35f   : > { %5967 = vpow2.f32 %v1962_v15  ;;  %v1959_v45 = vsub.f32 %v7139_v22, %v1941_v19 }
 0x360   : > { %5969 = vpow2.f32 %v1976_v24  ;;  %v1986_v22 = vmul.f32 1.442695, %v1958_v12 }
 0x361   : > { %5971 = vpow2.f32 %v1968_v49  ;;  %v1988_v10 = vmul.f32 1.442695, %v1959_v45 }
 0x362   : > { %5973 = vpow2.f32 %v1972_v28 }
 0x363   : > { %5975 = vpow2.f32 %v1964_v53 }
 0x364   : > { %5977 = vpow2.f32 %v1982_v0 }
 0x365   : > { %5979 = vpow2.f32 %v1970_v37 }
 0x366   : > { %5981 = vpow2.f32 %v1978_v43 }
 0x367   : > { %5983 = vpow2.f32 %v1980_v47 }
 0x368   : > { %2435 = vmax.xlane.f32.xlu1 %v7220_v21  ;;  %5985 = vpow2.f32 %v1984_v13 }
 0x369   : > { %v7253_v5 = vpop.eup %5967  ;;  %5987 = vpow2.f32 %v1990_v35 }
 0x36a   : > { %v7257_v54 = vpop.eup %5969  ;;  %5989 = vpow2.f32 %v1988_v10 }
 0x36b   : > { %v7261_v50 = vpop.eup %5971  ;;  %5991 = vpow2.f32 %v1986_v22  ;;  %v1961_v22 = vsub.f32 %v7131_v16, %v7243_v8 }
 0x36c   : > { %2431 = vmax.xlane.f32.xlu1 %v7226_v14  ;;  %v7265_v56 = vpop.eup %5973 }
 0x36d   : > { %v7269_v42 = vpop.eup %5975 }
 0x36e   : > { %v7272_v60 = vpop.eup %5977 }
 0x36f   : > { %v7275_v15 = vpop.eup %5979 }
 0x370   : > { %2443 = vmax.xlane.f32.xlu1 %v7232_v58  ;;  %v7278_v44 = vpop.eup %5981 }
 0x371   : > { %v7281_v33 = vpop.eup %5983 }
 0x372   : > { %v7284_v24 = vpop.eup %5985 }
 0x373   : > { %v7287_v51 = vpop.eup %5987 }
 0x374   : > { %2439 = vmax.xlane.f32.xlu1 %v7238_v3  ;;  %v7290_v1 = vpop.eup %5989 }
 0x375   : > { %v7293_v49 = vpop.eup %5991 }
 0x378   : > { %1998 = vadd.xlane.f32.xlu1 %v7245_v39 }
 0x37a   : > { %2006 = vadd.xlane.f32.xlu0 %v7249_v4 }
 0x37c   : > { %1994 = vadd.xlane.f32.xlu1 %v7253_v5 }
 0x37e   : > { %2008 = vadd.xlane.f32.xlu0 %v7257_v54 }
 0x380   : > { %2000 = vadd.xlane.f32.xlu1 %v7261_v50 }
 0x382   : > { %2004 = vadd.xlane.f32.xlu0 %v7265_v56 }
 0x384   : > { %1996 = vadd.xlane.f32.xlu1 %v7269_v42 }
 0x386   : > { %2014 = vadd.xlane.f32.xlu0 %v7272_v60 }
 0x388   : > { %2002 = vadd.xlane.f32.xlu1 %v7275_v15 }
 0x38a   : > { %2010 = vadd.xlane.f32.xlu0 %v7278_v44 }
 0x38c   : > { %2012 = vadd.xlane.f32.xlu1 %v7281_v33 }
 0x38e   : > { %2016 = vadd.xlane.f32.xlu0 %v7284_v24 }
 0x390   : > { %2022 = vadd.xlane.f32.xlu1 %v7287_v51 }
 0x392   : > { %2020 = vadd.xlane.f32.xlu0 %v7290_v1 }
 0x394   : > { %2018 = vadd.xlane.f32.xlu1 %v7293_v49 }
 0x3b2   : > { %v2418_v55 = vpop.xlane.xlu0 %2417 }
 0x3b3   : > { %v2447_v46 = vsub.f32 %v7149_v38, %v2418_v55 }
 0x3b4   : > { %v2420_v28 = vpop.xlane.xlu1 %2419 }
 0x3b5   : > { %v2465_v6 = vmul.f32 1.442695, %v2447_v46  ;;  %v2448_v36 = vsub.f32 %v7156_v31, %v2420_v28 }
 0x3b6   : > { %v2414_v53 = vpop.xlane.xlu0 %2413 }
 0x3b7   : > { %5993 = vpow2.f32 %v2465_v6  ;;  %v2445_v0 = vsub.f32 %v7160_v26, %v2414_v53  ;;  %v2467_v37 = vmul.f32 1.442695, %v2448_v36  ;;  %v1992_v6 = vmul.f32 1.442695, %v1961_v22 }
 0x3b9   : > { %v2461_v40 = vmul.f32 1.442695, %v2445_v0 }
 0x3ba   : > { %v2416_v30 = vpop.xlane.xlu0 %2415 }
 0x3bb   : > { %5995 = vpow2.f32 %v2461_v40  ;;  %v2446_v34 = vsub.f32 %v7167_v52, %v2416_v30 }
 0x3bc   : > { %v2428_v18 = vpop.xlane.xlu1 %2427  ;;  %5997 = vpow2.f32 %v2467_v37 }
 0x3bd   : > { %v2463_v43 = vmul.f32 1.442695, %v2446_v34  ;;  %v2452_v26 = vsub.f32 %v7174_v25, %v2428_v18 }
 0x3be   : > { %v2426_v19 = vpop.xlane.xlu0 %2425 }
 0x3bf   : > { %v2451_v38 = vsub.f32 %v7178_v63, %v2426_v19  ;;  %5999 = vpow2.f32 %v2463_v43  ;;  %v2475_v12 = vmul.f32 1.442695, %v2452_v26 }
 0x3c0   : > { %v2424_v47 = vpop.xlane.xlu1 %2423 }
 0x3c1   : > { %v7301_v17 = vpop.eup %5993  ;;  %v2473_v29 = vmul.f32 1.442695, %v2451_v38  ;;  %v2450_v10 = vsub.f32 %v7185_v23, %v2424_v47 }
 0x3c2   : > { %2497 = vadd.xlane.f32.xlu0 %v7301_v17  ;;  %v2422_v31 = vpop.xlane.xlu0 %2421 }
 0x3c3   : > { %6001 = vpow2.f32 %v2473_v29  ;;  %v2449_v13 = vsub.f32 %v7189_v27, %v2422_v31  ;;  %v2471_v55 = vmul.f32 1.442695, %v2450_v10 }
 0x3c4   : > { %v7306_v52 = vpop.permute.xlu1 %2583 }
 0x3c5   : > { %v7308_v45 = vpop.eup %5995  ;;  %v2469_v35 = vmul.f32 1.442695, %v2449_v13  ;;  %5419 = vmatprep.subr.bf16.mxu0 %v7306_v52 }
 0x3c6   : > { %5420 = vmatpush3.bf16.msra.mxu0 %v7306_v52  ;;  %2493 = vadd.xlane.f32.xlu1 %v7308_v45  ;;  %v2434_v63 = vpop.xlane.xlu0 %2433  ;;  %v7314_v25 = vpop.eup %5997 }
 0x3c7   : > { %6003 = vpow2.f32 %v2469_v35  ;;  %v2455_v53 = vsub.f32 %v7196_v48, %v2434_v63 }
 0x3c8   : > { %6005 = vpow2.f32 %v2475_v12 }
 0x3c9   : > { %v7319_v46 = vpop.eup %5999  ;;  %6007 = vpow2.f32 %v2471_v55  ;;  %v2481_v8 = vmul.f32 1.442695, %v2455_v53 }
 0x3ca   : > { %2499 = vadd.xlane.f32.xlu1 %v7314_v25  ;;  %v2430_v27 = vpop.xlane.xlu0 %2429  ;;  %6009 = vpow2.f32 %v1992_v6 }
 0x3cb   : > { %v2453_v0 = vsub.f32 %v7203_v7, %v2430_v27  ;;  %6011 = vpow2.f32 %v2481_v8 }
 0x3cd   : > { %v7321_v28 = vpop.eup %6001  ;;  %v2477_v37 = vmul.f32 1.442695, %v2453_v0 }
 0x3ce   : > { %2495 = vadd.xlane.f32.xlu1 %v7319_v46  ;;  %2505 = vadd.xlane.f32.xlu0 %v7321_v28  ;;  %v2442_v23 = vpop.xlane.xlu0 %2441 }
 0x3cf   : > { %6013 = vpow2.f32 %v2477_v37  ;;  %v2459_v13 = vsub.f32 %v7207_v32, %v2442_v23 }
 0x3d1   : > { %v7326_v36 = vpop.eup %6003  ;;  %v2489_v10 = vmul.f32 1.442695, %v2459_v13 }
 0x3d2   : > { %2501 = vadd.xlane.f32.xlu0 %v7326_v36  ;;  %v2438_v16 = vpop.xlane.xlu0 %2437  ;;  %v7330_v40 = vpop.eup %6005 }
 0x3d3   : > { %v7337_v48 = vpop.eup %6007  ;;  %v2457_v43 = vsub.f32 %v7211_v9, %v2438_v16 }
 0x3d4   : > { %v7340_v34 = vpop.eup %6009 }
 0x3d5   : > { %v7345_v7 = vpop.eup %6011  ;;  %v2485_v19 = vmul.f32 1.442695, %v2457_v43 }
 0x3d6   : > { %2507 = vadd.xlane.f32.xlu0 %v7330_v40  ;;  %v7333_v30 = vpop.permute.xlu0 %2585 }
 0x3d7   : > { %5421 = vmatprep.subr.bf16.mxu0 %v7333_v30  ;;  %6015 = vpow2.f32 %v2485_v19 }
 0x3d8   : > { %5422 = vmatpush3.bf16.msra.mxu0 %v7333_v30 }
 0x3d9   : > { %v7348_v18 = vpop.eup %6013 }
 0x3da   : > { %2503 = vadd.xlane.f32.xlu0 %v7337_v48 }
 0x3de   : > { %2024 = vadd.xlane.f32.xlu0 %v7340_v34 }
 0x3df   : > { %2587 = vrot.lane.b32.xlu1 %v6996_v41, %s6244_s19 }
 0x3e1   : > { %v7355_v12 = vpop.eup %6015 }
 0x3e2   : > { %2513 = vadd.xlane.f32.xlu0 %v7345_v7 }
 0x3e6   : > { %2509 = vadd.xlane.f32.xlu0 %v7348_v18 }
 0x3f5   : > { %v2436_v38 = vpop.xlane.xlu1 %2435 }
 0x3f6   : > { %v2456_v29 = vsub.f32 %v7220_v21, %v2436_v38 }
 0x3f8   : > { %v2483_v35 = vmul.f32 1.442695, %v2456_v29 }
 0x3f9   : > { %v2432_v47 = vpop.xlane.xlu1 %2431 }
 0x3fa   : > { %v2454_v31 = vsub.f32 %v7226_v14, %v2432_v47 }
 0x3fc   : > { %v2479_v26 = vmul.f32 1.442695, %v2454_v31 }
 0x3fd   : > { %v2444_v41 = vpop.xlane.xlu1 %2443 }
 0x3fe   : > { %6017 = vpow2.f32 %v2479_v26  ;;  %v2460_v21 = vsub.f32 %v7232_v58, %v2444_v41 }
 0x3ff   : > { %6019 = vpow2.f32 %v2483_v35 }
 0x400   : > { %6021 = vpow2.f32 %v2489_v10  ;;  %v2491_v23 = vmul.f32 1.442695, %v2460_v21 }
 0x401   : > { %v2440_v63 = vpop.xlane.xlu1 %2439 }
 0x402   : > { %v2458_v9 = vsub.f32 %v7238_v3, %v2440_v63 }
 0x403   : > { %2517 = vadd.xlane.f32.xlu1 %v7355_v12 }
 0x404   : > { %v2487_v14 = vmul.f32 1.442695, %v2458_v9 }
 0x405   : > { %v1999_v27 = vpop.xlane.xlu1 %1998 }
 0x406   : > { %6023 = vpow2.f32 %v2487_v14 }
 0x407   : > { %v2007_v22 = vpop.xlane.xlu0 %2006  ;;  %6025 = vpow2.f32 %v2491_v23 }
 0x408   : > { %v7360_v55 = vpop.eup %6017 }
 0x409   : > { %v1995_v32 = vpop.xlane.xlu1 %1994  ;;  %2511 = vadd.xlane.f32.xlu0 %v7360_v55  ;;  %v7363_v53 = vpop.eup %6019 }
 0x40a   : > { %v7366_v8 = vpop.eup %6021 }
 0x40b   : > { %v2009_v6 = vpop.xlane.xlu0 %2008 }
 0x40d   : > { %v2001_v16 = vpop.xlane.xlu1 %2000  ;;  %2515 = vadd.xlane.f32.xlu0 %v7363_v53 }
 0x40e   : > { %6027 = vrcp.f32 %v2001_v16 }
 0x40f   : > { %v2005_v3 = vpop.xlane.xlu0 %2004  ;;  %6029 = vrcp.f32 %v1995_v32 }
 0x410   : > { %6031 = vrcp.f32 %v1999_v27  ;;  %v7369_v37 = vpop.eup %6023 }
 0x411   : > { %v1997_v58 = vpop.xlane.xlu1 %1996  ;;  %2521 = vadd.xlane.f32.xlu0 %v7366_v8  ;;  %v7374_v38 = vpop.eup %6025 }
 0x412   : > { %6033 = vrcp.f32 %v1997_v58 }
 0x413   : > { %v2015_v0 = vpop.xlane.xlu0 %2014  ;;  %6035 = vrcp.f32 %v2005_v3 }
 0x414   : > { %3805 = vrot.lane.b32.xlu1 %v6871_v57, %s6244_s19 }
 0x415   : > { %v2003_v43 = vpop.xlane.xlu1 %2002  ;;  %2519 = vadd.xlane.f32.xlu0 %v7369_v37 }
 0x416   : > { %6037 = vrcp.f32 %v2003_v43 }
 0x417   : > { %6039 = vrcp.f32 %v2009_v6  ;;  %v2011_v19 = vpop.xlane.xlu0 %2010 }
 0x418   : > { %6041 = vrcp.f32 %v2007_v22  ;;  %v6028_v47 = vpop.eup %6027 }
 0x419   : > { %6043 = vrcp.f32 %v2011_v19  ;;  %v2013_v29 = vpop.xlane.xlu1 %2012  ;;  %2523 = vadd.xlane.f32.xlu0 %v7374_v38  ;;  %v6030_v31 = vpop.eup %6029  ;;  %v2045_v35 = vmul.f32 %v6028_v47, %v7261_v50 }
 0x41a   : > { %6045 = vrcp.f32 %v2013_v29  ;;  %v6032_v26 = vpop.eup %6031  ;;  %v2042_v10 = vmul.f32 %v6030_v31, %v7253_v5 }
 0x41b   : > { %v2017_v41 = vpop.xlane.xlu0 %2016  ;;  %v2044_v21 = vmul.f32 %v6032_v26, %v7245_v39 }
 0x41c   : > { %v6034_v13 = vpop.eup %6033  ;;  %6047 = vrcp.f32 %v2017_v41 }
 0x41d   : > { %v7378_v63 = vpop.xlane.xlu1 %2022  ;;  %v2043_v9 = vmul.f32 %v6034_v13, %v7269_v42  ;;  %v6036_v27 = vpop.eup %6035  ;;  %6049 = vrcp.f32 %v2015_v0  ;;  %v2059_v23 = vpack.c.bf16 %v2045_v35, %v2044_v21 }
 0x41e   : > { %v2047_v3 = vmul.f32 %v6036_v27, %v7265_v56 }
 0x41f   : > { %v2021_v14 = vpop.xlane.xlu0 %2020  ;;  %v2058_v22 = vpack.c.bf16 %v2043_v9, %v2042_v10 }
 0x420   : > { %v6038_v32 = vpop.eup %6037  ;;  %6051 = vrcp.f32 %v2021_v14 }
 0x421   : > { %v6040_v6 = vpop.eup %6039  ;;  %5361 = vmatprep.mubr.bf16.mxu1 %v2058_v22  ;;  %v2019_v16 = vpop.xlane.xlu1 %2018  ;;  %v2046_v50 = vmul.f32 %v6038_v32, %v7275_v15 }
 0x422   : > { %v6042_v5 = vpop.eup %6041  ;;  %6053 = vrcp.f32 %v2019_v16  ;;  %5362 = vmatmul.mubr.bf16.vlgmr.msra.gmra.mrb[48].mxu1 %v2059_v23  ;;  %v2049_v0 = vmul.f32 %v6040_v6, %v7257_v54  ;;  %v5895_v16 = vld [vmem:[%s8207_s5] ss:$8 sps:$4 sm:$0xff]  }
 0x423   : > { %v6044_v42 = vpop.eup %6043  ;;  %5577 = vmatpush3.bf16.msra.mxu1 %v7019_v11  ;;  %v2060_v39 = vpack.c.bf16 %v2047_v3, %v2046_v50  ;;  %v2048_v19 = vmul.f32 %v6042_v5, %v7249_v4 }
 0x424   : > { %v6046_v58 = vpop.eup %6045  ;;  %5570 = vmatprep.subr.bf16.mxu1 %v7026_v59  ;;  %v2050_v56 = vmul.f32 %v6044_v42, %v7278_v44  ;;  %v5901_v42 = vld [vmem:[%s8207_s5 + $0x20] ss:$8 sps:$4 sm:$0xff]  }
 0x425   : > { %5365 = vmatprep.mubr.bf16.mxu1 %v2060_v39  ;;  %v2051_v43 = vmul.f32 %v6046_v58, %v7281_v33  ;;  %v2061_v15 = vpack.c.bf16 %v2049_v0, %v2048_v19 }
 0x426   : > { %v6048_v47 = vpop.eup %6047 }
 0x427   : > { %5578 = vmatpush3.bf16.msra.mxu1 %v7026_v59  ;;  %v2062_v11 = vpack.c.bf16 %v2051_v43, %v2050_v56  ;;  %v6050_v29 = vpop.eup %6049  ;;  %v2053_v4 = vmul.f32 %v6048_v47, %v7284_v24 }
 0x428   : > { %5571 = vmatprep.subr.bf16.mxu1 %v7030_v62  ;;  %v2052_v44 = vmul.f32 %v6050_v29, %v7272_v60  ;;  %v5906_v29 = vld [vmem:[%s8207_s5 + $0x34] ss:$8 sps:$4 sm:$0xff]  }
 0x42a   : > { %5366 = vmatmul.mubr.bf16.gmra.mrb[52].mxu1 %v2061_v15  ;;  %v6052_v31 = vpop.eup %6051  ;;  %v2063_v26 = vpack.c.bf16 %v2053_v4, %v2052_v44 }
 0x42b   : > { %5579 = vmatpush3.bf16.msra.mxu1 %v7030_v62  ;;  %5369 = vmatprep.mubr.bf16.mxu1 %v2062_v11  ;;  %v2055_v33 = vmul.f32 %v6052_v31, %v7290_v1 }
 0x42c   : > { %v6054_v54 = vpop.eup %6053  ;;  %5572 = vmatprep.subr.bf16.mxu1 %v7036_v2 }
 0x42d   : > { %v2054_v59 = vmul.f32 %v6054_v54, %v7293_v49  ;;  %v5897_v49 = vld [vmem:[%s8207_s5 + $0x4] ss:$8 sps:$4 sm:$0xff]  }
 0x42f   : > { %5580 = vmatpush3.bf16.msra.mxu1 %v7036_v2  ;;  %v2064_v41 = vpack.c.bf16 %v2055_v33, %v2054_v59 }
 0x430   : > { %5573 = vmatprep.subr.bf16.mxu1 %v7041_v20 }
 0x432   : > { %5370 = vmatmul.mubr.bf16.gmra.mrb[56].mxu1 %v2063_v26 }
 0x433   : > { %5581 = vmatpush3.bf16.msra.mxu1 %v7041_v20  ;;  %5373 = vmatprep.mubr.bf16.mxu1 %v2064_v41  ;;  %v5885_v20 = vld [vmem:[%s8207_s5 + $0x44] ss:$8 sps:$4 sm:$0xff]  }
 0x434   : > { %5574 = vmatprep.subr.bf16.mxu1 %v7306_v52 }
 0x437   : > { %5582 = vmatpush3.bf16.msra.mxu1 %v7306_v52 }
 0x438   : > { %5575 = vmatprep.subr.bf16.mxu1 %v7333_v30 }
 0x43b   : > { %5583 = vmatpush3.bf16.msra.mxu1 %v7333_v30 }
 0x44f   : > { %v2498_v2 = vpop.xlane.xlu0 %2497 }
 0x453   : > { %v2494_v62 = vpop.xlane.xlu1 %2493 }
 0x457   : > { %v2500_v60 = vpop.xlane.xlu1 %2499 }
 0x458   : > { %6055 = vrcp.f32 %v2500_v60 }
 0x459   : > { %6057 = vrcp.f32 %v2494_v62 }
 0x45a   : > { %6059 = vrcp.f32 %v2498_v2 }
 0x45b   : > { %v2496_v24 = vpop.xlane.xlu1 %2495  ;;  %v2506_v1 = vpop.xlane.xlu0 %2505 }
 0x45c   : > { %6061 = vrcp.f32 %v2496_v24 }
 0x45f   : > { %v2588_v52 = vpop.permute.xlu1 %2587  ;;  %v2502_v13 = vpop.xlane.xlu0 %2501 }
 0x460   : > { %5423 = vmatprep.subr.bf16.mxu0 %v2588_v52  ;;  %5576 = vmatprep.subr.bf16.mxu1 %v2588_v52 }
 0x461   : > { %5424 = vmatpush3.bf16.msra.mxu0 %v2588_v52  ;;  %5584 = vmatpush3.bf16.msra.mxu1 %v2588_v52 }
 0x462   : > { %2766 = vmatprep.subr.bf16.mxu1 %v5885_v20  ;;  %2943 = vmatprep.subr.bf16.mxu0 %v5897_v49  ;;  %v6056_v30 = vpop.eup %6055 }
 0x463   : > { %v2508_v35 = vpop.xlane.xlu0 %2507  ;;  %v6058_v10 = vpop.eup %6057  ;;  %v2544_v21 = vmul.f32 %v6056_v30, %v7314_v25  ;;  %v5900_v25 = vld [vmem:[%s8207_s5 + $0x14] ss:$8 sps:$4 sm:$0xff]  }
 0x464   : > { %v6060_v9 = vpop.eup %6059  ;;  %6063 = vrcp.f32 %v2508_v35  ;;  %v2541_v22 = vmul.f32 %v6058_v10, %v7308_v45  ;;  %v5903_v45 = vld [vmem:[%s8207_s5 + $0x24] ss:$8 sps:$4 sm:$0xff]  }
 0x465   : > { %6065 = vrcp.f32 %v2502_v13  ;;  %v2543_v23 = vmul.f32 %v6060_v9, %v7301_v17  ;;  %v5898_v17 = vld [vmem:[%s8207_s5 + $0x10] ss:$8 sps:$4 sm:$0xff]   ;;  %v5883_v13 = vld [vmem:[%s8207_s5 + $0x40] ss:$8 sps:$4 sm:$0xff]  }
 0x466   : > { %v6062_v27 = vpop.eup %6061  ;;  %6067 = vrcp.f32 %v2506_v1 }
 0x467   : > { %v2504_v14 = vpop.xlane.xlu0 %2503  ;;  %v2542_v32 = vmul.f32 %v6062_v27, %v7319_v46  ;;  %v2558_v50 = vpack.c.bf16 %v2544_v21, %v2543_v23  ;;  %v5889_v21 = vld [vmem:[%s8207_s5 + $0x60] ss:$8 sps:$4 sm:$0xff]  }
 0x468   : > { %6069 = vrcp.f32 %v2504_v14 }
 0x469   : > { %v2557_v6 = vpack.c.bf16 %v2542_v32, %v2541_v22  ;;  %6071 = vrcp.f32 %v7378_v63  ;;  %v5894_v22 = vld [vmem:[%s8207_s5 + $0x74] ss:$8 sps:$4 sm:$0xff]  }
 0x46b   : > { %5425 = vmatprep.mubr.bf16.mxu0 %v2557_v6  ;;  %v2025_v3 = vpop.xlane.xlu0 %2024 }
 0x46c   : > { %6073 = vrcp.f32 %v2025_v3  ;;  %5426 = vmatmul.mubr.bf16.vlgmr.msra.gmra.mrb[80].mxu0 %v2558_v50 }
 0x46d   : > { %2944 = vmatpush1.bf16.msra.mxu0 %v5895_v16 }
 0x46e   : > { %2945 = vmatprep.subr.bf16.mxu0 %v5900_v25  ;;  %v6064_v46 = vpop.eup %6063 }
 0x46f   : > { %v6066_v63 = vpop.eup %6065  ;;  %v2548_v58 = vmul.f32 %v6064_v46, %v7330_v40  ;;  %v2514_v54 = vpop.xlane.xlu0 %2513 }
 0x470   : > { %v6068_v5 = vpop.eup %6067  ;;  %v2545_v0 = vmul.f32 %v6066_v63, %v7326_v36  ;;  %v5904_v36 = vld [vmem:[%s8207_s5 + $0x30] ss:$8 sps:$4 sm:$0xff]  }
 0x471   : > { %2946 = vmatpush1.bf16.msra.mxu0 %v5898_v17  ;;  %v2547_v56 = vmul.f32 %v6068_v5, %v7321_v28 }
 0x472   : > { %v6070_v39 = vpop.eup %6069  ;;  %2947 = vmatprep.subr.bf16.mxu0 %v5903_v45 }
 0x473   : > { %v2546_v43 = vmul.f32 %v6070_v39, %v7337_v48  ;;  %v6072_v19 = vpop.eup %6071  ;;  %v2560_v11 = vpack.c.bf16 %v2548_v58, %v2547_v56  ;;  %v8231_v48 = vmov 0   ;;  %v2510_v4 = vpop.xlane.xlu0 %2509 }
 0x474   : > { %v2056_v31 = vmul.f32 %v6072_v19, %v7287_v51  ;;  %6075 = vrcp.f32 %v2510_v4 }
 0x475   : > { %v2559_v15 = vpack.c.bf16 %v2546_v43, %v2545_v0  ;;  %2948 = vmatpush1.bf16.msra.mxu0 %v5901_v42 }
 0x476   : > { %v6074_v47 = vpop.eup %6073  ;;  %2949 = vmatprep.subr.bf16.mxu0 %v5906_v29 }
 0x477   : > { %5429 = vmatprep.mubr.bf16.mxu0 %v2559_v15  ;;  %v2057_v40 = vmul.f32 %v6074_v47, %v7340_v34 }
 0x478   : > { %5430 = vmatmul.mubr.bf16.gmra.mrb[84].mxu0 %v2560_v11 }
 0x479   : > { %v2065_v28 = vpack.c.bf16 %v2057_v40, %v2056_v31  ;;  %2950 = vmatpush1.bf16.msra.mxu0 %v5904_v36  ;;  %2975 = vmatprep.mubr.bf16.mxu0 %v8231_v48  ;;  %v3138_v36 = vsel %vm1746_vm0, %v6871_v57, 0 }
 0x47b   : > { %5374 = vmatmul.mubr.bf16.gmra.mrb[60].mxu1 %v2065_v28 }
 0x47e   : > { %v6076_v33 = vpop.eup %6075 }
 0x47f   : > { %v2549_v62 = vmul.f32 %v6076_v33, %v7348_v18  ;;  %v5888_v18 = vld [vmem:[%s8207_s5 + $0x54] ss:$8 sps:$4 sm:$0xff]  }
 0x480   : > { %v8255_v33 = vld [vmem:[#allocation6_spill] sm:$0xff] }
 0x490   : > { %v2518_v34 = vpop.xlane.xlu1 %2517 }
 0x496   : > { %v2512_v59 = vpop.xlane.xlu0 %2511 }
 0x497   : > { %6077 = vrcp.f32 %v2512_v59  ;;  %v3141_v59 = vsel %vm1746_vm0, %v6882_v61, 0 }
 0x498   : > { %6079 = vrcp.f32 %v2514_v54 }
 0x49a   : > { %v2516_v51 = vpop.xlane.xlu0 %2515 }
 0x49b   : > { %6081 = vrcp.f32 %v2516_v51 }
 0x49c   : > { %6083 = vrcp.f32 %v2518_v34 }
 0x49e   : > { %v2522_v44 = vpop.xlane.xlu0 %2521 }
 0x4a1   : > { %v6078_v26 = vpop.eup %6077 }
 0x4a2   : > { %v2520_v41 = vpop.xlane.xlu0 %2519  ;;  %v2550_v2 = vmul.f32 %v6078_v26, %v7360_v55  ;;  %v6080_v60 = vpop.eup %6079 }
 0x4a3   : > { %6085 = vrcp.f32 %v2520_v41  ;;  %v2551_v20 = vmul.f32 %v6080_v60, %v7345_v7  ;;  %v5886_v7 = vld [vmem:[%s8207_s5 + $0x50] ss:$8 sps:$4 sm:$0xff]  }
 0x4a4   : > { %v2561_v24 = vpack.c.bf16 %v2550_v2, %v2549_v62  ;;  %6087 = vrcp.f32 %v2522_v44 }
 0x4a5   : > { %v6082_v1 = vpop.eup %6081 }
 0x4a6   : > { %v2552_v49 = vmul.f32 %v6082_v1, %v7363_v53  ;;  %5433 = vmatprep.mubr.bf16.mxu1 %v2561_v24  ;;  %v2524_v52 = vpop.xlane.xlu0 %2523  ;;  %v6084_v55 = vpop.eup %6083  ;;  %v5891_v53 = vld [vmem:[%s8207_s5 + $0x64] ss:$8 sps:$4 sm:$0xff]   ;;  %v3144_v24 = vsel %vm1746_vm0, %v8255_v33, 0 }
 0x4a7   : > { %6089 = vrcp.f32 %v2524_v52  ;;  %v2553_v10 = vmul.f32 %v6084_v55, %v7355_v12  ;;  %v8256_v1 = vld [vmem:[#allocation8_spill] sm:$0xff] }
 0x4a8   : > { %v2562_v30 = vpack.c.bf16 %v2552_v49, %v2551_v20  ;;  %v3147_v20 = vsel %vm1746_vm0, %v8256_v1, 0  ;;  %v8257_v49 = vld [vmem:[#allocation10_spill] sm:$0xff] }
 0x4a9   : > { %v3150_v52 = vsel %vm1746_vm0, %v8257_v49, 0 }
 0x4aa   : > { %5434 = vmatmul.mubr.bf16.vlgmr.msra.gmra.mrb[64].mxu1 %v2562_v30 }
 0x4ab   : > { %2767 = vmatpush1.bf16.msra.mxu1 %v5883_v13  ;;  %v8258_v13 = vld [vmem:[#allocation12_spill] sm:$0xff] }
 0x4ac   : > { %2768 = vmatprep.subr.bf16.mxu1 %v5888_v18  ;;  %v3153_v30 = vsel %vm1746_vm0, %v8258_v13, 0  ;;  %v8259_v18 = vld [vmem:[#allocation14_spill] sm:$0xff] }
 0x4ad   : > { %v6086_v35 = vpop.eup %6085  ;;  %v3156_v55 = vsel %vm1746_vm0, %v8259_v18, 0 }
 0x4ae   : > { %v2554_v9 = vmul.f32 %v6086_v35, %v7369_v37  ;;  %v6088_v27 = vpop.eup %6087  ;;  %v5892_v37 = vld [vmem:[%s8207_s5 + $0x70] ss:$8 sps:$4 sm:$0xff]  }
 0x4af   : > { %2769 = vmatpush1.bf16.msra.mxu1 %v5886_v7  ;;  %v2555_v23 = vmul.f32 %v6088_v27, %v7366_v8  ;;  %v8260_v7 = vld [vmem:[#allocation16_spill] sm:$0xff] }
 0x4b0   : > { %2770 = vmatprep.subr.bf16.mxu1 %v5891_v53  ;;  %v2563_v14 = vpack.c.bf16 %v2554_v9, %v2553_v10  ;;  %v3159_v35 = vsel %vm1746_vm0, %v8260_v7, 0  ;;  %v8261_v9 = vld [vmem:[#allocation17_spill] sm:$0xff] }
 0x4b1   : > { %v6090_v32 = vpop.eup %6089 }
 0x4b2   : > { %5437 = vmatprep.mubr.bf16.mxu1 %v2563_v14  ;;  %v2556_v12 = vmul.f32 %v6090_v32, %v7374_v38 }
 0x4b3   : > { %2771 = vmatpush1.bf16.msra.mxu1 %v5889_v21 }
 0x4b4   : > { %2772 = vmatprep.subr.bf16.mxu1 %v5894_v22  ;;  %v2564_v6 = vpack.c.bf16 %v2556_v12, %v2555_v23 }
 0x4b6   : > { %5438 = vmatmul.mubr.bf16.gmra.mrb[68].mxu1 %v2564_v6 }
 0x4b7   : > { %2773 = vmatpush1.bf16.msra.mxu1 %v5892_v37  ;;  %2798 = vmatprep.mubr.bf16.mxu1 %v8231_v48 }
 0x4b8   : > { %5697 = vmatprep.subr.msk.bf16.mxu1 %vm1746_vm0, %v6871_v57 }
 0x4f5   : > { %v5363_v16 = vpop.f32.mrb[48].mxu1 }
 0x4f6   : > { %v2100_v50 = vpop.f32.mrb[49].mxu1 }
 0x4f7   : > { %v5364_v25 = vpop.f32.mrb[50].mxu1 }
 0x4f8   : > { %v2164_v8 = vpack.c.bf16 %v5364_v25, %v5363_v16  ;;  %v2103_v3 = vpop.f32.mrb[51].mxu1  ;;  %v8263_v25 = vld [vmem:[#allocation4_spill] sm:$0xff] }
 0x4f9   : > { %v2163_v38 = vpack.c.bf16 %v2103_v3, %v2100_v50  ;;  %v8262_v50 = vld [vmem:[#allocation3_spill] sm:$0xff]  ;;  %v8265_v3 = vld [vmem:[#allocation18_spill] sm:$0xff] }
 0x4fb   : > { %4902 = vmatmul.mubr.msk.bf16.vlgmr.msra.gmra.mrb[88].mxu0 %vm1746_vm0, %v2163_v38  ;;  %v8266_v38 = vld [vmem:[#allocation19_spill] sm:$0xff] }
 0x4fc   : > { %2985 = vmatprep.mubr.bf16.mxu0 %v8231_v48 }
 0x4fd   : > { %v5367_v17 = vpop.f32.mrb[52].mxu1 }
 0x4fe   : > { %v2116_v45 = vpop.f32.mrb[53].mxu1 }
 0x4ff   : > { %v5368_v46 = vpop.f32.mrb[54].mxu1 }
 0x500   : > { %v2166_v63 = vpack.c.bf16 %v5368_v46, %v5367_v17  ;;  %v2119_v5 = vpop.f32.mrb[55].mxu1  ;;  %v8267_v17 = vld [vmem:[#allocation7_spill] sm:$0xff]  ;;  %v8269_v46 = vld [vmem:[#allocation20_spill] sm:$0xff] }
 0x501   : > { %v2165_v42 = vpack.c.bf16 %v2119_v5, %v2116_v45  ;;  %v8268_v45 = vld [vmem:[#allocation9_spill] sm:$0xff]  ;;  %v8271_v5 = vld [vmem:[#allocation11_spill] sm:$0xff] }
 0x503   : > { %4903 = vmatmul.mubr.msk.bf16.gmra.mrb[92].mxu0 %vm1746_vm0, %v2164_v8  ;;  %v8264_v8 = vld [vmem:[#allocation5_spill] sm:$0xff] }
 0x504   : > { %2995 = vmatprep.mubr.bf16.mxu0 %v8231_v48 }
 0x505   : > { %v5371_v39 = vpop.f32.mrb[56].mxu1 }
 0x506   : > { %v2132_v58 = vpop.f32.mrb[57].mxu1 }
 0x507   : > { %v5372_v0 = vpop.f32.mrb[58].mxu1 }
 0x508   : > { %v2168_v43 = vpack.c.bf16 %v5372_v0, %v5371_v39  ;;  %v2135_v19 = vpop.f32.mrb[59].mxu1  ;;  %v8273_v39 = vld [vmem:[#allocation22_spill] sm:$0xff]  ;;  %v8275_v0 = vld [vmem:[#allocation15_spill] sm:$0xff] }
 0x509   : > { %v2167_v56 = vpack.c.bf16 %v2135_v19, %v2132_v58  ;;  %v8274_v58 = vld [vmem:[#allocation23_spill] sm:$0xff]  ;;  %v7569_v19 = vpop.permute.xlu1 %3805 }
 0x50b   : > { %4904 = vmatmul.mubr.msk.bf16.gmra.mrb[96].mxu0 %vm1746_vm0, %v2165_v42  ;;  %v8272_v42 = vld [vmem:[#allocation13_spill] sm:$0xff] }
 0x50c   : > { %3005 = vmatprep.mubr.bf16.mxu0 %v8231_v48 }
 0x513   : > { %4905 = vmatmul.mubr.msk.bf16.gmra.mrb[100].mxu0 %vm1746_vm0, %v2166_v63  ;;  %v8270_v63 = vld [vmem:[#allocation21_spill] sm:$0xff] }
 0x514   : > { %3015 = vmatprep.mubr.bf16.mxu0 %v8231_v48 }
 0x51b   : > { %4906 = vmatmul.mubr.msk.bf16.gmra.mrb[104].mxu0 %vm1746_vm0, %v2167_v56 }
 0x51c   : > { %3025 = vmatprep.mubr.bf16.mxu0 %v8231_v48 }
 0x523   : > { %4907 = vmatmul.mubr.msk.bf16.gmra.mrb[108].mxu0 %vm1746_vm0, %v2168_v43  ;;  %v8276_v43 = vld [vmem:[#allocation24_spill] sm:$0xff] }
 0x524   : > { %3035 = vmatprep.mubr.bf16.mxu0 %v8231_v48 }
 0x53f   : > { %v5427_v15 = vpop.f32.mrb[80].mxu0 }
 0x540   : > { %v2631_v47 = vpop.f32.mrb[81].mxu0 }
 0x541   : > { %v5428_v11 = vpop.f32.mrb[82].mxu0 }
 0x542   : > { %v2695_v29 = vpack.c.bf16 %v5428_v11, %v5427_v15  ;;  %v2634_v31 = vpop.f32.mrb[83].mxu0 }
 0x543   : > { %v2694_v40 = vpack.c.bf16 %v2634_v31, %v2631_v47 }
 0x545   : > { %4886 = vmatmul.mubr.msk.bf16.vlgmr.msra.gmra.mrb[72].mxu1 %vm1746_vm0, %v2694_v40 }
 0x546   : > { %5442 = vmatpush3.bf16.xpose.msra.mxu1 %v3138_v36  ;;  %2808 = vmatprep.mubr.bf16.mxu1 %v8231_v48 }
 0x547   : > { %5698 = vmatprep.subr.msk.bf16.mxu1 %vm1746_vm0, %v6882_v61 }
 0x54b   : > { %v5431_v28 = vpop.f32.mrb[84].mxu0 }
 0x54c   : > { %v2647_v54 = vpop.f32.mrb[85].mxu0 }
 0x54d   : > { %v5432_v4 = vpop.f32.mrb[86].mxu0  ;;  %4887 = vmatmul.mubr.msk.bf16.gmra.mrb[76].mxu1 %vm1746_vm0, %v2695_v29 }
 0x54e   : > { %v2697_v51 = vpack.c.bf16 %v5432_v4, %v5431_v28  ;;  %5444 = vmatpush3.bf16.xpose.msra.mxu1 %v3141_v59  ;;  %v5375_v34 = vpop.f32.mrb[60].mxu1  ;;  %v2650_v44 = vpop.f32.mrb[87].mxu0  ;;  %2818 = vmatprep.mubr.bf16.mxu1 %v8231_v48 }
 0x54f   : > { %v2696_v57 = vpack.c.bf16 %v2650_v44, %v2647_v54  ;;  %5699 = vmatprep.subr.msk.bf16.mxu1 %vm1746_vm0, %v8255_v33  ;;  %v2148_v26 = vpop.f32.mrb[61].mxu1 }
 0x550   : > { %v5376_v41 = vpop.f32.mrb[62].mxu1 }
 0x551   : > { %v2170_v62 = vpack.c.bf16 %v5376_v41, %v5375_v34  ;;  %v2151_v2 = vpop.f32.mrb[63].mxu1 }
 0x552   : > { %v2169_v60 = vpack.c.bf16 %v2151_v2, %v2148_v26 }
 0x554   : > { %4908 = vmatmul.mubr.msk.bf16.gmra.mrb[112].mxu0 %vm1746_vm0, %v2169_v60 }
 0x555   : > { %4888 = vmatmul.mubr.msk.bf16.gmra.mrb[80].mxu1 %vm1746_vm0, %v2696_v57  ;;  %3045 = vmatprep.mubr.bf16.mxu0 %v8231_v48 }
 0x556   : > { %5446 = vmatpush3.bf16.xpose.msra.mxu1 %v3144_v24  ;;  %2828 = vmatprep.mubr.bf16.mxu1 %v8231_v48 }
 0x557   : > { %5700 = vmatprep.subr.msk.bf16.mxu1 %vm1746_vm0, %v8256_v1 }
 0x55c   : > { %4909 = vmatmul.mubr.msk.bf16.gmra.mrb[116].mxu0 %vm1746_vm0, %v2170_v62 }
 0x55d   : > { %4889 = vmatmul.mubr.msk.bf16.gmra.mrb[84].mxu1 %vm1746_vm0, %v2697_v51  ;;  %3627 = vmatprep.mubr.bf16.mxu0 %v8231_v48 }
 0x55e   : > { %5448 = vmatpush3.bf16.xpose.msra.mxu1 %v3147_v20  ;;  %2838 = vmatprep.mubr.bf16.mxu1 %v8231_v48 }
 0x55f   : > { %5701 = vmatprep.subr.msk.bf16.mxu1 %vm1746_vm0, %v8257_v49 }
 0x566   : > { %5450 = vmatpush3.bf16.xpose.msra.mxu1 %v3150_v52 }
 0x567   : > { %5702 = vmatprep.subr.msk.bf16.mxu1 %vm1746_vm0, %v8258_v13 }
 0x56e   : > { %5452 = vmatpush3.bf16.xpose.msra.mxu1 %v3153_v30 }
 0x56f   : > { %5703 = vmatprep.subr.msk.bf16.mxu1 %vm1746_vm0, %v8259_v18 }
 0x576   : > { %5454 = vmatpush3.bf16.xpose.msra.mxu1 %v3156_v55 }
 0x577   : > { %5704 = vmatprep.subr.msk.bf16.mxu1 %vm1746_vm0, %v8260_v7 }
 0x57d   : > { %v5435_v53 = vpop.f32.mrb[64].mxu1 }
 0x57e   : > { %5456 = vmatpush3.bf16.xpose.msra.mxu1 %v3159_v35  ;;  %v2663_v10 = vpop.f32.mrb[65].mxu1 }
 0x57f   : > { %5473 = vmatprep.subr.bf16.mxu1 %v8261_v9  ;;  %v5436_v27 = vpop.f32.mrb[66].mxu1 }
 0x580   : > { %v2699_v21 = vpack.c.bf16 %v5436_v27, %v5435_v53  ;;  %v2666_v14 = vpop.f32.mrb[67].mxu1 }
 0x581   : > { %v2698_v22 = vpack.c.bf16 %v2666_v14, %v2663_v10  ;;  %v5170_v14 = vld [vmem:[%s8205_s3 + $0x88] sm:$0xff]  }
 0x583   : > { %4890 = vmatmul.mubr.msk.bf16.gmra.mrb[88].mxu1 %vm1746_vm0, %v2698_v22 }
 0x584   : > { %2848 = vmatprep.mubr.bf16.mxu1 %v8231_v48 }
 0x589   : > { %v5439_v32 = vpop.f32.mrb[68].mxu1 }
 0x58a   : > { %v2679_v23 = vpop.f32.mrb[69].mxu1 }
 0x58b   : > { %v5440_v12 = vpop.f32.mrb[70].mxu1  ;;  %4891 = vmatmul.mubr.msk.bf16.gmra.mrb[92].mxu1 %vm1746_vm0, %v2699_v21 }
 0x58c   : > { %v2701_v37 = vpack.c.bf16 %v5440_v12, %v5439_v32  ;;  %v2682_v6 = vpop.f32.mrb[71].mxu1  ;;  %2858 = vmatprep.mubr.bf16.mxu1 %v8231_v48  ;;  %v5169_v32 = vld [vmem:[%s8205_s3 + $0x80] sm:$0xff]  }
 0x58d   : > { %v2700_v16 = vpack.c.bf16 %v2682_v6, %v2679_v23  ;;  %v5096_v23 = vunpack.c.l.bf16 %v5170_v14  ;;  %v5092_v12 = vunpack.c.l.bf16 %v5169_v32 }
 0x593   : > { %4892 = vmatmul.mubr.msk.bf16.gmra.mrb[96].mxu1 %vm1746_vm0, %v2700_v16 }
 0x594   : > { %2868 = vmatprep.mubr.bf16.mxu1 %v8231_v48 }
 0x59b   : > { %4893 = vmatmul.mubr.msk.bf16.gmra.mrb[100].mxu1 %vm1746_vm0, %v2701_v37 }
 0x59c   : > { %5457 = vmatprep.mubr.msk.bf16.mxu1 %vm1746_vm0, %v8262_v50 }
 0x5a3   : > { %5458 = vmatmul.mubr.msk.bf16.vlgmr.msra.gmra.mrb[104].mxu1 %vm1746_vm0, %v8263_v25 }
 0x5a4   : > { %5474 = vmatpush3.bf16.msra.mxu1 %v8261_v9  ;;  %5461 = vmatprep.mubr.msk.bf16.mxu1 %vm1746_vm0, %v8264_v8 }
 0x5a5   : > { %5475 = vmatprep.subr.bf16.mxu1 %v8265_v3 }
 0x5a8   : > { %5476 = vmatpush3.bf16.msra.mxu1 %v8265_v3 }
 0x5a9   : > { %5477 = vmatprep.subr.bf16.mxu1 %v8266_v38 }
 0x5ab   : > { %5462 = vmatmul.mubr.msk.bf16.gmra.mrb[108].mxu1 %vm1746_vm0, %v8267_v17 }
 0x5ac   : > { %5478 = vmatpush3.bf16.msra.mxu1 %v8266_v38  ;;  %5465 = vmatprep.mubr.msk.bf16.mxu1 %vm1746_vm0, %v8268_v45 }
 0x5ad   : > { %5479 = vmatprep.subr.bf16.mxu1 %v8269_v46 }
 0x5b0   : > { %5480 = vmatpush3.bf16.msra.mxu1 %v8269_v46 }
 0x5b1   : > { %5481 = vmatprep.subr.bf16.mxu1 %v8270_v63 }
 0x5b3   : > { %5466 = vmatmul.mubr.msk.bf16.gmra.mrb[112].mxu1 %vm1746_vm0, %v8271_v5 }
 0x5b4   : > { %5482 = vmatpush3.bf16.msra.mxu1 %v8270_v63  ;;  %5469 = vmatprep.mubr.msk.bf16.mxu1 %vm1746_vm0, %v8272_v42 }
 0x5b5   : > { %5483 = vmatprep.subr.bf16.mxu1 %v8273_v39 }
 0x5b8   : > { %5484 = vmatpush3.bf16.msra.mxu1 %v8273_v39 }
 0x5b9   : > { %5485 = vmatprep.subr.bf16.mxu1 %v8274_v58 }
 0x5bb   : > { %5470 = vmatmul.mubr.msk.bf16.gmra.mrb[116].mxu1 %vm1746_vm0, %v8275_v0 }
 0x5bc   : > { %5486 = vmatpush3.bf16.msra.mxu1 %v8274_v58 }
 0x5bd   : > { %5487 = vmatprep.subr.bf16.mxu1 %v8276_v43 }
 0x5c0   : > { %5488 = vmatpush3.bf16.msra.mxu1 %v8276_v43 }
 0x5c1   : > { %5705 = vmatprep.subr.msk.bf16.mxu1 %vm1746_vm0, %v7569_v19 }
 0x618   : > { %v7574_v56 = vpop.f32.mrb[72].mxu1 }
 0x619   : > { %v7576_v15 = vpop.f32.mrb[73].mxu1 }
 0x61a   : > { %v7578_v47 = vpop.f32.mrb[74].mxu1 }
 0x61b   : > { %v7580_v11 = vpop.f32.mrb[75].mxu1 }
 0x620   : > { %v7582_v29 = vpop.f32.mrb[76].mxu1 }
 0x621   : > { %v7584_v31 = vpop.f32.mrb[77].mxu1 }
 0x622   : > { %v7586_v40 = vpop.f32.mrb[78].mxu1 }
 0x623   : > { %v7588_v36 = vpop.f32.mrb[79].mxu1 }
 0x624   : > { %8277 = vst [vmem:[#allocation6_spill] sm:$0xff] %v7588_v36 }
 0x628   : > { %v7590_v28 = vpop.f32.mrb[80].mxu1 }
 0x629   : > { %8278 = vst [vmem:[#allocation8_spill] sm:$0xff] %v7590_v28  ;;  %v7592_v54 = vpop.f32.mrb[81].mxu1 }
 0x62a   : > { %8279 = vst [vmem:[#allocation10_spill] sm:$0xff] %v7592_v54  ;;  %v7594_v4 = vpop.f32.mrb[82].mxu1 }
 0x62b   : > { %8280 = vst [vmem:[#allocation12_spill] sm:$0xff] %v7594_v4  ;;  %v7596_v59 = vpop.f32.mrb[83].mxu1 }
 0x62c   : > { %8281 = vst [vmem:[#allocation14_spill] sm:$0xff] %v7596_v59 }
 0x630   : > { %v7598_v51 = vpop.f32.mrb[84].mxu1 }
 0x631   : > { %8282 = vst [vmem:[#allocation16_spill] sm:$0xff] %v7598_v51  ;;  %v7600_v34 = vpop.f32.mrb[85].mxu1 }
 0x632   : > { %8283 = vst [vmem:[#allocation17_spill] sm:$0xff] %v7600_v34  ;;  %v7602_v44 = vpop.f32.mrb[86].mxu1 }
 0x633   : > { %8284 = vst [vmem:[#allocation3_spill] sm:$0xff] %v7602_v44  ;;  %v7604_v57 = vpop.f32.mrb[87].mxu1 }
 0x634   : > { %8285 = vst [vmem:[#allocation4_spill] sm:$0xff] %v7604_v57 }
 0x656   : > { %v7606_v26 = vpop.f32.mrb[88].mxu1 }
 0x657   : > { %8286 = vst [vmem:[#allocation5_spill] sm:$0xff] %v7606_v26  ;;  %v7608_v41 = vpop.f32.mrb[89].mxu1 }
 0x658   : > { %8287 = vst [vmem:[#allocation18_spill] sm:$0xff] %v7608_v41  ;;  %v7610_v62 = vpop.f32.mrb[90].mxu1 }
 0x659   : > { %8288 = vst [vmem:[#allocation19_spill] sm:$0xff] %v7610_v62  ;;  %v7612_v2 = vpop.f32.mrb[91].mxu1 }
 0x65a   : > { %8289 = vst [vmem:[#allocation7_spill] sm:$0xff] %v7612_v2 }
 0x65e   : > { %v7614_v60 = vpop.f32.mrb[92].mxu1 }
 0x65f   : > { %8290 = vst [vmem:[#allocation9_spill] sm:$0xff] %v7614_v60  ;;  %v7616_v24 = vpop.f32.mrb[93].mxu1 }
 0x660   : > { %8291 = vst [vmem:[#allocation20_spill] sm:$0xff] %v7616_v24  ;;  %v7618_v20 = vpop.f32.mrb[94].mxu1 }
 0x661   : > { %8292 = vst [vmem:[#allocation21_spill] sm:$0xff] %v7618_v20  ;;  %v7620_v52 = vpop.f32.mrb[95].mxu1 }
 0x662   : > { %8293 = vst [vmem:[#allocation11_spill] sm:$0xff] %v7620_v52 }
 0x666   : > { %v7622_v30 = vpop.f32.mrb[96].mxu1 }
 0x667   : > { %8294 = vst [vmem:[#allocation13_spill] sm:$0xff] %v7622_v30  ;;  %v7624_v55 = vpop.f32.mrb[97].mxu1 }
 0x668   : > { %8295 = vst [vmem:[#allocation22_spill] sm:$0xff] %v7624_v55  ;;  %v7626_v53 = vpop.f32.mrb[98].mxu1 }
 0x669   : > { %8296 = vst [vmem:[#allocation23_spill] sm:$0xff] %v7626_v53  ;;  %v7628_v35 = vpop.f32.mrb[99].mxu1 }
 0x66a   : > { %8297 = vst [vmem:[#allocation15_spill] sm:$0xff] %v7628_v35  ;;  %v5097_v35 = vunpack.c.h.bf16 %v5170_v14 }
 0x66e   : > { %v7630_v10 = vpop.f32.mrb[100].mxu1 }
 0x66f   : > { %8298 = vst [vmem:[#allocation24_spill] sm:$0xff] %v7630_v10  ;;  %v7632_v27 = vpop.f32.mrb[101].mxu1 }
 0x670   : > { %8299 = vst [vmem:[#allocation25_spill] sm:$0xff] %v7632_v27  ;;  %v7634_v21 = vpop.f32.mrb[102].mxu1  ;;  %v7648_v27 = vld [vmem:[%s7055_s30] ss:$0 sm:$0xff] }
 0x671   : > { %8300 = vst [vmem:[#allocation26_spill] sm:$0xff] %v7634_v21  ;;  %v7639_v22 = vpop.f32.mrb[103].mxu1  ;;  %v5172_v21 = vld [vmem:[%s8205_s3 + $0x98] sm:$0xff]  }
 0x672   : > { %8301 = vst [vmem:[#allocation27_spill] sm:$0xff] %v7639_v22  ;;  %v5104_v55 = vunpack.c.l.bf16 %v5172_v21 }
 0x676   : > { %v5459_v37 = vpop.f32.mrb[104].mxu1 }
 0x677   : > { %v3204_v6 = vadd.f32 %v5459_v37, %v5096_v23  ;;  %v3195_v16 = vpop.f32.mrb[105].mxu1  ;;  %v5093_v37 = vunpack.c.h.bf16 %v5169_v32 }
 0x678   : > { %v5460_v48 = vpop.f32.mrb[106].mxu1  ;;  %v3196_v22 = vadd.f32 %v5092_v12, %v3195_v16  ;;  %v5174_v12 = vld [vmem:[%s8205_s3 + $0xa8] sm:$0xff]  }
 0x679   : > { %v7651_v10 = vadd.f32 %v7648_v27, %v3204_v6  ;;  %v3198_v53 = vpop.f32.mrb[107].mxu1  ;;  %v3207_v23 = vadd.f32 %v5460_v48, %v5097_v35  ;;  %v5173_v48 = vld [vmem:[%s8205_s3 + $0xa0] sm:$0xff]   ;;  %v5113_v28 = vunpack.c.h.bf16 %v5174_v12 }
 0x67a   : > { %v7655_v30 = vadd.f32 %v7648_v27, %v3196_v22  ;;  %v3199_v6 = vadd.f32 %v5093_v37, %v3198_v53  ;;  %v5108_v35 = vunpack.c.l.bf16 %v5173_v48  ;;  %v5176_v37 = vld [vmem:[%s8205_s3 + $0xb8] sm:$0xff]   ;;  %v5109_v36 = vunpack.c.h.bf16 %v5173_v48 }
 0x67b   : > { %3278 = vmax.xlane.f32.xlu0 %v7651_v10  ;;  %v7662_v14 = vadd.f32 %v7648_v27, %v3207_v23 }
 0x67e   : > { %v5463_v52 = vpop.f32.mrb[108].mxu1 }
 0x67f   : > { %v3220_v20 = vadd.f32 %v5463_v52, %v5104_v55  ;;  %v3211_v24 = vpop.f32.mrb[109].mxu1  ;;  %3274 = vmax.xlane.f32.xlu0 %v7655_v30  ;;  %v5112_v52 = vunpack.c.l.bf16 %v5174_v12  ;;  %v7673_v55 = vadd.f32 %v7648_v27, %v3199_v6  ;;  %v5175_v6 = vld [vmem:[%s8205_s3 + $0xb0] sm:$0xff]  }
 0x680   : > { %v5464_v60 = vpop.f32.mrb[110].mxu1  ;;  %v5116_v26 = vunpack.c.l.bf16 %v5175_v6  ;;  %v5117_v12 = vunpack.c.h.bf16 %v5175_v6 }
 0x681   : > { %v7665_v16 = vadd.f32 %v7648_v27, %v3220_v20  ;;  %v3214_v22 = vpop.f32.mrb[111].mxu1 }
 0x683   : > { %3286 = vmax.xlane.f32.xlu1 %v7665_v16  ;;  %3280 = vmax.xlane.f32.xlu0 %v7662_v14 }
 0x686   : > { %v5467_v32 = vpop.f32.mrb[112].mxu1 }
 0x687   : > { %v3236_v23 = vadd.f32 %v5467_v32, %v5112_v52  ;;  %v3227_v53 = vpop.f32.mrb[113].mxu1  ;;  %3276 = vmax.xlane.f32.xlu0 %v7673_v55  ;;  %v5120_v52 = vunpack.c.l.bf16 %v5176_v37 }
 0x688   : > { %v5468_v20 = vpop.f32.mrb[114].mxu1  ;;  %v3228_v62 = vadd.f32 %v5108_v35, %v3227_v53 }
 0x689   : > { %v7680_v2 = vadd.f32 %v7648_v27, %v3236_v23  ;;  %v3230_v41 = vpop.f32.mrb[115].mxu1 }
 0x68a   : > { %v7687_v32 = vadd.f32 %v7648_v27, %v3228_v62 }
 0x68b   : > { %3294 = vmax.xlane.f32.xlu1 %v7680_v2 }
 0x68e   : > { %v5471_v57 = vpop.f32.mrb[116].mxu1 }
 0x68f   : > { %v3252_v44 = vadd.f32 %v5471_v57, %v5120_v52  ;;  %v3243_v34 = vpop.f32.mrb[117].mxu1  ;;  %3290 = vmax.xlane.f32.xlu1 %v7687_v32 }
 0x690   : > { %v5472_v23 = vpop.f32.mrb[118].mxu1  ;;  %v3244_v53 = vadd.f32 %v5116_v26, %v3243_v34  ;;  %v5105_v26 = vunpack.c.h.bf16 %v5172_v21  ;;  %v3231_v21 = vadd.f32 %v5109_v36, %v3230_v41 }
 0x691   : > { %v7691_v35 = vadd.f32 %v7648_v27, %v3252_v44  ;;  %v3246_v51 = vpop.f32.mrb[119].mxu1  ;;  %v5171_v44 = vld [vmem:[%s8205_s3 + $0x90] sm:$0xff]  }
 0x692   : > { %v7695_v59 = vadd.f32 %v7648_v27, %v3244_v53  ;;  %v5100_v57 = vunpack.c.l.bf16 %v5171_v44  ;;  %v3223_v52 = vadd.f32 %v5464_v60, %v5105_v26  ;;  %v5101_v53 = vunpack.c.h.bf16 %v5171_v44 }
 0x693   : > { %3302 = vmax.xlane.f32.xlu1 %v7691_v35  ;;  %v7716_v60 = vadd.f32 %v7648_v27, %v3231_v21 }
 0x694   : > { %v3212_v34 = vadd.f32 %v5100_v57, %v3211_v24  ;;  %v3265_v4 = vadd.f32 %v7648_v27, %v3223_v52  ;;  %v3215_v54 = vadd.f32 %v5101_v53, %v3214_v22  ;;  %v5121_v57 = vunpack.c.h.bf16 %v5176_v37 }
 0x696   : > { %v3262_v62 = vadd.f32 %v7648_v27, %v3212_v34  ;;  %v3255_v22 = vadd.f32 %v5472_v23, %v5121_v57 }
 0x697   : > { %3298 = vmax.xlane.f32.xlu1 %v7695_v59 }
 0x69d   : > { %3807 = vrot.lane.b32.xlu0 %v6882_v61, %s6244_s19  ;;  %v7708_v61 = vadd.f32 %v7648_v27, %v3215_v54  ;;  %v7720_v54 = vadd.f32 %v7648_v27, %v3255_v22 }
 0x6a8   : > { %3809 = vrot.lane.b32.xlu1 %v8255_v33, %s6244_s19  ;;  %v3239_v33 = vadd.f32 %v5468_v20, %v5113_v28  ;;  %v3247_v28 = vadd.f32 %v5117_v12, %v3246_v51 }
 0x6aa   : > { %v7712_v24 = vadd.f32 %v7648_v27, %v3239_v33  ;;  %v7724_v48 = vadd.f32 %v7648_v27, %v3247_v28 }
 0x6bc   : > { %3282 = vmax.xlane.f32.xlu0 %v3262_v62 }
 0x6c0   : > { %3288 = vmax.xlane.f32.xlu0 %v3265_v4 }
 0x6c4   : > { %3284 = vmax.xlane.f32.xlu0 %v7708_v61 }
 0x6c8   : > { %3296 = vmax.xlane.f32.xlu0 %v7712_v24 }
 0x6cc   : > { %3292 = vmax.xlane.f32.xlu0 %v7716_v60 }
 0x6d0   : > { %3304 = vmax.xlane.f32.xlu0 %v7720_v54 }
 0x6d4   : > { %3300 = vmax.xlane.f32.xlu0 %v7724_v48 }
 0x708   : > { %v3279_v36 = vpop.xlane.xlu0 %3278 }
 0x709   : > { %v3308_v41 = vsub.f32 %v7651_v10, %v3279_v36 }
 0x70b   : > { %v3326_v20 = vmul.f32 1.442695, %v3308_v41 }
 0x70c   : > { %v3275_v37 = vpop.xlane.xlu0 %3274 }
 0x70d   : > { %6091 = vpow2.f32 %v3326_v20  ;;  %v3306_v6 = vsub.f32 %v7655_v30, %v3275_v37 }
 0x70f   : > { %v3322_v23 = vmul.f32 1.442695, %v3306_v6 }
 0x710   : > { %v3287_v44 = vpop.xlane.xlu1 %3286  ;;  %v3281_v34 = vpop.xlane.xlu0 %3280 }
 0x711   : > { %6093 = vpow2.f32 %v3322_v23  ;;  %v3312_v51 = vsub.f32 %v7665_v16, %v3287_v44  ;;  %v3309_v26 = vsub.f32 %v7662_v14, %v3281_v34 }
 0x713   : > { %v3334_v52 = vmul.f32 1.442695, %v3312_v51  ;;  %v3328_v53 = vmul.f32 1.442695, %v3309_v26 }
 0x714   : > { %v3277_v33 = vpop.xlane.xlu0 %3276 }
 0x715   : > { %6095 = vpow2.f32 %v3334_v52  ;;  %v3307_v21 = vsub.f32 %v7673_v55, %v3277_v33 }
 0x716   : > { %6097 = vpow2.f32 %v3328_v53 }
 0x717   : > { %v7732_v10 = vpop.eup %6091  ;;  %v3324_v57 = vmul.f32 1.442695, %v3307_v21 }
 0x718   : > { %3358 = vadd.xlane.f32.xlu1 %v7732_v10  ;;  %v7751_v22 = vpop.permute.xlu0 %3807  ;;  %v3295_v20 = vpop.xlane.xlu1 %3294 }
 0x719   : > { %6099 = vpow2.f32 %v3324_v57  ;;  %v3316_v34 = vsub.f32 %v7680_v2, %v3295_v20 }
 0x71b   : > { %v7735_v30 = vpop.eup %6093  ;;  %v3342_v26 = vmul.f32 1.442695, %v3316_v34 }
 0x71c   : > { %3354 = vadd.xlane.f32.xlu1 %v7735_v30 }
 0x71f   : > { %v7738_v16 = vpop.eup %6095 }
 0x720   : > { %v7740_v14 = vpop.eup %6097  ;;  %3366 = vadd.xlane.f32.xlu1 %v7738_v16 }
 0x721   : > { %3360 = vadd.xlane.f32.xlu0 %v7740_v14 }
 0x723   : > { %v7744_v55 = vpop.eup %6099 }
 0x725   : > { %3356 = vadd.xlane.f32.xlu0 %v7744_v55 }
 0x73b   : > { %3813 = vrot.lane.b32.xlu0 %v8257_v49, %s6244_s19  ;;  %v3291_v49 = vpop.xlane.xlu1 %3290 }
 0x73c   : > { %v3314_v52 = vsub.f32 %v7687_v32, %v3291_v49 }
 0x73f   : > { %3815 = vrot.lane.b32.xlu0 %v8258_v13, %s6244_s19  ;;  %v3303_v21 = vpop.xlane.xlu1 %3302 }
 0x740   : > { %v3320_v32 = vsub.f32 %v7691_v35, %v3303_v21 }
 0x749   : > { %v3283_v12 = vpop.xlane.xlu0 %3282 }
 0x74a   : > { %v3310_v28 = vsub.f32 %v3262_v62, %v3283_v12 }
 0x74c   : > { %v3330_v36 = vmul.f32 1.442695, %v3310_v28 }
 0x74d   : > { %v3289_v41 = vpop.xlane.xlu0 %3288 }
 0x74e   : > { %6101 = vpow2.f32 %v3330_v36  ;;  %v3313_v37 = vsub.f32 %v3265_v4, %v3289_v41  ;;  %v3338_v4 = vmul.f32 1.442695, %v3314_v52  ;;  %v3299_v36 = vpop.xlane.xlu1 %3298  ;;  %v3350_v41 = vmul.f32 1.442695, %v3320_v32 }
 0x74f   : > { %v3318_v20 = vsub.f32 %v7695_v59, %v3299_v36 }
 0x750   : > { %v3336_v6 = vmul.f32 1.442695, %v3313_v37 }
 0x751   : > { %v3285_v23 = vpop.xlane.xlu0 %3284  ;;  %v3346_v35 = vmul.f32 1.442695, %v3318_v20 }
 0x752   : > { %6103 = vpow2.f32 %v3336_v6  ;;  %v3311_v44 = vsub.f32 %v7708_v61, %v3285_v23 }
 0x754   : > { %v3332_v51 = vmul.f32 1.442695, %v3311_v44 }
 0x755   : > { %v3297_v13 = vpop.xlane.xlu0 %3296 }
 0x756   : > { %6105 = vpow2.f32 %v3332_v51  ;;  %v3317_v53 = vsub.f32 %v7712_v24, %v3297_v13 }
 0x757   : > { %6107 = vpow2.f32 %v3342_v26 }
 0x758   : > { %v7756_v62 = vpop.eup %6101  ;;  %6109 = vpow2.f32 %v3338_v4  ;;  %v3344_v2 = vmul.f32 1.442695, %v3317_v53  ;;  %v5913_v53 = vld [vmem:[%s8207_s5 + $0xa0] ss:$8 sps:$4 sm:$0xff]  }
 0x759   : > { %3362 = vadd.xlane.f32.xlu1 %v7756_v62  ;;  %v3293_v61 = vpop.xlane.xlu0 %3292 }
 0x75a   : > { %v3315_v57 = vsub.f32 %v7716_v60, %v3293_v61  ;;  %6111 = vpow2.f32 %v3344_v2 }
 0x75c   : > { %v7760_v33 = vpop.eup %6103  ;;  %v3340_v28 = vmul.f32 1.442695, %v3315_v57 }
 0x75d   : > { %v3305_v37 = vpop.xlane.xlu0 %3304 }
 0x75e   : > { %3368 = vadd.xlane.f32.xlu0 %v7760_v33  ;;  %6113 = vpow2.f32 %v3340_v28  ;;  %v3321_v60 = vsub.f32 %v7720_v54, %v3305_v37 }
 0x75f   : > { %6115 = vpow2.f32 %v3350_v41 }
 0x760   : > { %v7764_v12 = vpop.eup %6105  ;;  %6117 = vpow2.f32 %v3346_v35  ;;  %v3352_v44 = vmul.f32 1.442695, %v3321_v60 }
 0x761   : > { %v7768_v24 = vpop.eup %6107 }
 0x762   : > { %3364 = vadd.xlane.f32.xlu0 %v7764_v12  ;;  %v7772_v6 = vpop.eup %6109  ;;  %6119 = vpow2.f32 %v3352_v44 }
 0x764   : > { %v7778_v23 = vpop.eup %6111 }
 0x766   : > { %3374 = vadd.xlane.f32.xlu0 %v7768_v24 }
 0x768   : > { %v7781_v59 = vpop.eup %6113 }
 0x769   : > { %v7784_v34 = vpop.eup %6115 }
 0x76a   : > { %3370 = vadd.xlane.f32.xlu0 %v7772_v6  ;;  %3811 = vrot.lane.b32.xlu1 %v8256_v1, %s6244_s19  ;;  %v3301_v1 = vpop.xlane.xlu0 %3300  ;;  %v7787_v49 = vpop.eup %6117 }
 0x76b   : > { %v3319_v54 = vsub.f32 %v7724_v48, %v3301_v1  ;;  %v3810_v48 = vpop.permute.xlu1 %3809 }
 0x76c   : > { %v7791_v51 = vpop.eup %6119 }
 0x76d   : > { %v3348_v13 = vmul.f32 1.442695, %v3319_v54 }
 0x76e   : > { %3376 = vadd.xlane.f32.xlu0 %v7778_v23 }
 0x76f   : > { %6121 = vpow2.f32 %v3348_v13 }
 0x772   : > { %3372 = vadd.xlane.f32.xlu0 %v7781_v59 }
 0x776   : > { %3382 = vadd.xlane.f32.xlu0 %v7784_v34 }
 0x779   : > { %v7794_v26 = vpop.eup %6121 }
 0x77a   : > { %3378 = vadd.xlane.f32.xlu0 %v7787_v49 }
 0x77e   : > { %3384 = vadd.xlane.f32.xlu0 %v7791_v51 }
 0x78e   : > { %3380 = vadd.xlane.f32.xlu1 %v7794_v26 }
 0x794   : > { %3817 = vrot.lane.b32.xlu0 %v8259_v18, %s6244_s19 }
 0x798   : > { %3781 = vrot.lane.b32.xlu0 %v8262_v50, %s6244_s19 }
 0x79c   : > { %3783 = vrot.lane.b32.xlu0 %v8263_v25, %s6244_s19 }
 0x79f   : > { %3819 = vrot.lane.b32.xlu1 %v8260_v7, %s6244_s19 }
 0x7a0   : > { %3785 = vrot.lane.b32.xlu0 %v8264_v8, %s6244_s19 }
 0x7a3   : > { %3789 = vrot.lane.b32.xlu1 %v8268_v45, %s6244_s19 }
 0x7a4   : > { %3787 = vrot.lane.b32.xlu0 %v8267_v17, %s6244_s19 }
 0x7a5   : > { %v3359_v18 = vpop.xlane.xlu1 %3358 }
 0x7a7   : > { %3793 = vrot.lane.b32.xlu1 %v8272_v42, %s6244_s19 }
 0x7a8   : > { %3791 = vrot.lane.b32.xlu0 %v8271_v5, %s6244_s19 }
 0x7a9   : > { %v3355_v7 = vpop.xlane.xlu1 %3354 }
 0x7ab   : > { %4144 = vrot.lane.b32.xlu1 %v8265_v3, %s6244_s19 }
 0x7ac   : > { %3795 = vrot.lane.b32.xlu0 %v8275_v0, %s6244_s19 }
 0x7ad   : > { %v3367_v21 = vpop.xlane.xlu1 %3366 }
 0x7ae   : > { %v3361_v50 = vpop.xlane.xlu0 %3360 }
 0x7af   : > { %6123 = vrcp.f32 %v3361_v50 }
 0x7b0   : > { %4142 = vrot.lane.b32.xlu0 %v8261_v9, %s6244_s19  ;;  %6125 = vrcp.f32 %v3355_v7 }
 0x7b1   : > { %6127 = vrcp.f32 %v3359_v18 }
 0x7b2   : > { %v3357_v25 = vpop.xlane.xlu0 %3356 }
 0x7b3   : > { %6129 = vrcp.f32 %v3357_v25 }
 0x7b4   : > { %4146 = vrot.lane.b32.xlu0 %v8266_v38, %s6244_s19  ;;  %v3846_v38 = vsel %vm1746_vm0, %v7569_v19, 0  ;;  %v5912_v19 = vld [vmem:[%s8207_s5 + $0x94] ss:$8 sps:$4 sm:$0xff]  }
 0x7b6   : > { %v3814_v61 = vpop.permute.xlu0 %3813 }
 0x7b7   : > { %v3858_v20 = vsel %vm1746_vm0, %v3814_v61, 0 }
 0x7b8   : > { %4148 = vrot.lane.b32.xlu0 %v8269_v46, %s6244_s19  ;;  %v3849_v46 = vsel %vm1746_vm0, %v7751_v22, 0 }
 0x7b9   : > { %v6124_v8 = vpop.eup %6123 }
 0x7ba   : > { %v6126_v3 = vpop.eup %6125  ;;  %v3405_v5 = vmul.f32 %v6124_v8, %v7740_v14  ;;  %v5910_v14 = vld [vmem:[%s8207_s5 + $0x90] ss:$8 sps:$4 sm:$0xff]   ;;  %v3816_v57 = vpop.permute.xlu0 %3815 }
 0x7bb   : > { %v6128_v17 = vpop.eup %6127  ;;  %v3402_v42 = vmul.f32 %v6126_v3, %v7735_v30  ;;  %v5907_v30 = vld [vmem:[%s8207_s5 + $0x80] ss:$8 sps:$4 sm:$0xff]  }
 0x7bc   : > { %v3404_v0 = vmul.f32 %v6128_v17, %v7732_v10  ;;  %v5909_v10 = vld [vmem:[%s8207_s5 + $0x84] ss:$8 sps:$4 sm:$0xff]  }
 0x7bd   : > { %v6130_v45 = vpop.eup %6129  ;;  %3595 = vmatprep.subr.bf16.mxu0 %v5909_v10 }
 0x7be   : > { %v3403_v9 = vmul.f32 %v6130_v45, %v7744_v55  ;;  %v3419_v4 = vpack.c.bf16 %v3405_v5, %v3404_v0  ;;  %3596 = vmatpush1.bf16.msra.mxu0 %v5907_v30  ;;  %v5915_v55 = vld [vmem:[%s8207_s5 + $0xa4] ss:$8 sps:$4 sm:$0xff]  }
 0x7bf   : > { %3597 = vmatprep.subr.bf16.mxu0 %v5912_v19 }
 0x7c0   : > { %v3418_v52 = vpack.c.bf16 %v3403_v9, %v3402_v42 }
 0x7c2   : > { %5489 = vmatprep.mubr.bf16.mxu1 %v3418_v52  ;;  %3598 = vmatpush1.bf16.msra.mxu0 %v5910_v14 }
 0x7c3   : > { %5490 = vmatmul.mubr.bf16.vlgmr.msra.gmra.mrb[120].mxu1 %v3419_v4  ;;  %3599 = vmatprep.subr.bf16.mxu0 %v5915_v55 }
 0x7c4   : > { %5506 = vmatpush3.bf16.xpose.msra.mxu1 %v3846_v38 }
 0x7c5   : > { %5706 = vmatprep.subr.msk.bf16.mxu1 %vm1746_vm0, %v7751_v22  ;;  %v3852_v22 = vsel %vm1746_vm0, %v3810_v48, 0 }
 0x7c6   : > { %3600 = vmatpush1.bf16.msra.mxu0 %v5913_v53 }
 0x7cc   : > { %5508 = vmatpush3.bf16.xpose.msra.mxu1 %v3849_v46 }
 0x7cd   : > { %5707 = vmatprep.subr.msk.bf16.mxu1 %vm1746_vm0, %v3810_v48  ;;  %v3861_v48 = vsel %vm1746_vm0, %v3816_v57, 0 }
 0x7d4   : > { %5510 = vmatpush3.bf16.xpose.msra.mxu1 %v3852_v22 }
 0x7e6   : > { %v3363_v2 = vpop.xlane.xlu1 %3362 }
 0x7ea   : > { %v3812_v32 = vpop.permute.xlu1 %3811 }
 0x7eb   : > { %v3855_v28 = vsel %vm1746_vm0, %v3812_v32, 0  ;;  %v3369_v36 = vpop.xlane.xlu0 %3368  ;;  %5708 = vmatprep.subr.msk.bf16.mxu1 %vm1746_vm0, %v3812_v32 }
 0x7ec   : > { %5512 = vmatpush3.bf16.xpose.msra.mxu1 %v3855_v28  ;;  %6131 = vrcp.f32 %v3369_v36 }
 0x7ed   : > { %5709 = vmatprep.subr.msk.bf16.mxu1 %vm1746_vm0, %v3814_v61  ;;  %6133 = vrcp.f32 %v3363_v2 }
 0x7ee   : > { %6135 = vrcp.f32 %v3367_v21 }
 0x7ef   : > { %v3365_v41 = vpop.xlane.xlu0 %3364 }
 0x7f0   : > { %6137 = vrcp.f32 %v3365_v41 }
 0x7f3   : > { %v3375_v37 = vpop.xlane.xlu0 %3374 }
 0x7f4   : > { %5514 = vmatpush3.bf16.xpose.msra.mxu1 %v3858_v20 }
 0x7f5   : > { %5710 = vmatprep.subr.msk.bf16.mxu1 %vm1746_vm0, %v3816_v57 }
 0x7f6   : > { %v6132_v35 = vpop.eup %6131 }
 0x7f7   : > { %v3371_v60 = vpop.xlane.xlu0 %3370  ;;  %v6134_v44 = vpop.eup %6133  ;;  %v3409_v13 = vmul.f32 %v6132_v35, %v7760_v33 }
 0x7f8   : > { %v6136_v1 = vpop.eup %6135  ;;  %v3406_v7 = vmul.f32 %v6134_v44, %v7756_v62 }
 0x7f9   : > { %v3408_v25 = vmul.f32 %v6136_v1, %v7738_v16 }
 0x7fa   : > { %v6138_v54 = vpop.eup %6137 }
 0x7fb   : > { %v3377_v18 = vpop.xlane.xlu0 %3376  ;;  %v3407_v50 = vmul.f32 %v6138_v54, %v7764_v12  ;;  %v3421_v3 = vpack.c.bf16 %v3409_v13, %v3408_v25  ;;  %v8302_v25 = vmov 0  }
 0x7fc   : > { %5516 = vmatpush3.bf16.xpose.msra.mxu1 %v3861_v48  ;;  %6139 = vrcp.f32 %v3377_v18 }
 0x7fd   : > { %v3420_v8 = vpack.c.bf16 %v3407_v50, %v3406_v7  ;;  %6141 = vrcp.f32 %v3371_v60 }
 0x7fe   : > { %6143 = vrcp.f32 %v3375_v37 }
 0x7ff   : > { %5493 = vmatprep.mubr.bf16.mxu1 %v3420_v8  ;;  %v3373_v17 = vpop.xlane.xlu0 %3372 }
 0x800   : > { %6145 = vrcp.f32 %v3373_v17  ;;  %5494 = vmatmul.mubr.bf16.gmra.mrb[124].mxu1 %v3421_v3 }
 0x803   : > { %v3383_v33 = vpop.xlane.xlu0 %3382 }
 0x806   : > { %v6140_v45 = vpop.eup %6139 }
 0x807   : > { %v3379_v5 = vpop.xlane.xlu0 %3378  ;;  %v6142_v42 = vpop.eup %6141  ;;  %v3413_v12 = vmul.f32 %v6140_v45, %v7778_v23 }
 0x808   : > { %v6144_v9 = vpop.eup %6143  ;;  %v3410_v16 = vmul.f32 %v6142_v42, %v7772_v6  ;;  %v5918_v6 = vld [vmem:[%s8207_s5 + $0xb4] ss:$8 sps:$4 sm:$0xff]  }
 0x809   : > { %v3412_v4 = vmul.f32 %v6144_v9, %v7768_v24  ;;  %v5916_v24 = vld [vmem:[%s8207_s5 + $0xb0] ss:$8 sps:$4 sm:$0xff]   ;;  %3601 = vmatprep.subr.bf16.mxu0 %v5918_v6 }
 0x80a   : > { %v6146_v62 = vpop.eup %6145  ;;  %3602 = vmatpush1.bf16.msra.mxu0 %v5916_v24 }
 0x80b   : > { %v3385_v0 = vpop.xlane.xlu0 %3384  ;;  %v3411_v52 = vmul.f32 %v6146_v62, %v7781_v59  ;;  %v3423_v46 = vpack.c.bf16 %v3413_v12, %v3412_v4 }
 0x80c   : > { %6147 = vrcp.f32 %v3385_v0 }
 0x80d   : > { %v3422_v38 = vpack.c.bf16 %v3411_v52, %v3410_v16  ;;  %6149 = vrcp.f32 %v3379_v5 }
 0x80e   : > { %6151 = vrcp.f32 %v3383_v33 }
 0x80f   : > { %5497 = vmatprep.mubr.bf16.mxu1 %v3422_v38  ;;  %v3818_v30 = vpop.permute.xlu0 %3817 }
 0x810   : > { %v3864_v10 = vsel %vm1746_vm0, %v3818_v30, 0  ;;  %5498 = vmatmul.mubr.bf16.gmra.mrb[128].mxu1 %v3423_v46  ;;  %5711 = vmatprep.subr.msk.bf16.mxu1 %vm1746_vm0, %v3818_v30  ;;  %v5178_v46 = vld [vmem:[%s8205_s3 + $0xc8] sm:$0xff]  }
 0x811   : > { %5518 = vmatpush3.bf16.xpose.msra.mxu1 %v3864_v10  ;;  %v5128_v6 = vunpack.c.l.bf16 %v5178_v46 }
 0x813   : > { %v3782_v19 = vpop.permute.xlu0 %3781 }
 0x816   : > { %v6148_v61 = vpop.eup %6147 }
 0x817   : > { %v3784_v14 = vpop.permute.xlu0 %3783  ;;  %v6150_v2 = vpop.eup %6149  ;;  %v3417_v28 = vmul.f32 %v6148_v61, %v7791_v51 }
 0x818   : > { %v6152_v57 = vpop.eup %6151  ;;  %v3414_v41 = vmul.f32 %v6150_v2, %v7787_v49  ;;  %v5180_v2 = vld [vmem:[%s8205_s3 + $0xd8] sm:$0xff]  }
 0x819   : > { %v3416_v37 = vmul.f32 %v6152_v57, %v7784_v34 }
 0x81b   : > { %v3786_v23 = vpop.permute.xlu0 %3785  ;;  %v3381_v59 = vpop.xlane.xlu1 %3380  ;;  %v3425_v44 = vpack.c.bf16 %v3417_v28, %v3416_v37  ;;  %v5136_v37 = vunpack.c.l.bf16 %v5180_v2 }
 0x81c   : > { %6153 = vrcp.f32 %v3381_v59  ;;  %v5129_v59 = vunpack.c.h.bf16 %v5178_v46 }
 0x81f   : > { %v3788_v55 = vpop.permute.xlu0 %3787  ;;  %v3820_v22 = vpop.permute.xlu1 %3819 }
 0x820   : > { %v3867_v53 = vsel %vm1746_vm0, %v3820_v22, 0  ;;  %5712 = vmatprep.subr.msk.bf16.mxu1 %vm1746_vm0, %v3820_v22 }
 0x821   : > { %5520 = vmatpush3.bf16.xpose.msra.mxu1 %v3867_v53 }
 0x823   : > { %v3792_v21 = vpop.permute.xlu0 %3791  ;;  %v3790_v35 = vpop.permute.xlu1 %3789 }
 0x826   : > { %v6154_v32 = vpop.eup %6153 }
 0x827   : > { %v3796_v36 = vpop.permute.xlu0 %3795  ;;  %v3415_v20 = vmul.f32 %v6154_v32, %v7794_v26  ;;  %v3794_v54 = vpop.permute.xlu1 %3793 }
 0x829   : > { %v3424_v60 = vpack.c.bf16 %v3415_v20, %v3414_v41  ;;  %v5179_v20 = vld [vmem:[%s8205_s3 + $0xd0] sm:$0xff]  }
 0x82b   : > { %v4143_v1 = vpop.permute.xlu0 %4142  ;;  %5501 = vmatprep.mubr.bf16.mxu1 %v3424_v60  ;;  %v4145_v51 = vpop.permute.xlu1 %4144  ;;  %v5132_v60 = vunpack.c.l.bf16 %v5179_v20 }
 0x82c   : > { %5537 = vmatprep.subr.bf16.mxu1 %v4143_v1  ;;  %5502 = vmatmul.mubr.bf16.gmra.mrb[132].mxu1 %v3425_v44  ;;  %v5137_v44 = vunpack.c.h.bf16 %v5180_v2 }
 0x82d   : > { %5521 = vmatprep.mubr.msk.bf16.mxu1 %vm1746_vm0, %v3782_v19  ;;  %v5177_v19 = vld [vmem:[%s8205_s3 + $0xc0] sm:$0xff]  }
 0x82e   : > { %v5124_v24 = vunpack.c.l.bf16 %v5177_v19 }
 0x82f   : > { %v4147_v49 = vpop.permute.xlu0 %4146 }
 0x833   : > { %v4149_v34 = vpop.permute.xlu0 %4148 }
 0x834   : > { %5522 = vmatmul.mubr.msk.bf16.vlgmr.msra.gmra.mrb[136].mxu1 %vm1746_vm0, %v3784_v14 }
 0x835   : > { %5538 = vmatpush3.bf16.msra.mxu1 %v4143_v1  ;;  %5525 = vmatprep.mubr.msk.bf16.mxu1 %vm1746_vm0, %v3786_v23 }
 0x836   : > { %5539 = vmatprep.subr.bf16.mxu1 %v4145_v51 }
 0x839   : > { %5540 = vmatpush3.bf16.msra.mxu1 %v4145_v51 }
 0x83a   : > { %5541 = vmatprep.subr.bf16.mxu1 %v4147_v49 }
 0x83c   : > { %5526 = vmatmul.mubr.msk.bf16.gmra.mrb[140].mxu1 %vm1746_vm0, %v3788_v55  ;;  %v5125_v55 = vunpack.c.h.bf16 %v5177_v19  ;;  %v5183_v19 = vld [vmem:[%s8205_s3 + $0xf0] sm:$0xff]  }
 0x83d   : > { %5542 = vmatpush3.bf16.msra.mxu1 %v4147_v49  ;;  %5529 = vmatprep.mubr.msk.bf16.mxu1 %vm1746_vm0, %v3790_v35 }
 0x83e   : > { %5543 = vmatprep.subr.bf16.mxu1 %v4149_v34 }
 0x841   : > { %5544 = vmatpush3.bf16.msra.mxu1 %v4149_v34  ;;  %v5133_v34 = vunpack.c.h.bf16 %v5179_v20 }
 0x844   : > { %5530 = vmatmul.mubr.msk.bf16.gmra.mrb[144].mxu1 %vm1746_vm0, %v3792_v21 }
 0x845   : > { %5533 = vmatprep.mubr.msk.bf16.mxu1 %vm1746_vm0, %v3794_v54 }
 0x84c   : > { %5534 = vmatmul.mubr.msk.bf16.gmra.mrb[148].mxu1 %vm1746_vm0, %v3796_v36 }
 0x896   : > { %v5491_v26 = vpop.f32.mrb[120].mxu1 }
 0x897   : > { %v3460_v13 = vpop.f32.mrb[121].mxu1 }
 0x898   : > { %v5492_v48 = vpop.f32.mrb[122].mxu1 }
 0x899   : > { %v3524_v18 = vpack.c.bf16 %v5492_v48, %v5491_v26  ;;  %v3463_v7 = vpop.f32.mrb[123].mxu1 }
 0x89a   : > { %v3523_v50 = vpack.c.bf16 %v3463_v7, %v3460_v13  ;;  %v5182_v13 = vld [vmem:[%s8205_s3 + $0xe8] sm:$0xff]  }
 0x89c   : > { %4942 = vmatmul.mubr.msk.bf16.vlgmr.msra.gmra.mrb[88].mxu0 %vm1746_vm0, %v3523_v50 }
 0x89d   : > { %3637 = vmatprep.mubr.bf16.mxu0 %v8302_v25 }
 0x8a4   : > { %4943 = vmatmul.mubr.msk.bf16.gmra.mrb[92].mxu0 %vm1746_vm0, %v3524_v18 }
 0x8a5   : > { %3647 = vmatprep.mubr.bf16.mxu0 %v8302_v25 }
 0x8d3   : > { %v5495_v8 = vpop.f32.mrb[124].mxu1 }
 0x8d4   : > { %v3476_v3 = vpop.f32.mrb[125].mxu1 }
 0x8d5   : > { %v5496_v17 = vpop.f32.mrb[126].mxu1 }
 0x8d6   : > { %v3526_v33 = vpack.c.bf16 %v5496_v17, %v5495_v8  ;;  %v3479_v45 = vpop.f32.mrb[127].mxu1  ;;  %v5181_v8 = vld [vmem:[%s8205_s3 + $0xe0] sm:$0xff]  }
 0x8d7   : > { %v3525_v5 = vpack.c.bf16 %v3479_v45, %v3476_v3 }
 0x8d9   : > { %4944 = vmatmul.mubr.msk.bf16.gmra.mrb[96].mxu0 %vm1746_vm0, %v3525_v5  ;;  %v5140_v5 = vunpack.c.l.bf16 %v5181_v8 }
 0x8da   : > { %3657 = vmatprep.mubr.bf16.mxu0 %v8302_v25 }
 0x8e1   : > { %4945 = vmatmul.mubr.msk.bf16.gmra.mrb[100].mxu0 %vm1746_vm0, %v3526_v33  ;;  %v5144_v33 = vunpack.c.l.bf16 %v5182_v13 }
 0x8e2   : > { %3667 = vmatprep.mubr.bf16.mxu0 %v8302_v25 }
 0x8e3   : > { %v5499_v42 = vpop.f32.mrb[128].mxu1 }
 0x8e4   : > { %v3492_v9 = vpop.f32.mrb[129].mxu1 }
 0x8e5   : > { %v5500_v62 = vpop.f32.mrb[130].mxu1 }
 0x8e6   : > { %v3528_v12 = vpack.c.bf16 %v5500_v62, %v5499_v42  ;;  %v3495_v0 = vpop.f32.mrb[131].mxu1  ;;  %v5145_v42 = vunpack.c.h.bf16 %v5182_v13 }
 0x8e7   : > { %v3527_v16 = vpack.c.bf16 %v3495_v0, %v3492_v9 }
 0x8e9   : > { %4946 = vmatmul.mubr.msk.bf16.gmra.mrb[104].mxu0 %vm1746_vm0, %v3527_v16  ;;  %v5141_v16 = vunpack.c.h.bf16 %v5181_v8 }
 0x8ea   : > { %3677 = vmatprep.mubr.bf16.mxu0 %v8302_v25 }
 0x8f1   : > { %4947 = vmatmul.mubr.msk.bf16.gmra.mrb[108].mxu0 %vm1746_vm0, %v3528_v12 }
 0x8f2   : > { %3687 = vmatprep.mubr.bf16.mxu0 %v8302_v25 }
 0x8ff   : > { %v5503_v52 = vpop.f32.mrb[132].mxu1 }
 0x900   : > { %v3508_v4 = vpop.f32.mrb[133].mxu1 }
 0x901   : > { %v5504_v38 = vpop.f32.mrb[134].mxu1 }
 0x902   : > { %v3530_v30 = vpack.c.bf16 %v5504_v38, %v5503_v52  ;;  %v3511_v10 = vpop.f32.mrb[135].mxu1 }
 0x903   : > { %v3529_v14 = vpack.c.bf16 %v3511_v10, %v3508_v4  ;;  %v5184_v4 = vld [vmem:[%s8205_s3 + $0xf8] sm:$0xff]  }
 0x904   : > { %v5153_v20 = vunpack.c.h.bf16 %v5184_v4 }
 0x905   : > { %4948 = vmatmul.mubr.msk.bf16.gmra.mrb[112].mxu0 %vm1746_vm0, %v3529_v14 }
 0x906   : > { %3697 = vmatprep.mubr.bf16.mxu0 %v8302_v25 }
 0x907   : > { %v5523_v23 = vpop.f32.mrb[136].mxu1 }
 0x908   : > { %v3912_v22 = vadd.f32 %v5523_v23, %v5128_v6  ;;  %v3903_v53 = vpop.f32.mrb[137].mxu1 }
 0x909   : > { %v3904_v61 = vadd.f32 %v5124_v24, %v3903_v53  ;;  %v5524_v21 = vpop.f32.mrb[138].mxu1  ;;  %v5152_v24 = vunpack.c.l.bf16 %v5184_v4 }
 0x90a   : > { %v7915_v57 = vadd.f32 %v7648_v27, %v3912_v22  ;;  %v3906_v32 = vpop.f32.mrb[139].mxu1  ;;  %v3915_v36 = vadd.f32 %v5524_v21, %v5129_v59  ;;  %v5148_v59 = vunpack.c.l.bf16 %v5183_v19 }
 0x90b   : > { %v7918_v28 = vadd.f32 %v7648_v27, %v3904_v61  ;;  %v3907_v41 = vadd.f32 %v5125_v55, %v3906_v32 }
 0x90c   : > { %3986 = vmax.xlane.f32.xlu0 %v7915_v57  ;;  %v7931_v1 = vadd.f32 %v7648_v27, %v3915_v36 }
 0x90d   : > { %v7925_v35 = vadd.f32 %v7648_v27, %v3907_v41  ;;  %4949 = vmatmul.mubr.msk.bf16.gmra.mrb[116].mxu0 %vm1746_vm0, %v3530_v30  ;;  %3982 = vmax.xlane.f32.xlu1 %v7918_v28 }
 0x90e   : > { %4367 = vmatprep.mubr.bf16.mxu0 %v8302_v25 }
 0x90f   : > { %v5527_v54 = vpop.f32.mrb[140].mxu1 }
 0x910   : > { %v3928_v51 = vadd.f32 %v5527_v54, %v5136_v37  ;;  %3984 = vmax.xlane.f32.xlu0 %v7925_v35  ;;  %v3919_v49 = vpop.f32.mrb[141].mxu1 }
 0x911   : > { %3988 = vmax.xlane.f32.xlu1 %v7931_v1  ;;  %v5528_v26 = vpop.f32.mrb[142].mxu1  ;;  %v3920_v18 = vadd.f32 %v5132_v60, %v3919_v49  ;;  %v5149_v60 = vunpack.c.h.bf16 %v5183_v19 }
 0x912   : > { %v7939_v48 = vadd.f32 %v7648_v27, %v3928_v51  ;;  %v3931_v7 = vadd.f32 %v5528_v26, %v5137_v44  ;;  %v3922_v50 = vpop.f32.mrb[143].mxu1 }
 0x913   : > { %v3923_v17 = vadd.f32 %v5133_v34, %v3922_v50  ;;  %v7949_v45 = vadd.f32 %v7648_v27, %v3920_v18 }
 0x914   : > { %v7945_v3 = vadd.f32 %v7648_v27, %v3931_v7  ;;  %3994 = vmax.xlane.f32.xlu0 %v7939_v48 }
 0x915   : > { %v7953_v62 = vadd.f32 %v7648_v27, %v3923_v17 }
 0x916   : > { %3996 = vmax.xlane.f32.xlu1 %v7945_v3 }
 0x917   : > { %v5531_v9 = vpop.f32.mrb[144].mxu1 }
 0x918   : > { %v3944_v12 = vadd.f32 %v5531_v9, %v5144_v33  ;;  %3990 = vmax.xlane.f32.xlu0 %v7949_v45  ;;  %v3935_v0 = vpop.f32.mrb[145].mxu1 }
 0x919   : > { %v5532_v52 = vpop.f32.mrb[146].mxu1  ;;  %v3936_v46 = vadd.f32 %v5140_v5, %v3935_v0 }
 0x91a   : > { %v7960_v38 = vadd.f32 %v7648_v27, %v3944_v12  ;;  %v3947_v30 = vadd.f32 %v5532_v52, %v5145_v42  ;;  %3992 = vmax.xlane.f32.xlu1 %v7953_v62  ;;  %v3938_v10 = vpop.f32.mrb[147].mxu1 }
 0x91b   : > { %v3939_v6 = vadd.f32 %v5141_v16, %v3938_v10  ;;  %v7971_v23 = vadd.f32 %v7648_v27, %v3936_v46 }
 0x91c   : > { %v7967_v14 = vadd.f32 %v7648_v27, %v3947_v30  ;;  %4002 = vmax.xlane.f32.xlu0 %v7960_v38 }
 0x91d   : > { %v7975_v22 = vadd.f32 %v7648_v27, %v3939_v6 }
 0x91e   : > { %4004 = vmax.xlane.f32.xlu1 %v7967_v14 }
 0x91f   : > { %v5535_v55 = vpop.f32.mrb[148].mxu1 }
 0x920   : > { %v3960_v53 = vadd.f32 %v5535_v55, %v5152_v24  ;;  %3998 = vmax.xlane.f32.xlu0 %v7971_v23  ;;  %v3951_v61 = vpop.f32.mrb[149].mxu1 }
 0x921   : > { %v5536_v21 = vpop.f32.mrb[150].mxu1  ;;  %v3952_v32 = vadd.f32 %v5148_v59, %v3951_v61 }
 0x922   : > { %v7979_v2 = vadd.f32 %v7648_v27, %v3960_v53  ;;  %4000 = vmax.xlane.f32.xlu1 %v7975_v22  ;;  %v3954_v36 = vpop.f32.mrb[151].mxu1  ;;  %v3963_v37 = vadd.f32 %v5536_v21, %v5153_v20 }
 0x923   : > { %v7984_v41 = vadd.f32 %v7648_v27, %v3952_v32  ;;  %v3955_v54 = vadd.f32 %v5149_v60, %v3954_v36 }
 0x924   : > { %4010 = vmax.xlane.f32.xlu0 %v7979_v2  ;;  %v7992_v44 = vadd.f32 %v7648_v27, %v3963_v37 }
 0x925   : > { %v7996_v51 = vadd.f32 %v7648_v27, %v3955_v54 }
 0x928   : > { %4006 = vmax.xlane.f32.xlu0 %v7984_v41 }
 0x933   : > { %4152 = vrot.lane.b32.xlu1 %v8273_v39, %s6244_s19 }
 0x93e   : > { %4150 = vrot.lane.b32.xlu0 %v8270_v63, %s6244_s19 }
 0x957   : > { %4012 = vmax.xlane.f32.xlu1 %v7992_v44 }
 0x95b   : > { %4008 = vmax.xlane.f32.xlu1 %v7996_v51 }
 0x999   : > { %v3987_v49 = vpop.xlane.xlu0 %3986 }
 0x99a   : > { %v4016_v39 = vsub.f32 %v7915_v57, %v3987_v49  ;;  %v3983_v34 = vpop.xlane.xlu1 %3982 }
 0x99b   : > { %v4014_v63 = vsub.f32 %v7918_v28, %v3983_v34 }
 0x99c   : > { %v4034_v26 = vmul.f32 1.442695, %v4016_v39 }
 0x99d   : > { %v3985_v13 = vpop.xlane.xlu0 %3984  ;;  %v4030_v18 = vmul.f32 1.442695, %v4014_v63 }
 0x99e   : > { %6155 = vpow2.f32 %v4034_v26  ;;  %v3989_v7 = vpop.xlane.xlu1 %3988  ;;  %v4015_v8 = vsub.f32 %v7925_v35, %v3985_v13 }
 0x99f   : > { %v4017_v50 = vsub.f32 %v7931_v1, %v3989_v7  ;;  %6157 = vpow2.f32 %v4030_v18 }
 0x9a0   : > { %v4032_v57 = vmul.f32 1.442695, %v4015_v8 }
 0x9a1   : > { %v4036_v17 = vmul.f32 1.442695, %v4017_v50  ;;  %v3995_v27 = vpop.xlane.xlu0 %3994 }
 0x9a2   : > { %v4020_v33 = vsub.f32 %v7939_v48, %v3995_v27  ;;  %v5921_v27 = vld [vmem:[%s8207_s5 + $0xc4] ss:$8 sps:$4 sm:$0xff]  }
 0x9a3   : > { %v3997_v5 = vpop.xlane.xlu1 %3996  ;;  %6159 = vpow2.f32 %v4036_v17  ;;  %v5919_v17 = vld [vmem:[%s8207_s5 + $0xc0] ss:$8 sps:$4 sm:$0xff]   ;;  %4335 = vmatprep.subr.bf16.mxu0 %v5921_v27 }
 0x9a4   : > { %v4042_v42 = vmul.f32 1.442695, %v4020_v33  ;;  %v4021_v28 = vsub.f32 %v7945_v3, %v3997_v5  ;;  %v5924_v33 = vld [vmem:[%s8207_s5 + $0xd4] ss:$8 sps:$4 sm:$0xff]   ;;  %4336 = vmatpush1.bf16.msra.mxu0 %v5919_v17  ;;  %v5922_v5 = vld [vmem:[%s8207_s5 + $0xd0] ss:$8 sps:$4 sm:$0xff]  }
 0x9a5   : > { %v3991_v9 = vpop.xlane.xlu0 %3990  ;;  %4337 = vmatprep.subr.bf16.mxu0 %v5924_v33 }
 0x9a6   : > { %6161 = vpow2.f32 %v4042_v42  ;;  %v4018_v12 = vsub.f32 %v7949_v45, %v3991_v9  ;;  %v4044_v52 = vmul.f32 1.442695, %v4021_v28  ;;  %v5927_v42 = vld [vmem:[%s8207_s5 + $0xe4] ss:$8 sps:$4 sm:$0xff]  }
 0x9a7   : > { %v3993_v0 = vpop.xlane.xlu1 %3992  ;;  %6163 = vpow2.f32 %v4032_v57  ;;  %v5925_v57 = vld [vmem:[%s8207_s5 + $0xe0] ss:$8 sps:$4 sm:$0xff]  }
 0x9a8   : > { %v8006_v16 = vpop.eup %6155  ;;  %v4038_v1 = vmul.f32 1.442695, %v4018_v12  ;;  %v4019_v35 = vsub.f32 %v7953_v62, %v3993_v0  ;;  %4338 = vmatpush1.bf16.msra.mxu0 %v5922_v5 }
 0x9a9   : > { %4066 = vadd.xlane.f32.xlu1 %v8006_v16  ;;  %v4003_v48 = vpop.xlane.xlu0 %4002  ;;  %v8010_v46 = vpop.eup %6157  ;;  %4339 = vmatprep.subr.bf16.mxu0 %v5927_v42 }
 0x9aa   : > { %6165 = vpow2.f32 %v4038_v1  ;;  %v4040_v4 = vmul.f32 1.442695, %v4019_v35  ;;  %v4024_v20 = vsub.f32 %v7960_v38, %v4003_v48 }
 0x9ab   : > { %6167 = vpow2.f32 %v4044_v52  ;;  %v4005_v30 = vpop.xlane.xlu1 %4004 }
 0x9ac   : > { %6169 = vpow2.f32 %v4040_v4  ;;  %v4025_v60 = vsub.f32 %v7967_v14, %v4005_v30  ;;  %v4050_v49 = vmul.f32 1.442695, %v4024_v20  ;;  %4340 = vmatpush1.bf16.msra.mxu0 %v5925_v57 }
 0x9ad   : > { %4062 = vadd.xlane.f32.xlu1 %v8010_v46  ;;  %v3999_v3 = vpop.xlane.xlu0 %3998  ;;  %v8013_v45 = vpop.eup %6159 }
 0x9ae   : > { %v4022_v32 = vsub.f32 %v7971_v23, %v3999_v3  ;;  %v4052_v39 = vmul.f32 1.442695, %v4025_v60 }
 0x9af   : > { %v4001_v24 = vpop.xlane.xlu1 %4000 }
 0x9b0   : > { %v8015_v10 = vpop.eup %6161  ;;  %v4023_v36 = vsub.f32 %v7975_v22, %v4001_v24  ;;  %v4046_v37 = vmul.f32 1.442695, %v4022_v32 }
 0x9b1   : > { %4068 = vadd.xlane.f32.xlu1 %v8013_v45  ;;  %4074 = vadd.xlane.f32.xlu0 %v8015_v10  ;;  %v4011_v62 = vpop.xlane.xlu0 %4010  ;;  %v8019_v19 = vpop.eup %6163 }
 0x9b2   : > { %v4048_v54 = vmul.f32 1.442695, %v4023_v36  ;;  %6171 = vpow2.f32 %v4046_v37 }
 0x9b3   : > { %v4153_v21 = vpop.permute.xlu1 %4152 }
 0x9b4   : > { %v8021_v6 = vpop.eup %6165  ;;  %6173 = vpow2.f32 %v4048_v54 }
 0x9b5   : > { %4064 = vadd.xlane.f32.xlu1 %v8019_v19  ;;  %4070 = vadd.xlane.f32.xlu0 %v8021_v6  ;;  %v4007_v59 = vpop.xlane.xlu0 %4006  ;;  %v8025_v55 = vpop.eup %6167  ;;  %6175 = vpow2.f32 %v4050_v49 }
 0x9b6   : > { %v8027_v53 = vpop.eup %6169  ;;  %v4026_v34 = vsub.f32 %v7984_v41, %v4007_v59  ;;  %6177 = vpow2.f32 %v4052_v39 }
 0x9b8   : > { %v4054_v23 = vmul.f32 1.442695, %v4026_v34 }
 0x9b9   : > { %4072 = vadd.xlane.f32.xlu1 %v8027_v53  ;;  %4076 = vadd.xlane.f32.xlu0 %v8025_v55  ;;  %v4151_v61 = vpop.permute.xlu0 %4150 }
 0x9ba   : > { %5545 = vmatprep.subr.bf16.mxu1 %v4151_v61  ;;  %6179 = vpow2.f32 %v4054_v23 }
 0x9bb   : > { %5546 = vmatpush3.bf16.msra.mxu1 %v4151_v61 }
 0x9bc   : > { %5547 = vmatprep.subr.bf16.mxu1 %v4153_v21  ;;  %v8043_v13 = vpop.eup %6171 }
 0x9be   : > { %v8045_v18 = vpop.eup %6173 }
 0x9bf   : > { %5548 = vmatpush3.bf16.msra.mxu1 %v4153_v21 }
 0x9ca   : > { %4156 = vrot.lane.b32.xlu1 %v8276_v43, %s6244_s19 }
 0x9cf   : > { %4154 = vrot.lane.b32.xlu0 %v8274_v58, %s6244_s19  ;;  %v4028_v58 = vsub.f32 %v7979_v2, %v4011_v62  ;;  %v8049_v2 = vpop.eup %6175  ;;  %s8134_s19 = scalar_lea.vmem %s8208_s6, %s5008_s11 }
 0x9d0   : > { %v8051_v41 = vpop.eup %6177 }
 0x9d1   : > { %v4058_v26 = vmul.f32 1.442695, %v4028_v58 }
 0x9e4   : > { %v4013_v43 = vpop.xlane.xlu1 %4012 }
 0x9e5   : > { %v4029_v22 = vsub.f32 %v7992_v44, %v4013_v43  ;;  %v8055_v44 = vpop.eup %6179 }
 0x9e7   : > { %v4060_v7 = vmul.f32 1.442695, %v4029_v22 }
 0x9e8   : > { %v4009_v63 = vpop.xlane.xlu1 %4008 }
 0x9e9   : > { %v4027_v38 = vsub.f32 %v7996_v51, %v4009_v63 }
 0x9eb   : > { %v4056_v14 = vmul.f32 1.442695, %v4027_v38 }
 0x9ed   : > { %6181 = vpow2.f32 %v4056_v14 }
 0x9ee   : > { %4080 = vadd.xlane.f32.xlu0 %v8045_v18  ;;  %4078 = vadd.xlane.f32.xlu1 %v8043_v13  ;;  %6183 = vpow2.f32 %v4058_v26 }
 0x9ef   : > { %6185 = vpow2.f32 %v4060_v7 }
 0x9f2   : > { %4082 = vadd.xlane.f32.xlu0 %v8049_v2  ;;  %4084 = vadd.xlane.f32.xlu1 %v8051_v41 }
 0x9f6   : > { %4086 = vadd.xlane.f32.xlu0 %v8055_v44 }
 0x9f7   : > { %v8058_v51 = vpop.eup %6181 }
 0x9f8   : > { %4088 = vadd.xlane.f32.xlu1 %v8058_v51  ;;  %v8061_v50 = vpop.eup %6183 }
 0x9f9   : > { %v8064_v8 = vpop.eup %6185 }
 0x9fa   : > { %4090 = vadd.xlane.f32.xlu0 %v8061_v50 }
 0x9fc   : > { %4092 = vadd.xlane.f32.xlu1 %v8064_v8 }
 0xa36   : > { %v4067_v28 = vpop.xlane.xlu1 %4066 }
 0xa3a   : > { %v4063_v9 = vpop.xlane.xlu1 %4062 }
 0xa3e   : > { %v4069_v12 = vpop.xlane.xlu1 %4068  ;;  %v4075_v0 = vpop.xlane.xlu0 %4074 }
 0xa3f   : > { %6187 = vrcp.f32 %v4069_v12 }
 0xa40   : > { %6189 = vrcp.f32 %v4063_v9 }
 0xa41   : > { %6191 = vrcp.f32 %v4067_v28 }
 0xa42   : > { %v4065_v1 = vpop.xlane.xlu1 %4064  ;;  %v4071_v35 = vpop.xlane.xlu0 %4070 }
 0xa43   : > { %6193 = vrcp.f32 %v4065_v1 }
 0xa44   : > { %6195 = vrcp.f32 %v4071_v35 }
 0xa46   : > { %v4073_v52 = vpop.xlane.xlu1 %4072  ;;  %v4077_v48 = vpop.xlane.xlu0 %4076 }
 0xa47   : > { %6197 = vrcp.f32 %v4073_v52 }
 0xa48   : > { %6199 = vrcp.f32 %v4077_v48 }
 0xa49   : > { %v6188_v4 = vpop.eup %6187  ;;  %6201 = vrcp.f32 %v4075_v0 }
 0xa4a   : > { %v4155_v3 = vpop.permute.xlu0 %4154  ;;  %v6190_v30 = vpop.eup %6189  ;;  %v4113_v61 = vmul.f32 %v6188_v4, %v8013_v45 }
 0xa4b   : > { %5549 = vmatprep.subr.bf16.mxu1 %v4155_v3  ;;  %v6192_v62 = vpop.eup %6191  ;;  %v4157_v24 = vpop.permute.xlu1 %4156  ;;  %v4110_v21 = vmul.f32 %v6190_v30, %v8010_v46 }
 0xa4c   : > { %5550 = vmatpush3.bf16.msra.mxu1 %v4155_v3  ;;  %v4112_v20 = vmul.f32 %v6192_v62, %v8006_v16 }
 0xa4d   : > { %v6194_v59 = vpop.eup %6193  ;;  %5551 = vmatprep.subr.bf16.mxu1 %v4157_v24 }
 0xa4e   : > { %v4111_v32 = vmul.f32 %v6194_v59, %v8019_v19  ;;  %v6196_v36 = vpop.eup %6195  ;;  %v4127_v54 = vpack.c.bf16 %v4113_v61, %v4112_v20 }
 0xa4f   : > { %v4114_v39 = vmul.f32 %v6196_v36, %v8021_v6 }
 0xa50   : > { %5552 = vmatpush3.bf16.msra.mxu1 %v4157_v24  ;;  %v4126_v37 = vpack.c.bf16 %v4111_v32, %v4110_v21 }
 0xa51   : > { %v6198_v60 = vpop.eup %6197 }
 0xa52   : > { %v6200_v49 = vpop.eup %6199  ;;  %5553 = vmatprep.mubr.bf16.mxu1 %v4126_v37  ;;  %v4115_v34 = vmul.f32 %v6198_v60, %v8027_v53 }
 0xa53   : > { %5554 = vmatmul.mubr.bf16.vlgmr.msra.gmra.mrb[152].mxu1 %v4127_v54  ;;  %v6202_v45 = vpop.eup %6201  ;;  %v4117_v46 = vmul.f32 %v6200_v49, %v8025_v55 }
 0xa54   : > { %v4128_v43 = vpack.c.bf16 %v4115_v34, %v4114_v39  ;;  %v4116_v19 = vmul.f32 %v6202_v45, %v8015_v10 }
 0xa56   : > { %5557 = vmatprep.mubr.bf16.mxu1 %v4128_v43  ;;  %v4129_v58 = vpack.c.bf16 %v4117_v46, %v4116_v19  ;;  %v1604_v19 = vld [vmem:[%s6328_s18] sm:$0xff] }
 0xa5b   : > { %5558 = vmatmul.mubr.bf16.gmra.mrb[156].mxu1 %v4129_v58  ;;  %v1605_v58 = vld [vmem:[%s6328_s18 + $0x8] sm:$0xff] }
 0xa7b   : > { %v4079_v16 = vpop.xlane.xlu1 %4078  ;;  %v4081_v23 = vpop.xlane.xlu0 %4080 }
 0xa7c   : > { %6203 = vrcp.f32 %v4079_v16  ;;  %v1620_v16 = vunpack.c.l.bf16 %v1604_v19 }
 0xa7d   : > { %6205 = vrcp.f32 %v4081_v23 }
 0xa7f   : > { %v4085_v63 = vpop.xlane.xlu1 %4084  ;;  %v4083_v22 = vpop.xlane.xlu0 %4082 }
 0xa80   : > { %6207 = vrcp.f32 %v4085_v63  ;;  %v1621_v63 = vunpack.c.h.bf16 %v1604_v19 }
 0xa81   : > { %6209 = vrcp.f32 %v4083_v22 }
 0xa83   : > { %v4087_v6 = vpop.xlane.xlu0 %4086 }
 0xa84   : > { %6211 = vrcp.f32 %v4087_v6 }
 0xa85   : > { %v4089_v53 = vpop.xlane.xlu1 %4088 }
 0xa86   : > { %v6204_v38 = vpop.eup %6203  ;;  %6213 = vrcp.f32 %v4089_v53  ;;  %v1622_v53 = vunpack.c.l.bf16 %v1605_v58 }
 0xa87   : > { %v6206_v26 = vpop.eup %6205  ;;  %v4091_v55 = vpop.xlane.xlu0 %4090  ;;  %v4118_v14 = vmul.f32 %v6204_v38, %v8043_v13 }
 0xa88   : > { %6215 = vrcp.f32 %v4091_v55  ;;  %v4119_v10 = vmul.f32 %v6206_v26, %v8045_v18  ;;  %v1623_v55 = vunpack.c.h.bf16 %v1605_v58  ;;  %v1611_v58 = vld [vmem:[%s6328_s18 + $0x38] sm:$0xff] }
 0xa89   : > { %v4093_v7 = vpop.xlane.xlu1 %4092 }
 0xa8a   : > { %v6208_v17 = vpop.eup %6207  ;;  %6217 = vrcp.f32 %v4093_v7  ;;  %v4130_v27 = vpack.c.bf16 %v4119_v10, %v4118_v14 }
 0xa8b   : > { %v6210_v33 = vpop.eup %6209  ;;  %v4121_v5 = vmul.f32 %v6208_v17, %v8051_v41 }
 0xa8c   : > { %5561 = vmatprep.mubr.bf16.mxu1 %v4130_v27  ;;  %v4120_v42 = vmul.f32 %v6210_v33, %v8049_v2  ;;  %v5930_v2 = vld [vmem:[%s8207_s5 + $0xf4] ss:$8 sps:$4 sm:$0xff]  }
 0xa8d   : > { %4341 = vmatprep.subr.bf16.mxu0 %v5930_v2  ;;  %v1606_v27 = vld [vmem:[%s6328_s18 + $0x10] sm:$0xff]  ;;  %v8303_v2 = vld [vmem:[#allocation6_spill] sm:$0xff] }
 0xa8e   : > { %v6212_v57 = vpop.eup %6211  ;;  %v4131_v28 = vpack.c.bf16 %v4121_v5, %v4120_v42  ;;  %v1607_v5 = vld [vmem:[%s6328_s18 + $0x18] sm:$0xff]  ;;  %v1624_v42 = vunpack.c.l.bf16 %v1606_v27 }
 0xa8f   : > { %v4122_v12 = vmul.f32 %v6212_v57, %v8055_v44  ;;  %v5928_v44 = vld [vmem:[%s8207_s5 + $0xf0] ss:$8 sps:$4 sm:$0xff]  }
 0xa90   : > { %v6214_v9 = vpop.eup %6213  ;;  %5562 = vmatmul.mubr.bf16.gmra.mrb[160].mxu1 %v4131_v28  ;;  %4342 = vmatpush1.bf16.msra.mxu0 %v5928_v44  ;;  %v1625_v28 = vunpack.c.h.bf16 %v1606_v27 }
 0xa91   : > { %v4123_v13 = vmul.f32 %v6214_v9, %v8058_v51 }
 0xa92   : > { %v6216_v0 = vpop.eup %6215 }
 0xa93   : > { %v4132_v18 = vpack.c.bf16 %v4123_v13, %v4122_v12  ;;  %v4124_v35 = vmul.f32 %v6216_v0, %v8061_v50  ;;  %v1626_v12 = vunpack.c.l.bf16 %v1607_v5 }
 0xa94   : > { %v6218_v1 = vpop.eup %6217 }
 0xa95   : > { %5565 = vmatprep.mubr.bf16.mxu1 %v4132_v18  ;;  %v4125_v52 = vmul.f32 %v6218_v1, %v8064_v8  ;;  %v1627_v18 = vunpack.c.h.bf16 %v1607_v5 }
 0xa97   : > { %v4133_v41 = vpack.c.bf16 %v4125_v52, %v4124_v35 }
 0xa99   : > { %5566 = vmatmul.mubr.bf16.gmra.mrb[164].mxu1 %v4133_v41 }
 0xb26   : > { %v5555_v51 = vpop.f32.mrb[152].mxu1 }
 0xb27   : > { %v4200_v48 = vpop.f32.mrb[153].mxu1 }
 0xb28   : > { %v5556_v4 = vpop.f32.mrb[154].mxu1 }
 0xb29   : > { %v4264_v3 = vpack.c.bf16 %v5556_v4, %v5555_v51  ;;  %v4203_v30 = vpop.f32.mrb[155].mxu1  ;;  %v1608_v51 = vld [vmem:[%s6328_s18 + $0x20] sm:$0xff] }
 0xb2a   : > { %v4263_v50 = vpack.c.bf16 %v4203_v30, %v4200_v48  ;;  %v1628_v30 = vunpack.c.l.bf16 %v1608_v51 }
 0xb2c   : > { %4982 = vmatmul.mubr.msk.bf16.vlgmr.msra.gmra.mrb[88].mxu0 %vm1746_vm0, %v4263_v50 }
 0xb2d   : > { %4377 = vmatprep.mubr.bf16.mxu0 %v8302_v25 }
 0xb2e   : > { %v5559_v8 = vpop.f32.mrb[156].mxu1 }
 0xb2f   : > { %v4216_v62 = vpop.f32.mrb[157].mxu1 }
 0xb30   : > { %v5560_v24 = vpop.f32.mrb[158].mxu1 }
 0xb31   : > { %v4266_v59 = vpack.c.bf16 %v5560_v24, %v5559_v8  ;;  %v4219_v61 = vpop.f32.mrb[159].mxu1  ;;  %v1629_v8 = vunpack.c.h.bf16 %v1608_v51 }
 0xb32   : > { %v4265_v21 = vpack.c.bf16 %v4219_v61, %v4216_v62  ;;  %v8304_v62 = vld [vmem:[#allocation8_spill] sm:$0xff]  ;;  %v8305_v61 = vld [vmem:[#allocation10_spill] sm:$0xff] }
 0xb34   : > { %4983 = vmatmul.mubr.msk.bf16.gmra.mrb[92].mxu0 %vm1746_vm0, %v4264_v3  ;;  %v1609_v3 = vld [vmem:[%s6328_s18 + $0x28] sm:$0xff] }
 0xb35   : > { %4387 = vmatprep.mubr.bf16.mxu0 %v8302_v25 }
 0xb3c   : > { %4984 = vmatmul.mubr.msk.bf16.gmra.mrb[96].mxu0 %vm1746_vm0, %v4265_v21 }
 0xb3d   : > { %4397 = vmatprep.mubr.bf16.mxu0 %v8302_v25 }
 0xb44   : > { %4985 = vmatmul.mubr.msk.bf16.gmra.mrb[100].mxu0 %vm1746_vm0, %v4266_v59  ;;  %v1630_v59 = vunpack.c.l.bf16 %v1609_v3 }
 0xb45   : > { %4407 = vmatprep.mubr.bf16.mxu0 %v8302_v25 }
 0xb63   : > { %v5563_v32 = vpop.f32.mrb[160].mxu1 }
 0xb64   : > { %v4232_v36 = vpop.f32.mrb[161].mxu1 }
 0xb65   : > { %v5564_v20 = vpop.f32.mrb[162].mxu1 }
 0xb66   : > { %v4268_v37 = vpack.c.bf16 %v5564_v20, %v5563_v32  ;;  %v4235_v60 = vpop.f32.mrb[163].mxu1 }
 0xb67   : > { %v4267_v54 = vpack.c.bf16 %v4235_v60, %v4232_v36  ;;  %v1631_v36 = vunpack.c.h.bf16 %v1609_v3 }
 0xb69   : > { %4986 = vmatmul.mubr.msk.bf16.gmra.mrb[104].mxu0 %vm1746_vm0, %v4267_v54 }
 0xb6a   : > { %4417 = vmatprep.mubr.bf16.mxu0 %v8302_v25 }
 0xb6c   : > { %v5567_v49 = vpop.f32.mrb[164].mxu1 }
 0xb6d   : > { %v4248_v39 = vpop.f32.mrb[165].mxu1 }
 0xb6e   : > { %v5568_v34 = vpop.f32.mrb[166].mxu1 }
 0xb6f   : > { %v4270_v45 = vpack.c.bf16 %v5568_v34, %v5567_v49  ;;  %v4251_v43 = vpop.f32.mrb[167].mxu1 }
 0xb70   : > { %v4269_v46 = vpack.c.bf16 %v4251_v43, %v4248_v39  ;;  %v8307_v39 = vld [vmem:[#allocation14_spill] sm:$0xff] }
 0xb71   : > { %4987 = vmatmul.mubr.msk.bf16.gmra.mrb[108].mxu0 %vm1746_vm0, %v4268_v37  ;;  %v8306_v37 = vld [vmem:[#allocation12_spill] sm:$0xff] }
 0xb72   : > { %4427 = vmatprep.mubr.bf16.mxu0 %v8302_v25 }
 0xb79   : > { %4988 = vmatmul.mubr.msk.bf16.gmra.mrb[112].mxu0 %vm1746_vm0, %v4269_v46 }
 0xb7a   : > { %4437 = vmatprep.mubr.bf16.mxu0 %v8302_v25 }
 0xb81   : > { %4989 = vmatmul.mubr.msk.bf16.gmra.mrb[116].mxu0 %vm1746_vm0, %v4270_v45  ;;  %v1610_v45 = vld [vmem:[%s6328_s18 + $0x30] sm:$0xff] }
 0xbff   : > { %v4369_v23 = vpop.f32.mrb[88].mxu0 }
 0xc00   : > { %v5585_v22 = vadd.f32 %v4369_v23, %v7574_v56  ;;  %v4371_v6 = vpop.f32.mrb[89].mxu0 }
 0xc01   : > { %v5586_v38 = vadd.f32 %v4371_v6, %v7576_v15  ;;  %v4373_v26 = vpop.f32.mrb[90].mxu0  ;;  %v8308_v6 = vld [vmem:[#allocation16_spill] sm:$0xff] }
 0xc02   : > { %v4480_v14 = vadd.f32 %v5585_v22, %v1620_v16  ;;  %v5587_v25 = vadd.f32 %v4373_v26, %v7578_v47  ;;  %v4375_v10 = vpop.f32.mrb[91].mxu0  ;;  %v1632_v16 = vunpack.c.l.bf16 %v1610_v45  ;;  %v1633_v22 = vunpack.c.h.bf16 %v1610_v45 }
 0xc03   : > { %v4481_v7 = vadd.f32 %v5586_v38, %v1621_v63  ;;  %v5588_v17 = vadd.f32 %v4375_v10, %v7580_v11  ;;  %v1634_v26 = vunpack.c.l.bf16 %v1611_v58  ;;  %v1635_v10 = vunpack.c.h.bf16 %v1611_v58 }
 0xc04   : > { %v4482_v56 = vadd.f32 %v5587_v25, %v1622_v53 }
 0xc05   : > { %v5010_v15 = vpack.c.bf16 %v4481_v7, %v4480_v14  ;;  %v4483_v33 = vadd.f32 %v5588_v17, %v1623_v55  ;;  %v8309_v55 = vld [vmem:[#allocation17_spill] sm:$0xff]  ;;  %v8310_v17 = vld [vmem:[#allocation3_spill] sm:$0xff] }
 0xc07   : > { %4608 = vst [vmem:[%s8134_s19] sm:$0xff] %v5010_v15  ;;  %v5011_v47 = vpack.c.bf16 %v4483_v33, %v4482_v56  ;;  %v4379_v57 = vpop.f32.mrb[92].mxu0  ;;  %v8311_v33 = vld [vmem:[#allocation4_spill] sm:$0xff] }
 0xc08   : > { %v5589_v11 = vadd.f32 %v4379_v57, %v7582_v29  ;;  %v4381_v9 = vpop.f32.mrb[93].mxu0 }
 0xc09   : > { %4609 = vst [vmem:[%s8134_s19 + $0x8] sm:$0xff] %v5011_v47  ;;  %v5590_v13 = vadd.f32 %v4381_v9, %v7584_v31  ;;  %v4383_v0 = vpop.f32.mrb[94].mxu0  ;;  %v1613_v9 = vld [vmem:[%s6328_s18 + $0x48] sm:$0xff] }
 0xc0a   : > { %v4484_v1 = vadd.f32 %v5589_v11, %v1624_v42  ;;  %v5591_v35 = vadd.f32 %v4383_v0, %v7586_v40  ;;  %v4385_v52 = vpop.f32.mrb[95].mxu0  ;;  %v1612_v11 = vld [vmem:[%s6328_s18 + $0x40] sm:$0xff]  ;;  %v1639_v51 = vunpack.c.h.bf16 %v1613_v9 }
 0xc0b   : > { %v4485_v41 = vadd.f32 %v5590_v13, %v1625_v28  ;;  %v5592_v44 = vadd.f32 %v4385_v52, %v8303_v2  ;;  %v1637_v0 = vunpack.c.h.bf16 %v1612_v11  ;;  %v1638_v52 = vunpack.c.l.bf16 %v1613_v9 }
 0xc0c   : > { %v4486_v48 = vadd.f32 %v5591_v35, %v1626_v12  ;;  %v1636_v12 = vunpack.c.l.bf16 %v1612_v11 }
 0xc0d   : > { %v5012_v29 = vpack.c.bf16 %v4485_v41, %v4484_v1  ;;  %v4487_v4 = vadd.f32 %v5592_v44, %v1627_v18  ;;  %v8312_v18 = vld [vmem:[#allocation5_spill] sm:$0xff]  ;;  %v8313_v41 = vld [vmem:[#allocation18_spill] sm:$0xff] }
 0xc0f   : > { %4610 = vst [vmem:[%s8134_s19 + $0x10] sm:$0xff] %v5012_v29  ;;  %v5013_v50 = vpack.c.bf16 %v4487_v4, %v4486_v48  ;;  %v4389_v31 = vpop.f32.mrb[96].mxu0  ;;  %v8314_v29 = vld [vmem:[#allocation19_spill] sm:$0xff] }
 0xc10   : > { %v5593_v24 = vadd.f32 %v4389_v31, %v8304_v62  ;;  %v4391_v40 = vpop.f32.mrb[97].mxu0 }
 0xc11   : > { %4611 = vst [vmem:[%s8134_s19 + $0x18] sm:$0xff] %v5013_v50  ;;  %v5594_v21 = vadd.f32 %v4391_v40, %v8305_v61  ;;  %v4393_v32 = vpop.f32.mrb[98].mxu0  ;;  %v8315_v50 = vld [vmem:[#allocation7_spill] sm:$0xff] }
 0xc12   : > { %v4488_v20 = vadd.f32 %v5593_v24, %v1628_v30  ;;  %v5595_v60 = vadd.f32 %v4393_v32, %v8306_v37  ;;  %v4395_v54 = vpop.f32.mrb[99].mxu0 }
 0xc13   : > { %v4489_v49 = vadd.f32 %v5594_v21, %v1629_v8  ;;  %v5596_v34 = vadd.f32 %v4395_v54, %v8307_v39  ;;  %v1614_v8 = vld [vmem:[%s6328_s18 + $0x50] sm:$0xff] }
 0xc14   : > { %v4490_v43 = vadd.f32 %v5595_v60, %v1630_v59  ;;  %v1615_v59 = vld [vmem:[%s6328_s18 + $0x58] sm:$0xff]  ;;  %v1640_v61 = vunpack.c.l.bf16 %v1614_v8 }
 0xc15   : > { %v5014_v46 = vpack.c.bf16 %v4489_v49, %v4488_v20  ;;  %v4491_v19 = vadd.f32 %v5596_v34, %v1631_v36  ;;  %v1641_v36 = vunpack.c.h.bf16 %v1614_v8  ;;  %v8316_v20 = vld [vmem:[#allocation9_spill] sm:$0xff]  ;;  %v1642_v54 = vunpack.c.l.bf16 %v1615_v59  ;;  %v8317_v49 = vld [vmem:[#allocation20_spill] sm:$0xff] }
 0xc16   : > { %v1643_v45 = vunpack.c.h.bf16 %v1615_v59 }
 0xc17   : > { %4612 = vst [vmem:[%s8134_s19 + $0x20] sm:$0xff] %v5014_v46  ;;  %v5015_v23 = vpack.c.bf16 %v4491_v19, %v4490_v43  ;;  %v4399_v63 = vpop.f32.mrb[100].mxu0  ;;  %v8318_v46 = vld [vmem:[#allocation21_spill] sm:$0xff] }
 0xc18   : > { %v5597_v53 = vadd.f32 %v4399_v63, %v8308_v6  ;;  %v4401_v38 = vpop.f32.mrb[101].mxu0 }
 0xc19   : > { %4613 = vst [vmem:[%s8134_s19 + $0x28] sm:$0xff] %v5015_v23  ;;  %v5598_v14 = vadd.f32 %v4401_v38, %v8309_v55  ;;  %v4403_v25 = vpop.f32.mrb[102].mxu0  ;;  %v8319_v23 = vld [vmem:[#allocation11_spill] sm:$0xff] }
 0xc1a   : > { %v4492_v7 = vadd.f32 %v5597_v53, %v1632_v16  ;;  %v5599_v27 = vadd.f32 %v4403_v25, %v8310_v17  ;;  %v4405_v56 = vpop.f32.mrb[103].mxu0 }
 0xc1b   : > { %v4493_v15 = vadd.f32 %v5598_v14, %v1633_v22  ;;  %v5600_v5 = vadd.f32 %v4405_v56, %v8311_v33  ;;  %v1616_v22 = vld [vmem:[%s6328_s18 + $0x60] sm:$0xff] }
 0xc1c   : > { %v4494_v42 = vadd.f32 %v5599_v27, %v1634_v26  ;;  %v1617_v26 = vld [vmem:[%s6328_s18 + $0x68] sm:$0xff]  ;;  %v1644_v55 = vunpack.c.l.bf16 %v1616_v22 }
 0xc1d   : > { %v5016_v47 = vpack.c.bf16 %v4493_v15, %v4492_v7  ;;  %v4495_v57 = vadd.f32 %v5600_v5, %v1635_v10  ;;  %v1645_v10 = vunpack.c.h.bf16 %v1616_v22  ;;  %v8320_v7 = vld [vmem:[#allocation13_spill] sm:$0xff]  ;;  %v1646_v56 = vunpack.c.l.bf16 %v1617_v26  ;;  %v8321_v15 = vld [vmem:[#allocation22_spill] sm:$0xff] }
 0xc1f   : > { %4614 = vst [vmem:[%s8134_s19 + $0x30] sm:$0xff] %v5016_v47  ;;  %v5017_v28 = vpack.c.bf16 %v4495_v57, %v4494_v42  ;;  %v1647_v42 = vunpack.c.h.bf16 %v1617_v26  ;;  %v8322_v57 = vld [vmem:[#allocation23_spill] sm:$0xff] }
 0xc21   : > { %4615 = vst [vmem:[%s8134_s19 + $0x38] sm:$0xff] %v5017_v28 }
 0xc3c   : > { %v4409_v13 = vpop.f32.mrb[104].mxu0 }
 0xc3d   : > { %v5601_v1 = vadd.f32 %v4409_v13, %v8312_v18  ;;  %v4411_v35 = vpop.f32.mrb[105].mxu0 }
 0xc3e   : > { %v5602_v2 = vadd.f32 %v4411_v35, %v8313_v41  ;;  %v4413_v44 = vpop.f32.mrb[106].mxu0 }
 0xc3f   : > { %v4496_v48 = vadd.f32 %v5601_v1, %v1636_v12  ;;  %v5603_v4 = vadd.f32 %v4413_v44, %v8314_v29  ;;  %v4415_v3 = vpop.f32.mrb[107].mxu0  ;;  %v8323_v12 = vld [vmem:[#allocation15_spill] sm:$0xff] }
 0xc40   : > { %v4497_v30 = vadd.f32 %v5602_v2, %v1637_v0  ;;  %v5604_v31 = vadd.f32 %v4415_v3, %v8315_v50  ;;  %v1618_v0 = vld [vmem:[%s6328_s18 + $0x70] sm:$0xff] }
 0xc41   : > { %v4498_v62 = vadd.f32 %v5603_v4, %v1638_v52  ;;  %v1619_v52 = vld [vmem:[%s6328_s18 + $0x78] sm:$0xff]  ;;  %v1648_v41 = vunpack.c.l.bf16 %v1618_v0 }
 0xc42   : > { %v5018_v24 = vpack.c.bf16 %v4497_v30, %v4496_v48  ;;  %v4499_v40 = vadd.f32 %v5604_v31, %v1639_v51  ;;  %v1649_v51 = vunpack.c.h.bf16 %v1618_v0  ;;  %v8324_v48 = vld [vmem:[#allocation24_spill] sm:$0xff]  ;;  %v1650_v3 = vunpack.c.l.bf16 %v1619_v52  ;;  %v8325_v30 = vld [vmem:[#allocation25_spill] sm:$0xff] }
 0xc43   : > { %v1651_v8 = vunpack.c.h.bf16 %v1619_v52 }
 0xc44   : > { %4616 = vst [vmem:[%s8134_s19 + $0x40] sm:$0xff] %v5018_v24  ;;  %v5019_v21 = vpack.c.bf16 %v4499_v40, %v4498_v62  ;;  %v4419_v32 = vpop.f32.mrb[108].mxu0  ;;  %v8326_v24 = vld [vmem:[#allocation26_spill] sm:$0xff] }
 0xc45   : > { %v5605_v37 = vadd.f32 %v4419_v32, %v8316_v20  ;;  %v4421_v60 = vpop.f32.mrb[109].mxu0 }
 0xc46   : > { %4617 = vst [vmem:[%s8134_s19 + $0x48] sm:$0xff] %v5019_v21  ;;  %v5606_v39 = vadd.f32 %v4421_v60, %v8317_v49  ;;  %v4423_v34 = vpop.f32.mrb[110].mxu0  ;;  %v8327_v21 = vld [vmem:[#allocation27_spill] sm:$0xff] }
 0xc47   : > { %v4500_v43 = vadd.f32 %v5605_v37, %v1640_v61  ;;  %v5607_v19 = vadd.f32 %v4423_v34, %v8318_v46  ;;  %v4425_v58 = vpop.f32.mrb[111].mxu0 }
 0xc48   : > { %v4501_v16 = vadd.f32 %v5606_v39, %v1641_v36  ;;  %v5608_v63 = vadd.f32 %v4425_v58, %v8319_v23 }
 0xc49   : > { %v4502_v6 = vadd.f32 %v5607_v19, %v1642_v54 }
 0xc4a   : > { %v5020_v53 = vpack.c.bf16 %v4501_v16, %v4500_v43  ;;  %v4503_v38 = vadd.f32 %v5608_v63, %v1643_v45 }
 0xc4c   : > { %4618 = vst [vmem:[%s8134_s19 + $0x50] sm:$0xff] %v5020_v53  ;;  %v5021_v14 = vpack.c.bf16 %v4503_v38, %v4502_v6  ;;  %v4429_v25 = vpop.f32.mrb[112].mxu0 }
 0xc4d   : > { %v5609_v17 = vadd.f32 %v4429_v25, %v8320_v7  ;;  %v4431_v27 = vpop.f32.mrb[113].mxu0 }
 0xc4e   : > { %4619 = vst [vmem:[%s8134_s19 + $0x58] sm:$0xff] %v5021_v14  ;;  %v5610_v33 = vadd.f32 %v4431_v27, %v8321_v15  ;;  %v4433_v5 = vpop.f32.mrb[114].mxu0 }
 0xc4f   : > { %v4504_v47 = vadd.f32 %v5609_v17, %v1644_v55  ;;  %v5611_v28 = vadd.f32 %v4433_v5, %v8322_v57  ;;  %v4435_v11 = vpop.f32.mrb[115].mxu0 }
 0xc50   : > { %v4505_v9 = vadd.f32 %v5610_v33, %v1645_v10  ;;  %v5612_v13 = vadd.f32 %v4435_v11, %v8323_v12 }
 0xc51   : > { %v4506_v18 = vadd.f32 %v5611_v28, %v1646_v56 }
 0xc52   : > { %v5022_v1 = vpack.c.bf16 %v4505_v9, %v4504_v47  ;;  %v4507_v35 = vadd.f32 %v5612_v13, %v1647_v42 }
 0xc54   : > { %4620 = vst [vmem:[%s8134_s19 + $0x60] sm:$0xff] %v5022_v1  ;;  %v5023_v2 = vpack.c.bf16 %v4507_v35, %v4506_v18  ;;  %v4439_v44 = vpop.f32.mrb[116].mxu0 }
 0xc55   : > { %v5613_v29 = vadd.f32 %v4439_v44, %v8324_v48  ;;  %v4441_v4 = vpop.f32.mrb[117].mxu0 }
 0xc56   : > { %4621 = vst [vmem:[%s8134_s19 + $0x68] sm:$0xff] %v5023_v2  ;;  %v5614_v50 = vadd.f32 %v4441_v4, %v8325_v30  ;;  %v4443_v31 = vpop.f32.mrb[118].mxu0 }
 0xc57   : > { %v4508_v62 = vadd.f32 %v5613_v29, %v1648_v41  ;;  %v5615_v40 = vadd.f32 %v4443_v31, %v8326_v24  ;;  %v4445_v59 = vpop.f32.mrb[119].mxu0 }
 0xc58   : > { %v4509_v61 = vadd.f32 %v5614_v50, %v1649_v51  ;;  %v5616_v32 = vadd.f32 %v4445_v59, %v8327_v21 }
 0xc59   : > { %v4510_v36 = vadd.f32 %v5615_v40, %v1650_v3 }
 0xc5a   : > { %v5024_v20 = vpack.c.bf16 %v4509_v61, %v4508_v62  ;;  %v4511_v37 = vadd.f32 %v5616_v32, %v1651_v8 }
 0xc5c   : > { %4622 = vst [vmem:[%s8134_s19 + $0x70] sm:$0xff] %v5024_v20  ;;  %v5025_v60 = vpack.c.bf16 %v4511_v37, %v4510_v36 }
 0xc5e   : > { %4623 = vst [vmem:[%s8134_s19 + $0x78] sm:$0xff] %v5025_v60 }
 0xc5f PF: > { %s16_s23 = sadd.s32 1, %s6242_s23   ;;  %s8328_s21 = smov %s6238_s22 }
 0xc60   : > { %p13_p5 = scmp.ge.s32.totalorder %s16_s23, 4   ;;  %s8329_s22 = smov %s8331_s24 }
 0xc62   :  { %15 = sbr.rel (!%p13_p5) target bundleno = 2 (0x2), region = 89 }

</bundles_post_ra>
